<compile_context>
chip_gen: v5e
topology: v5e:2x2
jax: 0.10.0
libtpu: 0.0.40
codegen_flags: <defaults>
</compile_context>

<pallas_src>
import functools

import numpy as np
import jax
import jax.numpy as jnp
from jax.experimental import pallas as pl
from jax.experimental.pallas import tpu as pltpu

# ------------------------- synthetic htsat config ---------------------------
HTSAT_DIM = 16                 # config.htsat_dim (small for this script)
HTSAT_DEPTH = (1, 1, 1, 1)     # config.htsat_depth
OUT_EMB = HTSAT_DIM * 2 ** (len(HTSAT_DEPTH) - 1)   # = 128, same formula as module
PATCH = 4
NUM_HEADS = 4
MLP_RATIO = 4
EPS = 1e-5


# ------------------------------ helpers -------------------------------------
def _const_spec(arr):
    """Full-array, grid-invariant block (stays resident in VMEM across grid)."""
    zeros = (0,) * arr.ndim
    return pl.BlockSpec(arr.shape, lambda b: zeros)


def _ln(z, g, b, eps):
    mu = jnp.mean(z, axis=-1, keepdims=True)
    var = jnp.mean((z - mu) ** 2, axis=-1, keepdims=True)
    return (z - mu) * jax.lax.rsqrt(var + eps) * g + b


def _merge_select(gh, gw):
    """Constant one-hot row-selection matrices for Swin 2x2 patch merging.

    Returns (4, (gh//2)*(gw//2), gh*gw) f32; quadrant order x0,x1,x2,x3 =
    (0,0),(1,0),(0,1),(1,1).
    """
    oh, ow = gh // 2, gw // 2
    sels = np.zeros((4, oh * ow, gh * gw), np.float32)
    offsets = [(0, 0), (1, 0), (0, 1), (1, 1)]
    for k, (dr, dc) in enumerate(offsets):
        for i in range(oh):
            for j in range(ow):
                sels[k, i * ow + j, (2 * i + dr) * gw + (2 * j + dc)] = 1.0
    return jnp.asarray(sels)


# ----------------------- in-kernel building blocks --------------------------
def _attn_mlp_block(x, bp, num_heads, eps):
    """Pre-LN transformer block on a (T, C) VMEM-resident token tensor."""
    T, C = x.shape
    dh = C // num_heads
    scale = 1.0 / float(dh) ** 0.5

    h = _ln(x, bp["ln1_g"], bp["ln1_b"], eps)
    # Fused QKV: single (T, C) @ (C, 3C) matmul + single bias add.
    qkv = jnp.dot(h, bp["qkv_w"], preferred_element_type=jnp.float32) + bp["qkv_b"]

    attn = jnp.zeros((T, C), jnp.float32)
    for hh in range(num_heads):                       # static unroll (H = 4)
        v_h = qkv[:, 2 * C + hh * dh:2 * C + (hh + 1) * dh]
        if T > 1:
            q_h = qkv[:, hh * dh:(hh + 1) * dh]
            k_h = qkv[:, C + hh * dh:C + (hh + 1) * dh]
            # q @ k^T without an explicit transpose.
            s = jax.lax.dot_general(q_h, k_h, (((1,), (1,)), ((), ())),
                                    preferred_element_type=jnp.float32) * scale
            m = jnp.max(s, axis=-1, keepdims=True)
            p = jnp.exp(s - m)
            p = p * pl.reciprocal(jnp.sum(p, axis=-1, keepdims=True), approx=True)
            o_h = jnp.dot(p, v_h, preferred_element_type=jnp.float32)   # (T, dh)
        else:
            o_h = v_h          # softmax over a single key is the identity
        # Per-head slice of the (C, C) output projection, summed (== concat+proj).
        attn = attn + jnp.dot(o_h, bp["proj_w"][hh],
                              preferred_element_type=jnp.float32)       # (T, C)

    x = x + attn + bp["proj_b"]                         # fused residual

    h2 = _ln(x, bp["ln2_g"], bp["ln2_b"], eps)
    m1 = jnp.dot(h2, bp["fc1_w"], preferred_element_type=jnp.float32) + bp["fc1_b"]
    # TODO(synk): PyTorch nn.GELU defaults to exact erf; tanh approx used here.
    m1 = jax.nn.gelu(m1, approximate=True)
    m2 = jnp.dot(m1, bp["fc2_w"], preferred_element_type=jnp.float32) + bp["fc2_b"]
    return x + m2                                       # fused residual


def _patch_merge(tok, mp, eps):
    """Swin patch merging, fully in VMEM.

    Equivalent to: 2x2 neighborhood concat -> LayerNorm(4C) -> Linear(4C->2C).
    The spatial gather is realized as 4 constant one-hot selection matmuls;
    the LN over the 4C concat is split algebraically over the 4 chunks.
    """
    sel = mp["sel"]                                     # (4, T_out, T_in)
    xs = [jnp.dot(sel[k], tok, preferred_element_type=jnp.float32)
          for k in range(4)]                            # 4 x (T_out, C)

    # LayerNorm statistics over the (virtual) 4C concatenation.
    mu = jnp.mean(xs[0] + xs[1] + xs[2] + xs[3], axis=-1, keepdims=True) * 0.25
    ex2 = jnp.mean(xs[0] * xs[0] + xs[1] * xs[1] + xs[2] * xs[2] + xs[3] * xs[3],
                   axis=-1, keepdims=True) * 0.25
    rstd = jax.lax.rsqrt(ex2 - mu * mu + eps)

    acc = mp["bias"]                                    # (1, 2C) broadcast
    for k in range(4):
        nk = (xs[k] - mu) * rstd * mp["ln_g"][k] + mp["ln_b"][k]
        acc = acc + jnp.dot(nk, mp["w"][k], preferred_element_type=jnp.float32)
    return acc                                          # (T_out, 2C)


# ------------------------------ fused kernel --------------------------------
def _htsat_kernel(*refs, treedef, num_heads, eps):
    """Whole HTSAT encoder for ONE batch element; everything stays in VMEM."""
    x_ref = refs[0]
    o_ref = refs[-1]
    p = jax.tree_util.tree_unflatten(treedef, [r[...] for r in refs[1:-1]])

    # Patch embedding (im2col'd patches -> linear projection).
    tok = x_ref[0].astype(jnp.float32)                  # (T0, PATCH*PATCH)
    tok = jnp.dot(tok, p["patch_w"], preferred_element_type=jnp.float32) + p["patch_b"]

    n_stages = len(p["stages"])
    for s, st in enumerate(p["stages"]):
        for bp in st["blocks"]:
            tok = _attn_mlp_block(tok, bp, num_heads, eps)
        if s < n_stages - 1:
            tok = _patch_merge(tok, st["merge"], eps)

    y = _ln(tok, p["final_ln_g"], p["final_ln_b"], eps)          # (T_last, OUT_EMB)
    o_ref[0] = jnp.mean(y, axis=0, keepdims=True).astype(o_ref.dtype)   # (1, OUT_EMB)


# ------------------------------ model (glue) --------------------------------
def encoder_htsat_forward(x, params):
    """x: (B, T, F) spectrogram; PyTorch does x.unsqueeze(1) -> (B, 1, T, F)."""
    B, T, F = x.shape
    gh, gw = T // PATCH, F // PATCH
    T0 = gh * gw

    # 4x4/stride-4 patch extraction (im2col).  Pure layout op on the INPUT in
    # XLA; the projection matmul itself happens inside the fused kernel, and
    # no intermediate activation ever round-trips through HBM.
    patches = x.reshape(B, gh, PATCH, gw, PATCH)
    patches = patches.transpose(0, 1, 3, 2, 4).reshape(B, T0, PATCH * PATCH)

    leaves, treedef = jax.tree_util.tree_flatten(params)
    kernel = functools.partial(_htsat_kernel, treedef=treedef,
                               num_heads=NUM_HEADS, eps=EPS)

    in_specs = [pl.BlockSpec((1, T0, PATCH * PATCH), lambda b: (b, 0, 0))]
    in_specs += [_const_spec(w) for w in leaves]

    out = pl.pallas_call(
        kernel,
        out_shape=jax.ShapeDtypeStruct((B, 1, OUT_EMB), jnp.float32),
        grid=(B,),
        in_specs=in_specs,
        out_specs=pl.BlockSpec((1, 1, OUT_EMB), lambda b: (b, 0, 0)),
        compiler_params=pltpu.CompilerParams(
            dimension_semantics=("parallel",)),   # 1 batch element per TC on v7x
    )(patches, *leaves)
    return out.reshape(B, OUT_EMB)


# ---------------------------- deterministic init -----------------------------
def init_params(key, spec_shape=(32, 32)):
    keys = iter(jax.random.split(key, 256))

    def nrm(shape, std=0.02):
        return std * jax.random.normal(next(keys), shape, jnp.float32)

    gh, gw = spec_shape[0] // PATCH, spec_shape[1] // PATCH
    params = {
        "patch_w": nrm((PATCH * PATCH, HTSAT_DIM)),
        "patch_b": jnp.zeros((1, HTSAT_DIM), jnp.float32),
        "stages": [],
    }
    C = HTSAT_DIM
    for s, depth in enumerate(HTSAT_DEPTH):
        dh = C // NUM_HEADS
        blocks = []
        for _ in range(depth):
            blocks.append({
                "ln1_g": jnp.ones((1, C), jnp.float32),
                "ln1_b": jnp.zeros((1, C), jnp.float32),
                # fused QKV weight: columns = [q_h0..q_h3 | k_h0..k_h3 | v_h0..v_h3]
                "qkv_w": nrm((C, 3 * C)),
                "qkv_b": jnp.zeros((1, 3 * C), jnp.float32),
                # output projection stored per head (rows of the (C, C) matrix)
                "proj_w": nrm((NUM_HEADS, dh, C)),
                "proj_b": jnp.zeros((1, C), jnp.float32),
                "ln2_g": jnp.ones((1, C), jnp.float32),
                "ln2_b": jnp.zeros((1, C), jnp.float32),
                "fc1_w": nrm((C, MLP_RATIO * C)),
                "fc1_b": jnp.zeros((1, MLP_RATIO * C), jnp.float32),
                "fc2_w": nrm((MLP_RATIO * C, C)),
                "fc2_b": jnp.zeros((1, C), jnp.float32),
            })
        stage = {"blocks": blocks}
        if s < len(HTSAT_DEPTH) - 1:
            stage["merge"] = {
                "sel": _merge_select(gh, gw),                    # (4, T/4, T)
                "ln_g": jnp.ones((4, 1, C), jnp.float32),        # LN(4C) split in 4 chunks
                "ln_b": jnp.zeros((4, 1, C), jnp.float32),
                "w": nrm((4, C, 2 * C)),                         # Linear(4C->2C) split
                "bias": jnp.zeros((1, 2 * C), jnp.float32),
            }
            gh, gw = gh // 2, gw // 2
            C = 2 * C
        params["stages"].append(stage)
    params["final_ln_g"] = jnp.ones((1, C), jnp.float32)
    params["final_ln_b"] = jnp.zeros((1, C), jnp.float32)
    return params


if __name__ == "__main__":
    key = jax.random.PRNGKey(0)
    k_param, k_x = jax.random.split(key)

    # small spectrogram: batch=2, time=32, mel bins=32
    x = jax.random.normal(k_x, (2, 32, 32), jnp.float32)
    params = init_params(k_param, spec_shape=(32, 32))

    fwd = jax.jit(encoder_htsat_forward)
    y = fwd(x, params)
    jax.block_until_ready(y)

    assert y.shape == (2, OUT_EMB), y.shape
    assert bool(jnp.all(jnp.isfinite(y)))
    print("KERNEL_OK")
</pallas_src>

<mosaic_0001>
module attributes {stable_mosaic.version = 11 : i64} {
  func.func @_htsat_kernel(%arg0: i32, %arg1: memref<1x64x16xf32, #tpu.memory_space<vmem>>, %arg2: memref<1x128xf32, #tpu.memory_space<vmem>>, %arg3: memref<1x128xf32, #tpu.memory_space<vmem>>, %arg4: memref<1x16xf32, #tpu.memory_space<vmem>>, %arg5: memref<16x16xf32, #tpu.memory_space<vmem>>, %arg6: memref<1x64xf32, #tpu.memory_space<vmem>>, %arg7: memref<16x64xf32, #tpu.memory_space<vmem>>, %arg8: memref<1x16xf32, #tpu.memory_space<vmem>>, %arg9: memref<64x16xf32, #tpu.memory_space<vmem>>, %arg10: memref<1x16xf32, #tpu.memory_space<vmem>>, %arg11: memref<1x16xf32, #tpu.memory_space<vmem>>, %arg12: memref<1x16xf32, #tpu.memory_space<vmem>>, %arg13: memref<1x16xf32, #tpu.memory_space<vmem>>, %arg14: memref<1x16xf32, #tpu.memory_space<vmem>>, %arg15: memref<4x4x16xf32, #tpu.memory_space<vmem>>, %arg16: memref<1x48xf32, #tpu.memory_space<vmem>>, %arg17: memref<16x48xf32, #tpu.memory_space<vmem>>, %arg18: memref<1x32xf32, #tpu.memory_space<vmem>>, %arg19: memref<4x1x16xf32, #tpu.memory_space<vmem>>, %arg20: memref<4x1x16xf32, #tpu.memory_space<vmem>>, %arg21: memref<4x16x64xf32, #tpu.memory_space<vmem>>, %arg22: memref<4x16x32xf32, #tpu.memory_space<vmem>>, %arg23: memref<1x128xf32, #tpu.memory_space<vmem>>, %arg24: memref<32x128xf32, #tpu.memory_space<vmem>>, %arg25: memref<1x32xf32, #tpu.memory_space<vmem>>, %arg26: memref<128x32xf32, #tpu.memory_space<vmem>>, %arg27: memref<1x32xf32, #tpu.memory_space<vmem>>, %arg28: memref<1x32xf32, #tpu.memory_space<vmem>>, %arg29: memref<1x32xf32, #tpu.memory_space<vmem>>, %arg30: memref<1x32xf32, #tpu.memory_space<vmem>>, %arg31: memref<1x32xf32, #tpu.memory_space<vmem>>, %arg32: memref<4x8x32xf32, #tpu.memory_space<vmem>>, %arg33: memref<1x96xf32, #tpu.memory_space<vmem>>, %arg34: memref<32x96xf32, #tpu.memory_space<vmem>>, %arg35: memref<1x64xf32, #tpu.memory_space<vmem>>, %arg36: memref<4x1x32xf32, #tpu.memory_space<vmem>>, %arg37: memref<4x1x32xf32, #tpu.memory_space<vmem>>, %arg38: memref<4x4x16xf32, #tpu.memory_space<vmem>>, %arg39: memref<4x32x64xf32, #tpu.memory_space<vmem>>, %arg40: memref<1x256xf32, #tpu.memory_space<vmem>>, %arg41: memref<64x256xf32, #tpu.memory_space<vmem>>, %arg42: memref<1x64xf32, #tpu.memory_space<vmem>>, %arg43: memref<256x64xf32, #tpu.memory_space<vmem>>, %arg44: memref<1x64xf32, #tpu.memory_space<vmem>>, %arg45: memref<1x64xf32, #tpu.memory_space<vmem>>, %arg46: memref<1x64xf32, #tpu.memory_space<vmem>>, %arg47: memref<1x64xf32, #tpu.memory_space<vmem>>, %arg48: memref<1x64xf32, #tpu.memory_space<vmem>>, %arg49: memref<4x16x64xf32, #tpu.memory_space<vmem>>, %arg50: memref<1x192xf32, #tpu.memory_space<vmem>>, %arg51: memref<64x192xf32, #tpu.memory_space<vmem>>, %arg52: memref<1x128xf32, #tpu.memory_space<vmem>>, %arg53: memref<4x1x64xf32, #tpu.memory_space<vmem>>, %arg54: memref<4x1x64xf32, #tpu.memory_space<vmem>>, %arg55: memref<4x1x4xf32, #tpu.memory_space<vmem>>, %arg56: memref<4x64x128xf32, #tpu.memory_space<vmem>>, %arg57: memref<1x512xf32, #tpu.memory_space<vmem>>, %arg58: memref<128x512xf32, #tpu.memory_space<vmem>>, %arg59: memref<1x128xf32, #tpu.memory_space<vmem>>, %arg60: memref<512x128xf32, #tpu.memory_space<vmem>>, %arg61: memref<1x128xf32, #tpu.memory_space<vmem>>, %arg62: memref<1x128xf32, #tpu.memory_space<vmem>>, %arg63: memref<1x128xf32, #tpu.memory_space<vmem>>, %arg64: memref<1x128xf32, #tpu.memory_space<vmem>>, %arg65: memref<1x128xf32, #tpu.memory_space<vmem>>, %arg66: memref<4x32x128xf32, #tpu.memory_space<vmem>>, %arg67: memref<1x384xf32, #tpu.memory_space<vmem>>, %arg68: memref<128x384xf32, #tpu.memory_space<vmem>>, %arg69: memref<1x1x128xf32, #tpu.memory_space<vmem>>) attributes {dimension_semantics = [#tpu.dimension_semantics<parallel>], iteration_bounds = array<i64: 2>, scalar_prefetch = 0 : i64, scratch_operands = 0 : i64, tpu.core_type = #tpu.core_type<tc>, window_params = [{transform_indices = @transform_0, window_bounds = array<i64: 1, 64, 16>}, {pipeline_mode = #tpu.pipeline_mode<synchronous>, transform_indices = @transform_1, window_bounds = array<i64: 1, 128>}, {pipeline_mode = #tpu.pipeline_mode<synchronous>, transform_indices = @transform_2, window_bounds = array<i64: 1, 128>}, {pipeline_mode = #tpu.pipeline_mode<synchronous>, transform_indices = @transform_3, window_bounds = array<i64: 1, 16>}, {pipeline_mode = #tpu.pipeline_mode<synchronous>, transform_indices = @transform_4, window_bounds = array<i64: 16, 16>}, {pipeline_mode = #tpu.pipeline_mode<synchronous>, transform_indices = @transform_5, window_bounds = array<i64: 1, 64>}, {pipeline_mode = #tpu.pipeline_mode<synchronous>, transform_indices = @transform_6, window_bounds = array<i64: 16, 64>}, {pipeline_mode = #tpu.pipeline_mode<synchronous>, transform_indices = @transform_7, window_bounds = array<i64: 1, 16>}, {pipeline_mode = #tpu.pipeline_mode<synchronous>, transform_indices = @transform_8, window_bounds = array<i64: 64, 16>}, {pipeline_mode = #tpu.pipeline_mode<synchronous>, transform_indices = @transform_9, window_bounds = array<i64: 1, 16>}, {pipeline_mode = #tpu.pipeline_mode<synchronous>, transform_indices = @transform_10, window_bounds = array<i64: 1, 16>}, {pipeline_mode = #tpu.pipeline_mode<synchronous>, transform_indices = @transform_11, window_bounds = array<i64: 1, 16>}, {pipeline_mode = #tpu.pipeline_mode<synchronous>, transform_indices = @transform_12, window_bounds = array<i64: 1, 16>}, {pipeline_mode = #tpu.pipeline_mode<synchronous>, transform_indices = @transform_13, window_bounds = array<i64: 1, 16>}, {pipeline_mode = #tpu.pipeline_mode<synchronous>, transform_indices = @transform_14, window_bounds = array<i64: 4, 4, 16>}, {pipeline_mode = #tpu.pipeline_mode<synchronous>, transform_indices = @transform_15, window_bounds = array<i64: 1, 48>}, {pipeline_mode = #tpu.pipeline_mode<synchronous>, transform_indices = @transform_16, window_bounds = array<i64: 16, 48>}, {pipeline_mode = #tpu.pipeline_mode<synchronous>, transform_indices = @transform_17, window_bounds = array<i64: 1, 32>}, {pipeline_mode = #tpu.pipeline_mode<synchronous>, transform_indices = @transform_18, window_bounds = array<i64: 4, 1, 16>}, {pipeline_mode = #tpu.pipeline_mode<synchronous>, transform_indices = @transform_19, window_bounds = array<i64: 4, 1, 16>}, {pipeline_mode = #tpu.pipeline_mode<synchronous>, transform_indices = @transform_20, window_bounds = array<i64: 4, 16, 64>}, {pipeline_mode = #tpu.pipeline_mode<synchronous>, transform_indices = @transform_21, window_bounds = array<i64: 4, 16, 32>}, {pipeline_mode = #tpu.pipeline_mode<synchronous>, transform_indices = @transform_22, window_bounds = array<i64: 1, 128>}, {pipeline_mode = #tpu.pipeline_mode<synchronous>, transform_indices = @transform_23, window_bounds = array<i64: 32, 128>}, {pipeline_mode = #tpu.pipeline_mode<synchronous>, transform_indices = @transform_24, window_bounds = array<i64: 1, 32>}, {pipeline_mode = #tpu.pipeline_mode<synchronous>, transform_indices = @transform_25, window_bounds = array<i64: 128, 32>}, {pipeline_mode = #tpu.pipeline_mode<synchronous>, transform_indices = @transform_26, window_bounds = array<i64: 1, 32>}, {pipeline_mode = #tpu.pipeline_mode<synchronous>, transform_indices = @transform_27, window_bounds = array<i64: 1, 32>}, {pipeline_mode = #tpu.pipeline_mode<synchronous>, transform_indices = @transform_28, window_bounds = array<i64: 1, 32>}, {pipeline_mode = #tpu.pipeline_mode<synchronous>, transform_indices = @transform_29, window_bounds = array<i64: 1, 32>}, {pipeline_mode = #tpu.pipeline_mode<synchronous>, transform_indices = @transform_30, window_bounds = array<i64: 1, 32>}, {pipeline_mode = #tpu.pipeline_mode<synchronous>, transform_indices = @transform_31, window_bounds = array<i64: 4, 8, 32>}, {pipeline_mode = #tpu.pipeline_mode<synchronous>, transform_indices = @transform_32, window_bounds = array<i64: 1, 96>}, {pipeline_mode = #tpu.pipeline_mode<synchronous>, transform_indices = @transform_33, window_bounds = array<i64: 32, 96>}, {pipeline_mode = #tpu.pipeline_mode<synchronous>, transform_indices = @transform_34, window_bounds = array<i64: 1, 64>}, {pipeline_mode = #tpu.pipeline_mode<synchronous>, transform_indices = @transform_35, window_bounds = array<i64: 4, 1, 32>}, {pipeline_mode = #tpu.pipeline_mode<synchronous>, transform_indices = @transform_36, window_bounds = array<i64: 4, 1, 32>}, {pipeline_mode = #tpu.pipeline_mode<synchronous>, transform_indices = @transform_37, window_bounds = array<i64: 4, 4, 16>}, {pipeline_mode = #tpu.pipeline_mode<synchronous>, transform_indices = @transform_38, window_bounds = array<i64: 4, 32, 64>}, {pipeline_mode = #tpu.pipeline_mode<synchronous>, transform_indices = @transform_39, window_bounds = array<i64: 1, 256>}, {pipeline_mode = #tpu.pipeline_mode<synchronous>, transform_indices = @transform_40, window_bounds = array<i64: 64, 256>}, {pipeline_mode = #tpu.pipeline_mode<synchronous>, transform_indices = @transform_41, window_bounds = array<i64: 1, 64>}, {pipeline_mode = #tpu.pipeline_mode<synchronous>, transform_indices = @transform_42, window_bounds = array<i64: 256, 64>}, {pipeline_mode = #tpu.pipeline_mode<synchronous>, transform_indices = @transform_43, window_bounds = array<i64: 1, 64>}, {pipeline_mode = #tpu.pipeline_mode<synchronous>, transform_indices = @transform_44, window_bounds = array<i64: 1, 64>}, {pipeline_mode = #tpu.pipeline_mode<synchronous>, transform_indices = @transform_45, window_bounds = array<i64: 1, 64>}, {pipeline_mode = #tpu.pipeline_mode<synchronous>, transform_indices = @transform_46, window_bounds = array<i64: 1, 64>}, {pipeline_mode = #tpu.pipeline_mode<synchronous>, transform_indices = @transform_47, window_bounds = array<i64: 1, 64>}, {pipeline_mode = #tpu.pipeline_mode<synchronous>, transform_indices = @transform_48, window_bounds = array<i64: 4, 16, 64>}, {pipeline_mode = #tpu.pipeline_mode<synchronous>, transform_indices = @transform_49, window_bounds = array<i64: 1, 192>}, {pipeline_mode = #tpu.pipeline_mode<synchronous>, transform_indices = @transform_50, window_bounds = array<i64: 64, 192>}, {pipeline_mode = #tpu.pipeline_mode<synchronous>, transform_indices = @transform_51, window_bounds = array<i64: 1, 128>}, {pipeline_mode = #tpu.pipeline_mode<synchronous>, transform_indices = @transform_52, window_bounds = array<i64: 4, 1, 64>}, {pipeline_mode = #tpu.pipeline_mode<synchronous>, transform_indices = @transform_53, window_bounds = array<i64: 4, 1, 64>}, {pipeline_mode = #tpu.pipeline_mode<synchronous>, transform_indices = @transform_54, window_bounds = array<i64: 4, 1, 4>}, {pipeline_mode = #tpu.pipeline_mode<synchronous>, transform_indices = @transform_55, window_bounds = array<i64: 4, 64, 128>}, {pipeline_mode = #tpu.pipeline_mode<synchronous>, transform_indices = @transform_56, window_bounds = array<i64: 1, 512>}, {pipeline_mode = #tpu.pipeline_mode<synchronous>, transform_indices = @transform_57, window_bounds = array<i64: 128, 512>}, {pipeline_mode = #tpu.pipeline_mode<synchronous>, transform_indices = @transform_58, window_bounds = array<i64: 1, 128>}, {pipeline_mode = #tpu.pipeline_mode<synchronous>, transform_indices = @transform_59, window_bounds = array<i64: 512, 128>}, {pipeline_mode = #tpu.pipeline_mode<synchronous>, transform_indices = @transform_60, window_bounds = array<i64: 1, 128>}, {pipeline_mode = #tpu.pipeline_mode<synchronous>, transform_indices = @transform_61, window_bounds = array<i64: 1, 128>}, {pipeline_mode = #tpu.pipeline_mode<synchronous>, transform_indices = @transform_62, window_bounds = array<i64: 1, 128>}, {pipeline_mode = #tpu.pipeline_mode<synchronous>, transform_indices = @transform_63, window_bounds = array<i64: 1, 128>}, {pipeline_mode = #tpu.pipeline_mode<synchronous>, transform_indices = @transform_64, window_bounds = array<i64: 1, 128>}, {pipeline_mode = #tpu.pipeline_mode<synchronous>, transform_indices = @transform_65, window_bounds = array<i64: 4, 32, 128>}, {pipeline_mode = #tpu.pipeline_mode<synchronous>, transform_indices = @transform_66, window_bounds = array<i64: 1, 384>}, {pipeline_mode = #tpu.pipeline_mode<synchronous>, transform_indices = @transform_67, window_bounds = array<i64: 128, 384>}, {transform_indices = @transform_68, window_bounds = array<i64: 1, 1, 128>}]} {
    %c0 = arith.constant 0 : index
    %c0_0 = arith.constant 0 : index
    %0 = vector.load %arg2[%c0, %c0_0] : memref<1x128xf32, #tpu.memory_space<vmem>>, vector<1x128xf32>
    %c0_1 = arith.constant 0 : index
    %c0_2 = arith.constant 0 : index
    %1 = vector.load %arg3[%c0_1, %c0_2] : memref<1x128xf32, #tpu.memory_space<vmem>>, vector<1x128xf32>
    %c0_3 = arith.constant 0 : index
    %c0_4 = arith.constant 0 : index
    %2 = vector.load %arg4[%c0_3, %c0_4] : memref<1x16xf32, #tpu.memory_space<vmem>>, vector<1x16xf32>
    %c0_5 = arith.constant 0 : index
    %c0_6 = arith.constant 0 : index
    %3 = vector.load %arg5[%c0_5, %c0_6] : memref<16x16xf32, #tpu.memory_space<vmem>>, vector<16x16xf32>
    %c0_7 = arith.constant 0 : index
    %c0_8 = arith.constant 0 : index
    %4 = vector.load %arg6[%c0_7, %c0_8] : memref<1x64xf32, #tpu.memory_space<vmem>>, vector<1x64xf32>
    %c0_9 = arith.constant 0 : index
    %c0_10 = arith.constant 0 : index
    %5 = vector.load %arg7[%c0_9, %c0_10] : memref<16x64xf32, #tpu.memory_space<vmem>>, vector<16x64xf32>
    %c0_11 = arith.constant 0 : index
    %c0_12 = arith.constant 0 : index
    %6 = vector.load %arg8[%c0_11, %c0_12] : memref<1x16xf32, #tpu.memory_space<vmem>>, vector<1x16xf32>
    %c0_13 = arith.constant 0 : index
    %c0_14 = arith.constant 0 : index
    %7 = vector.load %arg9[%c0_13, %c0_14] : memref<64x16xf32, #tpu.memory_space<vmem>>, vector<64x16xf32>
    %c0_15 = arith.constant 0 : index
    %c0_16 = arith.constant 0 : index
    %8 = vector.load %arg10[%c0_15, %c0_16] : memref<1x16xf32, #tpu.memory_space<vmem>>, vector<1x16xf32>
    %c0_17 = arith.constant 0 : index
    %c0_18 = arith.constant 0 : index
    %9 = vector.load %arg11[%c0_17, %c0_18] : memref<1x16xf32, #tpu.memory_space<vmem>>, vector<1x16xf32>
    %c0_19 = arith.constant 0 : index
    %c0_20 = arith.constant 0 : index
    %10 = vector.load %arg12[%c0_19, %c0_20] : memref<1x16xf32, #tpu.memory_space<vmem>>, vector<1x16xf32>
    %c0_21 = arith.constant 0 : index
    %c0_22 = arith.constant 0 : index
    %11 = vector.load %arg13[%c0_21, %c0_22] : memref<1x16xf32, #tpu.memory_space<vmem>>, vector<1x16xf32>
    %c0_23 = arith.constant 0 : index
    %c0_24 = arith.constant 0 : index
    %12 = vector.load %arg14[%c0_23, %c0_24] : memref<1x16xf32, #tpu.memory_space<vmem>>, vector<1x16xf32>
    %c0_25 = arith.constant 0 : index
    %c0_26 = arith.constant 0 : index
    %c0_27 = arith.constant 0 : index
    %13 = vector.load %arg15[%c0_25, %c0_26, %c0_27] : memref<4x4x16xf32, #tpu.memory_space<vmem>>, vector<4x4x16xf32>
    %c0_28 = arith.constant 0 : index
    %c0_29 = arith.constant 0 : index
    %14 = vector.load %arg16[%c0_28, %c0_29] : memref<1x48xf32, #tpu.memory_space<vmem>>, vector<1x48xf32>
    %c0_30 = arith.constant 0 : index
    %c0_31 = arith.constant 0 : index
    %15 = vector.load %arg17[%c0_30, %c0_31] : memref<16x48xf32, #tpu.memory_space<vmem>>, vector<16x48xf32>
    %c0_32 = arith.constant 0 : index
    %c0_33 = arith.constant 0 : index
    %16 = vector.load %arg18[%c0_32, %c0_33] : memref<1x32xf32, #tpu.memory_space<vmem>>, vector<1x32xf32>
    %c0_34 = arith.constant 0 : index
    %c0_35 = arith.constant 0 : index
    %c0_36 = arith.constant 0 : index
    %17 = vector.load %arg19[%c0_34, %c0_35, %c0_36] : memref<4x1x16xf32, #tpu.memory_space<vmem>>, vector<4x1x16xf32>
    %c0_37 = arith.constant 0 : index
    %c0_38 = arith.constant 0 : index
    %c0_39 = arith.constant 0 : index
    %18 = vector.load %arg20[%c0_37, %c0_38, %c0_39] : memref<4x1x16xf32, #tpu.memory_space<vmem>>, vector<4x1x16xf32>
    %c0_40 = arith.constant 0 : index
    %c0_41 = arith.constant 0 : index
    %c0_42 = arith.constant 0 : index
    %19 = vector.load %arg21[%c0_40, %c0_41, %c0_42] : memref<4x16x64xf32, #tpu.memory_space<vmem>>, vector<4x16x64xf32>
    %c0_43 = arith.constant 0 : index
    %c0_44 = arith.constant 0 : index
    %c0_45 = arith.constant 0 : index
    %20 = vector.load %arg22[%c0_43, %c0_44, %c0_45] : memref<4x16x32xf32, #tpu.memory_space<vmem>>, vector<4x16x32xf32>
    %c0_46 = arith.constant 0 : index
    %c0_47 = arith.constant 0 : index
    %21 = vector.load %arg23[%c0_46, %c0_47] : memref<1x128xf32, #tpu.memory_space<vmem>>, vector<1x128xf32>
    %c0_48 = arith.constant 0 : index
    %c0_49 = arith.constant 0 : index
    %22 = vector.load %arg24[%c0_48, %c0_49] : memref<32x128xf32, #tpu.memory_space<vmem>>, vector<32x128xf32>
    %c0_50 = arith.constant 0 : index
    %c0_51 = arith.constant 0 : index
    %23 = vector.load %arg25[%c0_50, %c0_51] : memref<1x32xf32, #tpu.memory_space<vmem>>, vector<1x32xf32>
    %c0_52 = arith.constant 0 : index
    %c0_53 = arith.constant 0 : index
    %24 = vector.load %arg26[%c0_52, %c0_53] : memref<128x32xf32, #tpu.memory_space<vmem>>, vector<128x32xf32>
    %c0_54 = arith.constant 0 : index
    %c0_55 = arith.constant 0 : index
    %25 = vector.load %arg27[%c0_54, %c0_55] : memref<1x32xf32, #tpu.memory_space<vmem>>, vector<1x32xf32>
    %c0_56 = arith.constant 0 : index
    %c0_57 = arith.constant 0 : index
    %26 = vector.load %arg28[%c0_56, %c0_57] : memref<1x32xf32, #tpu.memory_space<vmem>>, vector<1x32xf32>
    %c0_58 = arith.constant 0 : index
    %c0_59 = arith.constant 0 : index
    %27 = vector.load %arg29[%c0_58, %c0_59] : memref<1x32xf32, #tpu.memory_space<vmem>>, vector<1x32xf32>
    %c0_60 = arith.constant 0 : index
    %c0_61 = arith.constant 0 : index
    %28 = vector.load %arg30[%c0_60, %c0_61] : memref<1x32xf32, #tpu.memory_space<vmem>>, vector<1x32xf32>
    %c0_62 = arith.constant 0 : index
    %c0_63 = arith.constant 0 : index
    %29 = vector.load %arg31[%c0_62, %c0_63] : memref<1x32xf32, #tpu.memory_space<vmem>>, vector<1x32xf32>
    %c0_64 = arith.constant 0 : index
    %c0_65 = arith.constant 0 : index
    %c0_66 = arith.constant 0 : index
    %30 = vector.load %arg32[%c0_64, %c0_65, %c0_66] : memref<4x8x32xf32, #tpu.memory_space<vmem>>, vector<4x8x32xf32>
    %c0_67 = arith.constant 0 : index
    %c0_68 = arith.constant 0 : index
    %31 = vector.load %arg33[%c0_67, %c0_68] : memref<1x96xf32, #tpu.memory_space<vmem>>, vector<1x96xf32>
    %c0_69 = arith.constant 0 : index
    %c0_70 = arith.constant 0 : index
    %32 = vector.load %arg34[%c0_69, %c0_70] : memref<32x96xf32, #tpu.memory_space<vmem>>, vector<32x96xf32>
    %c0_71 = arith.constant 0 : index
    %c0_72 = arith.constant 0 : index
    %33 = vector.load %arg35[%c0_71, %c0_72] : memref<1x64xf32, #tpu.memory_space<vmem>>, vector<1x64xf32>
    %c0_73 = arith.constant 0 : index
    %c0_74 = arith.constant 0 : index
    %c0_75 = arith.constant 0 : index
    %34 = vector.load %arg36[%c0_73, %c0_74, %c0_75] : memref<4x1x32xf32, #tpu.memory_space<vmem>>, vector<4x1x32xf32>
    %c0_76 = arith.constant 0 : index
    %c0_77 = arith.constant 0 : index
    %c0_78 = arith.constant 0 : index
    %35 = vector.load %arg37[%c0_76, %c0_77, %c0_78] : memref<4x1x32xf32, #tpu.memory_space<vmem>>, vector<4x1x32xf32>
    %c0_79 = arith.constant 0 : index
    %c0_80 = arith.constant 0 : index
    %c0_81 = arith.constant 0 : index
    %36 = vector.load %arg38[%c0_79, %c0_80, %c0_81] : memref<4x4x16xf32, #tpu.memory_space<vmem>>, vector<4x4x16xf32>
    %c0_82 = arith.constant 0 : index
    %c0_83 = arith.constant 0 : index
    %c0_84 = arith.constant 0 : index
    %37 = vector.load %arg39[%c0_82, %c0_83, %c0_84] : memref<4x32x64xf32, #tpu.memory_space<vmem>>, vector<4x32x64xf32>
    %c0_85 = arith.constant 0 : index
    %c0_86 = arith.constant 0 : index
    %38 = vector.load %arg40[%c0_85, %c0_86] : memref<1x256xf32, #tpu.memory_space<vmem>>, vector<1x256xf32>
    %c0_87 = arith.constant 0 : index
    %c0_88 = arith.constant 0 : index
    %39 = vector.load %arg41[%c0_87, %c0_88] : memref<64x256xf32, #tpu.memory_space<vmem>>, vector<64x256xf32>
    %c0_89 = arith.constant 0 : index
    %c0_90 = arith.constant 0 : index
    %40 = vector.load %arg42[%c0_89, %c0_90] : memref<1x64xf32, #tpu.memory_space<vmem>>, vector<1x64xf32>
    %c0_91 = arith.constant 0 : index
    %c0_92 = arith.constant 0 : index
    %41 = vector.load %arg43[%c0_91, %c0_92] : memref<256x64xf32, #tpu.memory_space<vmem>>, vector<256x64xf32>
    %c0_93 = arith.constant 0 : index
    %c0_94 = arith.constant 0 : index
    %42 = vector.load %arg44[%c0_93, %c0_94] : memref<1x64xf32, #tpu.memory_space<vmem>>, vector<1x64xf32>
    %c0_95 = arith.constant 0 : index
    %c0_96 = arith.constant 0 : index
    %43 = vector.load %arg45[%c0_95, %c0_96] : memref<1x64xf32, #tpu.memory_space<vmem>>, vector<1x64xf32>
    %c0_97 = arith.constant 0 : index
    %c0_98 = arith.constant 0 : index
    %44 = vector.load %arg46[%c0_97, %c0_98] : memref<1x64xf32, #tpu.memory_space<vmem>>, vector<1x64xf32>
    %c0_99 = arith.constant 0 : index
    %c0_100 = arith.constant 0 : index
    %45 = vector.load %arg47[%c0_99, %c0_100] : memref<1x64xf32, #tpu.memory_space<vmem>>, vector<1x64xf32>
    %c0_101 = arith.constant 0 : index
    %c0_102 = arith.constant 0 : index
    %46 = vector.load %arg48[%c0_101, %c0_102] : memref<1x64xf32, #tpu.memory_space<vmem>>, vector<1x64xf32>
    %c0_103 = arith.constant 0 : index
    %c0_104 = arith.constant 0 : index
    %c0_105 = arith.constant 0 : index
    %47 = vector.load %arg49[%c0_103, %c0_104, %c0_105] : memref<4x16x64xf32, #tpu.memory_space<vmem>>, vector<4x16x64xf32>
    %c0_106 = arith.constant 0 : index
    %c0_107 = arith.constant 0 : index
    %48 = vector.load %arg50[%c0_106, %c0_107] : memref<1x192xf32, #tpu.memory_space<vmem>>, vector<1x192xf32>
    %c0_108 = arith.constant 0 : index
    %c0_109 = arith.constant 0 : index
    %49 = vector.load %arg51[%c0_108, %c0_109] : memref<64x192xf32, #tpu.memory_space<vmem>>, vector<64x192xf32>
    %c0_110 = arith.constant 0 : index
    %c0_111 = arith.constant 0 : index
    %50 = vector.load %arg52[%c0_110, %c0_111] : memref<1x128xf32, #tpu.memory_space<vmem>>, vector<1x128xf32>
    %c0_112 = arith.constant 0 : index
    %c0_113 = arith.constant 0 : index
    %c0_114 = arith.constant 0 : index
    %51 = vector.load %arg53[%c0_112, %c0_113, %c0_114] : memref<4x1x64xf32, #tpu.memory_space<vmem>>, vector<4x1x64xf32>
    %c0_115 = arith.constant 0 : index
    %c0_116 = arith.constant 0 : index
    %c0_117 = arith.constant 0 : index
    %52 = vector.load %arg54[%c0_115, %c0_116, %c0_117] : memref<4x1x64xf32, #tpu.memory_space<vmem>>, vector<4x1x64xf32>
    %c0_118 = arith.constant 0 : index
    %c0_119 = arith.constant 0 : index
    %c0_120 = arith.constant 0 : index
    %53 = vector.load %arg55[%c0_118, %c0_119, %c0_120] : memref<4x1x4xf32, #tpu.memory_space<vmem>>, vector<4x1x4xf32>
    %c0_121 = arith.constant 0 : index
    %c0_122 = arith.constant 0 : index
    %c0_123 = arith.constant 0 : index
    %54 = vector.load %arg56[%c0_121, %c0_122, %c0_123] : memref<4x64x128xf32, #tpu.memory_space<vmem>>, vector<4x64x128xf32>
    %c0_124 = arith.constant 0 : index
    %c0_125 = arith.constant 0 : index
    %55 = vector.load %arg57[%c0_124, %c0_125] : memref<1x512xf32, #tpu.memory_space<vmem>>, vector<1x512xf32>
    %c0_126 = arith.constant 0 : index
    %c0_127 = arith.constant 0 : index
    %56 = vector.load %arg58[%c0_126, %c0_127] : memref<128x512xf32, #tpu.memory_space<vmem>>, vector<128x512xf32>
    %c0_128 = arith.constant 0 : index
    %c0_129 = arith.constant 0 : index
    %57 = vector.load %arg59[%c0_128, %c0_129] : memref<1x128xf32, #tpu.memory_space<vmem>>, vector<1x128xf32>
    %c0_130 = arith.constant 0 : index
    %c0_131 = arith.constant 0 : index
    %58 = vector.load %arg60[%c0_130, %c0_131] : memref<512x128xf32, #tpu.memory_space<vmem>>, vector<512x128xf32>
    %c0_132 = arith.constant 0 : index
    %c0_133 = arith.constant 0 : index
    %59 = vector.load %arg61[%c0_132, %c0_133] : memref<1x128xf32, #tpu.memory_space<vmem>>, vector<1x128xf32>
    %c0_134 = arith.constant 0 : index
    %c0_135 = arith.constant 0 : index
    %60 = vector.load %arg62[%c0_134, %c0_135] : memref<1x128xf32, #tpu.memory_space<vmem>>, vector<1x128xf32>
    %c0_136 = arith.constant 0 : index
    %c0_137 = arith.constant 0 : index
    %61 = vector.load %arg63[%c0_136, %c0_137] : memref<1x128xf32, #tpu.memory_space<vmem>>, vector<1x128xf32>
    %c0_138 = arith.constant 0 : index
    %c0_139 = arith.constant 0 : index
    %62 = vector.load %arg64[%c0_138, %c0_139] : memref<1x128xf32, #tpu.memory_space<vmem>>, vector<1x128xf32>
    %c0_140 = arith.constant 0 : index
    %c0_141 = arith.constant 0 : index
    %63 = vector.load %arg65[%c0_140, %c0_141] : memref<1x128xf32, #tpu.memory_space<vmem>>, vector<1x128xf32>
    %c0_142 = arith.constant 0 : index
    %c0_143 = arith.constant 0 : index
    %c0_144 = arith.constant 0 : index
    %64 = vector.load %arg66[%c0_142, %c0_143, %c0_144] : memref<4x32x128xf32, #tpu.memory_space<vmem>>, vector<4x32x128xf32>
    %c0_145 = arith.constant 0 : index
    %c0_146 = arith.constant 0 : index
    %65 = vector.load %arg67[%c0_145, %c0_146] : memref<1x384xf32, #tpu.memory_space<vmem>>, vector<1x384xf32>
    %c0_147 = arith.constant 0 : index
    %c0_148 = arith.constant 0 : index
    %66 = vector.load %arg68[%c0_147, %c0_148] : memref<128x384xf32, #tpu.memory_space<vmem>>, vector<128x384xf32>
    %c0_149 = arith.constant 0 : index
    %c0_150 = arith.constant 0 : index
    %c0_151 = arith.constant 0 : index
    %67 = vector.load %arg1[%c0_149, %c0_150, %c0_151] : memref<1x64x16xf32, #tpu.memory_space<vmem>>, vector<1x64x16xf32>
    %68 = vector.shape_cast %67 : vector<1x64x16xf32> to vector<64x16xf32>
    %cst = arith.constant dense<0.000000e+00> : vector<64x16xf32>
    %69 = tpu.matmul %68, %3, %cst {dimension_numbers = #tpu.dot_dimension_numbers<[1], [0], [0], [1], [0, 0, 1, 1], [], []>} : vector<64x16xf32>, vector<16x16xf32>, vector<64x16xf32> -> vector<64x16xf32>
    %70 = vector.broadcast %2 : vector<1x16xf32> to vector<64x16xf32>
    %71 = arith.addf %69, %70 : vector<64x16xf32>
    %cst_152 = arith.constant dense<0.000000e+00> : vector<64xf32>
    %72 = vector.multi_reduction <add>, %71, %cst_152 [1] : vector<64x16xf32> to vector<64xf32>
    %73 = vector.shape_cast %72 : vector<64xf32> to vector<64x1xf32>
    %cst_153 = arith.constant 1.600000e+01 : f32
    %74 = vector.broadcast %cst_153 : f32 to vector<64x1xf32>
    %75 = arith.divf %73, %74 : vector<64x1xf32>
    %76 = vector.broadcast %75 : vector<64x1xf32> to vector<64x16xf32>
    %77 = arith.subf %71, %76 : vector<64x16xf32>
    %78 = arith.mulf %77, %77 : vector<64x16xf32>
    %cst_154 = arith.constant dense<0.000000e+00> : vector<64xf32>
    %79 = vector.multi_reduction <add>, %78, %cst_154 [1] : vector<64x16xf32> to vector<64xf32>
    %80 = vector.shape_cast %79 : vector<64xf32> to vector<64x1xf32>
    %cst_155 = arith.constant 1.600000e+01 : f32
    %81 = vector.broadcast %cst_155 : f32 to vector<64x1xf32>
    %82 = arith.divf %80, %81 : vector<64x1xf32>
    %83 = vector.broadcast %75 : vector<64x1xf32> to vector<64x16xf32>
    %84 = arith.subf %71, %83 : vector<64x16xf32>
    %cst_156 = arith.constant 9.99999974E-6 : f32
    %85 = vector.broadcast %cst_156 : f32 to vector<64x1xf32>
    %86 = arith.addf %82, %85 : vector<64x1xf32>
    %87 = math.rsqrt %86 : vector<64x1xf32>
    %88 = vector.broadcast %87 : vector<64x1xf32> to vector<64x16xf32>
    %89 = arith.mulf %84, %88 : vector<64x16xf32>
    %90 = vector.broadcast %9 : vector<1x16xf32> to vector<64x16xf32>
    %91 = arith.mulf %89, %90 : vector<64x16xf32>
    %92 = vector.broadcast %8 : vector<1x16xf32> to vector<64x16xf32>
    %93 = arith.addf %91, %92 : vector<64x16xf32>
    %cst_157 = arith.constant dense<0.000000e+00> : vector<64x48xf32>
    %94 = tpu.matmul %93, %15, %cst_157 {dimension_numbers = #tpu.dot_dimension_numbers<[1], [0], [0], [1], [0, 0, 1, 1], [], []>} : vector<64x16xf32>, vector<16x48xf32>, vector<64x48xf32> -> vector<64x48xf32>
    %95 = vector.broadcast %14 : vector<1x48xf32> to vector<64x48xf32>
    %96 = arith.addf %94, %95 : vector<64x48xf32>
    %cst_158 = arith.constant 0.000000e+00 : f32
    %97 = vector.broadcast %cst_158 : f32 to vector<64x16xf32>
    %98 = vector.extract_strided_slice %96 {offsets = [0, 32], sizes = [64, 4], strides = [1, 1]} : vector<64x48xf32> to vector<64x4xf32>
    %99 = vector.extract_strided_slice %96 {offsets = [0, 0], sizes = [64, 4], strides = [1, 1]} : vector<64x48xf32> to vector<64x4xf32>
    %100 = vector.extract_strided_slice %96 {offsets = [0, 16], sizes = [64, 4], strides = [1, 1]} : vector<64x48xf32> to vector<64x4xf32>
    %cst_159 = arith.constant dense<0.000000e+00> : vector<64x64xf32>
    %101 = tpu.matmul %99, %100, %cst_159 {dimension_numbers = #tpu.dot_dimension_numbers<[1], [1], [0], [0], [0, 0, 1, 0], [], []>} : vector<64x4xf32>, vector<64x4xf32>, vector<64x64xf32> -> vector<64x64xf32>
    %cst_160 = arith.constant 5.000000e-01 : f32
    %102 = vector.broadcast %cst_160 : f32 to vector<64x64xf32>
    %103 = arith.mulf %101, %102 : vector<64x64xf32>
    %cst_161 = arith.constant dense<0xFF800000> : vector<64xf32>
    %104 = vector.multi_reduction <maximumf>, %103, %cst_161 [1] : vector<64x64xf32> to vector<64xf32>
    %105 = vector.shape_cast %104 : vector<64xf32> to vector<64x1xf32>
    %106 = vector.broadcast %105 : vector<64x1xf32> to vector<64x64xf32>
    %107 = arith.subf %103, %106 : vector<64x64xf32>
    %108 = math.exp %107 : vector<64x64xf32>
    %cst_162 = arith.constant dense<0.000000e+00> : vector<64xf32>
    %109 = vector.multi_reduction <add>, %108, %cst_162 [1] : vector<64x64xf32> to vector<64xf32>
    %110 = vector.shape_cast %109 : vector<64xf32> to vector<64x1xf32>
    %111 = tpu.reciprocal %110 {approx = true} : vector<64x1xf32> -> vector<64x1xf32>
    %112 = vector.broadcast %111 : vector<64x1xf32> to vector<64x64xf32>
    %113 = arith.mulf %108, %112 : vector<64x64xf32>
    %cst_163 = arith.constant dense<0.000000e+00> : vector<64x4xf32>
    %114 = tpu.matmul %113, %98, %cst_163 {dimension_numbers = #tpu.dot_dimension_numbers<[1], [0], [0], [1], [0, 0, 1, 1], [], []>} : vector<64x64xf32>, vector<64x4xf32>, vector<64x4xf32> -> vector<64x4xf32>
    %115 = vector.extract_strided_slice %13 {offsets = [0, 0, 0], sizes = [1, 4, 16], strides = [1, 1, 1]} : vector<4x4x16xf32> to vector<1x4x16xf32>
    %116 = vector.shape_cast %115 : vector<1x4x16xf32> to vector<4x16xf32>
    %cst_164 = arith.constant dense<0.000000e+00> : vector<64x16xf32>
    %117 = tpu.matmul %114, %116, %cst_164 {dimension_numbers = #tpu.dot_dimension_numbers<[1], [0], [0], [1], [0, 0, 1, 1], [], []>} : vector<64x4xf32>, vector<4x16xf32>, vector<64x16xf32> -> vector<64x16xf32>
    %118 = arith.addf %97, %117 : vector<64x16xf32>
    %119 = vector.extract_strided_slice %96 {offsets = [0, 36], sizes = [64, 4], strides = [1, 1]} : vector<64x48xf32> to vector<64x4xf32>
    %120 = vector.extract_strided_slice %96 {offsets = [0, 4], sizes = [64, 4], strides = [1, 1]} : vector<64x48xf32> to vector<64x4xf32>
    %121 = vector.extract_strided_slice %96 {offsets = [0, 20], sizes = [64, 4], strides = [1, 1]} : vector<64x48xf32> to vector<64x4xf32>
    %cst_165 = arith.constant dense<0.000000e+00> : vector<64x64xf32>
    %122 = tpu.matmul %120, %121, %cst_165 {dimension_numbers = #tpu.dot_dimension_numbers<[1], [1], [0], [0], [0, 0, 1, 0], [], []>} : vector<64x4xf32>, vector<64x4xf32>, vector<64x64xf32> -> vector<64x64xf32>
    %cst_166 = arith.constant 5.000000e-01 : f32
    %123 = vector.broadcast %cst_166 : f32 to vector<64x64xf32>
    %124 = arith.mulf %122, %123 : vector<64x64xf32>
    %cst_167 = arith.constant dense<0xFF800000> : vector<64xf32>
    %125 = vector.multi_reduction <maximumf>, %124, %cst_167 [1] : vector<64x64xf32> to vector<64xf32>
    %126 = vector.shape_cast %125 : vector<64xf32> to vector<64x1xf32>
    %127 = vector.broadcast %126 : vector<64x1xf32> to vector<64x64xf32>
    %128 = arith.subf %124, %127 : vector<64x64xf32>
    %129 = math.exp %128 : vector<64x64xf32>
    %cst_168 = arith.constant dense<0.000000e+00> : vector<64xf32>
    %130 = vector.multi_reduction <add>, %129, %cst_168 [1] : vector<64x64xf32> to vector<64xf32>
    %131 = vector.shape_cast %130 : vector<64xf32> to vector<64x1xf32>
    %132 = tpu.reciprocal %131 {approx = true} : vector<64x1xf32> -> vector<64x1xf32>
    %133 = vector.broadcast %132 : vector<64x1xf32> to vector<64x64xf32>
    %134 = arith.mulf %129, %133 : vector<64x64xf32>
    %cst_169 = arith.constant dense<0.000000e+00> : vector<64x4xf32>
    %135 = tpu.matmul %134, %119, %cst_169 {dimension_numbers = #tpu.dot_dimension_numbers<[1], [0], [0], [1], [0, 0, 1, 1], [], []>} : vector<64x64xf32>, vector<64x4xf32>, vector<64x4xf32> -> vector<64x4xf32>
    %136 = vector.extract_strided_slice %13 {offsets = [1, 0, 0], sizes = [1, 4, 16], strides = [1, 1, 1]} : vector<4x4x16xf32> to vector<1x4x16xf32>
    %137 = vector.shape_cast %136 : vector<1x4x16xf32> to vector<4x16xf32>
    %cst_170 = arith.constant dense<0.000000e+00> : vector<64x16xf32>
    %138 = tpu.matmul %135, %137, %cst_170 {dimension_numbers = #tpu.dot_dimension_numbers<[1], [0], [0], [1], [0, 0, 1, 1], [], []>} : vector<64x4xf32>, vector<4x16xf32>, vector<64x16xf32> -> vector<64x16xf32>
    %139 = arith.addf %118, %138 : vector<64x16xf32>
    %140 = vector.extract_strided_slice %96 {offsets = [0, 40], sizes = [64, 4], strides = [1, 1]} : vector<64x48xf32> to vector<64x4xf32>
    %141 = vector.extract_strided_slice %96 {offsets = [0, 8], sizes = [64, 4], strides = [1, 1]} : vector<64x48xf32> to vector<64x4xf32>
    %142 = vector.extract_strided_slice %96 {offsets = [0, 24], sizes = [64, 4], strides = [1, 1]} : vector<64x48xf32> to vector<64x4xf32>
    %cst_171 = arith.constant dense<0.000000e+00> : vector<64x64xf32>
    %143 = tpu.matmul %141, %142, %cst_171 {dimension_numbers = #tpu.dot_dimension_numbers<[1], [1], [0], [0], [0, 0, 1, 0], [], []>} : vector<64x4xf32>, vector<64x4xf32>, vector<64x64xf32> -> vector<64x64xf32>
    %cst_172 = arith.constant 5.000000e-01 : f32
    %144 = vector.broadcast %cst_172 : f32 to vector<64x64xf32>
    %145 = arith.mulf %143, %144 : vector<64x64xf32>
    %cst_173 = arith.constant dense<0xFF800000> : vector<64xf32>
    %146 = vector.multi_reduction <maximumf>, %145, %cst_173 [1] : vector<64x64xf32> to vector<64xf32>
    %147 = vector.shape_cast %146 : vector<64xf32> to vector<64x1xf32>
    %148 = vector.broadcast %147 : vector<64x1xf32> to vector<64x64xf32>
    %149 = arith.subf %145, %148 : vector<64x64xf32>
    %150 = math.exp %149 : vector<64x64xf32>
    %cst_174 = arith.constant dense<0.000000e+00> : vector<64xf32>
    %151 = vector.multi_reduction <add>, %150, %cst_174 [1] : vector<64x64xf32> to vector<64xf32>
    %152 = vector.shape_cast %151 : vector<64xf32> to vector<64x1xf32>
    %153 = tpu.reciprocal %152 {approx = true} : vector<64x1xf32> -> vector<64x1xf32>
    %154 = vector.broadcast %153 : vector<64x1xf32> to vector<64x64xf32>
    %155 = arith.mulf %150, %154 : vector<64x64xf32>
    %cst_175 = arith.constant dense<0.000000e+00> : vector<64x4xf32>
    %156 = tpu.matmul %155, %140, %cst_175 {dimension_numbers = #tpu.dot_dimension_numbers<[1], [0], [0], [1], [0, 0, 1, 1], [], []>} : vector<64x64xf32>, vector<64x4xf32>, vector<64x4xf32> -> vector<64x4xf32>
    %157 = vector.extract_strided_slice %13 {offsets = [2, 0, 0], sizes = [1, 4, 16], strides = [1, 1, 1]} : vector<4x4x16xf32> to vector<1x4x16xf32>
    %158 = vector.shape_cast %157 : vector<1x4x16xf32> to vector<4x16xf32>
    %cst_176 = arith.constant dense<0.000000e+00> : vector<64x16xf32>
    %159 = tpu.matmul %156, %158, %cst_176 {dimension_numbers = #tpu.dot_dimension_numbers<[1], [0], [0], [1], [0, 0, 1, 1], [], []>} : vector<64x4xf32>, vector<4x16xf32>, vector<64x16xf32> -> vector<64x16xf32>
    %160 = arith.addf %139, %159 : vector<64x16xf32>
    %161 = vector.extract_strided_slice %96 {offsets = [0, 44], sizes = [64, 4], strides = [1, 1]} : vector<64x48xf32> to vector<64x4xf32>
    %162 = vector.extract_strided_slice %96 {offsets = [0, 12], sizes = [64, 4], strides = [1, 1]} : vector<64x48xf32> to vector<64x4xf32>
    %163 = vector.extract_strided_slice %96 {offsets = [0, 28], sizes = [64, 4], strides = [1, 1]} : vector<64x48xf32> to vector<64x4xf32>
    %cst_177 = arith.constant dense<0.000000e+00> : vector<64x64xf32>
    %164 = tpu.matmul %162, %163, %cst_177 {dimension_numbers = #tpu.dot_dimension_numbers<[1], [1], [0], [0], [0, 0, 1, 0], [], []>} : vector<64x4xf32>, vector<64x4xf32>, vector<64x64xf32> -> vector<64x64xf32>
    %cst_178 = arith.constant 5.000000e-01 : f32
    %165 = vector.broadcast %cst_178 : f32 to vector<64x64xf32>
    %166 = arith.mulf %164, %165 : vector<64x64xf32>
    %cst_179 = arith.constant dense<0xFF800000> : vector<64xf32>
    %167 = vector.multi_reduction <maximumf>, %166, %cst_179 [1] : vector<64x64xf32> to vector<64xf32>
    %168 = vector.shape_cast %167 : vector<64xf32> to vector<64x1xf32>
    %169 = vector.broadcast %168 : vector<64x1xf32> to vector<64x64xf32>
    %170 = arith.subf %166, %169 : vector<64x64xf32>
    %171 = math.exp %170 : vector<64x64xf32>
    %cst_180 = arith.constant dense<0.000000e+00> : vector<64xf32>
    %172 = vector.multi_reduction <add>, %171, %cst_180 [1] : vector<64x64xf32> to vector<64xf32>
    %173 = vector.shape_cast %172 : vector<64xf32> to vector<64x1xf32>
    %174 = tpu.reciprocal %173 {approx = true} : vector<64x1xf32> -> vector<64x1xf32>
    %175 = vector.broadcast %174 : vector<64x1xf32> to vector<64x64xf32>
    %176 = arith.mulf %171, %175 : vector<64x64xf32>
    %cst_181 = arith.constant dense<0.000000e+00> : vector<64x4xf32>
    %177 = tpu.matmul %176, %161, %cst_181 {dimension_numbers = #tpu.dot_dimension_numbers<[1], [0], [0], [1], [0, 0, 1, 1], [], []>} : vector<64x64xf32>, vector<64x4xf32>, vector<64x4xf32> -> vector<64x4xf32>
    %178 = vector.extract_strided_slice %13 {offsets = [3, 0, 0], sizes = [1, 4, 16], strides = [1, 1, 1]} : vector<4x4x16xf32> to vector<1x4x16xf32>
    %179 = vector.shape_cast %178 : vector<1x4x16xf32> to vector<4x16xf32>
    %cst_182 = arith.constant dense<0.000000e+00> : vector<64x16xf32>
    %180 = tpu.matmul %177, %179, %cst_182 {dimension_numbers = #tpu.dot_dimension_numbers<[1], [0], [0], [1], [0, 0, 1, 1], [], []>} : vector<64x4xf32>, vector<4x16xf32>, vector<64x16xf32> -> vector<64x16xf32>
    %181 = arith.addf %160, %180 : vector<64x16xf32>
    %182 = arith.addf %71, %181 : vector<64x16xf32>
    %183 = vector.broadcast %12 : vector<1x16xf32> to vector<64x16xf32>
    %184 = arith.addf %182, %183 : vector<64x16xf32>
    %cst_183 = arith.constant dense<0.000000e+00> : vector<64xf32>
    %185 = vector.multi_reduction <add>, %184, %cst_183 [1] : vector<64x16xf32> to vector<64xf32>
    %186 = vector.shape_cast %185 : vector<64xf32> to vector<64x1xf32>
    %cst_184 = arith.constant 1.600000e+01 : f32
    %187 = vector.broadcast %cst_184 : f32 to vector<64x1xf32>
    %188 = arith.divf %186, %187 : vector<64x1xf32>
    %189 = vector.broadcast %188 : vector<64x1xf32> to vector<64x16xf32>
    %190 = arith.subf %184, %189 : vector<64x16xf32>
    %191 = arith.mulf %190, %190 : vector<64x16xf32>
    %cst_185 = arith.constant dense<0.000000e+00> : vector<64xf32>
    %192 = vector.multi_reduction <add>, %191, %cst_185 [1] : vector<64x16xf32> to vector<64xf32>
    %193 = vector.shape_cast %192 : vector<64xf32> to vector<64x1xf32>
    %cst_186 = arith.constant 1.600000e+01 : f32
    %194 = vector.broadcast %cst_186 : f32 to vector<64x1xf32>
    %195 = arith.divf %193, %194 : vector<64x1xf32>
    %196 = vector.broadcast %188 : vector<64x1xf32> to vector<64x16xf32>
    %197 = arith.subf %184, %196 : vector<64x16xf32>
    %cst_187 = arith.constant 9.99999974E-6 : f32
    %198 = vector.broadcast %cst_187 : f32 to vector<64x1xf32>
    %199 = arith.addf %195, %198 : vector<64x1xf32>
    %200 = math.rsqrt %199 : vector<64x1xf32>
    %201 = vector.broadcast %200 : vector<64x1xf32> to vector<64x16xf32>
    %202 = arith.mulf %197, %201 : vector<64x16xf32>
    %203 = vector.broadcast %11 : vector<1x16xf32> to vector<64x16xf32>
    %204 = arith.mulf %202, %203 : vector<64x16xf32>
    %205 = vector.broadcast %10 : vector<1x16xf32> to vector<64x16xf32>
    %206 = arith.addf %204, %205 : vector<64x16xf32>
    %cst_188 = arith.constant dense<0.000000e+00> : vector<64x64xf32>
    %207 = tpu.matmul %206, %5, %cst_188 {dimension_numbers = #tpu.dot_dimension_numbers<[1], [0], [0], [1], [0, 0, 1, 1], [], []>} : vector<64x16xf32>, vector<16x64xf32>, vector<64x64xf32> -> vector<64x64xf32>
    %208 = vector.broadcast %4 : vector<1x64xf32> to vector<64x64xf32>
    %209 = arith.addf %207, %208 : vector<64x64xf32>
    %210 = arith.mulf %209, %209 : vector<64x64xf32>
    %211 = arith.mulf %209, %210 : vector<64x64xf32>
    %cst_189 = arith.constant 4.471500e-02 : f32
    %212 = vector.broadcast %cst_189 : f32 to vector<64x64xf32>
    %213 = arith.mulf %212, %211 : vector<64x64xf32>
    %214 = arith.addf %209, %213 : vector<64x64xf32>
    %cst_190 = arith.constant 0.797884583 : f32
    %215 = vector.broadcast %cst_190 : f32 to vector<64x64xf32>
    %216 = arith.mulf %215, %214 : vector<64x64xf32>
    %217 = math.tanh %216 : vector<64x64xf32>
    %cst_191 = arith.constant 1.000000e+00 : f32
    %218 = vector.broadcast %cst_191 : f32 to vector<64x64xf32>
    %219 = arith.addf %218, %217 : vector<64x64xf32>
    %cst_192 = arith.constant 5.000000e-01 : f32
    %220 = vector.broadcast %cst_192 : f32 to vector<64x64xf32>
    %221 = arith.mulf %220, %219 : vector<64x64xf32>
    %222 = arith.mulf %209, %221 : vector<64x64xf32>
    %cst_193 = arith.constant dense<0.000000e+00> : vector<64x16xf32>
    %223 = tpu.matmul %222, %7, %cst_193 {dimension_numbers = #tpu.dot_dimension_numbers<[1], [0], [0], [1], [0, 0, 1, 1], [], []>} : vector<64x64xf32>, vector<64x16xf32>, vector<64x16xf32> -> vector<64x16xf32>
    %224 = vector.broadcast %6 : vector<1x16xf32> to vector<64x16xf32>
    %225 = arith.addf %223, %224 : vector<64x16xf32>
    %226 = arith.addf %184, %225 : vector<64x16xf32>
    %227 = vector.extract_strided_slice %19 {offsets = [0, 0, 0], sizes = [1, 16, 64], strides = [1, 1, 1]} : vector<4x16x64xf32> to vector<1x16x64xf32>
    %228 = vector.shape_cast %227 : vector<1x16x64xf32> to vector<16x64xf32>
    %cst_194 = arith.constant dense<0.000000e+00> : vector<16x16xf32>
    %229 = tpu.matmul %228, %226, %cst_194 {dimension_numbers = #tpu.dot_dimension_numbers<[1], [0], [0], [1], [0, 0, 1, 1], [], []>} : vector<16x64xf32>, vector<64x16xf32>, vector<16x16xf32> -> vector<16x16xf32>
    %230 = vector.extract_strided_slice %19 {offsets = [1, 0, 0], sizes = [1, 16, 64], strides = [1, 1, 1]} : vector<4x16x64xf32> to vector<1x16x64xf32>
    %231 = vector.shape_cast %230 : vector<1x16x64xf32> to vector<16x64xf32>
    %cst_195 = arith.constant dense<0.000000e+00> : vector<16x16xf32>
    %232 = tpu.matmul %231, %226, %cst_195 {dimension_numbers = #tpu.dot_dimension_numbers<[1], [0], [0], [1], [0, 0, 1, 1], [], []>} : vector<16x64xf32>, vector<64x16xf32>, vector<16x16xf32> -> vector<16x16xf32>
    %233 = vector.extract_strided_slice %19 {offsets = [2, 0, 0], sizes = [1, 16, 64], strides = [1, 1, 1]} : vector<4x16x64xf32> to vector<1x16x64xf32>
    %234 = vector.shape_cast %233 : vector<1x16x64xf32> to vector<16x64xf32>
    %cst_196 = arith.constant dense<0.000000e+00> : vector<16x16xf32>
    %235 = tpu.matmul %234, %226, %cst_196 {dimension_numbers = #tpu.dot_dimension_numbers<[1], [0], [0], [1], [0, 0, 1, 1], [], []>} : vector<16x64xf32>, vector<64x16xf32>, vector<16x16xf32> -> vector<16x16xf32>
    %236 = vector.extract_strided_slice %19 {offsets = [3, 0, 0], sizes = [1, 16, 64], strides = [1, 1, 1]} : vector<4x16x64xf32> to vector<1x16x64xf32>
    %237 = vector.shape_cast %236 : vector<1x16x64xf32> to vector<16x64xf32>
    %cst_197 = arith.constant dense<0.000000e+00> : vector<16x16xf32>
    %238 = tpu.matmul %237, %226, %cst_197 {dimension_numbers = #tpu.dot_dimension_numbers<[1], [0], [0], [1], [0, 0, 1, 1], [], []>} : vector<16x64xf32>, vector<64x16xf32>, vector<16x16xf32> -> vector<16x16xf32>
    %239 = arith.addf %229, %232 : vector<16x16xf32>
    %240 = arith.addf %239, %235 : vector<16x16xf32>
    %241 = arith.addf %240, %238 : vector<16x16xf32>
    %cst_198 = arith.constant dense<0.000000e+00> : vector<16xf32>
    %242 = vector.multi_reduction <add>, %241, %cst_198 [1] : vector<16x16xf32> to vector<16xf32>
    %243 = vector.shape_cast %242 : vector<16xf32> to vector<16x1xf32>
    %cst_199 = arith.constant 1.600000e+01 : f32
    %244 = vector.broadcast %cst_199 : f32 to vector<16x1xf32>
    %245 = arith.divf %243, %244 : vector<16x1xf32>
    %cst_200 = arith.constant 2.500000e-01 : f32
    %246 = vector.broadcast %cst_200 : f32 to vector<16x1xf32>
    %247 = arith.mulf %245, %246 : vector<16x1xf32>
    %248 = arith.mulf %229, %229 : vector<16x16xf32>
    %249 = arith.mulf %232, %232 : vector<16x16xf32>
    %250 = arith.addf %248, %249 : vector<16x16xf32>
    %251 = arith.mulf %235, %235 : vector<16x16xf32>
    %252 = arith.addf %250, %251 : vector<16x16xf32>
    %253 = arith.mulf %238, %238 : vector<16x16xf32>
    %254 = arith.addf %252, %253 : vector<16x16xf32>
    %cst_201 = arith.constant dense<0.000000e+00> : vector<16xf32>
    %255 = vector.multi_reduction <add>, %254, %cst_201 [1] : vector<16x16xf32> to vector<16xf32>
    %256 = vector.shape_cast %255 : vector<16xf32> to vector<16x1xf32>
    %cst_202 = arith.constant 1.600000e+01 : f32
    %257 = vector.broadcast %cst_202 : f32 to vector<16x1xf32>
    %258 = arith.divf %256, %257 : vector<16x1xf32>
    %cst_203 = arith.constant 2.500000e-01 : f32
    %259 = vector.broadcast %cst_203 : f32 to vector<16x1xf32>
    %260 = arith.mulf %258, %259 : vector<16x1xf32>
    %261 = arith.mulf %247, %247 : vector<16x1xf32>
    %262 = arith.subf %260, %261 : vector<16x1xf32>
    %cst_204 = arith.constant 9.99999974E-6 : f32
    %263 = vector.broadcast %cst_204 : f32 to vector<16x1xf32>
    %264 = arith.addf %262, %263 : vector<16x1xf32>
    %265 = math.rsqrt %264 : vector<16x1xf32>
    %266 = vector.broadcast %247 : vector<16x1xf32> to vector<16x16xf32>
    %267 = arith.subf %229, %266 : vector<16x16xf32>
    %268 = vector.broadcast %265 : vector<16x1xf32> to vector<16x16xf32>
    %269 = arith.mulf %267, %268 : vector<16x16xf32>
    %270 = vector.extract_strided_slice %18 {offsets = [0, 0, 0], sizes = [1, 1, 16], strides = [1, 1, 1]} : vector<4x1x16xf32> to vector<1x1x16xf32>
    %271 = vector.shape_cast %270 : vector<1x1x16xf32> to vector<1x16xf32>
    %272 = vector.broadcast %271 : vector<1x16xf32> to vector<16x16xf32>
    %273 = arith.mulf %269, %272 : vector<16x16xf32>
    %274 = vector.extract_strided_slice %17 {offsets = [0, 0, 0], sizes = [1, 1, 16], strides = [1, 1, 1]} : vector<4x1x16xf32> to vector<1x1x16xf32>
    %275 = vector.shape_cast %274 : vector<1x1x16xf32> to vector<1x16xf32>
    %276 = vector.broadcast %275 : vector<1x16xf32> to vector<16x16xf32>
    %277 = arith.addf %273, %276 : vector<16x16xf32>
    %278 = vector.extract_strided_slice %20 {offsets = [0, 0, 0], sizes = [1, 16, 32], strides = [1, 1, 1]} : vector<4x16x32xf32> to vector<1x16x32xf32>
    %279 = vector.shape_cast %278 : vector<1x16x32xf32> to vector<16x32xf32>
    %cst_205 = arith.constant dense<0.000000e+00> : vector<16x32xf32>
    %280 = tpu.matmul %277, %279, %cst_205 {dimension_numbers = #tpu.dot_dimension_numbers<[1], [0], [0], [1], [0, 0, 1, 1], [], []>} : vector<16x16xf32>, vector<16x32xf32>, vector<16x32xf32> -> vector<16x32xf32>
    %281 = vector.broadcast %16 : vector<1x32xf32> to vector<16x32xf32>
    %282 = arith.addf %281, %280 : vector<16x32xf32>
    %283 = vector.broadcast %247 : vector<16x1xf32> to vector<16x16xf32>
    %284 = arith.subf %232, %283 : vector<16x16xf32>
    %285 = vector.broadcast %265 : vector<16x1xf32> to vector<16x16xf32>
    %286 = arith.mulf %284, %285 : vector<16x16xf32>
    %287 = vector.extract_strided_slice %18 {offsets = [1, 0, 0], sizes = [1, 1, 16], strides = [1, 1, 1]} : vector<4x1x16xf32> to vector<1x1x16xf32>
    %288 = vector.shape_cast %287 : vector<1x1x16xf32> to vector<1x16xf32>
    %289 = vector.broadcast %288 : vector<1x16xf32> to vector<16x16xf32>
    %290 = arith.mulf %286, %289 : vector<16x16xf32>
    %291 = vector.extract_strided_slice %17 {offsets = [1, 0, 0], sizes = [1, 1, 16], strides = [1, 1, 1]} : vector<4x1x16xf32> to vector<1x1x16xf32>
    %292 = vector.shape_cast %291 : vector<1x1x16xf32> to vector<1x16xf32>
    %293 = vector.broadcast %292 : vector<1x16xf32> to vector<16x16xf32>
    %294 = arith.addf %290, %293 : vector<16x16xf32>
    %295 = vector.extract_strided_slice %20 {offsets = [1, 0, 0], sizes = [1, 16, 32], strides = [1, 1, 1]} : vector<4x16x32xf32> to vector<1x16x32xf32>
    %296 = vector.shape_cast %295 : vector<1x16x32xf32> to vector<16x32xf32>
    %cst_206 = arith.constant dense<0.000000e+00> : vector<16x32xf32>
    %297 = tpu.matmul %294, %296, %cst_206 {dimension_numbers = #tpu.dot_dimension_numbers<[1], [0], [0], [1], [0, 0, 1, 1], [], []>} : vector<16x16xf32>, vector<16x32xf32>, vector<16x32xf32> -> vector<16x32xf32>
    %298 = arith.addf %282, %297 : vector<16x32xf32>
    %299 = vector.broadcast %247 : vector<16x1xf32> to vector<16x16xf32>
    %300 = arith.subf %235, %299 : vector<16x16xf32>
    %301 = vector.broadcast %265 : vector<16x1xf32> to vector<16x16xf32>
    %302 = arith.mulf %300, %301 : vector<16x16xf32>
    %303 = vector.extract_strided_slice %18 {offsets = [2, 0, 0], sizes = [1, 1, 16], strides = [1, 1, 1]} : vector<4x1x16xf32> to vector<1x1x16xf32>
    %304 = vector.shape_cast %303 : vector<1x1x16xf32> to vector<1x16xf32>
    %305 = vector.broadcast %304 : vector<1x16xf32> to vector<16x16xf32>
    %306 = arith.mulf %302, %305 : vector<16x16xf32>
    %307 = vector.extract_strided_slice %17 {offsets = [2, 0, 0], sizes = [1, 1, 16], strides = [1, 1, 1]} : vector<4x1x16xf32> to vector<1x1x16xf32>
    %308 = vector.shape_cast %307 : vector<1x1x16xf32> to vector<1x16xf32>
    %309 = vector.broadcast %308 : vector<1x16xf32> to vector<16x16xf32>
    %310 = arith.addf %306, %309 : vector<16x16xf32>
    %311 = vector.extract_strided_slice %20 {offsets = [2, 0, 0], sizes = [1, 16, 32], strides = [1, 1, 1]} : vector<4x16x32xf32> to vector<1x16x32xf32>
    %312 = vector.shape_cast %311 : vector<1x16x32xf32> to vector<16x32xf32>
    %cst_207 = arith.constant dense<0.000000e+00> : vector<16x32xf32>
    %313 = tpu.matmul %310, %312, %cst_207 {dimension_numbers = #tpu.dot_dimension_numbers<[1], [0], [0], [1], [0, 0, 1, 1], [], []>} : vector<16x16xf32>, vector<16x32xf32>, vector<16x32xf32> -> vector<16x32xf32>
    %314 = arith.addf %298, %313 : vector<16x32xf32>
    %315 = vector.broadcast %247 : vector<16x1xf32> to vector<16x16xf32>
    %316 = arith.subf %238, %315 : vector<16x16xf32>
    %317 = vector.broadcast %265 : vector<16x1xf32> to vector<16x16xf32>
    %318 = arith.mulf %316, %317 : vector<16x16xf32>
    %319 = vector.extract_strided_slice %18 {offsets = [3, 0, 0], sizes = [1, 1, 16], strides = [1, 1, 1]} : vector<4x1x16xf32> to vector<1x1x16xf32>
    %320 = vector.shape_cast %319 : vector<1x1x16xf32> to vector<1x16xf32>
    %321 = vector.broadcast %320 : vector<1x16xf32> to vector<16x16xf32>
    %322 = arith.mulf %318, %321 : vector<16x16xf32>
    %323 = vector.extract_strided_slice %17 {offsets = [3, 0, 0], sizes = [1, 1, 16], strides = [1, 1, 1]} : vector<4x1x16xf32> to vector<1x1x16xf32>
    %324 = vector.shape_cast %323 : vector<1x1x16xf32> to vector<1x16xf32>
    %325 = vector.broadcast %324 : vector<1x16xf32> to vector<16x16xf32>
    %326 = arith.addf %322, %325 : vector<16x16xf32>
    %327 = vector.extract_strided_slice %20 {offsets = [3, 0, 0], sizes = [1, 16, 32], strides = [1, 1, 1]} : vector<4x16x32xf32> to vector<1x16x32xf32>
    %328 = vector.shape_cast %327 : vector<1x16x32xf32> to vector<16x32xf32>
    %cst_208 = arith.constant dense<0.000000e+00> : vector<16x32xf32>
    %329 = tpu.matmul %326, %328, %cst_208 {dimension_numbers = #tpu.dot_dimension_numbers<[1], [0], [0], [1], [0, 0, 1, 1], [], []>} : vector<16x16xf32>, vector<16x32xf32>, vector<16x32xf32> -> vector<16x32xf32>
    %330 = arith.addf %314, %329 : vector<16x32xf32>
    %cst_209 = arith.constant dense<0.000000e+00> : vector<16xf32>
    %331 = vector.multi_reduction <add>, %330, %cst_209 [1] : vector<16x32xf32> to vector<16xf32>
    %332 = vector.shape_cast %331 : vector<16xf32> to vector<16x1xf32>
    %cst_210 = arith.constant 3.200000e+01 : f32
    %333 = vector.broadcast %cst_210 : f32 to vector<16x1xf32>
    %334 = arith.divf %332, %333 : vector<16x1xf32>
    %335 = vector.broadcast %334 : vector<16x1xf32> to vector<16x32xf32>
    %336 = arith.subf %330, %335 : vector<16x32xf32>
    %337 = arith.mulf %336, %336 : vector<16x32xf32>
    %cst_211 = arith.constant dense<0.000000e+00> : vector<16xf32>
    %338 = vector.multi_reduction <add>, %337, %cst_211 [1] : vector<16x32xf32> to vector<16xf32>
    %339 = vector.shape_cast %338 : vector<16xf32> to vector<16x1xf32>
    %cst_212 = arith.constant 3.200000e+01 : f32
    %340 = vector.broadcast %cst_212 : f32 to vector<16x1xf32>
    %341 = arith.divf %339, %340 : vector<16x1xf32>
    %342 = vector.broadcast %334 : vector<16x1xf32> to vector<16x32xf32>
    %343 = arith.subf %330, %342 : vector<16x32xf32>
    %cst_213 = arith.constant 9.99999974E-6 : f32
    %344 = vector.broadcast %cst_213 : f32 to vector<16x1xf32>
    %345 = arith.addf %341, %344 : vector<16x1xf32>
    %346 = math.rsqrt %345 : vector<16x1xf32>
    %347 = vector.broadcast %346 : vector<16x1xf32> to vector<16x32xf32>
    %348 = arith.mulf %343, %347 : vector<16x32xf32>
    %349 = vector.broadcast %26 : vector<1x32xf32> to vector<16x32xf32>
    %350 = arith.mulf %348, %349 : vector<16x32xf32>
    %351 = vector.broadcast %25 : vector<1x32xf32> to vector<16x32xf32>
    %352 = arith.addf %350, %351 : vector<16x32xf32>
    %cst_214 = arith.constant dense<0.000000e+00> : vector<16x96xf32>
    %353 = tpu.matmul %352, %32, %cst_214 {dimension_numbers = #tpu.dot_dimension_numbers<[1], [0], [0], [1], [0, 0, 1, 1], [], []>} : vector<16x32xf32>, vector<32x96xf32>, vector<16x96xf32> -> vector<16x96xf32>
    %354 = vector.broadcast %31 : vector<1x96xf32> to vector<16x96xf32>
    %355 = arith.addf %353, %354 : vector<16x96xf32>
    %cst_215 = arith.constant 0.000000e+00 : f32
    %356 = vector.broadcast %cst_215 : f32 to vector<16x32xf32>
    %357 = vector.extract_strided_slice %355 {offsets = [0, 64], sizes = [16, 8], strides = [1, 1]} : vector<16x96xf32> to vector<16x8xf32>
    %358 = vector.extract_strided_slice %355 {offsets = [0, 0], sizes = [16, 8], strides = [1, 1]} : vector<16x96xf32> to vector<16x8xf32>
    %359 = vector.extract_strided_slice %355 {offsets = [0, 32], sizes = [16, 8], strides = [1, 1]} : vector<16x96xf32> to vector<16x8xf32>
    %cst_216 = arith.constant dense<0.000000e+00> : vector<16x16xf32>
    %360 = tpu.matmul %358, %359, %cst_216 {dimension_numbers = #tpu.dot_dimension_numbers<[1], [1], [0], [0], [0, 0, 1, 0], [], []>} : vector<16x8xf32>, vector<16x8xf32>, vector<16x16xf32> -> vector<16x16xf32>
    %cst_217 = arith.constant 0.353553385 : f32
    %361 = vector.broadcast %cst_217 : f32 to vector<16x16xf32>
    %362 = arith.mulf %360, %361 : vector<16x16xf32>
    %cst_218 = arith.constant dense<0xFF800000> : vector<16xf32>
    %363 = vector.multi_reduction <maximumf>, %362, %cst_218 [1] : vector<16x16xf32> to vector<16xf32>
    %364 = vector.shape_cast %363 : vector<16xf32> to vector<16x1xf32>
    %365 = vector.broadcast %364 : vector<16x1xf32> to vector<16x16xf32>
    %366 = arith.subf %362, %365 : vector<16x16xf32>
    %367 = math.exp %366 : vector<16x16xf32>
    %cst_219 = arith.constant dense<0.000000e+00> : vector<16xf32>
    %368 = vector.multi_reduction <add>, %367, %cst_219 [1] : vector<16x16xf32> to vector<16xf32>
    %369 = vector.shape_cast %368 : vector<16xf32> to vector<16x1xf32>
    %370 = tpu.reciprocal %369 {approx = true} : vector<16x1xf32> -> vector<16x1xf32>
    %371 = vector.broadcast %370 : vector<16x1xf32> to vector<16x16xf32>
    %372 = arith.mulf %367, %371 : vector<16x16xf32>
    %cst_220 = arith.constant dense<0.000000e+00> : vector<16x8xf32>
    %373 = tpu.matmul %372, %357, %cst_220 {dimension_numbers = #tpu.dot_dimension_numbers<[1], [0], [0], [1], [0, 0, 1, 1], [], []>} : vector<16x16xf32>, vector<16x8xf32>, vector<16x8xf32> -> vector<16x8xf32>
    %374 = vector.extract_strided_slice %30 {offsets = [0, 0, 0], sizes = [1, 8, 32], strides = [1, 1, 1]} : vector<4x8x32xf32> to vector<1x8x32xf32>
    %375 = vector.shape_cast %374 : vector<1x8x32xf32> to vector<8x32xf32>
    %cst_221 = arith.constant dense<0.000000e+00> : vector<16x32xf32>
    %376 = tpu.matmul %373, %375, %cst_221 {dimension_numbers = #tpu.dot_dimension_numbers<[1], [0], [0], [1], [0, 0, 1, 1], [], []>} : vector<16x8xf32>, vector<8x32xf32>, vector<16x32xf32> -> vector<16x32xf32>
    %377 = arith.addf %356, %376 : vector<16x32xf32>
    %378 = vector.extract_strided_slice %355 {offsets = [0, 72], sizes = [16, 8], strides = [1, 1]} : vector<16x96xf32> to vector<16x8xf32>
    %379 = vector.extract_strided_slice %355 {offsets = [0, 8], sizes = [16, 8], strides = [1, 1]} : vector<16x96xf32> to vector<16x8xf32>
    %380 = vector.extract_strided_slice %355 {offsets = [0, 40], sizes = [16, 8], strides = [1, 1]} : vector<16x96xf32> to vector<16x8xf32>
    %cst_222 = arith.constant dense<0.000000e+00> : vector<16x16xf32>
    %381 = tpu.matmul %379, %380, %cst_222 {dimension_numbers = #tpu.dot_dimension_numbers<[1], [1], [0], [0], [0, 0, 1, 0], [], []>} : vector<16x8xf32>, vector<16x8xf32>, vector<16x16xf32> -> vector<16x16xf32>
    %cst_223 = arith.constant 0.353553385 : f32
    %382 = vector.broadcast %cst_223 : f32 to vector<16x16xf32>
    %383 = arith.mulf %381, %382 : vector<16x16xf32>
    %cst_224 = arith.constant dense<0xFF800000> : vector<16xf32>
    %384 = vector.multi_reduction <maximumf>, %383, %cst_224 [1] : vector<16x16xf32> to vector<16xf32>
    %385 = vector.shape_cast %384 : vector<16xf32> to vector<16x1xf32>
    %386 = vector.broadcast %385 : vector<16x1xf32> to vector<16x16xf32>
    %387 = arith.subf %383, %386 : vector<16x16xf32>
    %388 = math.exp %387 : vector<16x16xf32>
    %cst_225 = arith.constant dense<0.000000e+00> : vector<16xf32>
    %389 = vector.multi_reduction <add>, %388, %cst_225 [1] : vector<16x16xf32> to vector<16xf32>
    %390 = vector.shape_cast %389 : vector<16xf32> to vector<16x1xf32>
    %391 = tpu.reciprocal %390 {approx = true} : vector<16x1xf32> -> vector<16x1xf32>
    %392 = vector.broadcast %391 : vector<16x1xf32> to vector<16x16xf32>
    %393 = arith.mulf %388, %392 : vector<16x16xf32>
    %cst_226 = arith.constant dense<0.000000e+00> : vector<16x8xf32>
    %394 = tpu.matmul %393, %378, %cst_226 {dimension_numbers = #tpu.dot_dimension_numbers<[1], [0], [0], [1], [0, 0, 1, 1], [], []>} : vector<16x16xf32>, vector<16x8xf32>, vector<16x8xf32> -> vector<16x8xf32>
    %395 = vector.extract_strided_slice %30 {offsets = [1, 0, 0], sizes = [1, 8, 32], strides = [1, 1, 1]} : vector<4x8x32xf32> to vector<1x8x32xf32>
    %396 = vector.shape_cast %395 : vector<1x8x32xf32> to vector<8x32xf32>
    %cst_227 = arith.constant dense<0.000000e+00> : vector<16x32xf32>
    %397 = tpu.matmul %394, %396, %cst_227 {dimension_numbers = #tpu.dot_dimension_numbers<[1], [0], [0], [1], [0, 0, 1, 1], [], []>} : vector<16x8xf32>, vector<8x32xf32>, vector<16x32xf32> -> vector<16x32xf32>
    %398 = arith.addf %377, %397 : vector<16x32xf32>
    %399 = vector.extract_strided_slice %355 {offsets = [0, 80], sizes = [16, 8], strides = [1, 1]} : vector<16x96xf32> to vector<16x8xf32>
    %400 = vector.extract_strided_slice %355 {offsets = [0, 16], sizes = [16, 8], strides = [1, 1]} : vector<16x96xf32> to vector<16x8xf32>
    %401 = vector.extract_strided_slice %355 {offsets = [0, 48], sizes = [16, 8], strides = [1, 1]} : vector<16x96xf32> to vector<16x8xf32>
    %cst_228 = arith.constant dense<0.000000e+00> : vector<16x16xf32>
    %402 = tpu.matmul %400, %401, %cst_228 {dimension_numbers = #tpu.dot_dimension_numbers<[1], [1], [0], [0], [0, 0, 1, 0], [], []>} : vector<16x8xf32>, vector<16x8xf32>, vector<16x16xf32> -> vector<16x16xf32>
    %cst_229 = arith.constant 0.353553385 : f32
    %403 = vector.broadcast %cst_229 : f32 to vector<16x16xf32>
    %404 = arith.mulf %402, %403 : vector<16x16xf32>
    %cst_230 = arith.constant dense<0xFF800000> : vector<16xf32>
    %405 = vector.multi_reduction <maximumf>, %404, %cst_230 [1] : vector<16x16xf32> to vector<16xf32>
    %406 = vector.shape_cast %405 : vector<16xf32> to vector<16x1xf32>
    %407 = vector.broadcast %406 : vector<16x1xf32> to vector<16x16xf32>
    %408 = arith.subf %404, %407 : vector<16x16xf32>
    %409 = math.exp %408 : vector<16x16xf32>
    %cst_231 = arith.constant dense<0.000000e+00> : vector<16xf32>
    %410 = vector.multi_reduction <add>, %409, %cst_231 [1] : vector<16x16xf32> to vector<16xf32>
    %411 = vector.shape_cast %410 : vector<16xf32> to vector<16x1xf32>
    %412 = tpu.reciprocal %411 {approx = true} : vector<16x1xf32> -> vector<16x1xf32>
    %413 = vector.broadcast %412 : vector<16x1xf32> to vector<16x16xf32>
    %414 = arith.mulf %409, %413 : vector<16x16xf32>
    %cst_232 = arith.constant dense<0.000000e+00> : vector<16x8xf32>
    %415 = tpu.matmul %414, %399, %cst_232 {dimension_numbers = #tpu.dot_dimension_numbers<[1], [0], [0], [1], [0, 0, 1, 1], [], []>} : vector<16x16xf32>, vector<16x8xf32>, vector<16x8xf32> -> vector<16x8xf32>
    %416 = vector.extract_strided_slice %30 {offsets = [2, 0, 0], sizes = [1, 8, 32], strides = [1, 1, 1]} : vector<4x8x32xf32> to vector<1x8x32xf32>
    %417 = vector.shape_cast %416 : vector<1x8x32xf32> to vector<8x32xf32>
    %cst_233 = arith.constant dense<0.000000e+00> : vector<16x32xf32>
    %418 = tpu.matmul %415, %417, %cst_233 {dimension_numbers = #tpu.dot_dimension_numbers<[1], [0], [0], [1], [0, 0, 1, 1], [], []>} : vector<16x8xf32>, vector<8x32xf32>, vector<16x32xf32> -> vector<16x32xf32>
    %419 = arith.addf %398, %418 : vector<16x32xf32>
    %420 = vector.extract_strided_slice %355 {offsets = [0, 88], sizes = [16, 8], strides = [1, 1]} : vector<16x96xf32> to vector<16x8xf32>
    %421 = vector.extract_strided_slice %355 {offsets = [0, 24], sizes = [16, 8], strides = [1, 1]} : vector<16x96xf32> to vector<16x8xf32>
    %422 = vector.extract_strided_slice %355 {offsets = [0, 56], sizes = [16, 8], strides = [1, 1]} : vector<16x96xf32> to vector<16x8xf32>
    %cst_234 = arith.constant dense<0.000000e+00> : vector<16x16xf32>
    %423 = tpu.matmul %421, %422, %cst_234 {dimension_numbers = #tpu.dot_dimension_numbers<[1], [1], [0], [0], [0, 0, 1, 0], [], []>} : vector<16x8xf32>, vector<16x8xf32>, vector<16x16xf32> -> vector<16x16xf32>
    %cst_235 = arith.constant 0.353553385 : f32
    %424 = vector.broadcast %cst_235 : f32 to vector<16x16xf32>
    %425 = arith.mulf %423, %424 : vector<16x16xf32>
    %cst_236 = arith.constant dense<0xFF800000> : vector<16xf32>
    %426 = vector.multi_reduction <maximumf>, %425, %cst_236 [1] : vector<16x16xf32> to vector<16xf32>
    %427 = vector.shape_cast %426 : vector<16xf32> to vector<16x1xf32>
    %428 = vector.broadcast %427 : vector<16x1xf32> to vector<16x16xf32>
    %429 = arith.subf %425, %428 : vector<16x16xf32>
    %430 = math.exp %429 : vector<16x16xf32>
    %cst_237 = arith.constant dense<0.000000e+00> : vector<16xf32>
    %431 = vector.multi_reduction <add>, %430, %cst_237 [1] : vector<16x16xf32> to vector<16xf32>
    %432 = vector.shape_cast %431 : vector<16xf32> to vector<16x1xf32>
    %433 = tpu.reciprocal %432 {approx = true} : vector<16x1xf32> -> vector<16x1xf32>
    %434 = vector.broadcast %433 : vector<16x1xf32> to vector<16x16xf32>
    %435 = arith.mulf %430, %434 : vector<16x16xf32>
    %cst_238 = arith.constant dense<0.000000e+00> : vector<16x8xf32>
    %436 = tpu.matmul %435, %420, %cst_238 {dimension_numbers = #tpu.dot_dimension_numbers<[1], [0], [0], [1], [0, 0, 1, 1], [], []>} : vector<16x16xf32>, vector<16x8xf32>, vector<16x8xf32> -> vector<16x8xf32>
    %437 = vector.extract_strided_slice %30 {offsets = [3, 0, 0], sizes = [1, 8, 32], strides = [1, 1, 1]} : vector<4x8x32xf32> to vector<1x8x32xf32>
    %438 = vector.shape_cast %437 : vector<1x8x32xf32> to vector<8x32xf32>
    %cst_239 = arith.constant dense<0.000000e+00> : vector<16x32xf32>
    %439 = tpu.matmul %436, %438, %cst_239 {dimension_numbers = #tpu.dot_dimension_numbers<[1], [0], [0], [1], [0, 0, 1, 1], [], []>} : vector<16x8xf32>, vector<8x32xf32>, vector<16x32xf32> -> vector<16x32xf32>
    %440 = arith.addf %419, %439 : vector<16x32xf32>
    %441 = arith.addf %330, %440 : vector<16x32xf32>
    %442 = vector.broadcast %29 : vector<1x32xf32> to vector<16x32xf32>
    %443 = arith.addf %441, %442 : vector<16x32xf32>
    %cst_240 = arith.constant dense<0.000000e+00> : vector<16xf32>
    %444 = vector.multi_reduction <add>, %443, %cst_240 [1] : vector<16x32xf32> to vector<16xf32>
    %445 = vector.shape_cast %444 : vector<16xf32> to vector<16x1xf32>
    %cst_241 = arith.constant 3.200000e+01 : f32
    %446 = vector.broadcast %cst_241 : f32 to vector<16x1xf32>
    %447 = arith.divf %445, %446 : vector<16x1xf32>
    %448 = vector.broadcast %447 : vector<16x1xf32> to vector<16x32xf32>
    %449 = arith.subf %443, %448 : vector<16x32xf32>
    %450 = arith.mulf %449, %449 : vector<16x32xf32>
    %cst_242 = arith.constant dense<0.000000e+00> : vector<16xf32>
    %451 = vector.multi_reduction <add>, %450, %cst_242 [1] : vector<16x32xf32> to vector<16xf32>
    %452 = vector.shape_cast %451 : vector<16xf32> to vector<16x1xf32>
    %cst_243 = arith.constant 3.200000e+01 : f32
    %453 = vector.broadcast %cst_243 : f32 to vector<16x1xf32>
    %454 = arith.divf %452, %453 : vector<16x1xf32>
    %455 = vector.broadcast %447 : vector<16x1xf32> to vector<16x32xf32>
    %456 = arith.subf %443, %455 : vector<16x32xf32>
    %cst_244 = arith.constant 9.99999974E-6 : f32
    %457 = vector.broadcast %cst_244 : f32 to vector<16x1xf32>
    %458 = arith.addf %454, %457 : vector<16x1xf32>
    %459 = math.rsqrt %458 : vector<16x1xf32>
    %460 = vector.broadcast %459 : vector<16x1xf32> to vector<16x32xf32>
    %461 = arith.mulf %456, %460 : vector<16x32xf32>
    %462 = vector.broadcast %28 : vector<1x32xf32> to vector<16x32xf32>
    %463 = arith.mulf %461, %462 : vector<16x32xf32>
    %464 = vector.broadcast %27 : vector<1x32xf32> to vector<16x32xf32>
    %465 = arith.addf %463, %464 : vector<16x32xf32>
    %cst_245 = arith.constant dense<0.000000e+00> : vector<16x128xf32>
    %466 = tpu.matmul %465, %22, %cst_245 {dimension_numbers = #tpu.dot_dimension_numbers<[1], [0], [0], [1], [0, 0, 1, 1], [], []>} : vector<16x32xf32>, vector<32x128xf32>, vector<16x128xf32> -> vector<16x128xf32>
    %467 = vector.broadcast %21 : vector<1x128xf32> to vector<16x128xf32>
    %468 = arith.addf %466, %467 : vector<16x128xf32>
    %469 = arith.mulf %468, %468 : vector<16x128xf32>
    %470 = arith.mulf %468, %469 : vector<16x128xf32>
    %cst_246 = arith.constant 4.471500e-02 : f32
    %471 = vector.broadcast %cst_246 : f32 to vector<16x128xf32>
    %472 = arith.mulf %471, %470 : vector<16x128xf32>
    %473 = arith.addf %468, %472 : vector<16x128xf32>
    %cst_247 = arith.constant 0.797884583 : f32
    %474 = vector.broadcast %cst_247 : f32 to vector<16x128xf32>
    %475 = arith.mulf %474, %473 : vector<16x128xf32>
    %476 = math.tanh %475 : vector<16x128xf32>
    %cst_248 = arith.constant 1.000000e+00 : f32
    %477 = vector.broadcast %cst_248 : f32 to vector<16x128xf32>
    %478 = arith.addf %477, %476 : vector<16x128xf32>
    %cst_249 = arith.constant 5.000000e-01 : f32
    %479 = vector.broadcast %cst_249 : f32 to vector<16x128xf32>
    %480 = arith.mulf %479, %478 : vector<16x128xf32>
    %481 = arith.mulf %468, %480 : vector<16x128xf32>
    %cst_250 = arith.constant dense<0.000000e+00> : vector<16x32xf32>
    %482 = tpu.matmul %481, %24, %cst_250 {dimension_numbers = #tpu.dot_dimension_numbers<[1], [0], [0], [1], [0, 0, 1, 1], [], []>} : vector<16x128xf32>, vector<128x32xf32>, vector<16x32xf32> -> vector<16x32xf32>
    %483 = vector.broadcast %23 : vector<1x32xf32> to vector<16x32xf32>
    %484 = arith.addf %482, %483 : vector<16x32xf32>
    %485 = arith.addf %443, %484 : vector<16x32xf32>
    %486 = vector.extract_strided_slice %36 {offsets = [0, 0, 0], sizes = [1, 4, 16], strides = [1, 1, 1]} : vector<4x4x16xf32> to vector<1x4x16xf32>
    %487 = vector.shape_cast %486 : vector<1x4x16xf32> to vector<4x16xf32>
    %cst_251 = arith.constant dense<0.000000e+00> : vector<4x32xf32>
    %488 = tpu.matmul %487, %485, %cst_251 {dimension_numbers = #tpu.dot_dimension_numbers<[1], [0], [0], [1], [0, 0, 1, 1], [], []>} : vector<4x16xf32>, vector<16x32xf32>, vector<4x32xf32> -> vector<4x32xf32>
    %489 = vector.extract_strided_slice %36 {offsets = [1, 0, 0], sizes = [1, 4, 16], strides = [1, 1, 1]} : vector<4x4x16xf32> to vector<1x4x16xf32>
    %490 = vector.shape_cast %489 : vector<1x4x16xf32> to vector<4x16xf32>
    %cst_252 = arith.constant dense<0.000000e+00> : vector<4x32xf32>
    %491 = tpu.matmul %490, %485, %cst_252 {dimension_numbers = #tpu.dot_dimension_numbers<[1], [0], [0], [1], [0, 0, 1, 1], [], []>} : vector<4x16xf32>, vector<16x32xf32>, vector<4x32xf32> -> vector<4x32xf32>
    %492 = vector.extract_strided_slice %36 {offsets = [2, 0, 0], sizes = [1, 4, 16], strides = [1, 1, 1]} : vector<4x4x16xf32> to vector<1x4x16xf32>
    %493 = vector.shape_cast %492 : vector<1x4x16xf32> to vector<4x16xf32>
    %cst_253 = arith.constant dense<0.000000e+00> : vector<4x32xf32>
    %494 = tpu.matmul %493, %485, %cst_253 {dimension_numbers = #tpu.dot_dimension_numbers<[1], [0], [0], [1], [0, 0, 1, 1], [], []>} : vector<4x16xf32>, vector<16x32xf32>, vector<4x32xf32> -> vector<4x32xf32>
    %495 = vector.extract_strided_slice %36 {offsets = [3, 0, 0], sizes = [1, 4, 16], strides = [1, 1, 1]} : vector<4x4x16xf32> to vector<1x4x16xf32>
    %496 = vector.shape_cast %495 : vector<1x4x16xf32> to vector<4x16xf32>
    %cst_254 = arith.constant dense<0.000000e+00> : vector<4x32xf32>
    %497 = tpu.matmul %496, %485, %cst_254 {dimension_numbers = #tpu.dot_dimension_numbers<[1], [0], [0], [1], [0, 0, 1, 1], [], []>} : vector<4x16xf32>, vector<16x32xf32>, vector<4x32xf32> -> vector<4x32xf32>
    %498 = arith.addf %488, %491 : vector<4x32xf32>
    %499 = arith.addf %498, %494 : vector<4x32xf32>
    %500 = arith.addf %499, %497 : vector<4x32xf32>
    %cst_255 = arith.constant dense<0.000000e+00> : vector<4xf32>
    %501 = vector.multi_reduction <add>, %500, %cst_255 [1] : vector<4x32xf32> to vector<4xf32>
    %502 = vector.shape_cast %501 : vector<4xf32> to vector<4x1xf32>
    %cst_256 = arith.constant 3.200000e+01 : f32
    %503 = vector.broadcast %cst_256 : f32 to vector<4x1xf32>
    %504 = arith.divf %502, %503 : vector<4x1xf32>
    %cst_257 = arith.constant 2.500000e-01 : f32
    %505 = vector.broadcast %cst_257 : f32 to vector<4x1xf32>
    %506 = arith.mulf %504, %505 : vector<4x1xf32>
    %507 = arith.mulf %488, %488 : vector<4x32xf32>
    %508 = arith.mulf %491, %491 : vector<4x32xf32>
    %509 = arith.addf %507, %508 : vector<4x32xf32>
    %510 = arith.mulf %494, %494 : vector<4x32xf32>
    %511 = arith.addf %509, %510 : vector<4x32xf32>
    %512 = arith.mulf %497, %497 : vector<4x32xf32>
    %513 = arith.addf %511, %512 : vector<4x32xf32>
    %cst_258 = arith.constant dense<0.000000e+00> : vector<4xf32>
    %514 = vector.multi_reduction <add>, %513, %cst_258 [1] : vector<4x32xf32> to vector<4xf32>
    %515 = vector.shape_cast %514 : vector<4xf32> to vector<4x1xf32>
    %cst_259 = arith.constant 3.200000e+01 : f32
    %516 = vector.broadcast %cst_259 : f32 to vector<4x1xf32>
    %517 = arith.divf %515, %516 : vector<4x1xf32>
    %cst_260 = arith.constant 2.500000e-01 : f32
    %518 = vector.broadcast %cst_260 : f32 to vector<4x1xf32>
    %519 = arith.mulf %517, %518 : vector<4x1xf32>
    %520 = arith.mulf %506, %506 : vector<4x1xf32>
    %521 = arith.subf %519, %520 : vector<4x1xf32>
    %cst_261 = arith.constant 9.99999974E-6 : f32
    %522 = vector.broadcast %cst_261 : f32 to vector<4x1xf32>
    %523 = arith.addf %521, %522 : vector<4x1xf32>
    %524 = math.rsqrt %523 : vector<4x1xf32>
    %525 = vector.broadcast %506 : vector<4x1xf32> to vector<4x32xf32>
    %526 = arith.subf %488, %525 : vector<4x32xf32>
    %527 = vector.broadcast %524 : vector<4x1xf32> to vector<4x32xf32>
    %528 = arith.mulf %526, %527 : vector<4x32xf32>
    %529 = vector.extract_strided_slice %35 {offsets = [0, 0, 0], sizes = [1, 1, 32], strides = [1, 1, 1]} : vector<4x1x32xf32> to vector<1x1x32xf32>
    %530 = vector.shape_cast %529 : vector<1x1x32xf32> to vector<1x32xf32>
    %531 = vector.broadcast %530 : vector<1x32xf32> to vector<4x32xf32>
    %532 = arith.mulf %528, %531 : vector<4x32xf32>
    %533 = vector.extract_strided_slice %34 {offsets = [0, 0, 0], sizes = [1, 1, 32], strides = [1, 1, 1]} : vector<4x1x32xf32> to vector<1x1x32xf32>
    %534 = vector.shape_cast %533 : vector<1x1x32xf32> to vector<1x32xf32>
    %535 = vector.broadcast %534 : vector<1x32xf32> to vector<4x32xf32>
    %536 = arith.addf %532, %535 : vector<4x32xf32>
    %537 = vector.extract_strided_slice %37 {offsets = [0, 0, 0], sizes = [1, 32, 64], strides = [1, 1, 1]} : vector<4x32x64xf32> to vector<1x32x64xf32>
    %538 = vector.shape_cast %537 : vector<1x32x64xf32> to vector<32x64xf32>
    %cst_262 = arith.constant dense<0.000000e+00> : vector<4x64xf32>
    %539 = tpu.matmul %536, %538, %cst_262 {dimension_numbers = #tpu.dot_dimension_numbers<[1], [0], [0], [1], [0, 0, 1, 1], [], []>} : vector<4x32xf32>, vector<32x64xf32>, vector<4x64xf32> -> vector<4x64xf32>
    %540 = vector.broadcast %33 : vector<1x64xf32> to vector<4x64xf32>
    %541 = arith.addf %540, %539 : vector<4x64xf32>
    %542 = vector.broadcast %506 : vector<4x1xf32> to vector<4x32xf32>
    %543 = arith.subf %491, %542 : vector<4x32xf32>
    %544 = vector.broadcast %524 : vector<4x1xf32> to vector<4x32xf32>
    %545 = arith.mulf %543, %544 : vector<4x32xf32>
    %546 = vector.extract_strided_slice %35 {offsets = [1, 0, 0], sizes = [1, 1, 32], strides = [1, 1, 1]} : vector<4x1x32xf32> to vector<1x1x32xf32>
    %547 = vector.shape_cast %546 : vector<1x1x32xf32> to vector<1x32xf32>
    %548 = vector.broadcast %547 : vector<1x32xf32> to vector<4x32xf32>
    %549 = arith.mulf %545, %548 : vector<4x32xf32>
    %550 = vector.extract_strided_slice %34 {offsets = [1, 0, 0], sizes = [1, 1, 32], strides = [1, 1, 1]} : vector<4x1x32xf32> to vector<1x1x32xf32>
    %551 = vector.shape_cast %550 : vector<1x1x32xf32> to vector<1x32xf32>
    %552 = vector.broadcast %551 : vector<1x32xf32> to vector<4x32xf32>
    %553 = arith.addf %549, %552 : vector<4x32xf32>
    %554 = vector.extract_strided_slice %37 {offsets = [1, 0, 0], sizes = [1, 32, 64], strides = [1, 1, 1]} : vector<4x32x64xf32> to vector<1x32x64xf32>
    %555 = vector.shape_cast %554 : vector<1x32x64xf32> to vector<32x64xf32>
    %cst_263 = arith.constant dense<0.000000e+00> : vector<4x64xf32>
    %556 = tpu.matmul %553, %555, %cst_263 {dimension_numbers = #tpu.dot_dimension_numbers<[1], [0], [0], [1], [0, 0, 1, 1], [], []>} : vector<4x32xf32>, vector<32x64xf32>, vector<4x64xf32> -> vector<4x64xf32>
    %557 = arith.addf %541, %556 : vector<4x64xf32>
    %558 = vector.broadcast %506 : vector<4x1xf32> to vector<4x32xf32>
    %559 = arith.subf %494, %558 : vector<4x32xf32>
    %560 = vector.broadcast %524 : vector<4x1xf32> to vector<4x32xf32>
    %561 = arith.mulf %559, %560 : vector<4x32xf32>
    %562 = vector.extract_strided_slice %35 {offsets = [2, 0, 0], sizes = [1, 1, 32], strides = [1, 1, 1]} : vector<4x1x32xf32> to vector<1x1x32xf32>
    %563 = vector.shape_cast %562 : vector<1x1x32xf32> to vector<1x32xf32>
    %564 = vector.broadcast %563 : vector<1x32xf32> to vector<4x32xf32>
    %565 = arith.mulf %561, %564 : vector<4x32xf32>
    %566 = vector.extract_strided_slice %34 {offsets = [2, 0, 0], sizes = [1, 1, 32], strides = [1, 1, 1]} : vector<4x1x32xf32> to vector<1x1x32xf32>
    %567 = vector.shape_cast %566 : vector<1x1x32xf32> to vector<1x32xf32>
    %568 = vector.broadcast %567 : vector<1x32xf32> to vector<4x32xf32>
    %569 = arith.addf %565, %568 : vector<4x32xf32>
    %570 = vector.extract_strided_slice %37 {offsets = [2, 0, 0], sizes = [1, 32, 64], strides = [1, 1, 1]} : vector<4x32x64xf32> to vector<1x32x64xf32>
    %571 = vector.shape_cast %570 : vector<1x32x64xf32> to vector<32x64xf32>
    %cst_264 = arith.constant dense<0.000000e+00> : vector<4x64xf32>
    %572 = tpu.matmul %569, %571, %cst_264 {dimension_numbers = #tpu.dot_dimension_numbers<[1], [0], [0], [1], [0, 0, 1, 1], [], []>} : vector<4x32xf32>, vector<32x64xf32>, vector<4x64xf32> -> vector<4x64xf32>
    %573 = arith.addf %557, %572 : vector<4x64xf32>
    %574 = vector.broadcast %506 : vector<4x1xf32> to vector<4x32xf32>
    %575 = arith.subf %497, %574 : vector<4x32xf32>
    %576 = vector.broadcast %524 : vector<4x1xf32> to vector<4x32xf32>
    %577 = arith.mulf %575, %576 : vector<4x32xf32>
    %578 = vector.extract_strided_slice %35 {offsets = [3, 0, 0], sizes = [1, 1, 32], strides = [1, 1, 1]} : vector<4x1x32xf32> to vector<1x1x32xf32>
    %579 = vector.shape_cast %578 : vector<1x1x32xf32> to vector<1x32xf32>
    %580 = vector.broadcast %579 : vector<1x32xf32> to vector<4x32xf32>
    %581 = arith.mulf %577, %580 : vector<4x32xf32>
    %582 = vector.extract_strided_slice %34 {offsets = [3, 0, 0], sizes = [1, 1, 32], strides = [1, 1, 1]} : vector<4x1x32xf32> to vector<1x1x32xf32>
    %583 = vector.shape_cast %582 : vector<1x1x32xf32> to vector<1x32xf32>
    %584 = vector.broadcast %583 : vector<1x32xf32> to vector<4x32xf32>
    %585 = arith.addf %581, %584 : vector<4x32xf32>
    %586 = vector.extract_strided_slice %37 {offsets = [3, 0, 0], sizes = [1, 32, 64], strides = [1, 1, 1]} : vector<4x32x64xf32> to vector<1x32x64xf32>
    %587 = vector.shape_cast %586 : vector<1x32x64xf32> to vector<32x64xf32>
    %cst_265 = arith.constant dense<0.000000e+00> : vector<4x64xf32>
    %588 = tpu.matmul %585, %587, %cst_265 {dimension_numbers = #tpu.dot_dimension_numbers<[1], [0], [0], [1], [0, 0, 1, 1], [], []>} : vector<4x32xf32>, vector<32x64xf32>, vector<4x64xf32> -> vector<4x64xf32>
    %589 = arith.addf %573, %588 : vector<4x64xf32>
    %cst_266 = arith.constant dense<0.000000e+00> : vector<4xf32>
    %590 = vector.multi_reduction <add>, %589, %cst_266 [1] : vector<4x64xf32> to vector<4xf32>
    %591 = vector.shape_cast %590 : vector<4xf32> to vector<4x1xf32>
    %cst_267 = arith.constant 6.400000e+01 : f32
    %592 = vector.broadcast %cst_267 : f32 to vector<4x1xf32>
    %593 = arith.divf %591, %592 : vector<4x1xf32>
    %594 = vector.broadcast %593 : vector<4x1xf32> to vector<4x64xf32>
    %595 = arith.subf %589, %594 : vector<4x64xf32>
    %596 = arith.mulf %595, %595 : vector<4x64xf32>
    %cst_268 = arith.constant dense<0.000000e+00> : vector<4xf32>
    %597 = vector.multi_reduction <add>, %596, %cst_268 [1] : vector<4x64xf32> to vector<4xf32>
    %598 = vector.shape_cast %597 : vector<4xf32> to vector<4x1xf32>
    %cst_269 = arith.constant 6.400000e+01 : f32
    %599 = vector.broadcast %cst_269 : f32 to vector<4x1xf32>
    %600 = arith.divf %598, %599 : vector<4x1xf32>
    %601 = vector.broadcast %593 : vector<4x1xf32> to vector<4x64xf32>
    %602 = arith.subf %589, %601 : vector<4x64xf32>
    %cst_270 = arith.constant 9.99999974E-6 : f32
    %603 = vector.broadcast %cst_270 : f32 to vector<4x1xf32>
    %604 = arith.addf %600, %603 : vector<4x1xf32>
    %605 = math.rsqrt %604 : vector<4x1xf32>
    %606 = vector.broadcast %605 : vector<4x1xf32> to vector<4x64xf32>
    %607 = arith.mulf %602, %606 : vector<4x64xf32>
    %608 = vector.broadcast %43 : vector<1x64xf32> to vector<4x64xf32>
    %609 = arith.mulf %607, %608 : vector<4x64xf32>
    %610 = vector.broadcast %42 : vector<1x64xf32> to vector<4x64xf32>
    %611 = arith.addf %609, %610 : vector<4x64xf32>
    %cst_271 = arith.constant dense<0.000000e+00> : vector<4x192xf32>
    %612 = tpu.matmul %611, %49, %cst_271 {dimension_numbers = #tpu.dot_dimension_numbers<[1], [0], [0], [1], [0, 0, 1, 1], [], []>} : vector<4x64xf32>, vector<64x192xf32>, vector<4x192xf32> -> vector<4x192xf32>
    %613 = vector.broadcast %48 : vector<1x192xf32> to vector<4x192xf32>
    %614 = arith.addf %612, %613 : vector<4x192xf32>
    %cst_272 = arith.constant 0.000000e+00 : f32
    %615 = vector.broadcast %cst_272 : f32 to vector<4x64xf32>
    %616 = vector.extract_strided_slice %614 {offsets = [0, 128], sizes = [4, 16], strides = [1, 1]} : vector<4x192xf32> to vector<4x16xf32>
    %617 = vector.extract_strided_slice %614 {offsets = [0, 0], sizes = [4, 16], strides = [1, 1]} : vector<4x192xf32> to vector<4x16xf32>
    %618 = vector.extract_strided_slice %614 {offsets = [0, 64], sizes = [4, 16], strides = [1, 1]} : vector<4x192xf32> to vector<4x16xf32>
    %cst_273 = arith.constant dense<0.000000e+00> : vector<4x4xf32>
    %619 = tpu.matmul %617, %618, %cst_273 {dimension_numbers = #tpu.dot_dimension_numbers<[1], [1], [0], [0], [0, 0, 1, 0], [], []>} : vector<4x16xf32>, vector<4x16xf32>, vector<4x4xf32> -> vector<4x4xf32>
    %cst_274 = arith.constant 2.500000e-01 : f32
    %620 = vector.broadcast %cst_274 : f32 to vector<4x4xf32>
    %621 = arith.mulf %619, %620 : vector<4x4xf32>
    %cst_275 = arith.constant dense<0xFF800000> : vector<4xf32>
    %622 = vector.multi_reduction <maximumf>, %621, %cst_275 [1] : vector<4x4xf32> to vector<4xf32>
    %623 = vector.shape_cast %622 : vector<4xf32> to vector<4x1xf32>
    %624 = vector.broadcast %623 : vector<4x1xf32> to vector<4x4xf32>
    %625 = arith.subf %621, %624 : vector<4x4xf32>
    %626 = math.exp %625 : vector<4x4xf32>
    %cst_276 = arith.constant dense<0.000000e+00> : vector<4xf32>
    %627 = vector.multi_reduction <add>, %626, %cst_276 [1] : vector<4x4xf32> to vector<4xf32>
    %628 = vector.shape_cast %627 : vector<4xf32> to vector<4x1xf32>
    %629 = tpu.reciprocal %628 {approx = true} : vector<4x1xf32> -> vector<4x1xf32>
    %630 = vector.broadcast %629 : vector<4x1xf32> to vector<4x4xf32>
    %631 = arith.mulf %626, %630 : vector<4x4xf32>
    %cst_277 = arith.constant dense<0.000000e+00> : vector<4x16xf32>
    %632 = tpu.matmul %631, %616, %cst_277 {dimension_numbers = #tpu.dot_dimension_numbers<[1], [0], [0], [1], [0, 0, 1, 1], [], []>} : vector<4x4xf32>, vector<4x16xf32>, vector<4x16xf32> -> vector<4x16xf32>
    %633 = vector.extract_strided_slice %47 {offsets = [0, 0, 0], sizes = [1, 16, 64], strides = [1, 1, 1]} : vector<4x16x64xf32> to vector<1x16x64xf32>
    %634 = vector.shape_cast %633 : vector<1x16x64xf32> to vector<16x64xf32>
    %cst_278 = arith.constant dense<0.000000e+00> : vector<4x64xf32>
    %635 = tpu.matmul %632, %634, %cst_278 {dimension_numbers = #tpu.dot_dimension_numbers<[1], [0], [0], [1], [0, 0, 1, 1], [], []>} : vector<4x16xf32>, vector<16x64xf32>, vector<4x64xf32> -> vector<4x64xf32>
    %636 = arith.addf %615, %635 : vector<4x64xf32>
    %637 = vector.extract_strided_slice %614 {offsets = [0, 144], sizes = [4, 16], strides = [1, 1]} : vector<4x192xf32> to vector<4x16xf32>
    %638 = vector.extract_strided_slice %614 {offsets = [0, 16], sizes = [4, 16], strides = [1, 1]} : vector<4x192xf32> to vector<4x16xf32>
    %639 = vector.extract_strided_slice %614 {offsets = [0, 80], sizes = [4, 16], strides = [1, 1]} : vector<4x192xf32> to vector<4x16xf32>
    %cst_279 = arith.constant dense<0.000000e+00> : vector<4x4xf32>
    %640 = tpu.matmul %638, %639, %cst_279 {dimension_numbers = #tpu.dot_dimension_numbers<[1], [1], [0], [0], [0, 0, 1, 0], [], []>} : vector<4x16xf32>, vector<4x16xf32>, vector<4x4xf32> -> vector<4x4xf32>
    %cst_280 = arith.constant 2.500000e-01 : f32
    %641 = vector.broadcast %cst_280 : f32 to vector<4x4xf32>
    %642 = arith.mulf %640, %641 : vector<4x4xf32>
    %cst_281 = arith.constant dense<0xFF800000> : vector<4xf32>
    %643 = vector.multi_reduction <maximumf>, %642, %cst_281 [1] : vector<4x4xf32> to vector<4xf32>
    %644 = vector.shape_cast %643 : vector<4xf32> to vector<4x1xf32>
    %645 = vector.broadcast %644 : vector<4x1xf32> to vector<4x4xf32>
    %646 = arith.subf %642, %645 : vector<4x4xf32>
    %647 = math.exp %646 : vector<4x4xf32>
    %cst_282 = arith.constant dense<0.000000e+00> : vector<4xf32>
    %648 = vector.multi_reduction <add>, %647, %cst_282 [1] : vector<4x4xf32> to vector<4xf32>
    %649 = vector.shape_cast %648 : vector<4xf32> to vector<4x1xf32>
    %650 = tpu.reciprocal %649 {approx = true} : vector<4x1xf32> -> vector<4x1xf32>
    %651 = vector.broadcast %650 : vector<4x1xf32> to vector<4x4xf32>
    %652 = arith.mulf %647, %651 : vector<4x4xf32>
    %cst_283 = arith.constant dense<0.000000e+00> : vector<4x16xf32>
    %653 = tpu.matmul %652, %637, %cst_283 {dimension_numbers = #tpu.dot_dimension_numbers<[1], [0], [0], [1], [0, 0, 1, 1], [], []>} : vector<4x4xf32>, vector<4x16xf32>, vector<4x16xf32> -> vector<4x16xf32>
    %654 = vector.extract_strided_slice %47 {offsets = [1, 0, 0], sizes = [1, 16, 64], strides = [1, 1, 1]} : vector<4x16x64xf32> to vector<1x16x64xf32>
    %655 = vector.shape_cast %654 : vector<1x16x64xf32> to vector<16x64xf32>
    %cst_284 = arith.constant dense<0.000000e+00> : vector<4x64xf32>
    %656 = tpu.matmul %653, %655, %cst_284 {dimension_numbers = #tpu.dot_dimension_numbers<[1], [0], [0], [1], [0, 0, 1, 1], [], []>} : vector<4x16xf32>, vector<16x64xf32>, vector<4x64xf32> -> vector<4x64xf32>
    %657 = arith.addf %636, %656 : vector<4x64xf32>
    %658 = vector.extract_strided_slice %614 {offsets = [0, 160], sizes = [4, 16], strides = [1, 1]} : vector<4x192xf32> to vector<4x16xf32>
    %659 = vector.extract_strided_slice %614 {offsets = [0, 32], sizes = [4, 16], strides = [1, 1]} : vector<4x192xf32> to vector<4x16xf32>
    %660 = vector.extract_strided_slice %614 {offsets = [0, 96], sizes = [4, 16], strides = [1, 1]} : vector<4x192xf32> to vector<4x16xf32>
    %cst_285 = arith.constant dense<0.000000e+00> : vector<4x4xf32>
    %661 = tpu.matmul %659, %660, %cst_285 {dimension_numbers = #tpu.dot_dimension_numbers<[1], [1], [0], [0], [0, 0, 1, 0], [], []>} : vector<4x16xf32>, vector<4x16xf32>, vector<4x4xf32> -> vector<4x4xf32>
    %cst_286 = arith.constant 2.500000e-01 : f32
    %662 = vector.broadcast %cst_286 : f32 to vector<4x4xf32>
    %663 = arith.mulf %661, %662 : vector<4x4xf32>
    %cst_287 = arith.constant dense<0xFF800000> : vector<4xf32>
    %664 = vector.multi_reduction <maximumf>, %663, %cst_287 [1] : vector<4x4xf32> to vector<4xf32>
    %665 = vector.shape_cast %664 : vector<4xf32> to vector<4x1xf32>
    %666 = vector.broadcast %665 : vector<4x1xf32> to vector<4x4xf32>
    %667 = arith.subf %663, %666 : vector<4x4xf32>
    %668 = math.exp %667 : vector<4x4xf32>
    %cst_288 = arith.constant dense<0.000000e+00> : vector<4xf32>
    %669 = vector.multi_reduction <add>, %668, %cst_288 [1] : vector<4x4xf32> to vector<4xf32>
    %670 = vector.shape_cast %669 : vector<4xf32> to vector<4x1xf32>
    %671 = tpu.reciprocal %670 {approx = true} : vector<4x1xf32> -> vector<4x1xf32>
    %672 = vector.broadcast %671 : vector<4x1xf32> to vector<4x4xf32>
    %673 = arith.mulf %668, %672 : vector<4x4xf32>
    %cst_289 = arith.constant dense<0.000000e+00> : vector<4x16xf32>
    %674 = tpu.matmul %673, %658, %cst_289 {dimension_numbers = #tpu.dot_dimension_numbers<[1], [0], [0], [1], [0, 0, 1, 1], [], []>} : vector<4x4xf32>, vector<4x16xf32>, vector<4x16xf32> -> vector<4x16xf32>
    %675 = vector.extract_strided_slice %47 {offsets = [2, 0, 0], sizes = [1, 16, 64], strides = [1, 1, 1]} : vector<4x16x64xf32> to vector<1x16x64xf32>
    %676 = vector.shape_cast %675 : vector<1x16x64xf32> to vector<16x64xf32>
    %cst_290 = arith.constant dense<0.000000e+00> : vector<4x64xf32>
    %677 = tpu.matmul %674, %676, %cst_290 {dimension_numbers = #tpu.dot_dimension_numbers<[1], [0], [0], [1], [0, 0, 1, 1], [], []>} : vector<4x16xf32>, vector<16x64xf32>, vector<4x64xf32> -> vector<4x64xf32>
    %678 = arith.addf %657, %677 : vector<4x64xf32>
    %679 = vector.extract_strided_slice %614 {offsets = [0, 176], sizes = [4, 16], strides = [1, 1]} : vector<4x192xf32> to vector<4x16xf32>
    %680 = vector.extract_strided_slice %614 {offsets = [0, 48], sizes = [4, 16], strides = [1, 1]} : vector<4x192xf32> to vector<4x16xf32>
    %681 = vector.extract_strided_slice %614 {offsets = [0, 112], sizes = [4, 16], strides = [1, 1]} : vector<4x192xf32> to vector<4x16xf32>
    %cst_291 = arith.constant dense<0.000000e+00> : vector<4x4xf32>
    %682 = tpu.matmul %680, %681, %cst_291 {dimension_numbers = #tpu.dot_dimension_numbers<[1], [1], [0], [0], [0, 0, 1, 0], [], []>} : vector<4x16xf32>, vector<4x16xf32>, vector<4x4xf32> -> vector<4x4xf32>
    %cst_292 = arith.constant 2.500000e-01 : f32
    %683 = vector.broadcast %cst_292 : f32 to vector<4x4xf32>
    %684 = arith.mulf %682, %683 : vector<4x4xf32>
    %cst_293 = arith.constant dense<0xFF800000> : vector<4xf32>
    %685 = vector.multi_reduction <maximumf>, %684, %cst_293 [1] : vector<4x4xf32> to vector<4xf32>
    %686 = vector.shape_cast %685 : vector<4xf32> to vector<4x1xf32>
    %687 = vector.broadcast %686 : vector<4x1xf32> to vector<4x4xf32>
    %688 = arith.subf %684, %687 : vector<4x4xf32>
    %689 = math.exp %688 : vector<4x4xf32>
    %cst_294 = arith.constant dense<0.000000e+00> : vector<4xf32>
    %690 = vector.multi_reduction <add>, %689, %cst_294 [1] : vector<4x4xf32> to vector<4xf32>
    %691 = vector.shape_cast %690 : vector<4xf32> to vector<4x1xf32>
    %692 = tpu.reciprocal %691 {approx = true} : vector<4x1xf32> -> vector<4x1xf32>
    %693 = vector.broadcast %692 : vector<4x1xf32> to vector<4x4xf32>
    %694 = arith.mulf %689, %693 : vector<4x4xf32>
    %cst_295 = arith.constant dense<0.000000e+00> : vector<4x16xf32>
    %695 = tpu.matmul %694, %679, %cst_295 {dimension_numbers = #tpu.dot_dimension_numbers<[1], [0], [0], [1], [0, 0, 1, 1], [], []>} : vector<4x4xf32>, vector<4x16xf32>, vector<4x16xf32> -> vector<4x16xf32>
    %696 = vector.extract_strided_slice %47 {offsets = [3, 0, 0], sizes = [1, 16, 64], strides = [1, 1, 1]} : vector<4x16x64xf32> to vector<1x16x64xf32>
    %697 = vector.shape_cast %696 : vector<1x16x64xf32> to vector<16x64xf32>
    %cst_296 = arith.constant dense<0.000000e+00> : vector<4x64xf32>
    %698 = tpu.matmul %695, %697, %cst_296 {dimension_numbers = #tpu.dot_dimension_numbers<[1], [0], [0], [1], [0, 0, 1, 1], [], []>} : vector<4x16xf32>, vector<16x64xf32>, vector<4x64xf32> -> vector<4x64xf32>
    %699 = arith.addf %678, %698 : vector<4x64xf32>
    %700 = arith.addf %589, %699 : vector<4x64xf32>
    %701 = vector.broadcast %46 : vector<1x64xf32> to vector<4x64xf32>
    %702 = arith.addf %700, %701 : vector<4x64xf32>
    %cst_297 = arith.constant dense<0.000000e+00> : vector<4xf32>
    %703 = vector.multi_reduction <add>, %702, %cst_297 [1] : vector<4x64xf32> to vector<4xf32>
    %704 = vector.shape_cast %703 : vector<4xf32> to vector<4x1xf32>
    %cst_298 = arith.constant 6.400000e+01 : f32
    %705 = vector.broadcast %cst_298 : f32 to vector<4x1xf32>
    %706 = arith.divf %704, %705 : vector<4x1xf32>
    %707 = vector.broadcast %706 : vector<4x1xf32> to vector<4x64xf32>
    %708 = arith.subf %702, %707 : vector<4x64xf32>
    %709 = arith.mulf %708, %708 : vector<4x64xf32>
    %cst_299 = arith.constant dense<0.000000e+00> : vector<4xf32>
    %710 = vector.multi_reduction <add>, %709, %cst_299 [1] : vector<4x64xf32> to vector<4xf32>
    %711 = vector.shape_cast %710 : vector<4xf32> to vector<4x1xf32>
    %cst_300 = arith.constant 6.400000e+01 : f32
    %712 = vector.broadcast %cst_300 : f32 to vector<4x1xf32>
    %713 = arith.divf %711, %712 : vector<4x1xf32>
    %714 = vector.broadcast %706 : vector<4x1xf32> to vector<4x64xf32>
    %715 = arith.subf %702, %714 : vector<4x64xf32>
    %cst_301 = arith.constant 9.99999974E-6 : f32
    %716 = vector.broadcast %cst_301 : f32 to vector<4x1xf32>
    %717 = arith.addf %713, %716 : vector<4x1xf32>
    %718 = math.rsqrt %717 : vector<4x1xf32>
    %719 = vector.broadcast %718 : vector<4x1xf32> to vector<4x64xf32>
    %720 = arith.mulf %715, %719 : vector<4x64xf32>
    %721 = vector.broadcast %45 : vector<1x64xf32> to vector<4x64xf32>
    %722 = arith.mulf %720, %721 : vector<4x64xf32>
    %723 = vector.broadcast %44 : vector<1x64xf32> to vector<4x64xf32>
    %724 = arith.addf %722, %723 : vector<4x64xf32>
    %cst_302 = arith.constant dense<0.000000e+00> : vector<4x256xf32>
    %725 = tpu.matmul %724, %39, %cst_302 {dimension_numbers = #tpu.dot_dimension_numbers<[1], [0], [0], [1], [0, 0, 1, 1], [], []>} : vector<4x64xf32>, vector<64x256xf32>, vector<4x256xf32> -> vector<4x256xf32>
    %726 = vector.broadcast %38 : vector<1x256xf32> to vector<4x256xf32>
    %727 = arith.addf %725, %726 : vector<4x256xf32>
    %728 = arith.mulf %727, %727 : vector<4x256xf32>
    %729 = arith.mulf %727, %728 : vector<4x256xf32>
    %cst_303 = arith.constant 4.471500e-02 : f32
    %730 = vector.broadcast %cst_303 : f32 to vector<4x256xf32>
    %731 = arith.mulf %730, %729 : vector<4x256xf32>
    %732 = arith.addf %727, %731 : vector<4x256xf32>
    %cst_304 = arith.constant 0.797884583 : f32
    %733 = vector.broadcast %cst_304 : f32 to vector<4x256xf32>
    %734 = arith.mulf %733, %732 : vector<4x256xf32>
    %735 = math.tanh %734 : vector<4x256xf32>
    %cst_305 = arith.constant 1.000000e+00 : f32
    %736 = vector.broadcast %cst_305 : f32 to vector<4x256xf32>
    %737 = arith.addf %736, %735 : vector<4x256xf32>
    %cst_306 = arith.constant 5.000000e-01 : f32
    %738 = vector.broadcast %cst_306 : f32 to vector<4x256xf32>
    %739 = arith.mulf %738, %737 : vector<4x256xf32>
    %740 = arith.mulf %727, %739 : vector<4x256xf32>
    %cst_307 = arith.constant dense<0.000000e+00> : vector<4x64xf32>
    %741 = tpu.matmul %740, %41, %cst_307 {dimension_numbers = #tpu.dot_dimension_numbers<[1], [0], [0], [1], [0, 0, 1, 1], [], []>} : vector<4x256xf32>, vector<256x64xf32>, vector<4x64xf32> -> vector<4x64xf32>
    %742 = vector.broadcast %40 : vector<1x64xf32> to vector<4x64xf32>
    %743 = arith.addf %741, %742 : vector<4x64xf32>
    %744 = arith.addf %702, %743 : vector<4x64xf32>
    %745 = vector.extract_strided_slice %53 {offsets = [0, 0, 0], sizes = [1, 1, 4], strides = [1, 1, 1]} : vector<4x1x4xf32> to vector<1x1x4xf32>
    %746 = vector.shape_cast %745 : vector<1x1x4xf32> to vector<1x4xf32>
    %cst_308 = arith.constant dense<0.000000e+00> : vector<1x64xf32>
    %747 = tpu.matmul %746, %744, %cst_308 {dimension_numbers = #tpu.dot_dimension_numbers<[1], [0], [0], [1], [0, 0, 1, 1], [], []>} : vector<1x4xf32>, vector<4x64xf32>, vector<1x64xf32> -> vector<1x64xf32>
    %748 = vector.extract_strided_slice %53 {offsets = [1, 0, 0], sizes = [1, 1, 4], strides = [1, 1, 1]} : vector<4x1x4xf32> to vector<1x1x4xf32>
    %749 = vector.shape_cast %748 : vector<1x1x4xf32> to vector<1x4xf32>
    %cst_309 = arith.constant dense<0.000000e+00> : vector<1x64xf32>
    %750 = tpu.matmul %749, %744, %cst_309 {dimension_numbers = #tpu.dot_dimension_numbers<[1], [0], [0], [1], [0, 0, 1, 1], [], []>} : vector<1x4xf32>, vector<4x64xf32>, vector<1x64xf32> -> vector<1x64xf32>
    %751 = vector.extract_strided_slice %53 {offsets = [2, 0, 0], sizes = [1, 1, 4], strides = [1, 1, 1]} : vector<4x1x4xf32> to vector<1x1x4xf32>
    %752 = vector.shape_cast %751 : vector<1x1x4xf32> to vector<1x4xf32>
    %cst_310 = arith.constant dense<0.000000e+00> : vector<1x64xf32>
    %753 = tpu.matmul %752, %744, %cst_310 {dimension_numbers = #tpu.dot_dimension_numbers<[1], [0], [0], [1], [0, 0, 1, 1], [], []>} : vector<1x4xf32>, vector<4x64xf32>, vector<1x64xf32> -> vector<1x64xf32>
    %754 = vector.extract_strided_slice %53 {offsets = [3, 0, 0], sizes = [1, 1, 4], strides = [1, 1, 1]} : vector<4x1x4xf32> to vector<1x1x4xf32>
    %755 = vector.shape_cast %754 : vector<1x1x4xf32> to vector<1x4xf32>
    %cst_311 = arith.constant dense<0.000000e+00> : vector<1x64xf32>
    %756 = tpu.matmul %755, %744, %cst_311 {dimension_numbers = #tpu.dot_dimension_numbers<[1], [0], [0], [1], [0, 0, 1, 1], [], []>} : vector<1x4xf32>, vector<4x64xf32>, vector<1x64xf32> -> vector<1x64xf32>
    %757 = arith.addf %747, %750 : vector<1x64xf32>
    %758 = arith.addf %757, %753 : vector<1x64xf32>
    %759 = arith.addf %758, %756 : vector<1x64xf32>
    %cst_312 = arith.constant dense<0.000000e+00> : vector<1xf32>
    %760 = vector.multi_reduction <add>, %759, %cst_312 [1] : vector<1x64xf32> to vector<1xf32>
    %761 = vector.shape_cast %760 : vector<1xf32> to vector<1x1xf32>
    %cst_313 = arith.constant 6.400000e+01 : f32
    %762 = vector.broadcast %cst_313 : f32 to vector<1x1xf32>
    %763 = arith.divf %761, %762 : vector<1x1xf32>
    %cst_314 = arith.constant 2.500000e-01 : f32
    %764 = vector.broadcast %cst_314 : f32 to vector<1x1xf32>
    %765 = arith.mulf %763, %764 : vector<1x1xf32>
    %766 = arith.mulf %747, %747 : vector<1x64xf32>
    %767 = arith.mulf %750, %750 : vector<1x64xf32>
    %768 = arith.addf %766, %767 : vector<1x64xf32>
    %769 = arith.mulf %753, %753 : vector<1x64xf32>
    %770 = arith.addf %768, %769 : vector<1x64xf32>
    %771 = arith.mulf %756, %756 : vector<1x64xf32>
    %772 = arith.addf %770, %771 : vector<1x64xf32>
    %cst_315 = arith.constant dense<0.000000e+00> : vector<1xf32>
    %773 = vector.multi_reduction <add>, %772, %cst_315 [1] : vector<1x64xf32> to vector<1xf32>
    %774 = vector.shape_cast %773 : vector<1xf32> to vector<1x1xf32>
    %cst_316 = arith.constant 6.400000e+01 : f32
    %775 = vector.broadcast %cst_316 : f32 to vector<1x1xf32>
    %776 = arith.divf %774, %775 : vector<1x1xf32>
    %cst_317 = arith.constant 2.500000e-01 : f32
    %777 = vector.broadcast %cst_317 : f32 to vector<1x1xf32>
    %778 = arith.mulf %776, %777 : vector<1x1xf32>
    %779 = arith.mulf %765, %765 : vector<1x1xf32>
    %780 = arith.subf %778, %779 : vector<1x1xf32>
    %cst_318 = arith.constant 9.99999974E-6 : f32
    %781 = vector.broadcast %cst_318 : f32 to vector<1x1xf32>
    %782 = arith.addf %780, %781 : vector<1x1xf32>
    %783 = math.rsqrt %782 : vector<1x1xf32>
    %784 = vector.broadcast %765 : vector<1x1xf32> to vector<1x64xf32>
    %785 = arith.subf %747, %784 : vector<1x64xf32>
    %786 = vector.broadcast %783 : vector<1x1xf32> to vector<1x64xf32>
    %787 = arith.mulf %785, %786 : vector<1x64xf32>
    %788 = vector.extract_strided_slice %52 {offsets = [0, 0, 0], sizes = [1, 1, 64], strides = [1, 1, 1]} : vector<4x1x64xf32> to vector<1x1x64xf32>
    %789 = vector.shape_cast %788 : vector<1x1x64xf32> to vector<1x64xf32>
    %790 = arith.mulf %787, %789 : vector<1x64xf32>
    %791 = vector.extract_strided_slice %51 {offsets = [0, 0, 0], sizes = [1, 1, 64], strides = [1, 1, 1]} : vector<4x1x64xf32> to vector<1x1x64xf32>
    %792 = vector.shape_cast %791 : vector<1x1x64xf32> to vector<1x64xf32>
    %793 = arith.addf %790, %792 : vector<1x64xf32>
    %794 = vector.extract_strided_slice %54 {offsets = [0, 0, 0], sizes = [1, 64, 128], strides = [1, 1, 1]} : vector<4x64x128xf32> to vector<1x64x128xf32>
    %795 = vector.shape_cast %794 : vector<1x64x128xf32> to vector<64x128xf32>
    %cst_319 = arith.constant dense<0.000000e+00> : vector<1x128xf32>
    %796 = tpu.matmul %793, %795, %cst_319 {dimension_numbers = #tpu.dot_dimension_numbers<[1], [0], [0], [1], [0, 0, 1, 1], [], []>} : vector<1x64xf32>, vector<64x128xf32>, vector<1x128xf32> -> vector<1x128xf32>
    %797 = arith.addf %50, %796 : vector<1x128xf32>
    %798 = vector.broadcast %765 : vector<1x1xf32> to vector<1x64xf32>
    %799 = arith.subf %750, %798 : vector<1x64xf32>
    %800 = vector.broadcast %783 : vector<1x1xf32> to vector<1x64xf32>
    %801 = arith.mulf %799, %800 : vector<1x64xf32>
    %802 = vector.extract_strided_slice %52 {offsets = [1, 0, 0], sizes = [1, 1, 64], strides = [1, 1, 1]} : vector<4x1x64xf32> to vector<1x1x64xf32>
    %803 = vector.shape_cast %802 : vector<1x1x64xf32> to vector<1x64xf32>
    %804 = arith.mulf %801, %803 : vector<1x64xf32>
    %805 = vector.extract_strided_slice %51 {offsets = [1, 0, 0], sizes = [1, 1, 64], strides = [1, 1, 1]} : vector<4x1x64xf32> to vector<1x1x64xf32>
    %806 = vector.shape_cast %805 : vector<1x1x64xf32> to vector<1x64xf32>
    %807 = arith.addf %804, %806 : vector<1x64xf32>
    %808 = vector.extract_strided_slice %54 {offsets = [1, 0, 0], sizes = [1, 64, 128], strides = [1, 1, 1]} : vector<4x64x128xf32> to vector<1x64x128xf32>
    %809 = vector.shape_cast %808 : vector<1x64x128xf32> to vector<64x128xf32>
    %cst_320 = arith.constant dense<0.000000e+00> : vector<1x128xf32>
    %810 = tpu.matmul %807, %809, %cst_320 {dimension_numbers = #tpu.dot_dimension_numbers<[1], [0], [0], [1], [0, 0, 1, 1], [], []>} : vector<1x64xf32>, vector<64x128xf32>, vector<1x128xf32> -> vector<1x128xf32>
    %811 = arith.addf %797, %810 : vector<1x128xf32>
    %812 = vector.broadcast %765 : vector<1x1xf32> to vector<1x64xf32>
    %813 = arith.subf %753, %812 : vector<1x64xf32>
    %814 = vector.broadcast %783 : vector<1x1xf32> to vector<1x64xf32>
    %815 = arith.mulf %813, %814 : vector<1x64xf32>
    %816 = vector.extract_strided_slice %52 {offsets = [2, 0, 0], sizes = [1, 1, 64], strides = [1, 1, 1]} : vector<4x1x64xf32> to vector<1x1x64xf32>
    %817 = vector.shape_cast %816 : vector<1x1x64xf32> to vector<1x64xf32>
    %818 = arith.mulf %815, %817 : vector<1x64xf32>
    %819 = vector.extract_strided_slice %51 {offsets = [2, 0, 0], sizes = [1, 1, 64], strides = [1, 1, 1]} : vector<4x1x64xf32> to vector<1x1x64xf32>
    %820 = vector.shape_cast %819 : vector<1x1x64xf32> to vector<1x64xf32>
    %821 = arith.addf %818, %820 : vector<1x64xf32>
    %822 = vector.extract_strided_slice %54 {offsets = [2, 0, 0], sizes = [1, 64, 128], strides = [1, 1, 1]} : vector<4x64x128xf32> to vector<1x64x128xf32>
    %823 = vector.shape_cast %822 : vector<1x64x128xf32> to vector<64x128xf32>
    %cst_321 = arith.constant dense<0.000000e+00> : vector<1x128xf32>
    %824 = tpu.matmul %821, %823, %cst_321 {dimension_numbers = #tpu.dot_dimension_numbers<[1], [0], [0], [1], [0, 0, 1, 1], [], []>} : vector<1x64xf32>, vector<64x128xf32>, vector<1x128xf32> -> vector<1x128xf32>
    %825 = arith.addf %811, %824 : vector<1x128xf32>
    %826 = vector.broadcast %765 : vector<1x1xf32> to vector<1x64xf32>
    %827 = arith.subf %756, %826 : vector<1x64xf32>
    %828 = vector.broadcast %783 : vector<1x1xf32> to vector<1x64xf32>
    %829 = arith.mulf %827, %828 : vector<1x64xf32>
    %830 = vector.extract_strided_slice %52 {offsets = [3, 0, 0], sizes = [1, 1, 64], strides = [1, 1, 1]} : vector<4x1x64xf32> to vector<1x1x64xf32>
    %831 = vector.shape_cast %830 : vector<1x1x64xf32> to vector<1x64xf32>
    %832 = arith.mulf %829, %831 : vector<1x64xf32>
    %833 = vector.extract_strided_slice %51 {offsets = [3, 0, 0], sizes = [1, 1, 64], strides = [1, 1, 1]} : vector<4x1x64xf32> to vector<1x1x64xf32>
    %834 = vector.shape_cast %833 : vector<1x1x64xf32> to vector<1x64xf32>
    %835 = arith.addf %832, %834 : vector<1x64xf32>
    %836 = vector.extract_strided_slice %54 {offsets = [3, 0, 0], sizes = [1, 64, 128], strides = [1, 1, 1]} : vector<4x64x128xf32> to vector<1x64x128xf32>
    %837 = vector.shape_cast %836 : vector<1x64x128xf32> to vector<64x128xf32>
    %cst_322 = arith.constant dense<0.000000e+00> : vector<1x128xf32>
    %838 = tpu.matmul %835, %837, %cst_322 {dimension_numbers = #tpu.dot_dimension_numbers<[1], [0], [0], [1], [0, 0, 1, 1], [], []>} : vector<1x64xf32>, vector<64x128xf32>, vector<1x128xf32> -> vector<1x128xf32>
    %839 = arith.addf %825, %838 : vector<1x128xf32>
    %cst_323 = arith.constant dense<0.000000e+00> : vector<1xf32>
    %840 = vector.multi_reduction <add>, %839, %cst_323 [1] : vector<1x128xf32> to vector<1xf32>
    %841 = vector.shape_cast %840 : vector<1xf32> to vector<1x1xf32>
    %cst_324 = arith.constant 1.280000e+02 : f32
    %842 = vector.broadcast %cst_324 : f32 to vector<1x1xf32>
    %843 = arith.divf %841, %842 : vector<1x1xf32>
    %844 = vector.broadcast %843 : vector<1x1xf32> to vector<1x128xf32>
    %845 = arith.subf %839, %844 : vector<1x128xf32>
    %846 = arith.mulf %845, %845 : vector<1x128xf32>
    %cst_325 = arith.constant dense<0.000000e+00> : vector<1xf32>
    %847 = vector.multi_reduction <add>, %846, %cst_325 [1] : vector<1x128xf32> to vector<1xf32>
    %848 = vector.shape_cast %847 : vector<1xf32> to vector<1x1xf32>
    %cst_326 = arith.constant 1.280000e+02 : f32
    %849 = vector.broadcast %cst_326 : f32 to vector<1x1xf32>
    %850 = arith.divf %848, %849 : vector<1x1xf32>
    %851 = vector.broadcast %843 : vector<1x1xf32> to vector<1x128xf32>
    %852 = arith.subf %839, %851 : vector<1x128xf32>
    %cst_327 = arith.constant 9.99999974E-6 : f32
    %853 = vector.broadcast %cst_327 : f32 to vector<1x1xf32>
    %854 = arith.addf %850, %853 : vector<1x1xf32>
    %855 = math.rsqrt %854 : vector<1x1xf32>
    %856 = vector.broadcast %855 : vector<1x1xf32> to vector<1x128xf32>
    %857 = arith.mulf %852, %856 : vector<1x128xf32>
    %858 = arith.mulf %857, %60 : vector<1x128xf32>
    %859 = arith.addf %858, %59 : vector<1x128xf32>
    %cst_328 = arith.constant dense<0.000000e+00> : vector<1x384xf32>
    %860 = tpu.matmul %859, %66, %cst_328 {dimension_numbers = #tpu.dot_dimension_numbers<[1], [0], [0], [1], [0, 0, 1, 1], [], []>} : vector<1x128xf32>, vector<128x384xf32>, vector<1x384xf32> -> vector<1x384xf32>
    %861 = arith.addf %860, %65 : vector<1x384xf32>
    %cst_329 = arith.constant 0.000000e+00 : f32
    %862 = vector.broadcast %cst_329 : f32 to vector<1x128xf32>
    %863 = vector.extract_strided_slice %861 {offsets = [0, 256], sizes = [1, 32], strides = [1, 1]} : vector<1x384xf32> to vector<1x32xf32>
    %864 = vector.extract_strided_slice %64 {offsets = [0, 0, 0], sizes = [1, 32, 128], strides = [1, 1, 1]} : vector<4x32x128xf32> to vector<1x32x128xf32>
    %865 = vector.shape_cast %864 : vector<1x32x128xf32> to vector<32x128xf32>
    %cst_330 = arith.constant dense<0.000000e+00> : vector<1x128xf32>
    %866 = tpu.matmul %863, %865, %cst_330 {dimension_numbers = #tpu.dot_dimension_numbers<[1], [0], [0], [1], [0, 0, 1, 1], [], []>} : vector<1x32xf32>, vector<32x128xf32>, vector<1x128xf32> -> vector<1x128xf32>
    %867 = arith.addf %862, %866 : vector<1x128xf32>
    %868 = vector.extract_strided_slice %861 {offsets = [0, 288], sizes = [1, 32], strides = [1, 1]} : vector<1x384xf32> to vector<1x32xf32>
    %869 = vector.extract_strided_slice %64 {offsets = [1, 0, 0], sizes = [1, 32, 128], strides = [1, 1, 1]} : vector<4x32x128xf32> to vector<1x32x128xf32>
    %870 = vector.shape_cast %869 : vector<1x32x128xf32> to vector<32x128xf32>
    %cst_331 = arith.constant dense<0.000000e+00> : vector<1x128xf32>
    %871 = tpu.matmul %868, %870, %cst_331 {dimension_numbers = #tpu.dot_dimension_numbers<[1], [0], [0], [1], [0, 0, 1, 1], [], []>} : vector<1x32xf32>, vector<32x128xf32>, vector<1x128xf32> -> vector<1x128xf32>
    %872 = arith.addf %867, %871 : vector<1x128xf32>
    %873 = vector.extract_strided_slice %861 {offsets = [0, 320], sizes = [1, 32], strides = [1, 1]} : vector<1x384xf32> to vector<1x32xf32>
    %874 = vector.extract_strided_slice %64 {offsets = [2, 0, 0], sizes = [1, 32, 128], strides = [1, 1, 1]} : vector<4x32x128xf32> to vector<1x32x128xf32>
    %875 = vector.shape_cast %874 : vector<1x32x128xf32> to vector<32x128xf32>
    %cst_332 = arith.constant dense<0.000000e+00> : vector<1x128xf32>
    %876 = tpu.matmul %873, %875, %cst_332 {dimension_numbers = #tpu.dot_dimension_numbers<[1], [0], [0], [1], [0, 0, 1, 1], [], []>} : vector<1x32xf32>, vector<32x128xf32>, vector<1x128xf32> -> vector<1x128xf32>
    %877 = arith.addf %872, %876 : vector<1x128xf32>
    %878 = vector.extract_strided_slice %861 {offsets = [0, 352], sizes = [1, 32], strides = [1, 1]} : vector<1x384xf32> to vector<1x32xf32>
    %879 = vector.extract_strided_slice %64 {offsets = [3, 0, 0], sizes = [1, 32, 128], strides = [1, 1, 1]} : vector<4x32x128xf32> to vector<1x32x128xf32>
    %880 = vector.shape_cast %879 : vector<1x32x128xf32> to vector<32x128xf32>
    %cst_333 = arith.constant dense<0.000000e+00> : vector<1x128xf32>
    %881 = tpu.matmul %878, %880, %cst_333 {dimension_numbers = #tpu.dot_dimension_numbers<[1], [0], [0], [1], [0, 0, 1, 1], [], []>} : vector<1x32xf32>, vector<32x128xf32>, vector<1x128xf32> -> vector<1x128xf32>
    %882 = arith.addf %877, %881 : vector<1x128xf32>
    %883 = arith.addf %839, %882 : vector<1x128xf32>
    %884 = arith.addf %883, %63 : vector<1x128xf32>
    %cst_334 = arith.constant dense<0.000000e+00> : vector<1xf32>
    %885 = vector.multi_reduction <add>, %884, %cst_334 [1] : vector<1x128xf32> to vector<1xf32>
    %886 = vector.shape_cast %885 : vector<1xf32> to vector<1x1xf32>
    %cst_335 = arith.constant 1.280000e+02 : f32
    %887 = vector.broadcast %cst_335 : f32 to vector<1x1xf32>
    %888 = arith.divf %886, %887 : vector<1x1xf32>
    %889 = vector.broadcast %888 : vector<1x1xf32> to vector<1x128xf32>
    %890 = arith.subf %884, %889 : vector<1x128xf32>
    %891 = arith.mulf %890, %890 : vector<1x128xf32>
    %cst_336 = arith.constant dense<0.000000e+00> : vector<1xf32>
    %892 = vector.multi_reduction <add>, %891, %cst_336 [1] : vector<1x128xf32> to vector<1xf32>
    %893 = vector.shape_cast %892 : vector<1xf32> to vector<1x1xf32>
    %cst_337 = arith.constant 1.280000e+02 : f32
    %894 = vector.broadcast %cst_337 : f32 to vector<1x1xf32>
    %895 = arith.divf %893, %894 : vector<1x1xf32>
    %896 = vector.broadcast %888 : vector<1x1xf32> to vector<1x128xf32>
    %897 = arith.subf %884, %896 : vector<1x128xf32>
    %cst_338 = arith.constant 9.99999974E-6 : f32
    %898 = vector.broadcast %cst_338 : f32 to vector<1x1xf32>
    %899 = arith.addf %895, %898 : vector<1x1xf32>
    %900 = math.rsqrt %899 : vector<1x1xf32>
    %901 = vector.broadcast %900 : vector<1x1xf32> to vector<1x128xf32>
    %902 = arith.mulf %897, %901 : vector<1x128xf32>
    %903 = arith.mulf %902, %62 : vector<1x128xf32>
    %904 = arith.addf %903, %61 : vector<1x128xf32>
    %cst_339 = arith.constant dense<0.000000e+00> : vector<1x512xf32>
    %905 = tpu.matmul %904, %56, %cst_339 {dimension_numbers = #tpu.dot_dimension_numbers<[1], [0], [0], [1], [0, 0, 1, 1], [], []>} : vector<1x128xf32>, vector<128x512xf32>, vector<1x512xf32> -> vector<1x512xf32>
    %906 = arith.addf %905, %55 : vector<1x512xf32>
    %907 = arith.mulf %906, %906 : vector<1x512xf32>
    %908 = arith.mulf %906, %907 : vector<1x512xf32>
    %cst_340 = arith.constant 4.471500e-02 : f32
    %909 = vector.broadcast %cst_340 : f32 to vector<1x512xf32>
    %910 = arith.mulf %909, %908 : vector<1x512xf32>
    %911 = arith.addf %906, %910 : vector<1x512xf32>
    %cst_341 = arith.constant 0.797884583 : f32
    %912 = vector.broadcast %cst_341 : f32 to vector<1x512xf32>
    %913 = arith.mulf %912, %911 : vector<1x512xf32>
    %914 = math.tanh %913 : vector<1x512xf32>
    %cst_342 = arith.constant 1.000000e+00 : f32
    %915 = vector.broadcast %cst_342 : f32 to vector<1x512xf32>
    %916 = arith.addf %915, %914 : vector<1x512xf32>
    %cst_343 = arith.constant 5.000000e-01 : f32
    %917 = vector.broadcast %cst_343 : f32 to vector<1x512xf32>
    %918 = arith.mulf %917, %916 : vector<1x512xf32>
    %919 = arith.mulf %906, %918 : vector<1x512xf32>
    %cst_344 = arith.constant dense<0.000000e+00> : vector<1x128xf32>
    %920 = tpu.matmul %919, %58, %cst_344 {dimension_numbers = #tpu.dot_dimension_numbers<[1], [0], [0], [1], [0, 0, 1, 1], [], []>} : vector<1x512xf32>, vector<512x128xf32>, vector<1x128xf32> -> vector<1x128xf32>
    %921 = arith.addf %920, %57 : vector<1x128xf32>
    %922 = arith.addf %884, %921 : vector<1x128xf32>
    %cst_345 = arith.constant dense<0.000000e+00> : vector<1xf32>
    %923 = vector.multi_reduction <add>, %922, %cst_345 [1] : vector<1x128xf32> to vector<1xf32>
    %924 = vector.shape_cast %923 : vector<1xf32> to vector<1x1xf32>
    %cst_346 = arith.constant 1.280000e+02 : f32
    %925 = vector.broadcast %cst_346 : f32 to vector<1x1xf32>
    %926 = arith.divf %924, %925 : vector<1x1xf32>
    %927 = vector.broadcast %926 : vector<1x1xf32> to vector<1x128xf32>
    %928 = arith.subf %922, %927 : vector<1x128xf32>
    %929 = arith.mulf %928, %928 : vector<1x128xf32>
    %cst_347 = arith.constant dense<0.000000e+00> : vector<1xf32>
    %930 = vector.multi_reduction <add>, %929, %cst_347 [1] : vector<1x128xf32> to vector<1xf32>
    %931 = vector.shape_cast %930 : vector<1xf32> to vector<1x1xf32>
    %cst_348 = arith.constant 1.280000e+02 : f32
    %932 = vector.broadcast %cst_348 : f32 to vector<1x1xf32>
    %933 = arith.divf %931, %932 : vector<1x1xf32>
    %934 = vector.broadcast %926 : vector<1x1xf32> to vector<1x128xf32>
    %935 = arith.subf %922, %934 : vector<1x128xf32>
    %cst_349 = arith.constant 9.99999974E-6 : f32
    %936 = vector.broadcast %cst_349 : f32 to vector<1x1xf32>
    %937 = arith.addf %933, %936 : vector<1x1xf32>
    %938 = math.rsqrt %937 : vector<1x1xf32>
    %939 = vector.broadcast %938 : vector<1x1xf32> to vector<1x128xf32>
    %940 = arith.mulf %935, %939 : vector<1x128xf32>
    %941 = arith.mulf %940, %1 : vector<1x128xf32>
    %942 = arith.addf %941, %0 : vector<1x128xf32>
    %cst_350 = arith.constant dense<0.000000e+00> : vector<128xf32>
    %943 = vector.multi_reduction <add>, %942, %cst_350 [0] : vector<1x128xf32> to vector<128xf32>
    %944 = vector.shape_cast %943 : vector<128xf32> to vector<1x128xf32>
    %cst_351 = arith.constant 1.000000e+00 : f32
    %945 = vector.broadcast %cst_351 : f32 to vector<1x128xf32>
    %946 = arith.divf %944, %945 : vector<1x128xf32>
    %c0_352 = arith.constant 0 : index
    %c0_353 = arith.constant 0 : index
    %c0_354 = arith.constant 0 : index
    %947 = vector.load %arg69[%c0_352, %c0_353, %c0_354] : memref<1x1x128xf32, #tpu.memory_space<vmem>>, vector<1x1x128xf32>
    %948 = vector.shape_cast %947 : vector<1x1x128xf32> to vector<1x128xf32>
    %949 = vector.shape_cast %946 : vector<1x128xf32> to vector<1x1x128xf32>
    tpu.vector_store %arg69[%c0_352, %c0_353, %c0_354], %949 {strides = array<i32>} : memref<1x1x128xf32, #tpu.memory_space<vmem>>, vector<1x1x128xf32>,
    return
  }
  func.func @transform_0(%arg0: i32) -> (i32, i32, i32) {
    %c0_i32 = arith.constant 0 : i32
    %c0_i32_0 = arith.constant 0 : i32
    %c0_i32_1 = arith.constant 0 : i32
    return %arg0, %c0_i32, %c0_i32_0 : i32, i32, i32
  }
  func.func @transform_1(%arg0: i32) -> (i32, i32) {
    %c0_i32 = arith.constant 0 : i32
    %c0_i32_0 = arith.constant 0 : i32
    %c0_i32_1 = arith.constant 0 : i32
    return %c0_i32, %c0_i32_0 : i32, i32
  }
  func.func @transform_2(%arg0: i32) -> (i32, i32) {
    %c0_i32 = arith.constant 0 : i32
    %c0_i32_0 = arith.constant 0 : i32
    %c0_i32_1 = arith.constant 0 : i32
    return %c0_i32, %c0_i32_0 : i32, i32
  }
  func.func @transform_3(%arg0: i32) -> (i32, i32) {
    %c0_i32 = arith.constant 0 : i32
    %c0_i32_0 = arith.constant 0 : i32
    %c0_i32_1 = arith.constant 0 : i32
    return %c0_i32, %c0_i32_0 : i32, i32
  }
  func.func @transform_4(%arg0: i32) -> (i32, i32) {
    %c0_i32 = arith.constant 0 : i32
    %c0_i32_0 = arith.constant 0 : i32
    %c0_i32_1 = arith.constant 0 : i32
    return %c0_i32, %c0_i32_0 : i32, i32
  }
  func.func @transform_5(%arg0: i32) -> (i32, i32) {
    %c0_i32 = arith.constant 0 : i32
    %c0_i32_0 = arith.constant 0 : i32
    %c0_i32_1 = arith.constant 0 : i32
    return %c0_i32, %c0_i32_0 : i32, i32
  }
  func.func @transform_6(%arg0: i32) -> (i32, i32) {
    %c0_i32 = arith.constant 0 : i32
    %c0_i32_0 = arith.constant 0 : i32
    %c0_i32_1 = arith.constant 0 : i32
    return %c0_i32, %c0_i32_0 : i32, i32
  }
  func.func @transform_7(%arg0: i32) -> (i32, i32) {
    %c0_i32 = arith.constant 0 : i32
    %c0_i32_0 = arith.constant 0 : i32
    %c0_i32_1 = arith.constant 0 : i32
    return %c0_i32, %c0_i32_0 : i32, i32
  }
  func.func @transform_8(%arg0: i32) -> (i32, i32) {
    %c0_i32 = arith.constant 0 : i32
    %c0_i32_0 = arith.constant 0 : i32
    %c0_i32_1 = arith.constant 0 : i32
    return %c0_i32, %c0_i32_0 : i32, i32
  }
  func.func @transform_9(%arg0: i32) -> (i32, i32) {
    %c0_i32 = arith.constant 0 : i32
    %c0_i32_0 = arith.constant 0 : i32
    %c0_i32_1 = arith.constant 0 : i32
    return %c0_i32, %c0_i32_0 : i32, i32
  }
  func.func @transform_10(%arg0: i32) -> (i32, i32) {
    %c0_i32 = arith.constant 0 : i32
    %c0_i32_0 = arith.constant 0 : i32
    %c0_i32_1 = arith.constant 0 : i32
    return %c0_i32, %c0_i32_0 : i32, i32
  }
  func.func @transform_11(%arg0: i32) -> (i32, i32) {
    %c0_i32 = arith.constant 0 : i32
    %c0_i32_0 = arith.constant 0 : i32
    %c0_i32_1 = arith.constant 0 : i32
    return %c0_i32, %c0_i32_0 : i32, i32
  }
  func.func @transform_12(%arg0: i32) -> (i32, i32) {
    %c0_i32 = arith.constant 0 : i32
    %c0_i32_0 = arith.constant 0 : i32
    %c0_i32_1 = arith.constant 0 : i32
    return %c0_i32, %c0_i32_0 : i32, i32
  }
  func.func @transform_13(%arg0: i32) -> (i32, i32) {
    %c0_i32 = arith.constant 0 : i32
    %c0_i32_0 = arith.constant 0 : i32
    %c0_i32_1 = arith.constant 0 : i32
    return %c0_i32, %c0_i32_0 : i32, i32
  }
  func.func @transform_14(%arg0: i32) -> (i32, i32, i32) {
    %c0_i32 = arith.constant 0 : i32
    %c0_i32_0 = arith.constant 0 : i32
    %c0_i32_1 = arith.constant 0 : i32
    %c0_i32_2 = arith.constant 0 : i32
    return %c0_i32, %c0_i32_0, %c0_i32_1 : i32, i32, i32
  }
  func.func @transform_15(%arg0: i32) -> (i32, i32) {
    %c0_i32 = arith.constant 0 : i32
    %c0_i32_0 = arith.constant 0 : i32
    %c0_i32_1 = arith.constant 0 : i32
    return %c0_i32, %c0_i32_0 : i32, i32
  }
  func.func @transform_16(%arg0: i32) -> (i32, i32) {
    %c0_i32 = arith.constant 0 : i32
    %c0_i32_0 = arith.constant 0 : i32
    %c0_i32_1 = arith.constant 0 : i32
    return %c0_i32, %c0_i32_0 : i32, i32
  }
  func.func @transform_17(%arg0: i32) -> (i32, i32) {
    %c0_i32 = arith.constant 0 : i32
    %c0_i32_0 = arith.constant 0 : i32
    %c0_i32_1 = arith.constant 0 : i32
    return %c0_i32, %c0_i32_0 : i32, i32
  }
  func.func @transform_18(%arg0: i32) -> (i32, i32, i32) {
    %c0_i32 = arith.constant 0 : i32
    %c0_i32_0 = arith.constant 0 : i32
    %c0_i32_1 = arith.constant 0 : i32
    %c0_i32_2 = arith.constant 0 : i32
    return %c0_i32, %c0_i32_0, %c0_i32_1 : i32, i32, i32
  }
  func.func @transform_19(%arg0: i32) -> (i32, i32, i32) {
    %c0_i32 = arith.constant 0 : i32
    %c0_i32_0 = arith.constant 0 : i32
    %c0_i32_1 = arith.constant 0 : i32
    %c0_i32_2 = arith.constant 0 : i32
    return %c0_i32, %c0_i32_0, %c0_i32_1 : i32, i32, i32
  }
  func.func @transform_20(%arg0: i32) -> (i32, i32, i32) {
    %c0_i32 = arith.constant 0 : i32
    %c0_i32_0 = arith.constant 0 : i32
    %c0_i32_1 = arith.constant 0 : i32
    %c0_i32_2 = arith.constant 0 : i32
    return %c0_i32, %c0_i32_0, %c0_i32_1 : i32, i32, i32
  }
  func.func @transform_21(%arg0: i32) -> (i32, i32, i32) {
    %c0_i32 = arith.constant 0 : i32
    %c0_i32_0 = arith.constant 0 : i32
    %c0_i32_1 = arith.constant 0 : i32
    %c0_i32_2 = arith.constant 0 : i32
    return %c0_i32, %c0_i32_0, %c0_i32_1 : i32, i32, i32
  }
  func.func @transform_22(%arg0: i32) -> (i32, i32) {
    %c0_i32 = arith.constant 0 : i32
    %c0_i32_0 = arith.constant 0 : i32
    %c0_i32_1 = arith.constant 0 : i32
    return %c0_i32, %c0_i32_0 : i32, i32
  }
  func.func @transform_23(%arg0: i32) -> (i32, i32) {
    %c0_i32 = arith.constant 0 : i32
    %c0_i32_0 = arith.constant 0 : i32
    %c0_i32_1 = arith.constant 0 : i32
    return %c0_i32, %c0_i32_0 : i32, i32
  }
  func.func @transform_24(%arg0: i32) -> (i32, i32) {
    %c0_i32 = arith.constant 0 : i32
    %c0_i32_0 = arith.constant 0 : i32
    %c0_i32_1 = arith.constant 0 : i32
    return %c0_i32, %c0_i32_0 : i32, i32
  }
  func.func @transform_25(%arg0: i32) -> (i32, i32) {
    %c0_i32 = arith.constant 0 : i32
    %c0_i32_0 = arith.constant 0 : i32
    %c0_i32_1 = arith.constant 0 : i32
    return %c0_i32, %c0_i32_0 : i32, i32
  }
  func.func @transform_26(%arg0: i32) -> (i32, i32) {
    %c0_i32 = arith.constant 0 : i32
    %c0_i32_0 = arith.constant 0 : i32
    %c0_i32_1 = arith.constant 0 : i32
    return %c0_i32, %c0_i32_0 : i32, i32
  }
  func.func @transform_27(%arg0: i32) -> (i32, i32) {
    %c0_i32 = arith.constant 0 : i32
    %c0_i32_0 = arith.constant 0 : i32
    %c0_i32_1 = arith.constant 0 : i32
    return %c0_i32, %c0_i32_0 : i32, i32
  }
  func.func @transform_28(%arg0: i32) -> (i32, i32) {
    %c0_i32 = arith.constant 0 : i32
    %c0_i32_0 = arith.constant 0 : i32
    %c0_i32_1 = arith.constant 0 : i32
    return %c0_i32, %c0_i32_0 : i32, i32
  }
  func.func @transform_29(%arg0: i32) -> (i32, i32) {
    %c0_i32 = arith.constant 0 : i32
    %c0_i32_0 = arith.constant 0 : i32
    %c0_i32_1 = arith.constant 0 : i32
    return %c0_i32, %c0_i32_0 : i32, i32
  }
  func.func @transform_30(%arg0: i32) -> (i32, i32) {
    %c0_i32 = arith.constant 0 : i32
    %c0_i32_0 = arith.constant 0 : i32
    %c0_i32_1 = arith.constant 0 : i32
    return %c0_i32, %c0_i32_0 : i32, i32
  }
  func.func @transform_31(%arg0: i32) -> (i32, i32, i32) {
    %c0_i32 = arith.constant 0 : i32
    %c0_i32_0 = arith.constant 0 : i32
    %c0_i32_1 = arith.constant 0 : i32
    %c0_i32_2 = arith.constant 0 : i32
    return %c0_i32, %c0_i32_0, %c0_i32_1 : i32, i32, i32
  }
  func.func @transform_32(%arg0: i32) -> (i32, i32) {
    %c0_i32 = arith.constant 0 : i32
    %c0_i32_0 = arith.constant 0 : i32
    %c0_i32_1 = arith.constant 0 : i32
    return %c0_i32, %c0_i32_0 : i32, i32
  }
  func.func @transform_33(%arg0: i32) -> (i32, i32) {
    %c0_i32 = arith.constant 0 : i32
    %c0_i32_0 = arith.constant 0 : i32
    %c0_i32_1 = arith.constant 0 : i32
    return %c0_i32, %c0_i32_0 : i32, i32
  }
  func.func @transform_34(%arg0: i32) -> (i32, i32) {
    %c0_i32 = arith.constant 0 : i32
    %c0_i32_0 = arith.constant 0 : i32
    %c0_i32_1 = arith.constant 0 : i32
    return %c0_i32, %c0_i32_0 : i32, i32
  }
  func.func @transform_35(%arg0: i32) -> (i32, i32, i32) {
    %c0_i32 = arith.constant 0 : i32
    %c0_i32_0 = arith.constant 0 : i32
    %c0_i32_1 = arith.constant 0 : i32
    %c0_i32_2 = arith.constant 0 : i32
    return %c0_i32, %c0_i32_0, %c0_i32_1 : i32, i32, i32
  }
  func.func @transform_36(%arg0: i32) -> (i32, i32, i32) {
    %c0_i32 = arith.constant 0 : i32
    %c0_i32_0 = arith.constant 0 : i32
    %c0_i32_1 = arith.constant 0 : i32
    %c0_i32_2 = arith.constant 0 : i32
    return %c0_i32, %c0_i32_0, %c0_i32_1 : i32, i32, i32
  }
  func.func @transform_37(%arg0: i32) -> (i32, i32, i32) {
    %c0_i32 = arith.constant 0 : i32
    %c0_i32_0 = arith.constant 0 : i32
    %c0_i32_1 = arith.constant 0 : i32
    %c0_i32_2 = arith.constant 0 : i32
    return %c0_i32, %c0_i32_0, %c0_i32_1 : i32, i32, i32
  }
  func.func @transform_38(%arg0: i32) -> (i32, i32, i32) {
    %c0_i32 = arith.constant 0 : i32
    %c0_i32_0 = arith.constant 0 : i32
    %c0_i32_1 = arith.constant 0 : i32
    %c0_i32_2 = arith.constant 0 : i32
    return %c0_i32, %c0_i32_0, %c0_i32_1 : i32, i32, i32
  }
  func.func @transform_39(%arg0: i32) -> (i32, i32) {
    %c0_i32 = arith.constant 0 : i32
    %c0_i32_0 = arith.constant 0 : i32
    %c0_i32_1 = arith.constant 0 : i32
    return %c0_i32, %c0_i32_0 : i32, i32
  }
  func.func @transform_40(%arg0: i32) -> (i32, i32) {
    %c0_i32 = arith.constant 0 : i32
    %c0_i32_0 = arith.constant 0 : i32
    %c0_i32_1 = arith.constant 0 : i32
    return %c0_i32, %c0_i32_0 : i32, i32
  }
  func.func @transform_41(%arg0: i32) -> (i32, i32) {
    %c0_i32 = arith.constant 0 : i32
    %c0_i32_0 = arith.constant 0 : i32
    %c0_i32_1 = arith.constant 0 : i32
    return %c0_i32, %c0_i32_0 : i32, i32
  }
  func.func @transform_42(%arg0: i32) -> (i32, i32) {
    %c0_i32 = arith.constant 0 : i32
    %c0_i32_0 = arith.constant 0 : i32
    %c0_i32_1 = arith.constant 0 : i32
    return %c0_i32, %c0_i32_0 : i32, i32
  }
  func.func @transform_43(%arg0: i32) -> (i32, i32) {
    %c0_i32 = arith.constant 0 : i32
    %c0_i32_0 = arith.constant 0 : i32
    %c0_i32_1 = arith.constant 0 : i32
    return %c0_i32, %c0_i32_0 : i32, i32
  }
  func.func @transform_44(%arg0: i32) -> (i32, i32) {
    %c0_i32 = arith.constant 0 : i32
    %c0_i32_0 = arith.constant 0 : i32
    %c0_i32_1 = arith.constant 0 : i32
    return %c0_i32, %c0_i32_0 : i32, i32
  }
  func.func @transform_45(%arg0: i32) -> (i32, i32) {
    %c0_i32 = arith.constant 0 : i32
    %c0_i32_0 = arith.constant 0 : i32
    %c0_i32_1 = arith.constant 0 : i32
    return %c0_i32, %c0_i32_0 : i32, i32
  }
  func.func @transform_46(%arg0: i32) -> (i32, i32) {
    %c0_i32 = arith.constant 0 : i32
    %c0_i32_0 = arith.constant 0 : i32
    %c0_i32_1 = arith.constant 0 : i32
    return %c0_i32, %c0_i32_0 : i32, i32
  }
  func.func @transform_47(%arg0: i32) -> (i32, i32) {
    %c0_i32 = arith.constant 0 : i32
    %c0_i32_0 = arith.constant 0 : i32
    %c0_i32_1 = arith.constant 0 : i32
    return %c0_i32, %c0_i32_0 : i32, i32
  }
  func.func @transform_48(%arg0: i32) -> (i32, i32, i32) {
    %c0_i32 = arith.constant 0 : i32
    %c0_i32_0 = arith.constant 0 : i32
    %c0_i32_1 = arith.constant 0 : i32
    %c0_i32_2 = arith.constant 0 : i32
    return %c0_i32, %c0_i32_0, %c0_i32_1 : i32, i32, i32
  }
  func.func @transform_49(%arg0: i32) -> (i32, i32) {
    %c0_i32 = arith.constant 0 : i32
    %c0_i32_0 = arith.constant 0 : i32
    %c0_i32_1 = arith.constant 0 : i32
    return %c0_i32, %c0_i32_0 : i32, i32
  }
  func.func @transform_50(%arg0: i32) -> (i32, i32) {
    %c0_i32 = arith.constant 0 : i32
    %c0_i32_0 = arith.constant 0 : i32
    %c0_i32_1 = arith.constant 0 : i32
    return %c0_i32, %c0_i32_0 : i32, i32
  }
  func.func @transform_51(%arg0: i32) -> (i32, i32) {
    %c0_i32 = arith.constant 0 : i32
    %c0_i32_0 = arith.constant 0 : i32
    %c0_i32_1 = arith.constant 0 : i32
    return %c0_i32, %c0_i32_0 : i32, i32
  }
  func.func @transform_52(%arg0: i32) -> (i32, i32, i32) {
    %c0_i32 = arith.constant 0 : i32
    %c0_i32_0 = arith.constant 0 : i32
    %c0_i32_1 = arith.constant 0 : i32
    %c0_i32_2 = arith.constant 0 : i32
    return %c0_i32, %c0_i32_0, %c0_i32_1 : i32, i32, i32
  }
  func.func @transform_53(%arg0: i32) -> (i32, i32, i32) {
    %c0_i32 = arith.constant 0 : i32
    %c0_i32_0 = arith.constant 0 : i32
    %c0_i32_1 = arith.constant 0 : i32
    %c0_i32_2 = arith.constant 0 : i32
    return %c0_i32, %c0_i32_0, %c0_i32_1 : i32, i32, i32
  }
  func.func @transform_54(%arg0: i32) -> (i32, i32, i32) {
    %c0_i32 = arith.constant 0 : i32
    %c0_i32_0 = arith.constant 0 : i32
    %c0_i32_1 = arith.constant 0 : i32
    %c0_i32_2 = arith.constant 0 : i32
    return %c0_i32, %c0_i32_0, %c0_i32_1 : i32, i32, i32
  }
  func.func @transform_55(%arg0: i32) -> (i32, i32, i32) {
    %c0_i32 = arith.constant 0 : i32
    %c0_i32_0 = arith.constant 0 : i32
    %c0_i32_1 = arith.constant 0 : i32
    %c0_i32_2 = arith.constant 0 : i32
    return %c0_i32, %c0_i32_0, %c0_i32_1 : i32, i32, i32
  }
  func.func @transform_56(%arg0: i32) -> (i32, i32) {
    %c0_i32 = arith.constant 0 : i32
    %c0_i32_0 = arith.constant 0 : i32
    %c0_i32_1 = arith.constant 0 : i32
    return %c0_i32, %c0_i32_0 : i32, i32
  }
  func.func @transform_57(%arg0: i32) -> (i32, i32) {
    %c0_i32 = arith.constant 0 : i32
    %c0_i32_0 = arith.constant 0 : i32
    %c0_i32_1 = arith.constant 0 : i32
    return %c0_i32, %c0_i32_0 : i32, i32
  }
  func.func @transform_58(%arg0: i32) -> (i32, i32) {
    %c0_i32 = arith.constant 0 : i32
    %c0_i32_0 = arith.constant 0 : i32
    %c0_i32_1 = arith.constant 0 : i32
    return %c0_i32, %c0_i32_0 : i32, i32
  }
  func.func @transform_59(%arg0: i32) -> (i32, i32) {
    %c0_i32 = arith.constant 0 : i32
    %c0_i32_0 = arith.constant 0 : i32
    %c0_i32_1 = arith.constant 0 : i32
    return %c0_i32, %c0_i32_0 : i32, i32
  }
  func.func @transform_60(%arg0: i32) -> (i32, i32) {
    %c0_i32 = arith.constant 0 : i32
    %c0_i32_0 = arith.constant 0 : i32
    %c0_i32_1 = arith.constant 0 : i32
    return %c0_i32, %c0_i32_0 : i32, i32
  }
  func.func @transform_61(%arg0: i32) -> (i32, i32) {
    %c0_i32 = arith.constant 0 : i32
    %c0_i32_0 = arith.constant 0 : i32
    %c0_i32_1 = arith.constant 0 : i32
    return %c0_i32, %c0_i32_0 : i32, i32
  }
  func.func @transform_62(%arg0: i32) -> (i32, i32) {
    %c0_i32 = arith.constant 0 : i32
    %c0_i32_0 = arith.constant 0 : i32
    %c0_i32_1 = arith.constant 0 : i32
    return %c0_i32, %c0_i32_0 : i32, i32
  }
  func.func @transform_63(%arg0: i32) -> (i32, i32) {
    %c0_i32 = arith.constant 0 : i32
    %c0_i32_0 = arith.constant 0 : i32
    %c0_i32_1 = arith.constant 0 : i32
    return %c0_i32, %c0_i32_0 : i32, i32
  }
  func.func @transform_64(%arg0: i32) -> (i32, i32) {
    %c0_i32 = arith.constant 0 : i32
    %c0_i32_0 = arith.constant 0 : i32
    %c0_i32_1 = arith.constant 0 : i32
    return %c0_i32, %c0_i32_0 : i32, i32
  }
  func.func @transform_65(%arg0: i32) -> (i32, i32, i32) {
    %c0_i32 = arith.constant 0 : i32
    %c0_i32_0 = arith.constant 0 : i32
    %c0_i32_1 = arith.constant 0 : i32
    %c0_i32_2 = arith.constant 0 : i32
    return %c0_i32, %c0_i32_0, %c0_i32_1 : i32, i32, i32
  }
  func.func @transform_66(%arg0: i32) -> (i32, i32) {
    %c0_i32 = arith.constant 0 : i32
    %c0_i32_0 = arith.constant 0 : i32
    %c0_i32_1 = arith.constant 0 : i32
    return %c0_i32, %c0_i32_0 : i32, i32
  }
  func.func @transform_67(%arg0: i32) -> (i32, i32) {
    %c0_i32 = arith.constant 0 : i32
    %c0_i32_0 = arith.constant 0 : i32
    %c0_i32_1 = arith.constant 0 : i32
    return %c0_i32, %c0_i32_0 : i32, i32
  }
  func.func @transform_68(%arg0: i32) -> (i32, i32, i32) {
    %c0_i32 = arith.constant 0 : i32
    %c0_i32_0 = arith.constant 0 : i32
    %c0_i32_1 = arith.constant 0 : i32
    return %arg0, %c0_i32, %c0_i32_0 : i32, i32, i32
  }
}

</mosaic_0001>

<bundles_post_ra>
// kernel: encoder_htsat_forward.1
= control target key start
LH: loop header
LB: loop body
LE: loop exit
PB: predicated region body
PF: predicated region fallthrough
CT: control target
= control target key end

     0   :  { %s11586_s6 = smov 1   ;;  %s11587_s10 = smov 2   ;;  %s14535_s0 = inlined_call_operand.smem [shape: u32[69], index: -1, kind: input, shape index: {}] }
   0x1   :  { %s11743_s5 = sld [smem:[%s14535_s0]]   ;;  %s11588_s14 = smov 3  }
   0x2   :  { %s11748_s9 = sld [smem:[%s14535_s0 + %s11586_s6]]   ;;  %s11589_s18 = smov 4  }
   0x3   :  { %s11753_s13 = sld [smem:[%s14535_s0 + %s11587_s10]]   ;;  %s11590_s22 = smov 5  }
   0x4   :  { %s11758_s17 = sld [smem:[%s14535_s0 + %s11588_s14]]   ;;  %s11591_s26 = smov 6  }
   0x5   :  { %s11763_s21 = sld [smem:[%s14535_s0 + %s11589_s18]]   ;;  %s11592_s30 = smov 7  }
   0x6   :  { %s11768_s25 = sld [smem:[%s14535_s0 + %s11590_s22]]   ;;  %s11593_s4 = smov 8  }
   0x7   :  { %14657 = sst [smem:[#allocation111_spill]] %s11743_s5  ;;  %s11594_s10 = smov 9  }
   0x8   :  { %14658 = sst [smem:[#allocation112_spill]] %s11748_s9  ;;  %s11595_s15 = smov 10  }
   0x9   :  { %14659 = sst [smem:[#allocation113_spill]] %s11753_s13  ;;  %s11596_s20 = smov 11  }
   0xa   :  { %14660 = sst [smem:[#allocation114_spill]] %s11758_s17  ;;  %s11598_s1 = smov 13  }
   0xb   :  { %14661 = sst [smem:[#allocation115_spill]] %s11763_s21  ;;  %s11599_s7 = smov 14  }
   0xc   :  { %s11773_s29 = sld [smem:[%s14535_s0 + %s11591_s26]]   ;;  %s11597_s26 = smov 12  }
   0xd   :  { %s11778_s3 = sld [smem:[%s14535_s0 + %s11592_s30]]   ;;  %s11601_s22 = smov 16  }
   0xe   :  { %s11783_s8 = sld [smem:[%s14535_s0 + %s11593_s4]]   ;;  %s11602_s28 = smov 17  }
   0xf   :  { %s11788_s14 = sld [smem:[%s14535_s0 + %s11594_s10]]  }
  0x10   :  { %s11793_s19 = sld [smem:[%s14535_s0 + %s11595_s15]]   ;;  %s11600_s15 = smov 15  }
  0x11   :  { %s11798_s24 = sld [smem:[%s14535_s0 + %s11596_s20]]  }
  0x12   :  { %14662 = sst [smem:[#allocation116_spill]] %s11773_s29 }
  0x13   :  { %14663 = sst [smem:[#allocation117_spill]] %s11778_s3 }
  0x14   :  { %14664 = sst [smem:[#allocation118_spill]] %s11783_s8 }
  0x15   :  { %14665 = sst [smem:[#allocation119_spill]] %s11788_s14 }
  0x16   :  { %s11803_s30 = sld [smem:[%s14535_s0 + %s11597_s26]]  }
  0x17   :  { %14666 = sst [smem:[#allocation120_spill]] %s11798_s24 }
  0x18   :  { %s11808_s6 = sld [smem:[%s14535_s0 + %s11598_s1]]  }
  0x19   :  { %s11813_s12 = sld [smem:[%s14535_s0 + %s11599_s7]]   ;;  %s11603_s7 = smov 18  }
  0x1a   :  { %s11818_s20 = sld [smem:[%s14535_s0 + %s11600_s15]]   ;;  %s11604_s15 = smov 19  }
  0x1b   :  { %s11823_s27 = sld [smem:[%s14535_s0 + %s11601_s22]]   ;;  %s11605_s22 = smov 20  }
  0x1c   :  { %s11828_s4 = sld [smem:[%s14535_s0 + %s11602_s28]]   ;;  %s11606_s28 = smov 21  }
  0x1d   :  { %s11833_s9 = sld [smem:[%s14535_s0 + %s11603_s7]]   ;;  %s11607_s7 = smov 22  }
  0x1e   :  { %14667 = sst [smem:[#allocation121_spill]] %s11808_s6 }
  0x1f   :  { %14668 = sst [smem:[#allocation122_spill]] %s11813_s12 }
  0x20   :  { %14669 = sst [smem:[#allocation123_spill]] %s11818_s20 }
  0x21   :  { %s11838_s8 = sld [smem:[%s14535_s0 + %s11604_s15]]   ;;  %s11608_s15 = smov 23  }
  0x22   :  { %14670 = sst [smem:[#allocation124_spill]] %s11828_s4 }
  0x23   :  { %14671 = sst [smem:[#allocation125_spill]] %s11833_s9 }
  0x24   :  { %s11843_s5 = sld [smem:[%s14535_s0 + %s11605_s22]]   ;;  %s11609_s22 = smov 24  }
  0x25   :  { %s11848_s4 = sld [smem:[%s14535_s0 + %s11606_s28]]   ;;  %s11610_s28 = smov 25  }
  0x26   :  { %s11853_s20 = sld [smem:[%s14535_s0 + %s11607_s7]]   ;;  %s11611_s7 = smov 26  }
  0x27   :  { %14672 = sst [smem:[#allocation126_spill]] %s11838_s8 }
  0x28   :  { %s11858_s8 = sld [smem:[%s14535_s0 + %s11608_s15]]   ;;  %s11612_s15 = smov 27  }
  0x29   :  { %s11873_s6 = sld [smem:[%s14535_s0 + %s11611_s7]]   ;;  %s11615_s7 = smov 30  }
  0x2a   :  { %14673 = sst [smem:[#allocation127_spill]] %s11843_s5 }
  0x2b   :  { %14674 = sst [smem:[#allocation128_spill]] %s11848_s4 }
  0x2c   :  { %s11863_s5 = sld [smem:[%s14535_s0 + %s11609_s22]]   ;;  %s11613_s22 = smov 28  }
  0x2d   :  { %s11868_s4 = sld [smem:[%s14535_s0 + %s11610_s28]]   ;;  %s11614_s28 = smov 29  }
  0x2e   :  { %14675 = sst [smem:[#allocation129_spill]] %s11858_s8 }
  0x2f   :  { %14678 = sst [smem:[#allocation132_spill]] %s11873_s6 }
  0x30   :  { %s11878_s8 = sld [smem:[%s14535_s0 + %s11612_s15]]   ;;  %s11616_s15 = smov 31  }
  0x31   :  { %s11893_s24 = sld [smem:[%s14535_s0 + %s11615_s7]]   ;;  %s11619_s7 = smov 34  }
  0x32   :  { %14676 = sst [smem:[#allocation130_spill]] %s11863_s5 }
  0x33   :  { %14677 = sst [smem:[#allocation131_spill]] %s11868_s4 }
  0x34   :  { %s11883_s5 = sld [smem:[%s14535_s0 + %s11613_s22]]   ;;  %s11617_s22 = smov 32  }
  0x35   :  { %s11888_s4 = sld [smem:[%s14535_s0 + %s11614_s28]]   ;;  %s11618_s28 = smov 33  }
  0x36   :  { %14679 = sst [smem:[#allocation133_spill]] %s11878_s8 }
  0x37   :  { %s11898_s8 = sld [smem:[%s14535_s0 + %s11616_s15]]   ;;  %s11620_s15 = smov 35  }
  0x38   :  { %s11903_s14 = sld [smem:[%s14535_s0 + %s11617_s22]]   ;;  %s11621_s22 = smov 36  }
  0x39   :  { %s11913_s29 = sld [smem:[%s14535_s0 + %s11619_s7]]   ;;  %s11623_s7 = smov 38  }
  0x3a   :  { %14680 = sst [smem:[#allocation134_spill]] %s11883_s5 }
  0x3b   :  { %14681 = sst [smem:[#allocation135_spill]] %s11888_s4 }
  0x3c   :  { %s11908_s4 = sld [smem:[%s14535_s0 + %s11618_s28]]   ;;  %s11622_s28 = smov 37  }
  0x3d   :  { %14682 = sst [smem:[#allocation136_spill]] %s11898_s8 }
  0x3e   :  { %14683 = sst [smem:[#allocation137_spill]] %s11903_s14 }
  0x3f   :  { %14685 = sst [smem:[#allocation139_spill]] %s11913_s29 }
  0x40   :  { %s11918_s8 = sld [smem:[%s14535_s0 + %s11620_s15]]   ;;  %s11624_s15 = smov 39  }
  0x41   :  { %s11923_s14 = sld [smem:[%s14535_s0 + %s11621_s22]]   ;;  %s11625_s22 = smov 40  }
  0x42   :  { %14684 = sst [smem:[#allocation138_spill]] %s11908_s4 }
  0x43   :  { %s11928_s21 = sld [smem:[%s14535_s0 + %s11622_s28]]   ;;  %s11626_s28 = smov 41  }
  0x44   :  { %s11933_s29 = sld [smem:[%s14535_s0 + %s11623_s7]]   ;;  %s11627_s7 = smov 42  }
  0x45   :  { %s11938_s13 = sld [smem:[%s14535_s0 + %s11624_s15]]   ;;  %s11628_s15 = smov 43  }
  0x46   :  { %14686 = sst [smem:[#allocation140_spill]] %s11918_s8 }
  0x47   :  { %14687 = sst [smem:[#allocation141_spill]] %s11923_s14 }
  0x48   :  { %s11943_s14 = sld [smem:[%s14535_s0 + %s11625_s22]]   ;;  %s11629_s22 = smov 44  }
  0x49   :  { %14688 = sst [smem:[#allocation142_spill]] %s11928_s21 }
  0x4a   :  { %14689 = sst [smem:[#allocation143_spill]] %s11933_s29 }
  0x4b   :  { %14690 = sst [smem:[#allocation144_spill]] %s11938_s13 }
  0x4c   :  { %s11948_s21 = sld [smem:[%s14535_s0 + %s11626_s28]]   ;;  %s11630_s28 = smov 45  }
  0x4d   :  { %s11953_s29 = sld [smem:[%s14535_s0 + %s11627_s7]]   ;;  %s11631_s7 = smov 46  }
  0x4e   :  { %14691 = sst [smem:[#allocation145_spill]] %s11943_s14 }
  0x4f   :  { %s11958_s13 = sld [smem:[%s14535_s0 + %s11628_s15]]   ;;  %s11632_s15 = smov 47  }
  0x50   :  { %s11963_s14 = sld [smem:[%s14535_s0 + %s11629_s22]]   ;;  %s11633_s22 = smov 48  }
  0x52   :  { %14692 = sst [smem:[#allocation146_spill]] %s11948_s21 }
  0x53   :  { %14693 = sst [smem:[#allocation147_spill]] %s11953_s29 }
  0x54   :  { %s11968_s21 = sld [smem:[%s14535_s0 + %s11630_s28]]   ;;  %s11634_s28 = smov 49  }
  0x55   :  { %14694 = sst [smem:[#allocation148_spill]] %s11958_s13 }
  0x56   :  { %14695 = sst [smem:[#allocation149_spill]] %s11963_s14 }
  0x57   :  { %s11973_s29 = sld [smem:[%s14535_s0 + %s11631_s7]]   ;;  %s11635_s7 = smov 50  }
  0x58   :  { %s11978_s13 = sld [smem:[%s14535_s0 + %s11632_s15]]   ;;  %s11636_s15 = smov 51  }
  0x59   :  { %s11983_s14 = sld [smem:[%s14535_s0 + %s11633_s22]]   ;;  %s11637_s22 = smov 52  }
  0x5a   :  { %14696 = sst [smem:[#allocation150_spill]] %s11968_s21 }
  0x5b   :  { %s11988_s21 = sld [smem:[%s14535_s0 + %s11634_s28]]   ;;  %s11638_s28 = smov 53  }
  0x5d   :  { %14697 = sst [smem:[#allocation151_spill]] %s11973_s29 }
  0x5e   :  { %14698 = sst [smem:[#allocation152_spill]] %s11978_s13 }
  0x5f   :  { %14699 = sst [smem:[#allocation153_spill]] %s11983_s14 }
  0x60   :  { %s11993_s29 = sld [smem:[%s14535_s0 + %s11635_s7]]   ;;  %s11639_s7 = smov 54  }
  0x61   :  { %14700 = sst [smem:[#allocation154_spill]] %s11988_s21 }
  0x62   :  { %s11998_s13 = sld [smem:[%s14535_s0 + %s11636_s15]]   ;;  %s11640_s15 = smov 55  }
  0x63   :  { %s12003_s14 = sld [smem:[%s14535_s0 + %s11637_s22]]   ;;  %s11641_s22 = smov 56  }
  0x64   :  { %s12008_s21 = sld [smem:[%s14535_s0 + %s11638_s28]]   ;;  %s11642_s28 = smov 57  }
  0x66   :  { %14701 = sst [smem:[#allocation155_spill]] %s11993_s29 }
  0x67   :  { %s12013_s29 = sld [smem:[%s14535_s0 + %s11639_s7]]   ;;  %s11643_s7 = smov 58  }
  0x68   :  { %14702 = sst [smem:[#allocation156_spill]] %s11998_s13 }
  0x69   :  { %14703 = sst [smem:[#allocation157_spill]] %s12003_s14 }
  0x6a   :  { %14704 = sst [smem:[#allocation158_spill]] %s12008_s21 }
  0x6b   :  { %s12018_s13 = sld [smem:[%s14535_s0 + %s11640_s15]]   ;;  %s11644_s15 = smov 59  }
  0x6c   :  { %s12023_s14 = sld [smem:[%s14535_s0 + %s11641_s22]]   ;;  %s11645_s22 = smov 60  }
  0x6d   :  { %14705 = sst [smem:[#allocation159_spill]] %s12013_s29 }
  0x6e   :  { %s12028_s21 = sld [smem:[%s14535_s0 + %s11642_s28]]   ;;  %s11646_s28 = smov 61  }
  0x6f   :  { %s12033_s29 = sld [smem:[%s14535_s0 + %s11643_s7]]   ;;  %s11647_s7 = smov 62  }
  0x71   :  { %14706 = sst [smem:[#allocation160_spill]] %s12018_s13 }
  0x72   :  { %14707 = sst [smem:[#allocation161_spill]] %s12023_s14 }
  0x73   :  { %s12038_s13 = sld [smem:[%s14535_s0 + %s11644_s15]]   ;;  %s11648_s15 = smov 63  }
  0x74   :  { %14708 = sst [smem:[#allocation162_spill]] %s12028_s21 }
  0x75   :  { %14709 = sst [smem:[#allocation163_spill]] %s12033_s29 }
  0x76   :  { %s12043_s14 = sld [smem:[%s14535_s0 + %s11645_s22]]   ;;  %s11649_s22 = smov 64  }
  0x77   :  { %s12048_s21 = sld [smem:[%s14535_s0 + %s11646_s28]]   ;;  %s11650_s28 = smov 65  }
  0x78   :  { %s12053_s29 = sld [smem:[%s14535_s0 + %s11647_s7]]   ;;  %s11651_s7 = smov 66  }
  0x79   :  { %14710 = sst [smem:[#allocation164_spill]] %s12038_s13 }
  0x7a   :  { %s12058_s13 = sld [smem:[%s14535_s0 + %s11648_s15]]   ;;  %s11652_s15 = smov 67  }
  0x7c   :  { %14711 = sst [smem:[#allocation165_spill]] %s12043_s14 }
  0x7d   :  { %14712 = sst [smem:[#allocation166_spill]] %s12048_s21 }
  0x7e   :  { %14713 = sst [smem:[#allocation167_spill]] %s12053_s29 }
  0x7f   :  { %s12063_s14 = sld [smem:[%s14535_s0 + %s11649_s22]]   ;;  %s11653_s22 = smov 68  }
  0x80   :  { %14714 = sst [smem:[#allocation168_spill]] %s12058_s13 }
  0x81   :  { %s12068_s21 = sld [smem:[%s14535_s0 + %s11650_s28]]  }
  0x82   :  { %s12073_s29 = sld [smem:[%s14535_s0 + %s11651_s7]]  }
  0x83   :  { %s12078_s13 = sld [smem:[%s14535_s0 + %s11652_s15]]  }
  0x85   :  { %14715 = sst [smem:[#allocation169_spill]] %s12063_s14 }
  0x86   :  { %s12083_s14 = sld [smem:[%s14535_s0 + %s11653_s22]]  }
  0x87   :  { %142 = vsyncpa [#allocation3], 0 }
  0x88   :  { %143 = vsyncpa [#allocation6], 0 }
  0x89   :  { %144 = vsyncpa [#allocation9], 0 }
  0x8a   :  { %145 = vsyncpa [#allocation12], 0 }
  0x8b   :  { %146 = vsyncpa [#allocation15], 0 }
  0x8c   :  { %147 = vsyncpa [#allocation18], 0 }
  0x8d   :  { %148 = vsyncpa [#allocation21], 0 }
  0x8e   :  { %149 = vsyncpa [#allocation24], 0 }
  0x8f   :  { %150 = vsyncpa [#allocation27], 0 }
  0x90   :  { %151 = vsyncpa [#allocation30], 0 }
  0x91   :  { %152 = vsyncpa [#allocation33], 0 }
  0x92   :  { %153 = vsyncpa [#allocation36], 0 }
  0x93   :  { %154 = vsyncpa [#allocation39], 0 }
  0x94   :  { %155 = vsyncpa [#allocation42], 0 }
  0x95   :  { %156 = vsyncpa [#allocation45], 0 }
  0x96   :  { %157 = vsyncpa [#allocation48], 0 }
  0x97   :  { %158 = vsyncpa [#allocation51], 0 }
  0x98   :  { %159 = vsyncpa [#allocation54], 0 }
  0x99   :  { %160 = vsyncpa [#allocation57], 0 }
  0x9a   :  { %161 = vsyncpa [#allocation60], 0 }
  0x9b   :  { %162 = vsyncpa [#allocation63], 0 }
  0x9c   :  { %163 = vsyncpa [#allocation66], 0 }
  0x9d   :  { %164 = vsyncpa [#allocation69], 0 }
  0x9e   :  { %165 = vsyncpa [#allocation72], 0 }
  0x9f   :  { %166 = vsyncpa [#allocation75], 0 }
  0xa0   :  { %167 = vsyncpa [#allocation78], 0 }
  0xa1   :  { %168 = vsyncpa [#allocation81], 0 }
  0xa2   :  { %169 = vsyncpa [#allocation4], 0 }
  0xa3   :  { %171 = vsyncpa [#allocation4 + $0x1], 0  ;;  %s12085_s0 = smov 0   ;;  %s12087_s28 = smov 0  }
  0xa4   :  { %s12089_s1 = smov 0   ;;  %s12091_s2 = smov 0  }
  0xa5 LB: > { %s14716_s17 = sld [smem:[#allocation114_spill]]  ;;  %s12106_s7 = sadd.s32 4294967295, %s11584_s2   ;;  %s11584_s2 = sphi %s12091_s2, %s14815_s2   ;;  %s11580_s1 = sphi %s12089_s1, %s14817_s1   ;;  %s11576_s28 = sphi %s12087_s28, %s14819_s28   ;;  %s11572_s0 = sphi %s12085_s0, %s14818_s0  }
  0xa6   : > { %s14717_s9 = sld [smem:[#allocation125_spill]]  ;;  %s8665_s10 = sadd.s32 4294967294, %s11584_s2  }
  0xa7   : > { %s14718_s8 = sld [smem:[#allocation140_spill]]  ;;  %s12110_s11 = sadd.s32 1, %s11584_s2  }
  0xa8   : > { %s14719_s6 = sld [smem:[#allocation132_spill]]  ;;  %s1617_s15 = sadd.s32 1, %s11580_s1 }
  0xa9   : > { %s14720_s5 = sld [smem:[#allocation134_spill]]  ;;  %s1614_s16 = ssub.s32 %s11584_s2, %s12110_s11 }
  0xaa   : > { %s14721_s4 = sld [smem:[#allocation138_spill]]  ;;  %p1627_p0 = scmp.ne.s32.totalorder %s11580_s1, %s11576_s28 }
  0xab   : > { %s14722_s12 = sld [smem:[#allocation122_spill]]  ;;  %p1615_p1 = scmp.eq.s32.totalorder %s1614_s16, 0 }
  0xac   : > { %s14723_s3 = sld [smem:[#allocation117_spill]]  ;;  %p1628_p2 = scmp.eq.s32.totalorder %s12106_s7, 1 }
  0xad   : > { %14724 = sst [smem:[#allocation170_spill]] %s11572_s0  ;;  %p1633_p3 = scmp.ne.s32.totalorder %s11576_s28, %s11572_s0 }
  0xae   : > { %14725 = sst [smem:[#allocation171_spill]] %s11580_s1  ;;  %p1634_p4 = scmp.eq.s32.totalorder %s8665_s10, 1 }
  0xaf   : > { %14726 = sst [smem:[#allocation172_spill]] %s11584_s2  ;;  %p12123_p5 = por %p1628_p2, %p1627_p0 }
  0xb0   : > { %14727 = sst [smem:[#allocation173_spill]] %s12110_s11  ;;  %p12127_p6 = por %p1634_p4, %p1633_p3 }
  0xb1   : > { %s12121_s18 = scalar_select %p1615_p1, %s11580_s1, %s1617_s15  }
  0xb2   : > { %s14729_s22 = scalar_select %p12123_p5, 1, 0 }
  0xb3   : > { %14728 = sst [smem:[#allocation174_spill]] %s12121_s18  ;;  %p8666_p7 = scmp.ge.s32.totalorder %s11584_s2, 1 }
  0xb4   : > { %14730 = sst [smem:[#allocation175_spill]] %s14729_s22  ;;  %p1641_p8 = scmp.lt.s32.totalorder %s11584_s2, 3 }
  0xb5   : > { %s14731_s23 = scalar_select %p12127_p6, 1, 0 }
  0xb6   : > { %p12133_p9 = pnand %p8666_p7, %p1641_p8 }
  0xb7   : > { %14732 = sst [smem:[#allocation176_spill]] %s14731_s23  ;;  %p9257_p10 = scmp.eq.s32.totalorder (!%p12133_p9), %s12106_s7, 0 }
  0xb8   : > { %1645 = sbr.rel (%p12133_p9) target bundleno = 874 (0x36a), region = 12  ;;  %s1668_s10 = sshll.u32 (!%p12133_p9), %s14716_s17, 4  ;;  %s1669_s10 = int_to_ptr.hbm [resolvable:$true] %s1668_s10 }
  0xb9   : > { %s11654_s15 = smov (!%p12133_p9), [#allocation5]   ;;  %s1694_s18 = sshll.u32 (!%p12133_p9), %s11768_s25, 4  ;;  %s12142_s18 = int_to_ptr.hbm [resolvable:$true] %s1694_s18 }
  0xba   : > { %s1670_s16 = sshll.u32 (!%p12133_p9), %s11654_s15, 4  ;;  %s9958_s1 = sshra.s32 (!%p12133_p9), %s1669_s10, 4  ;;  %s1671_s16 = int_to_ptr.vmem [resolvable:$true] %s1670_s16  ;;  %s9959_s1 = int_to_ptr.hbm [resolvable:$true] %s9958_s1 }
  0xbb   : > { %s9960_s11 = scalar_lea.hbm (!%p12133_p9), %s9959_s1, 1  ;;  %s9964_s23 = scalar_lea.hbm (!%p12133_p9), %s14716_s17, 1 }
  0xbc   : > { %p9961_p11 = scmp.ne.s32.totalorder (!%p12133_p9), %s9959_s1, %s9960_s11  ;;  %p9965_p0 = scmp.lt.s32.totalorder (!%p12133_p9), %s9959_s1, %s14716_s17 }
  0xbd   : > { %p9966_p1 = scmp.lt.s32.totalorder %s9964_s23, %s9960_s11 }
  0xbe   : > { %p9962_p12 = pnand %p9961_p11, %p9257_p10 }
  0xbf   : > { %p9967_p2 = por %p9966_p1, %p9965_p0 }
  0xc0   : > { %p9963_p13 = pneg %p9962_p12 }
  0xc2   : > { %p9968_p3 = pnand %p9967_p2, %p9963_p13 }
  0xc4   : > { %9971 = shalt.err (!%p9968_p3)
}
  0xc5   : > { %9046 = dma.hbm_to_vmem [thread:$0]  (%p9257_p10), %s1669_s10, 16, %s1671_s16, [#allocation6]  }
  0xc6   : > { %s1720_s15 = sshll.u32 %s14723_s3, 4  ;;  %s11655_s0 = smov [#allocation8]   ;;  %s12151_s15 = int_to_ptr.hbm [resolvable:$true] %s1720_s15 }
  0xc7   : > { %s1696_s2 = sshll.u32 %s11655_s0, 4  ;;  %s9986_s22 = sshra.s32 %s12142_s18, 4  ;;  %s1697_s2 = int_to_ptr.vmem [resolvable:$true] %s1696_s2  ;;  %s9987_s22 = int_to_ptr.hbm [resolvable:$true] %s9986_s22 }
  0xc8   : > { %s9988_s1 = scalar_lea.hbm %s9987_s22, 1  ;;  %s9992_s11 = scalar_lea.hbm %s11768_s25, 1 }
  0xc9   : > { %p9989_p4 = scmp.ne.s32.totalorder %s9987_s22, %s9988_s1  ;;  %p9993_p11 = scmp.lt.s32.totalorder %s9987_s22, %s11768_s25 }
  0xca   : > { %p9994_p12 = scmp.lt.s32.totalorder %s9992_s11, %s9988_s1 }
  0xcb   : > { %p9990_p7 = pnand %p9989_p4, %p9257_p10 }
  0xcc   : > { %p9995_p13 = por %p9994_p12, %p9993_p11 }
  0xcd   : > { %p9991_p8 = pneg %p9990_p7 }
  0xcf   : > { %p9996_p0 = pnand %p9995_p13, %p9991_p8 }
  0xd1   : > { %9999 = shalt.err (!%p9996_p0)
}
  0xd2   : > { %9050 = dma.hbm_to_vmem [thread:$0]  (%p9257_p10), %s12142_s18, 16, %s1697_s2, [#allocation9]  }
  0xd3   : > { %s11656_s0 = smov [#allocation11]   ;;  %s1747_s10 = sshll.u32 %s11793_s19, 4  ;;  %s12162_s10 = int_to_ptr.hbm [resolvable:$true] %s1747_s10 }
  0xd4   : > { %s1722_s23 = sshll.u32 %s11656_s0, 4  ;;  %s10014_s22 = sshra.s32 %s12151_s15, 4  ;;  %s1723_s23 = int_to_ptr.vmem [resolvable:$true] %s1722_s23  ;;  %s10015_s22 = int_to_ptr.hbm [resolvable:$true] %s10014_s22 }
  0xd5   : > { %s10016_s16 = scalar_lea.hbm %s10015_s22, 1  ;;  %s10020_s1 = scalar_lea.hbm %s14723_s3, 1 }
  0xd6   : > { %p10017_p1 = scmp.ne.s32.totalorder %s10015_s22, %s10016_s16  ;;  %p10021_p4 = scmp.lt.s32.totalorder %s10015_s22, %s14723_s3 }
  0xd7   : > { %p10022_p7 = scmp.lt.s32.totalorder %s10020_s1, %s10016_s16 }
  0xd8   : > { %p10018_p2 = pnand %p10017_p1, %p9257_p10 }
  0xd9   : > { %p10023_p8 = por %p10022_p7, %p10021_p4 }
  0xda   : > { %p10019_p3 = pneg %p10018_p2 }
  0xdc   : > { %p10024_p11 = pnand %p10023_p8, %p10019_p3 }
  0xde   : > { %10027 = shalt.err (!%p10024_p11)
}
  0xdf   : > { %9054 = dma.hbm_to_vmem [thread:$0]  (%p9257_p10), %s12151_s15, 16, %s1723_s23, [#allocation12]  }
  0xe0   : > { %s1771_s2 = sshll.u32 %s11803_s30, 4  ;;  %s11657_s18 = smov [#allocation14]   ;;  %s12173_s2 = int_to_ptr.hbm [resolvable:$true] %s1771_s2 }
  0xe1   : > { %s1749_s11 = sshll.u32 %s11657_s18, 4  ;;  %s10042_s0 = sshra.s32 %s12162_s10, 4  ;;  %s1750_s11 = int_to_ptr.vmem [resolvable:$true] %s1749_s11  ;;  %s10043_s0 = int_to_ptr.hbm [resolvable:$true] %s10042_s0 }
  0xe2   : > { %s10044_s22 = scalar_lea.hbm %s10043_s0, 1  ;;  %s10048_s16 = scalar_lea.hbm %s11793_s19, 1 }
  0xe3   : > { %p10045_p12 = scmp.ne.s32.totalorder %s10043_s0, %s10044_s22  ;;  %p10049_p1 = scmp.lt.s32.totalorder %s10043_s0, %s11793_s19 }
  0xe4   : > { %p10050_p2 = scmp.lt.s32.totalorder %s10048_s16, %s10044_s22 }
  0xe5   : > { %p10046_p13 = pnand %p10045_p12, %p9257_p10 }
  0xe6   : > { %p10051_p3 = por %p10050_p2, %p10049_p1 }
  0xe7   : > { %p10047_p0 = pneg %p10046_p13 }
  0xe9   : > { %p10052_p4 = pnand %p10051_p3, %p10047_p0 }
  0xeb   : > { %10055 = shalt.err (!%p10052_p4)
}
  0xec   : > { %9058 = dma.hbm_to_vmem [thread:$0]  (%p9257_p10), %s12162_s10, 16, %s1750_s11, [#allocation15]  }
  0xed   : > { %s11658_s15 = smov [#allocation17]   ;;  %s1794_s1 = sshll.u32 %s14722_s12, 4  ;;  %s12184_s1 = int_to_ptr.hbm [resolvable:$true] %s1794_s1 }
  0xee   : > { %s1773_s23 = sshll.u32 %s11658_s15, 4  ;;  %s10070_s18 = sshra.s32 %s12173_s2, 4  ;;  %s1774_s23 = int_to_ptr.vmem [resolvable:$true] %s1773_s23  ;;  %s10071_s18 = int_to_ptr.hbm [resolvable:$true] %s10070_s18 }
  0xef   : > { %s10072_s0 = scalar_lea.hbm %s10071_s18, 1  ;;  %s10076_s22 = scalar_lea.hbm %s11803_s30, 1 }
  0xf0   : > { %p10073_p7 = scmp.ne.s32.totalorder %s10071_s18, %s10072_s0  ;;  %p10077_p12 = scmp.lt.s32.totalorder %s10071_s18, %s11803_s30 }
  0xf1   : > { %p10078_p13 = scmp.lt.s32.totalorder %s10076_s22, %s10072_s0 }
  0xf2   : > { %p10074_p8 = pnand %p10073_p7, %p9257_p10 }
  0xf3   : > { %p10079_p0 = por %p10078_p13, %p10077_p12 }
  0xf4   : > { %p10075_p11 = pneg %p10074_p8 }
  0xf6   : > { %p10080_p1 = pnand %p10079_p0, %p10075_p11 }
  0xf8   : > { %10083 = shalt.err (!%p10080_p1)
}
  0xf9   : > { %9062 = dma.hbm_to_vmem [thread:$0]  (%p9257_p10), %s12173_s2, 16, %s1774_s23, [#allocation18]  }
  0xfa   : > { %s11659_s10 = smov [#allocation20]   ;;  %s10098_s16 = sshra.s32 %s12184_s1, 4  ;;  %s10099_s16 = int_to_ptr.hbm [resolvable:$true] %s10098_s16 }
  0xfb   : > { %s1796_s11 = sshll.u32 %s11659_s10, 4  ;;  %s10100_s15 = scalar_lea.hbm %s10099_s16, 16  ;;  %s1797_s11 = int_to_ptr.vmem [resolvable:$true] %s1796_s11 }
  0xfc   : > { %p10101_p2 = scmp.ne.s32.totalorder %s10099_s16, %s10100_s15  ;;  %s10104_s18 = scalar_lea.hbm %s14722_s12, 16 }
  0xfd   : > { %p10105_p7 = scmp.lt.s32.totalorder %s10099_s16, %s14722_s12  ;;  %p10106_p8 = scmp.lt.s32.totalorder %s10104_s18, %s10100_s15 }
  0xfe   : > { %p10102_p3 = pnand %p10101_p2, %p9257_p10 }
  0xff   : > { %p10107_p11 = por %p10106_p8, %p10105_p7 }
 0x100   : > { %p10103_p4 = pneg %p10102_p3 }
 0x102   : > { %p10108_p12 = pnand %p10107_p11, %p10103_p4 }
 0x104   : > { %10111 = shalt.err (!%p10108_p12)
}
 0x105   : > { %s14594_s0 = smov 64   ;;  %s14595_s2 = smov 4  }
 0x106   : > { %9066 = dma.hbm_to_vmem [thread:$0]  (%p9257_p10), %s12184_s1, 256, %s1797_s11, [#allocation21], %s14594_s0, %s14594_s0, %s14595_s2  }
 0x107   : > { %s1820_s23 = sshll.u32 %s11823_s27, 4  ;;  %s11662_s22 = smov [#allocation23]   ;;  %s1821_s23 = int_to_ptr.hbm [resolvable:$true] %s1820_s23 }
 0x108   : > { %s1822_s10 = sshll.u32 %s11662_s22, 4  ;;  %s1846_s16 = sshll.u32 %s14717_s9, 4  ;;  %s1823_s10 = int_to_ptr.vmem [resolvable:$true] %s1822_s10  ;;  %s12207_s16 = int_to_ptr.hbm [resolvable:$true] %s1846_s16 }
 0x109   : > { %s10126_s15 = sshra.s32 %s1821_s23, 4  ;;  %s10132_s3 = scalar_lea.hbm %s11823_s27, 16  ;;  %s10127_s15 = int_to_ptr.hbm [resolvable:$true] %s10126_s15 }
 0x10a   : > { %s10128_s18 = scalar_lea.hbm %s10127_s15, 16  ;;  %p10133_p2 = scmp.lt.s32.totalorder %s10127_s15, %s11823_s27 }
 0x10b   : > { %p10129_p13 = scmp.ne.s32.totalorder %s10127_s15, %s10128_s18  ;;  %p10134_p3 = scmp.lt.s32.totalorder %s10132_s3, %s10128_s18 }
 0x10d   : > { %p10130_p0 = pnand %p10129_p13, %p9257_p10  ;;  %p10135_p4 = por %p10134_p3, %p10133_p2 }
 0x10f   : > { %p10131_p1 = pneg %p10130_p0 }
 0x111   : > { %p10136_p7 = pnand %p10135_p4, %p10131_p1 }
 0x113   : > { %10139 = shalt.err (!%p10136_p7)
}
 0x114   : > { %s14597_s1 = smov 128   ;;  %s14603_s11 = smov 8  }
 0x115   : > { %9070 = dma.hbm_to_vmem [thread:$0]  (%p9257_p10), %s1821_s23, 256, %s1823_s10, [#allocation24], %s14597_s1, %s14597_s1, %s14603_s11  }
 0x116   : > { %s11665_s22 = smov [#allocation26]   ;;  %s1881_s3 = sshll.u32 %s11853_s20, 4  ;;  %s1882_s3 = int_to_ptr.hbm [resolvable:$true] %s1881_s3 }
 0x117   : > { %s1848_s0 = sshll.u32 %s11665_s22, 4  ;;  %s10154_s15 = sshra.s32 %s12207_s16, 4  ;;  %s1849_s0 = int_to_ptr.vmem [resolvable:$true] %s1848_s0  ;;  %s10155_s15 = int_to_ptr.hbm [resolvable:$true] %s10154_s15 }
 0x118   : > { %s10156_s18 = scalar_lea.hbm %s10155_s15, 4  ;;  %s10160_s2 = scalar_lea.hbm %s14717_s9, 4 }
 0x119   : > { %p10157_p8 = scmp.ne.s32.totalorder %s10155_s15, %s10156_s18  ;;  %p10161_p13 = scmp.lt.s32.totalorder %s10155_s15, %s14717_s9 }
 0x11a   : > { %p10162_p0 = scmp.lt.s32.totalorder %s10160_s2, %s10156_s18 }
 0x11b   : > { %p10158_p11 = pnand %p10157_p8, %p9257_p10 }
 0x11c   : > { %p10163_p1 = por %p10162_p0, %p10161_p13 }
 0x11d   : > { %p10159_p12 = pneg %p10158_p11 }
 0x11f   : > { %p10164_p2 = pnand %p10163_p1, %p10159_p12 }
 0x121   : > { %10167 = shalt.err (!%p10164_p2)
}
 0x122   : > { %s14599_s12 = smov 16   ;;  %s14601_s23 = smov 1  }
 0x123   : > { %9074 = dma.hbm_to_vmem [thread:$0]  (%p9257_p10), %s12207_s16, 64, %s1849_s0, [#allocation27], %s14599_s12, %s14599_s12, %s14601_s23  }
 0x124   : > { %s11668_s10 = smov [#allocation29]   ;;  %s1911_s2 = sshll.u32 %s14719_s6, 4  ;;  %s12231_s2 = int_to_ptr.hbm [resolvable:$true] %s1911_s2 }
 0x125   : > { %s1883_s22 = sshll.u32 %s11668_s10, 4  ;;  %s10182_s15 = sshra.s32 %s1882_s3, 4  ;;  %s1884_s22 = int_to_ptr.vmem [resolvable:$true] %s1883_s22  ;;  %s10183_s15 = int_to_ptr.hbm [resolvable:$true] %s10182_s15 }
 0x126   : > { %s10184_s18 = scalar_lea.hbm %s10183_s15, 1  ;;  %s10188_s1 = scalar_lea.hbm %s11853_s20, 1 }
 0x127   : > { %p10185_p3 = scmp.ne.s32.totalorder %s10183_s15, %s10184_s18  ;;  %p10189_p8 = scmp.lt.s32.totalorder %s10183_s15, %s11853_s20 }
 0x128   : > { %p10190_p11 = scmp.lt.s32.totalorder %s10188_s1, %s10184_s18 }
 0x129   : > { %p10186_p4 = pnand %p10185_p3, %p9257_p10 }
 0x12a   : > { %p10191_p12 = por %p10190_p11, %p10189_p8 }
 0x12b   : > { %p10187_p7 = pneg %p10186_p4 }
 0x12d   : > { %p10192_p13 = pnand %p10191_p12, %p10187_p7 }
 0x12f   : > { %10195 = shalt.err (!%p10192_p13)
}
 0x130   : > { %9078 = dma.hbm_to_vmem [thread:$0]  (%p9257_p10), %s1882_s3, 16, %s1884_s22, [#allocation30]  }
 0x131   : > { %s1935_s0 = sshll.u32 %s14720_s5, 4  ;;  %s11669_s16 = smov [#allocation32]   ;;  %s12240_s0 = int_to_ptr.hbm [resolvable:$true] %s1935_s0 }
 0x132   : > { %s1913_s10 = sshll.u32 %s11669_s16, 4  ;;  %s10210_s12 = sshra.s32 %s12231_s2, 4  ;;  %s1914_s10 = int_to_ptr.vmem [resolvable:$true] %s1913_s10  ;;  %s10211_s12 = int_to_ptr.hbm [resolvable:$true] %s10210_s12 }
 0x133   : > { %s10212_s1 = scalar_lea.hbm %s10211_s12, 1  ;;  %s10216_s15 = scalar_lea.hbm %s14719_s6, 1 }
 0x134   : > { %p10213_p0 = scmp.ne.s32.totalorder %s10211_s12, %s10212_s1  ;;  %p10217_p3 = scmp.lt.s32.totalorder %s10211_s12, %s14719_s6 }
 0x135   : > { %p10218_p4 = scmp.lt.s32.totalorder %s10216_s15, %s10212_s1 }
 0x136   : > { %p10214_p1 = pnand %p10213_p0, %p9257_p10 }
 0x137   : > { %p10219_p7 = por %p10218_p4, %p10217_p3 }
 0x138   : > { %p10215_p2 = pneg %p10214_p1 }
 0x13a   : > { %p10220_p8 = pnand %p10219_p7, %p10215_p2 }
 0x13c   : > { %10223 = shalt.err (!%p10220_p8)
}
 0x13d   : > { %9082 = dma.hbm_to_vmem [thread:$0]  (%p9257_p10), %s12231_s2, 16, %s1914_s10, [#allocation33]  }
 0x13e   : > { %s11670_s3 = smov [#allocation35]   ;;  %s1959_s18 = sshll.u32 %s11893_s24, 4  ;;  %s12251_s18 = int_to_ptr.hbm [resolvable:$true] %s1959_s18 }
 0x13f   : > { %s1937_s22 = sshll.u32 %s11670_s3, 4  ;;  %s10238_s12 = sshra.s32 %s12240_s0, 4  ;;  %s1938_s22 = int_to_ptr.vmem [resolvable:$true] %s1937_s22  ;;  %s10239_s12 = int_to_ptr.hbm [resolvable:$true] %s10238_s12 }
 0x140   : > { %s10240_s16 = scalar_lea.hbm %s10239_s12, 1  ;;  %s10244_s1 = scalar_lea.hbm %s14720_s5, 1 }
 0x141   : > { %p10241_p11 = scmp.ne.s32.totalorder %s10239_s12, %s10240_s16  ;;  %p10245_p0 = scmp.lt.s32.totalorder %s10239_s12, %s14720_s5 }
 0x142   : > { %p10246_p1 = scmp.lt.s32.totalorder %s10244_s1, %s10240_s16 }
 0x143   : > { %p10242_p12 = pnand %p10241_p11, %p9257_p10 }
 0x144   : > { %p10247_p2 = por %p10246_p1, %p10245_p0 }
 0x145   : > { %p10243_p13 = pneg %p10242_p12 }
 0x147   : > { %p10248_p3 = pnand %p10247_p2, %p10243_p13 }
 0x149   : > { %10251 = shalt.err (!%p10248_p3)
}
 0x14a   : > { %9086 = dma.hbm_to_vmem [thread:$0]  (%p9257_p10), %s12240_s0, 16, %s1938_s22, [#allocation36]  }
 0x14b   : > { %s1985_s2 = sshll.u32 %s14721_s4, 4  ;;  %s11671_s10 = smov [#allocation38]   ;;  %s12262_s2 = int_to_ptr.hbm [resolvable:$true] %s1985_s2 }
 0x14c   : > { %s1961_s15 = sshll.u32 %s11671_s10, 4  ;;  %s10266_s3 = sshra.s32 %s12251_s18, 4  ;;  %s1962_s15 = int_to_ptr.vmem [resolvable:$true] %s1961_s15  ;;  %s10267_s3 = int_to_ptr.hbm [resolvable:$true] %s10266_s3 }
 0x14d   : > { %s10268_s12 = scalar_lea.hbm %s10267_s3, 1  ;;  %s10272_s16 = scalar_lea.hbm %s11893_s24, 1 }
 0x14e   : > { %p10269_p4 = scmp.ne.s32.totalorder %s10267_s3, %s10268_s12  ;;  %p10273_p11 = scmp.lt.s32.totalorder %s10267_s3, %s11893_s24 }
 0x14f   : > { %p10274_p12 = scmp.lt.s32.totalorder %s10272_s16, %s10268_s12 }
 0x150   : > { %p10270_p7 = pnand %p10269_p4, %p9257_p10 }
 0x151   : > { %p10275_p13 = por %p10274_p12, %p10273_p11 }
 0x152   : > { %p10271_p8 = pneg %p10270_p7 }
 0x154   : > { %p10276_p0 = pnand %p10275_p13, %p10271_p8 }
 0x156   : > { %10279 = shalt.err (!%p10276_p0)
}
 0x157   : > { %9090 = dma.hbm_to_vmem [thread:$0]  (%p9257_p10), %s12251_s18, 16, %s1962_s15, [#allocation39]  }
 0x158   : > { %s11672_s0 = smov [#allocation41]   ;;  %s2011_s1 = sshll.u32 %s14718_s8, 4  ;;  %s12273_s1 = int_to_ptr.hbm [resolvable:$true] %s2011_s1 }
 0x159   : > { %s1987_s22 = sshll.u32 %s11672_s0, 4  ;;  %s10294_s10 = sshra.s32 %s12262_s2, 4  ;;  %s1988_s22 = int_to_ptr.vmem [resolvable:$true] %s1987_s22  ;;  %s10295_s10 = int_to_ptr.hbm [resolvable:$true] %s10294_s10 }
 0x15a   : > { %s10296_s3 = scalar_lea.hbm %s10295_s10, 32  ;;  %s10300_s12 = scalar_lea.hbm %s14721_s4, 32 }
 0x15b   : > { %p10297_p1 = scmp.ne.s32.totalorder %s10295_s10, %s10296_s3  ;;  %p10301_p4 = scmp.lt.s32.totalorder %s10295_s10, %s14721_s4 }
 0x15c   : > { %p10302_p7 = scmp.lt.s32.totalorder %s10300_s12, %s10296_s3 }
 0x15d   : > { %p10298_p2 = pnand %p10297_p1, %p9257_p10 }
 0x15e   : > { %p10303_p8 = por %p10302_p7, %p10301_p4 }
 0x15f   : > { %p10299_p3 = pneg %p10298_p2 }
 0x161   : > { %p10304_p11 = pnand %p10303_p8, %p10299_p3 }
 0x163   : > { %10307 = shalt.err (!%p10304_p11)
}
 0x164   : > { %s14734_s18 = smov 128   ;;  %s14735_s15 = sld [smem:[#allocation142_spill]] }
 0x165   : > { %9094 = dma.hbm_to_vmem [thread:$0]  (%p9257_p10), %s12262_s2, 512, %s1988_s22, [#allocation42], %s14734_s18, %s14734_s18, %s14603_s11  }
 0x166   : > { %s11673_s0 = smov [#allocation44]   ;;  %s10322_s10 = sshra.s32 %s12273_s1, 4  ;;  %s10323_s10 = int_to_ptr.hbm [resolvable:$true] %s10322_s10 }
 0x167   : > { %s2013_s23 = sshll.u32 %s11673_s0, 4  ;;  %s10324_s3 = scalar_lea.hbm %s10323_s10, 4  ;;  %s2014_s23 = int_to_ptr.vmem [resolvable:$true] %s2013_s23 }
 0x168   : > { %p10325_p12 = scmp.ne.s32.totalorder %s10323_s10, %s10324_s3  ;;  %s10328_s12 = scalar_lea.hbm %s14718_s8, 4 }
 0x169   : > { %p10329_p1 = scmp.lt.s32.totalorder %s10323_s10, %s14718_s8  ;;  %p10330_p2 = scmp.lt.s32.totalorder %s10328_s12, %s10324_s3 }
 0x16a   : > { %s2039_s16 = sshll.u32 %s14735_s15, 4  ;;  %p10326_p13 = pnand %p10325_p12, %p9257_p10  ;;  %s12287_s16 = int_to_ptr.hbm [resolvable:$true] %s2039_s16 }
 0x16b   : > { %p10331_p3 = por %p10330_p2, %p10329_p1 }
 0x16c   : > { %p10327_p0 = pneg %p10326_p13 }
 0x16e   : > { %p10332_p4 = pnand %p10331_p3, %p10327_p0 }
 0x170   : > { %10335 = shalt.err (!%p10332_p4)
}
 0x171   : > { %s14736_s2 = smov 1   ;;  %s14737_s22 = smov 16  }
 0x172   : > { %s14738_s0 = sld [smem:[#allocation146_spill]]  ;;  %s11674_s4 = smov [#allocation47]  }
 0x173   : > { %9098 = dma.hbm_to_vmem [thread:$0]  (%p9257_p10), %s12273_s1, 64, %s2014_s23, [#allocation45], %s14737_s22, %s14737_s22, %s14736_s2  }
 0x174   : > { %s2041_s5 = sshll.u32 %s11674_s4, 4  ;;  %s10350_s10 = sshra.s32 %s12287_s16, 4  ;;  %s2042_s5 = int_to_ptr.vmem [resolvable:$true] %s2041_s5  ;;  %s10351_s10 = int_to_ptr.hbm [resolvable:$true] %s10350_s10 }
 0x175   : > { %s10352_s3 = scalar_lea.hbm %s10351_s10, 16  ;;  %s10356_s12 = scalar_lea.hbm %s14735_s15, 16 }
 0x176   : > { %p10353_p7 = scmp.ne.s32.totalorder %s10351_s10, %s10352_s3  ;;  %p10357_p12 = scmp.lt.s32.totalorder %s10351_s10, %s14735_s15 }
 0x177   : > { %p10358_p13 = scmp.lt.s32.totalorder %s10356_s12, %s10352_s3 }
 0x178   : > { %s14739_s11 = smov %s14738_s0  ;;  %s2072_s6 = sshll.u32 %s14738_s0, 4  ;;  %s12301_s6 = int_to_ptr.hbm [resolvable:$true] %s2072_s6 }
 0x179   : > { %p10354_p8 = pnand %p10353_p7, %p9257_p10  ;;  %p10359_p0 = por %p10358_p13, %p10357_p12 }
 0x17b   : > { %p10355_p11 = pneg %p10354_p8 }
 0x17d   : > { %p10360_p1 = pnand %p10359_p0, %p10355_p11 }
 0x17f   : > { %10363 = shalt.err (!%p10360_p1)
}
 0x180   : > { %s14740_s4 = smov 4   ;;  %s14741_s23 = smov 64  }
 0x181   : > { %s14742_s1 = sld [smem:[#allocation149_spill]]  ;;  %s11675_s9 = smov [#allocation50]  }
 0x182   : > { %9102 = dma.hbm_to_vmem [thread:$0]  (%p9257_p10), %s12287_s16, 256, %s2042_s5, [#allocation48], %s14741_s23, %s14741_s23, %s14740_s4  }
 0x183   : > { %s2074_s17 = sshll.u32 %s11675_s9, 4  ;;  %s10378_s10 = sshra.s32 %s12301_s6, 4  ;;  %s2075_s17 = int_to_ptr.vmem [resolvable:$true] %s2074_s17  ;;  %s10379_s10 = int_to_ptr.hbm [resolvable:$true] %s10378_s10 }
 0x184   : > { %s10380_s3 = scalar_lea.hbm %s10379_s10, 1  ;;  %s10384_s12 = scalar_lea.hbm %s14739_s11, 1 }
 0x185   : > { %p10381_p2 = scmp.ne.s32.totalorder %s10379_s10, %s10380_s3  ;;  %p10385_p7 = scmp.lt.s32.totalorder %s10379_s10, %s14739_s11 }
 0x186   : > { %p10386_p8 = scmp.lt.s32.totalorder %s10384_s12, %s10380_s3 }
 0x187   : > { %s14743_s8 = smov %s14742_s1  ;;  %s2099_s0 = sshll.u32 %s14742_s1, 4  ;;  %s12315_s0 = int_to_ptr.hbm [resolvable:$true] %s2099_s0 }
 0x188   : > { %p10382_p3 = pnand %p10381_p2, %p9257_p10  ;;  %p10387_p11 = por %p10386_p8, %p10385_p7 }
 0x18a   : > { %p10383_p4 = pneg %p10382_p3 }
 0x18c   : > { %p10388_p12 = pnand %p10387_p11, %p10383_p4 }
 0x18e   : > { %10391 = shalt.err (!%p10388_p12)
}
 0x18f   : > { %s14744_s5 = sld [smem:[#allocation151_spill]]  ;;  %s11676_s9 = smov [#allocation53]  }
 0x190   : > { %9106 = dma.hbm_to_vmem [thread:$0]  (%p9257_p10), %s12301_s6, 16, %s2075_s17, [#allocation51]  }
 0x191   : > { %s2101_s16 = sshll.u32 %s11676_s9, 4  ;;  %s10406_s23 = sshra.s32 %s12315_s0, 4  ;;  %s2102_s16 = int_to_ptr.vmem [resolvable:$true] %s2101_s16  ;;  %s10407_s23 = int_to_ptr.hbm [resolvable:$true] %s10406_s23 }
 0x192   : > { %s10408_s1 = scalar_lea.hbm %s10407_s23, 1  ;;  %s10412_s10 = scalar_lea.hbm %s14743_s8, 1 }
 0x193   : > { %p10409_p13 = scmp.ne.s32.totalorder %s10407_s23, %s10408_s1  ;;  %p10413_p2 = scmp.lt.s32.totalorder %s10407_s23, %s14743_s8 }
 0x194   : > { %p10414_p3 = scmp.lt.s32.totalorder %s10412_s10, %s10408_s1 }
 0x195   : > { %s2123_s4 = sshll.u32 %s14744_s5, 4  ;;  %p10410_p0 = pnand %p10409_p13, %p9257_p10  ;;  %s12326_s4 = int_to_ptr.hbm [resolvable:$true] %s2123_s4 }
 0x196   : > { %p10415_p4 = por %p10414_p3, %p10413_p2 }
 0x197   : > { %p10411_p1 = pneg %p10410_p0 }
 0x199   : > { %p10416_p7 = pnand %p10415_p4, %p10411_p1 }
 0x19b   : > { %10419 = shalt.err (!%p10416_p7)
}
 0x19c   : > { %s14745_s17 = sld [smem:[#allocation153_spill]]  ;;  %s11677_s3 = smov [#allocation56]  }
 0x19d   : > { %9110 = dma.hbm_to_vmem [thread:$0]  (%p9257_p10), %s12315_s0, 16, %s2102_s16, [#allocation54]  }
 0x19e   : > { %s2125_s12 = sshll.u32 %s11677_s3, 4  ;;  %s10434_s9 = sshra.s32 %s12326_s4, 4  ;;  %s2126_s12 = int_to_ptr.vmem [resolvable:$true] %s2125_s12  ;;  %s10435_s9 = int_to_ptr.hbm [resolvable:$true] %s10434_s9 }
 0x19f   : > { %s10436_s23 = scalar_lea.hbm %s10435_s9, 1  ;;  %s10440_s1 = scalar_lea.hbm %s14744_s5, 1 }
 0x1a0   : > { %p10437_p8 = scmp.ne.s32.totalorder %s10435_s9, %s10436_s23  ;;  %p10441_p13 = scmp.lt.s32.totalorder %s10435_s9, %s14744_s5 }
 0x1a1   : > { %p10442_p0 = scmp.lt.s32.totalorder %s10440_s1, %s10436_s23 }
 0x1a2   : > { %s2146_s6 = sshll.u32 %s14745_s17, 4  ;;  %p10438_p11 = pnand %p10437_p8, %p9257_p10  ;;  %s12337_s6 = int_to_ptr.hbm [resolvable:$true] %s2146_s6 }
 0x1a3   : > { %p10443_p1 = por %p10442_p0, %p10441_p13 }
 0x1a4   : > { %p10439_p12 = pneg %p10438_p11 }
 0x1a6   : > { %p10444_p2 = pnand %p10443_p1, %p10439_p12 }
 0x1a8   : > { %10447 = shalt.err (!%p10444_p2)
}
 0x1a9   : > { %s14746_s0 = sld [smem:[#allocation156_spill]]  ;;  %s11678_s10 = smov [#allocation59]  }
 0x1aa   : > { %9114 = dma.hbm_to_vmem [thread:$0]  (%p9257_p10), %s12326_s4, 16, %s2126_s12, [#allocation57]  }
 0x1ab   : > { %s2148_s3 = sshll.u32 %s11678_s10, 4  ;;  %s10462_s9 = sshra.s32 %s12337_s6, 4  ;;  %s2149_s3 = int_to_ptr.vmem [resolvable:$true] %s2148_s3  ;;  %s10463_s9 = int_to_ptr.hbm [resolvable:$true] %s10462_s9 }
 0x1ac   : > { %s10464_s23 = scalar_lea.hbm %s10463_s9, 64  ;;  %s10468_s1 = scalar_lea.hbm %s14745_s17, 64 }
 0x1ad   : > { %p10465_p3 = scmp.ne.s32.totalorder %s10463_s9, %s10464_s23  ;;  %p10469_p8 = scmp.lt.s32.totalorder %s10463_s9, %s14745_s17 }
 0x1ae   : > { %p10470_p11 = scmp.lt.s32.totalorder %s10468_s1, %s10464_s23 }
 0x1af   : > { %s14747_s16 = smov %s14746_s0  ;;  %s2176_s8 = sshll.u32 %s14746_s0, 4  ;;  %s12348_s8 = int_to_ptr.hbm [resolvable:$true] %s2176_s8 }
 0x1b0   : > { %p10466_p4 = pnand %p10465_p3, %p9257_p10  ;;  %p10471_p12 = por %p10470_p11, %p10469_p8 }
 0x1b2   : > { %p10467_p7 = pneg %p10466_p4 }
 0x1b4   : > { %p10472_p13 = pnand %p10471_p12, %p10467_p7 }
 0x1b6   : > { %10475 = shalt.err (!%p10472_p13)
}
 0x1b7   : > { %s14748_s4 = smov 8   ;;  %s14749_s12 = sld [smem:[#allocation158_spill]] }
 0x1b8   : > { %9118 = dma.hbm_to_vmem [thread:$0]  (%p9257_p10), %s12337_s6, 1024, %s2149_s3, [#allocation60], %s14734_s18, %s14734_s18, %s14748_s4  }
 0x1b9   : > { %s11679_s10 = smov [#allocation62]   ;;  %s10490_s9 = sshra.s32 %s12348_s8, 4  ;;  %s10491_s9 = int_to_ptr.hbm [resolvable:$true] %s10490_s9 }
 0x1ba   : > { %s2178_s5 = sshll.u32 %s11679_s10, 4  ;;  %s10492_s23 = scalar_lea.hbm %s10491_s9, 1  ;;  %s2179_s5 = int_to_ptr.vmem [resolvable:$true] %s2178_s5 }
 0x1bb   : > { %p10493_p0 = scmp.ne.s32.totalorder %s10491_s9, %s10492_s23  ;;  %s10496_s1 = scalar_lea.hbm %s14747_s16, 1 }
 0x1bc   : > { %p10497_p3 = scmp.lt.s32.totalorder %s10491_s9, %s14747_s16  ;;  %p10498_p4 = scmp.lt.s32.totalorder %s10496_s1, %s10492_s23 }
 0x1bd   : > { %s2201_s0 = sshll.u32 %s14749_s12, 4  ;;  %p10494_p1 = pnand %p10493_p0, %p9257_p10  ;;  %s12362_s0 = int_to_ptr.hbm [resolvable:$true] %s2201_s0 }
 0x1be   : > { %p10499_p7 = por %p10498_p4, %p10497_p3 }
 0x1bf   : > { %p10495_p2 = pneg %p10494_p1 }
 0x1c1   : > { %p10500_p8 = pnand %p10499_p7, %p10495_p2 }
 0x1c3   : > { %10503 = shalt.err (!%p10500_p8)
}
 0x1c4   : > { %s14750_s6 = sld [smem:[#allocation161_spill]]  ;;  %s11680_s3 = smov [#allocation65]  }
 0x1c5   : > { %9122 = dma.hbm_to_vmem [thread:$0]  (%p9257_p10), %s12348_s8, 16, %s2179_s5, [#allocation63]  }
 0x1c6   : > { %s2203_s10 = sshll.u32 %s11680_s3, 4  ;;  %s10518_s9 = sshra.s32 %s12362_s0, 4  ;;  %s2204_s10 = int_to_ptr.vmem [resolvable:$true] %s2203_s10  ;;  %s10519_s9 = int_to_ptr.hbm [resolvable:$true] %s10518_s9 }
 0x1c7   : > { %s10520_s23 = scalar_lea.hbm %s10519_s9, 4  ;;  %s10524_s1 = scalar_lea.hbm %s14749_s12, 4 }
 0x1c8   : > { %p10521_p11 = scmp.ne.s32.totalorder %s10519_s9, %s10520_s23  ;;  %p10525_p0 = scmp.lt.s32.totalorder %s10519_s9, %s14749_s12 }
 0x1c9   : > { %p10526_p1 = scmp.lt.s32.totalorder %s10524_s1, %s10520_s23 }
 0x1ca   : > { %s2233_s11 = sshll.u32 %s14750_s6, 4  ;;  %p10522_p12 = pnand %p10521_p11, %p9257_p10  ;;  %s12373_s11 = int_to_ptr.hbm [resolvable:$true] %s2233_s11 }
 0x1cb   : > { %p10527_p2 = por %p10526_p1, %p10525_p0 }
 0x1cc   : > { %p10523_p13 = pneg %p10522_p12 }
 0x1ce   : > { %p10528_p3 = pnand %p10527_p2, %p10523_p13 }
 0x1d0   : > { %10531 = shalt.err (!%p10528_p3)
}
 0x1d1   : > { %s14751_s8 = sld [smem:[#allocation165_spill]]  ;;  %s11681_s3 = smov [#allocation68]  }
 0x1d2   : > { %9126 = dma.hbm_to_vmem [thread:$0]  (%p9257_p10), %s12362_s0, 64, %s2204_s10, [#allocation66], %s14737_s22, %s14737_s22, %s14736_s2  }
 0x1d3   : > { %s2235_s15 = sshll.u32 %s11681_s3, 4  ;;  %s10546_s9 = sshra.s32 %s12373_s11, 4  ;;  %s2236_s15 = int_to_ptr.vmem [resolvable:$true] %s2235_s15  ;;  %s10547_s9 = int_to_ptr.hbm [resolvable:$true] %s10546_s9 }
 0x1d4   : > { %s10548_s23 = scalar_lea.hbm %s10547_s9, 4  ;;  %s10552_s1 = scalar_lea.hbm %s14750_s6, 4 }
 0x1d5   : > { %p10549_p4 = scmp.ne.s32.totalorder %s10547_s9, %s10548_s23  ;;  %p10553_p11 = scmp.lt.s32.totalorder %s10547_s9, %s14750_s6 }
 0x1d6   : > { %p10554_p12 = scmp.lt.s32.totalorder %s10552_s1, %s10548_s23 }
 0x1d7   : > { %s2263_s5 = sshll.u32 %s14751_s8, 4  ;;  %p10550_p7 = pnand %p10549_p4, %p9257_p10  ;;  %s12387_s5 = int_to_ptr.hbm [resolvable:$true] %s2263_s5 }
 0x1d8   : > { %p10555_p13 = por %p10554_p12, %p10553_p11 }
 0x1d9   : > { %p10551_p8 = pneg %p10550_p7 }
 0x1db   : > { %p10556_p0 = pnand %p10555_p13, %p10551_p8 }
 0x1dd   : > { %10559 = shalt.err (!%p10556_p0)
}
 0x1de   : > { %s14752_s0 = sld [smem:[#allocation167_spill]]  ;;  %s11682_s3 = smov [#allocation71]  }
 0x1df   : > { %9130 = dma.hbm_to_vmem [thread:$0]  (%p9257_p10), %s12373_s11, 64, %s2236_s15, [#allocation69]  }
 0x1e0   : > { %s2265_s12 = sshll.u32 %s11682_s3, 4  ;;  %s10574_s9 = sshra.s32 %s12387_s5, 4  ;;  %s2266_s12 = int_to_ptr.vmem [resolvable:$true] %s2265_s12  ;;  %s10575_s9 = int_to_ptr.hbm [resolvable:$true] %s10574_s9 }
 0x1e1   : > { %s10576_s23 = scalar_lea.hbm %s10575_s9, 1  ;;  %s10580_s1 = scalar_lea.hbm %s14751_s8, 1 }
 0x1e2   : > { %p10577_p1 = scmp.ne.s32.totalorder %s10575_s9, %s10576_s23  ;;  %p10581_p4 = scmp.lt.s32.totalorder %s10575_s9, %s14751_s8 }
 0x1e3   : > { %p10582_p7 = scmp.lt.s32.totalorder %s10580_s1, %s10576_s23 }
 0x1e4   : > { %s14753_s10 = smov %s14752_s0  ;;  %s2287_s16 = sshll.u32 %s14752_s0, 4  ;;  %s12398_s16 = int_to_ptr.hbm [resolvable:$true] %s2287_s16 }
 0x1e5   : > { %p10578_p2 = pnand %p10577_p1, %p9257_p10  ;;  %p10583_p8 = por %p10582_p7, %p10581_p4 }
 0x1e7   : > { %p10579_p3 = pneg %p10578_p2 }
 0x1e9   : > { %p10584_p11 = pnand %p10583_p8, %p10579_p3 }
 0x1eb   : > { %10587 = shalt.err (!%p10584_p11)
}
 0x1ec   : > { %s14754_s11 = sld [smem:[#allocation169_spill]]  ;;  %s11683_s0 = smov [#allocation74]  }
 0x1ed   : > { %9134 = dma.hbm_to_vmem [thread:$0]  (%p9257_p10), %s12387_s5, 16, %s2266_s12, [#allocation72]  }
 0x1ee   : > { %s2289_s3 = sshll.u32 %s11683_s0, 4  ;;  %s10602_s9 = sshra.s32 %s12398_s16, 4  ;;  %s2290_s3 = int_to_ptr.vmem [resolvable:$true] %s2289_s3  ;;  %s10603_s9 = int_to_ptr.hbm [resolvable:$true] %s10602_s9 }
 0x1ef   : > { %s10604_s23 = scalar_lea.hbm %s10603_s9, 1  ;;  %s10608_s1 = scalar_lea.hbm %s14753_s10, 1 }
 0x1f0   : > { %p10605_p12 = scmp.ne.s32.totalorder %s10603_s9, %s10604_s23  ;;  %p10609_p1 = scmp.lt.s32.totalorder %s10603_s9, %s14753_s10 }
 0x1f1   : > { %p10610_p2 = scmp.lt.s32.totalorder %s10608_s1, %s10604_s23 }
 0x1f2   : > { %s2311_s15 = sshll.u32 %s14754_s11, 4  ;;  %p10606_p13 = pnand %p10605_p12, %p9257_p10  ;;  %s12409_s15 = int_to_ptr.hbm [resolvable:$true] %s2311_s15 }
 0x1f3   : > { %p10611_p3 = por %p10610_p2, %p10609_p1 }
 0x1f4   : > { %p10607_p0 = pneg %p10606_p13 }
 0x1f6   : > { %p10612_p4 = pnand %p10611_p3, %p10607_p0 }
 0x1f8   : > { %10615 = shalt.err (!%p10612_p4)
}
 0x1f9   : > { %s14755_s12 = sld [smem:[#allocation113_spill]]  ;;  %s11684_s5 = smov [#allocation77]  }
 0x1fa   : > { %9138 = dma.hbm_to_vmem [thread:$0]  (%p9257_p10), %s12398_s16, 16, %s2290_s3, [#allocation75]  }
 0x1fb   : > { %s2313_s0 = sshll.u32 %s11684_s5, 4  ;;  %s10630_s8 = sshra.s32 %s12409_s15, 4  ;;  %s2314_s0 = int_to_ptr.vmem [resolvable:$true] %s2313_s0  ;;  %s10631_s8 = int_to_ptr.hbm [resolvable:$true] %s10630_s8 }
 0x1fc   : > { %s10632_s9 = scalar_lea.hbm %s10631_s8, 1  ;;  %s10636_s23 = scalar_lea.hbm %s14754_s11, 1 }
 0x1fd   : > { %p10633_p7 = scmp.ne.s32.totalorder %s10631_s8, %s10632_s9  ;;  %p10637_p12 = scmp.lt.s32.totalorder %s10631_s8, %s14754_s11 }
 0x1fe   : > { %p10638_p13 = scmp.lt.s32.totalorder %s10636_s23, %s10632_s9 }
 0x1ff   : > { %s1656_s6 = sshll.u32 %s14755_s12, 4  ;;  %p10634_p8 = pnand %p10633_p7, %p9257_p10  ;;  %s1657_s6 = int_to_ptr.hbm [resolvable:$true] %s1656_s6 }
 0x200   : > { %p10639_p0 = por %p10638_p13, %p10637_p12 }
 0x201   : > { %p10635_p11 = pneg %p10634_p8 }
 0x203   : > { %p10640_p1 = pnand %p10639_p0, %p10635_p11 }
 0x205   : > { %10643 = shalt.err (!%p10640_p1)
}
 0x206   : > { %s14756_s16 = sld [smem:[#allocation115_spill]]  ;;  %s11685_s3 = smov [#allocation2]  }
 0x207   : > { %9142 = dma.hbm_to_vmem [thread:$0]  (%p9257_p10), %s12409_s15, 16, %s2314_s0, [#allocation78]  }
 0x208   : > { %s1658_s1 = sshll.u32 %s11685_s3, 4  ;;  %s10658_s8 = sshra.s32 %s1657_s6, 4  ;;  %s1659_s1 = int_to_ptr.vmem [resolvable:$true] %s1658_s1  ;;  %s10659_s8 = int_to_ptr.hbm [resolvable:$true] %s10658_s8 }
 0x209   : > { %s10660_s9 = scalar_lea.hbm %s10659_s8, 1  ;;  %s10664_s23 = scalar_lea.hbm %s14755_s12, 1 }
 0x20a   : > { %p10661_p2 = scmp.ne.s32.totalorder %s10659_s8, %s10660_s9  ;;  %p10665_p7 = scmp.lt.s32.totalorder %s10659_s8, %s14755_s12 }
 0x20b   : > { %p10666_p8 = scmp.lt.s32.totalorder %s10664_s23, %s10660_s9 }
 0x20c   : > { %s1679_s5 = sshll.u32 %s14756_s16, 4  ;;  %p10662_p3 = pnand %p10661_p2, %p9257_p10  ;;  %s12429_s5 = int_to_ptr.hbm [resolvable:$true] %s1679_s5 }
 0x20d   : > { %p10667_p11 = por %p10666_p8, %p10665_p7 }
 0x20e   : > { %p10663_p4 = pneg %p10662_p3 }
 0x210   : > { %p10668_p12 = pnand %p10667_p11, %p10663_p4 }
 0x212   : > { %10671 = shalt.err (!%p10668_p12)
}
 0x213   : > { %s14757_s15 = sld [smem:[#allocation116_spill]]  ;;  %s11686_s3 = smov [#allocation7]  }
 0x214   : > { %9044 = dma.hbm_to_vmem [thread:$0]  (%p9257_p10), %s1657_s6, 16, %s1659_s1, [#allocation3]  }
 0x215   : > { %s1681_s10 = sshll.u32 %s11686_s3, 4  ;;  %s10686_s11 = sshra.s32 %s12429_s5, 4  ;;  %s1682_s10 = int_to_ptr.vmem [resolvable:$true] %s1681_s10  ;;  %s10687_s11 = int_to_ptr.hbm [resolvable:$true] %s10686_s11 }
 0x216   : > { %s10688_s8 = scalar_lea.hbm %s10687_s11, 16  ;;  %s10692_s9 = scalar_lea.hbm %s14756_s16, 16 }
 0x217   : > { %p10689_p13 = scmp.ne.s32.totalorder %s10687_s11, %s10688_s8  ;;  %p10693_p2 = scmp.lt.s32.totalorder %s10687_s11, %s14756_s16 }
 0x218   : > { %p10694_p3 = scmp.lt.s32.totalorder %s10692_s9, %s10688_s8 }
 0x219   : > { %s1705_s0 = sshll.u32 %s14757_s15, 4  ;;  %p10690_p0 = pnand %p10689_p13, %p9257_p10  ;;  %s12438_s0 = int_to_ptr.hbm [resolvable:$true] %s1705_s0 }
 0x21a   : > { %p10695_p4 = por %p10694_p3, %p10693_p2 }
 0x21b   : > { %p10691_p1 = pneg %p10690_p0 }
 0x21d   : > { %p10696_p7 = pnand %p10695_p4, %p10691_p1 }
 0x21f   : > { %10699 = shalt.err (!%p10696_p7)
}
 0x220   : > { %s14758_s6 = sld [smem:[#allocation119_spill]]  ;;  %s11687_s1 = smov [#allocation10]  }
 0x221   : > { %9048 = dma.hbm_to_vmem [thread:$0]  (%p9257_p10), %s12429_s5, 256, %s1682_s10, [#allocation6], %s14734_s18, %s14734_s18, %s14748_s4  }
 0x222   : > { %s1707_s23 = sshll.u32 %s11687_s1, 4  ;;  %s10714_s11 = sshra.s32 %s12438_s0, 4  ;;  %s1708_s23 = int_to_ptr.vmem [resolvable:$true] %s1707_s23  ;;  %s10715_s11 = int_to_ptr.hbm [resolvable:$true] %s10714_s11 }
 0x223   : > { %s10716_s8 = scalar_lea.hbm %s10715_s11, 16  ;;  %s10720_s9 = scalar_lea.hbm %s14757_s15, 16 }
 0x224   : > { %p10717_p8 = scmp.ne.s32.totalorder %s10715_s11, %s10716_s8  ;;  %p10721_p13 = scmp.lt.s32.totalorder %s10715_s11, %s14757_s15 }
 0x225   : > { %p10722_p0 = scmp.lt.s32.totalorder %s10720_s9, %s10716_s8 }
 0x226   : > { %s1735_s3 = sshll.u32 %s14758_s6, 4  ;;  %p10718_p11 = pnand %p10717_p8, %p9257_p10  ;;  %s12452_s3 = int_to_ptr.hbm [resolvable:$true] %s1735_s3 }
 0x227   : > { %p10723_p1 = por %p10722_p0, %p10721_p13 }
 0x228   : > { %p10719_p12 = pneg %p10718_p11 }
 0x22a   : > { %p10724_p2 = pnand %p10723_p1, %p10719_p12 }
 0x22c   : > { %10727 = shalt.err (!%p10724_p2)
}
 0x22d   : > { %s14759_s10 = sld [smem:[#allocation120_spill]]  ;;  %s11688_s1 = smov [#allocation13]  }
 0x22e   : > { %9052 = dma.hbm_to_vmem [thread:$0]  (%p9257_p10), %s12438_s0, 256, %s1708_s23, [#allocation9], %s14734_s18, %s14734_s18, %s14748_s4  }
 0x22f   : > { %s1737_s12 = sshll.u32 %s11688_s1, 4  ;;  %s10742_s11 = sshra.s32 %s12452_s3, 4  ;;  %s1738_s12 = int_to_ptr.vmem [resolvable:$true] %s1737_s12  ;;  %s10743_s11 = int_to_ptr.hbm [resolvable:$true] %s10742_s11 }
 0x230   : > { %s10744_s8 = scalar_lea.hbm %s10743_s11, 1  ;;  %s10748_s9 = scalar_lea.hbm %s14758_s6, 1 }
 0x231   : > { %p10745_p3 = scmp.ne.s32.totalorder %s10743_s11, %s10744_s8  ;;  %p10749_p8 = scmp.lt.s32.totalorder %s10743_s11, %s14758_s6 }
 0x232   : > { %p10750_p11 = scmp.lt.s32.totalorder %s10748_s9, %s10744_s8 }
 0x233   : > { %s1759_s5 = sshll.u32 %s14759_s10, 4  ;;  %p10746_p4 = pnand %p10745_p3, %p9257_p10  ;;  %s12466_s5 = int_to_ptr.hbm [resolvable:$true] %s1759_s5 }
 0x234   : > { %p10751_p12 = por %p10750_p11, %p10749_p8 }
 0x235   : > { %p10747_p7 = pneg %p10746_p4 }
 0x237   : > { %p10752_p13 = pnand %p10751_p12, %p10747_p7 }
 0x239   : > { %10755 = shalt.err (!%p10752_p13)
}
 0x23a   : > { %s14760_s0 = sld [smem:[#allocation121_spill]]  ;;  %s11689_s1 = smov [#allocation16]  }
 0x23b   : > { %9056 = dma.hbm_to_vmem [thread:$0]  (%p9257_p10), %s12452_s3, 16, %s1738_s12, [#allocation12]  }
 0x23c   : > { %s1761_s15 = sshll.u32 %s11689_s1, 4  ;;  %s10770_s11 = sshra.s32 %s12466_s5, 4  ;;  %s1762_s15 = int_to_ptr.vmem [resolvable:$true] %s1761_s15  ;;  %s10771_s11 = int_to_ptr.hbm [resolvable:$true] %s10770_s11 }
 0x23d   : > { %s10772_s8 = scalar_lea.hbm %s10771_s11, 1  ;;  %s10776_s9 = scalar_lea.hbm %s14759_s10, 1 }
 0x23e   : > { %p10773_p0 = scmp.ne.s32.totalorder %s10771_s11, %s10772_s8  ;;  %p10777_p3 = scmp.lt.s32.totalorder %s10771_s11, %s14759_s10 }
 0x23f   : > { %p10778_p4 = scmp.lt.s32.totalorder %s10776_s9, %s10772_s8 }
 0x240   : > { %s14761_s23 = smov %s14760_s0  ;;  %s1783_s16 = sshll.u32 %s14760_s0, 4  ;;  %s12477_s16 = int_to_ptr.hbm [resolvable:$true] %s1783_s16 }
 0x241   : > { %p10774_p1 = pnand %p10773_p0, %p9257_p10  ;;  %p10779_p7 = por %p10778_p4, %p10777_p3 }
 0x243   : > { %p10775_p2 = pneg %p10774_p1 }
 0x245   : > { %p10780_p8 = pnand %p10779_p7, %p10775_p2 }
 0x247   : > { %10783 = shalt.err (!%p10780_p8)
}
 0x248   : > { %s14762_s12 = sld [smem:[#allocation123_spill]]  ;;  %s11690_s0 = smov [#allocation19]  }
 0x249   : > { %9060 = dma.hbm_to_vmem [thread:$0]  (%p9257_p10), %s12466_s5, 16, %s1762_s15, [#allocation15]  }
 0x24a   : > { %s1785_s1 = sshll.u32 %s11690_s0, 4  ;;  %s10798_s11 = sshra.s32 %s12477_s16, 4  ;;  %s1786_s1 = int_to_ptr.vmem [resolvable:$true] %s1785_s1  ;;  %s10799_s11 = int_to_ptr.hbm [resolvable:$true] %s10798_s11 }
 0x24b   : > { %s10800_s8 = scalar_lea.hbm %s10799_s11, 1  ;;  %s10804_s9 = scalar_lea.hbm %s14761_s23, 1 }
 0x24c   : > { %p10801_p11 = scmp.ne.s32.totalorder %s10799_s11, %s10800_s8  ;;  %p10805_p0 = scmp.lt.s32.totalorder %s10799_s11, %s14761_s23 }
 0x24d   : > { %p10806_p1 = scmp.lt.s32.totalorder %s10804_s9, %s10800_s8 }
 0x24e   : > { %s1809_s3 = sshll.u32 %s14762_s12, 4  ;;  %p10802_p12 = pnand %p10801_p11, %p9257_p10  ;;  %s12488_s3 = int_to_ptr.hbm [resolvable:$true] %s1809_s3 }
 0x24f   : > { %p10807_p2 = por %p10806_p1, %p10805_p0 }
 0x250   : > { %p10803_p13 = pneg %p10802_p12 }
 0x252   : > { %p10808_p3 = pnand %p10807_p2, %p10803_p13 }
 0x254   : > { %10811 = shalt.err (!%p10808_p3)
}
 0x255   : > { %s14763_s15 = sld [smem:[#allocation124_spill]]  ;;  %s11691_s5 = smov [#allocation22]  }
 0x256   : > { %9064 = dma.hbm_to_vmem [thread:$0]  (%p9257_p10), %s12477_s16, 16, %s1786_s1, [#allocation18]  }
 0x257   : > { %s1811_s0 = sshll.u32 %s11691_s5, 4  ;;  %s10826_s11 = sshra.s32 %s12488_s3, 4  ;;  %s1812_s0 = int_to_ptr.vmem [resolvable:$true] %s1811_s0  ;;  %s10827_s11 = int_to_ptr.hbm [resolvable:$true] %s10826_s11 }
 0x258   : > { %s10828_s8 = scalar_lea.hbm %s10827_s11, 1  ;;  %s10832_s9 = scalar_lea.hbm %s14762_s12, 1 }
 0x259   : > { %p10829_p4 = scmp.ne.s32.totalorder %s10827_s11, %s10828_s8  ;;  %p10833_p11 = scmp.lt.s32.totalorder %s10827_s11, %s14762_s12 }
 0x25a   : > { %p10834_p12 = scmp.lt.s32.totalorder %s10832_s9, %s10828_s8 }
 0x25b   : > { %s1835_s6 = sshll.u32 %s14763_s15, 4  ;;  %p10830_p7 = pnand %p10829_p4, %p9257_p10  ;;  %s12499_s6 = int_to_ptr.hbm [resolvable:$true] %s1835_s6 }
 0x25c   : > { %p10835_p13 = por %p10834_p12, %p10833_p11 }
 0x25d   : > { %p10831_p8 = pneg %p10830_p7 }
 0x25f   : > { %p10836_p0 = pnand %p10835_p13, %p10831_p8 }
 0x261   : > { %10839 = shalt.err (!%p10836_p0)
}
 0x262   : > { %s14764_s16 = sld [smem:[#allocation126_spill]]  ;;  %s11692_s5 = smov [#allocation25]  }
 0x263   : > { %9068 = dma.hbm_to_vmem [thread:$0]  (%p9257_p10), %s12488_s3, 16, %s1812_s0, [#allocation21]  }
 0x264   : > { %s1837_s10 = sshll.u32 %s11692_s5, 4  ;;  %s10854_s11 = sshra.s32 %s12499_s6, 4  ;;  %s1838_s10 = int_to_ptr.vmem [resolvable:$true] %s1837_s10  ;;  %s10855_s11 = int_to_ptr.hbm [resolvable:$true] %s10854_s11 }
 0x265   : > { %s10856_s8 = scalar_lea.hbm %s10855_s11, 1  ;;  %s10860_s9 = scalar_lea.hbm %s14763_s15, 1 }
 0x266   : > { %p10857_p1 = scmp.ne.s32.totalorder %s10855_s11, %s10856_s8  ;;  %p10861_p4 = scmp.lt.s32.totalorder %s10855_s11, %s14763_s15 }
 0x267   : > { %p10862_p7 = scmp.lt.s32.totalorder %s10860_s9, %s10856_s8 }
 0x268   : > { %s1860_s1 = sshll.u32 %s14764_s16, 4  ;;  %p10858_p2 = pnand %p10857_p1, %p9257_p10  ;;  %s12510_s1 = int_to_ptr.hbm [resolvable:$true] %s1860_s1 }
 0x269   : > { %p10863_p8 = por %p10862_p7, %p10861_p4 }
 0x26a   : > { %p10859_p3 = pneg %p10858_p2 }
 0x26c   : > { %p10864_p11 = pnand %p10863_p8, %p10859_p3 }
 0x26e   : > { %10867 = shalt.err (!%p10864_p11)
}
 0x26f   : > { %s14765_s3 = sld [smem:[#allocation130_spill]]  ;;  %s11693_s0 = smov [#allocation28]  }
 0x270   : > { %9072 = dma.hbm_to_vmem [thread:$0]  (%p9257_p10), %s12499_s6, 16, %s1838_s10, [#allocation24]  }
 0x271   : > { %s1862_s5 = sshll.u32 %s11693_s0, 4  ;;  %s10882_s11 = sshra.s32 %s12510_s1, 4  ;;  %s1863_s5 = int_to_ptr.vmem [resolvable:$true] %s1862_s5  ;;  %s10883_s11 = int_to_ptr.hbm [resolvable:$true] %s10882_s11 }
 0x272   : > { %s10884_s8 = scalar_lea.hbm %s10883_s11, 4  ;;  %s10888_s9 = scalar_lea.hbm %s14764_s16, 4 }
 0x273   : > { %p10885_p12 = scmp.ne.s32.totalorder %s10883_s11, %s10884_s8  ;;  %p10889_p1 = scmp.lt.s32.totalorder %s10883_s11, %s14764_s16 }
 0x274   : > { %p10890_p2 = scmp.lt.s32.totalorder %s10888_s9, %s10884_s8 }
 0x275   : > { %s1896_s12 = sshll.u32 %s14765_s3, 4  ;;  %p10886_p13 = pnand %p10885_p12, %p9257_p10  ;;  %s12521_s12 = int_to_ptr.hbm [resolvable:$true] %s1896_s12 }
 0x276   : > { %p10891_p3 = por %p10890_p2, %p10889_p1 }
 0x277   : > { %p10887_p0 = pneg %p10886_p13 }
 0x279   : > { %p10892_p4 = pnand %p10891_p3, %p10887_p0 }
 0x27b   : > { %10895 = shalt.err (!%p10892_p4)
}
 0x27c   : > { %s14766_s6 = sld [smem:[#allocation133_spill]]  ;;  %s11694_s0 = smov [#allocation31]  }
 0x27d   : > { %9076 = dma.hbm_to_vmem [thread:$0]  (%p9257_p10), %s12510_s1, 64, %s1863_s5, [#allocation27], %s14737_s22, %s14737_s22, %s14736_s2  }
 0x27e   : > { %s1898_s15 = sshll.u32 %s11694_s0, 4  ;;  %s10910_s11 = sshra.s32 %s12521_s12, 4  ;;  %s1899_s15 = int_to_ptr.vmem [resolvable:$true] %s1898_s15  ;;  %s10911_s11 = int_to_ptr.hbm [resolvable:$true] %s10910_s11 }
 0x27f   : > { %s10912_s8 = scalar_lea.hbm %s10911_s11, 1  ;;  %s10916_s9 = scalar_lea.hbm %s14765_s3, 1 }
 0x280   : > { %p10913_p7 = scmp.ne.s32.totalorder %s10911_s11, %s10912_s8  ;;  %p10917_p12 = scmp.lt.s32.totalorder %s10911_s11, %s14765_s3 }
 0x281   : > { %p10918_p13 = scmp.lt.s32.totalorder %s10916_s9, %s10912_s8 }
 0x282   : > { %s1923_s10 = sshll.u32 %s14766_s6, 4  ;;  %p10914_p8 = pnand %p10913_p7, %p9257_p10  ;;  %s12535_s10 = int_to_ptr.hbm [resolvable:$true] %s1923_s10 }
 0x283   : > { %p10919_p0 = por %p10918_p13, %p10917_p12 }
 0x284   : > { %p10915_p11 = pneg %p10914_p8 }
 0x286   : > { %p10920_p1 = pnand %p10919_p0, %p10915_p11 }
 0x288   : > { %10923 = shalt.err (!%p10920_p1)
}
 0x289   : > { %s14767_s1 = sld [smem:[#allocation135_spill]]  ;;  %s11695_s0 = smov [#allocation34]  }
 0x28a   : > { %9080 = dma.hbm_to_vmem [thread:$0]  (%p9257_p10), %s12521_s12, 16, %s1899_s15, [#allocation30]  }
 0x28b   : > { %s1925_s16 = sshll.u32 %s11695_s0, 4  ;;  %s10938_s11 = sshra.s32 %s12535_s10, 4  ;;  %s1926_s16 = int_to_ptr.vmem [resolvable:$true] %s1925_s16  ;;  %s10939_s11 = int_to_ptr.hbm [resolvable:$true] %s10938_s11 }
 0x28c   : > { %s10940_s8 = scalar_lea.hbm %s10939_s11, 1  ;;  %s10944_s9 = scalar_lea.hbm %s14766_s6, 1 }
 0x28d   : > { %p10941_p2 = scmp.ne.s32.totalorder %s10939_s11, %s10940_s8  ;;  %p10945_p7 = scmp.lt.s32.totalorder %s10939_s11, %s14766_s6 }
 0x28e   : > { %p10946_p8 = scmp.lt.s32.totalorder %s10944_s9, %s10940_s8 }
 0x28f   : > { %s14768_s5 = smov %s14767_s1  ;;  %s1947_s17 = sshll.u32 %s14767_s1, 4  ;;  %s12546_s17 = int_to_ptr.hbm [resolvable:$true] %s1947_s17 }
 0x290   : > { %p10942_p3 = pnand %p10941_p2, %p9257_p10  ;;  %p10947_p11 = por %p10946_p8, %p10945_p7 }
 0x292   : > { %p10943_p4 = pneg %p10942_p3 }
 0x294   : > { %p10948_p12 = pnand %p10947_p11, %p10943_p4 }
 0x296   : > { %10951 = shalt.err (!%p10948_p12)
}
 0x297   : > { %s14769_s12 = sld [smem:[#allocation137_spill]]  ;;  %s11696_s1 = smov [#allocation37]  }
 0x298   : > { %9084 = dma.hbm_to_vmem [thread:$0]  (%p9257_p10), %s12535_s10, 16, %s1926_s16, [#allocation33]  }
 0x299   : > { %s1949_s0 = sshll.u32 %s11696_s1, 4  ;;  %s10966_s11 = sshra.s32 %s12546_s17, 4  ;;  %s1950_s0 = int_to_ptr.vmem [resolvable:$true] %s1949_s0  ;;  %s10967_s11 = int_to_ptr.hbm [resolvable:$true] %s10966_s11 }
 0x29a   : > { %s10968_s8 = scalar_lea.hbm %s10967_s11, 1  ;;  %s10972_s9 = scalar_lea.hbm %s14768_s5, 1 }
 0x29b   : > { %p10969_p13 = scmp.ne.s32.totalorder %s10967_s11, %s10968_s8  ;;  %p10973_p2 = scmp.lt.s32.totalorder %s10967_s11, %s14768_s5 }
 0x29c   : > { %p10974_p3 = scmp.lt.s32.totalorder %s10972_s9, %s10968_s8 }
 0x29d   : > { %s1974_s15 = sshll.u32 %s14769_s12, 4  ;;  %p10970_p0 = pnand %p10969_p13, %p9257_p10  ;;  %s12557_s15 = int_to_ptr.hbm [resolvable:$true] %s1974_s15 }
 0x29e   : > { %p10975_p4 = por %p10974_p3, %p10973_p2 }
 0x29f   : > { %p10971_p1 = pneg %p10970_p0 }
 0x2a1   : > { %p10976_p7 = pnand %p10975_p4, %p10971_p1 }
 0x2a3   : > { %10979 = shalt.err (!%p10976_p7)
}
 0x2a4   : > { %s14770_s16 = sld [smem:[#allocation139_spill]]  ;;  %s11697_s10 = smov [#allocation40]  }
 0x2a5   : > { %9088 = dma.hbm_to_vmem [thread:$0]  (%p9257_p10), %s12546_s17, 16, %s1950_s0, [#allocation36]  }
 0x2a6   : > { %s1976_s1 = sshll.u32 %s11697_s10, 4  ;;  %s10994_s11 = sshra.s32 %s12557_s15, 4  ;;  %s1977_s1 = int_to_ptr.vmem [resolvable:$true] %s1976_s1  ;;  %s10995_s11 = int_to_ptr.hbm [resolvable:$true] %s10994_s11 }
 0x2a7   : > { %s10996_s8 = scalar_lea.hbm %s10995_s11, 1  ;;  %s11000_s9 = scalar_lea.hbm %s14769_s12, 1 }
 0x2a8   : > { %p10997_p8 = scmp.ne.s32.totalorder %s10995_s11, %s10996_s8  ;;  %p11001_p13 = scmp.lt.s32.totalorder %s10995_s11, %s14769_s12 }
 0x2a9   : > { %p11002_p0 = scmp.lt.s32.totalorder %s11000_s9, %s10996_s8 }
 0x2aa   : > { %s2000_s3 = sshll.u32 %s14770_s16, 4  ;;  %p10998_p11 = pnand %p10997_p8, %p9257_p10  ;;  %s12568_s3 = int_to_ptr.hbm [resolvable:$true] %s2000_s3 }
 0x2ab   : > { %p11003_p1 = por %p11002_p0, %p11001_p13 }
 0x2ac   : > { %p10999_p12 = pneg %p10998_p11 }
 0x2ae   : > { %p11004_p2 = pnand %p11003_p1, %p10999_p12 }
 0x2b0   : > { %11007 = shalt.err (!%p11004_p2)
}
 0x2b1   : > { %s14771_s17 = sld [smem:[#allocation141_spill]]  ;;  %s11698_s10 = smov [#allocation43]  }
 0x2b2   : > { %9092 = dma.hbm_to_vmem [thread:$0]  (%p9257_p10), %s12557_s15, 16, %s1977_s1, [#allocation39]  }
 0x2b3   : > { %s2002_s5 = sshll.u32 %s11698_s10, 4  ;;  %s11022_s11 = sshra.s32 %s12568_s3, 4  ;;  %s2003_s5 = int_to_ptr.vmem [resolvable:$true] %s2002_s5  ;;  %s11023_s11 = int_to_ptr.hbm [resolvable:$true] %s11022_s11 }
 0x2b4   : > { %s11024_s8 = scalar_lea.hbm %s11023_s11, 1  ;;  %s11028_s9 = scalar_lea.hbm %s14770_s16, 1 }
 0x2b5   : > { %p11025_p3 = scmp.ne.s32.totalorder %s11023_s11, %s11024_s8  ;;  %p11029_p8 = scmp.lt.s32.totalorder %s11023_s11, %s14770_s16 }
 0x2b6   : > { %p11030_p11 = scmp.lt.s32.totalorder %s11028_s9, %s11024_s8 }
 0x2b7   : > { %s2025_s0 = sshll.u32 %s14771_s17, 4  ;;  %p11026_p4 = pnand %p11025_p3, %p9257_p10  ;;  %s12579_s0 = int_to_ptr.hbm [resolvable:$true] %s2025_s0 }
 0x2b8   : > { %p11031_p12 = por %p11030_p11, %p11029_p8 }
 0x2b9   : > { %p11027_p7 = pneg %p11026_p4 }
 0x2bb   : > { %p11032_p13 = pnand %p11031_p12, %p11027_p7 }
 0x2bd   : > { %11035 = shalt.err (!%p11032_p13)
}
 0x2be   : > { %s14772_s15 = sld [smem:[#allocation144_spill]]  ;;  %s11699_s1 = smov [#allocation46]  }
 0x2bf   : > { %9096 = dma.hbm_to_vmem [thread:$0]  (%p9257_p10), %s12568_s3, 16, %s2003_s5, [#allocation42]  }
 0x2c0   : > { %s2027_s10 = sshll.u32 %s11699_s1, 4  ;;  %s11050_s11 = sshra.s32 %s12579_s0, 4  ;;  %s2028_s10 = int_to_ptr.vmem [resolvable:$true] %s2027_s10  ;;  %s11051_s11 = int_to_ptr.hbm [resolvable:$true] %s11050_s11 }
 0x2c1   : > { %s11052_s8 = scalar_lea.hbm %s11051_s11, 4  ;;  %s11056_s9 = scalar_lea.hbm %s14771_s17, 4 }
 0x2c2   : > { %p11053_p0 = scmp.ne.s32.totalorder %s11051_s11, %s11052_s8  ;;  %p11057_p3 = scmp.lt.s32.totalorder %s11051_s11, %s14771_s17 }
 0x2c3   : > { %p11058_p4 = scmp.lt.s32.totalorder %s11056_s9, %s11052_s8 }
 0x2c4   : > { %s2057_s6 = sshll.u32 %s14772_s15, 4  ;;  %p11054_p1 = pnand %p11053_p0, %p9257_p10  ;;  %s12590_s6 = int_to_ptr.hbm [resolvable:$true] %s2057_s6 }
 0x2c5   : > { %p11059_p7 = por %p11058_p4, %p11057_p3 }
 0x2c6   : > { %p11055_p2 = pneg %p11054_p1 }
 0x2c8   : > { %p11060_p8 = pnand %p11059_p7, %p11055_p2 }
 0x2ca   : > { %11063 = shalt.err (!%p11060_p8)
}
 0x2cb   : > { %s14773_s3 = sld [smem:[#allocation148_spill]]  ;;  %s11700_s1 = smov [#allocation49]  }
 0x2cc   : > { %9100 = dma.hbm_to_vmem [thread:$0]  (%p9257_p10), %s12579_s0, 64, %s2028_s10, [#allocation45], %s14737_s22, %s14737_s22, %s14736_s2  }
 0x2cd   : > { %s2059_s12 = sshll.u32 %s11700_s1, 4  ;;  %s11078_s11 = sshra.s32 %s12590_s6, 4  ;;  %s2060_s12 = int_to_ptr.vmem [resolvable:$true] %s2059_s12  ;;  %s11079_s11 = int_to_ptr.hbm [resolvable:$true] %s11078_s11 }
 0x2ce   : > { %s11080_s8 = scalar_lea.hbm %s11079_s11, 2  ;;  %s11084_s9 = scalar_lea.hbm %s14772_s15, 2 }
 0x2cf   : > { %p11081_p11 = scmp.ne.s32.totalorder %s11079_s11, %s11080_s8  ;;  %p11085_p0 = scmp.lt.s32.totalorder %s11079_s11, %s14772_s15 }
 0x2d0   : > { %p11086_p1 = scmp.lt.s32.totalorder %s11084_s9, %s11080_s8 }
 0x2d1   : > { %s2087_s5 = sshll.u32 %s14773_s3, 4  ;;  %p11082_p12 = pnand %p11081_p11, %p9257_p10  ;;  %s12604_s5 = int_to_ptr.hbm [resolvable:$true] %s2087_s5 }
 0x2d2   : > { %p11087_p2 = por %p11086_p1, %p11085_p0 }
 0x2d3   : > { %p11083_p13 = pneg %p11082_p12 }
 0x2d5   : > { %p11088_p3 = pnand %p11087_p2, %p11083_p13 }
 0x2d7   : > { %11091 = shalt.err (!%p11088_p3)
}
 0x2d8   : > { %s14774_s0 = sld [smem:[#allocation150_spill]]  ;;  %s11701_s1 = smov [#allocation52]  }
 0x2d9   : > { %9104 = dma.hbm_to_vmem [thread:$0]  (%p9257_p10), %s12590_s6, 32, %s2060_s12, [#allocation48]  }
 0x2da   : > { %s2089_s16 = sshll.u32 %s11701_s1, 4  ;;  %s11106_s11 = sshra.s32 %s12604_s5, 4  ;;  %s2090_s16 = int_to_ptr.vmem [resolvable:$true] %s2089_s16  ;;  %s11107_s11 = int_to_ptr.hbm [resolvable:$true] %s11106_s11 }
 0x2db   : > { %s11108_s8 = scalar_lea.hbm %s11107_s11, 1  ;;  %s11112_s9 = scalar_lea.hbm %s14773_s3, 1 }
 0x2dc   : > { %p11109_p4 = scmp.ne.s32.totalorder %s11107_s11, %s11108_s8  ;;  %p11113_p11 = scmp.lt.s32.totalorder %s11107_s11, %s14773_s3 }
 0x2dd   : > { %p11114_p12 = scmp.lt.s32.totalorder %s11112_s9, %s11108_s8 }
 0x2de   : > { %s14775_s10 = smov %s14774_s0  ;;  %s2111_s17 = sshll.u32 %s14774_s0, 4  ;;  %s12615_s17 = int_to_ptr.hbm [resolvable:$true] %s2111_s17 }
 0x2df   : > { %p11110_p7 = pnand %p11109_p4, %p9257_p10  ;;  %p11115_p13 = por %p11114_p12, %p11113_p11 }
 0x2e1   : > { %p11111_p8 = pneg %p11110_p7 }
 0x2e3   : > { %p11116_p0 = pnand %p11115_p13, %p11111_p8 }
 0x2e5   : > { %11119 = shalt.err (!%p11116_p0)
}
 0x2e6   : > { %s14776_s6 = sld [smem:[#allocation152_spill]]  ;;  %s11702_s0 = smov [#allocation55]  }
 0x2e7   : > { %9108 = dma.hbm_to_vmem [thread:$0]  (%p9257_p10), %s12604_s5, 16, %s2090_s16, [#allocation51]  }
 0x2e8   : > { %s2113_s1 = sshll.u32 %s11702_s0, 4  ;;  %s11134_s11 = sshra.s32 %s12615_s17, 4  ;;  %s2114_s1 = int_to_ptr.vmem [resolvable:$true] %s2113_s1  ;;  %s11135_s11 = int_to_ptr.hbm [resolvable:$true] %s11134_s11 }
 0x2e9   : > { %s11136_s8 = scalar_lea.hbm %s11135_s11, 1  ;;  %s11140_s9 = scalar_lea.hbm %s14775_s10, 1 }
 0x2ea   : > { %p11137_p1 = scmp.ne.s32.totalorder %s11135_s11, %s11136_s8  ;;  %p11141_p4 = scmp.lt.s32.totalorder %s11135_s11, %s14775_s10 }
 0x2eb   : > { %p11142_p7 = scmp.lt.s32.totalorder %s11140_s9, %s11136_s8 }
 0x2ec   : > { %s2135_s12 = sshll.u32 %s14776_s6, 4  ;;  %p11138_p2 = pnand %p11137_p1, %p9257_p10  ;;  %s12626_s12 = int_to_ptr.hbm [resolvable:$true] %s2135_s12 }
 0x2ed   : > { %p11143_p8 = por %p11142_p7, %p11141_p4 }
 0x2ee   : > { %p11139_p3 = pneg %p11138_p2 }
 0x2f0   : > { %p11144_p11 = pnand %p11143_p8, %p11139_p3 }
 0x2f2   : > { %11147 = shalt.err (!%p11144_p11)
}
 0x2f3   : > { %s14777_s16 = sld [smem:[#allocation154_spill]]  ;;  %s11703_s5 = smov [#allocation58]  }
 0x2f4   : > { %9112 = dma.hbm_to_vmem [thread:$0]  (%p9257_p10), %s12615_s17, 16, %s2114_s1, [#allocation54]  }
 0x2f5   : > { %s2137_s0 = sshll.u32 %s11703_s5, 4  ;;  %s11162_s11 = sshra.s32 %s12626_s12, 4  ;;  %s2138_s0 = int_to_ptr.vmem [resolvable:$true] %s2137_s0  ;;  %s11163_s11 = int_to_ptr.hbm [resolvable:$true] %s11162_s11 }
 0x2f6   : > { %s11164_s8 = scalar_lea.hbm %s11163_s11, 1  ;;  %s11168_s9 = scalar_lea.hbm %s14776_s6, 1 }
 0x2f7   : > { %p11165_p12 = scmp.ne.s32.totalorder %s11163_s11, %s11164_s8  ;;  %p11169_p1 = scmp.lt.s32.totalorder %s11163_s11, %s14776_s6 }
 0x2f8   : > { %p11170_p2 = scmp.lt.s32.totalorder %s11168_s9, %s11164_s8 }
 0x2f9   : > { %s2161_s3 = sshll.u32 %s14777_s16, 4  ;;  %p11166_p13 = pnand %p11165_p12, %p9257_p10  ;;  %s12637_s3 = int_to_ptr.hbm [resolvable:$true] %s2161_s3 }
 0x2fa   : > { %p11171_p3 = por %p11170_p2, %p11169_p1 }
 0x2fb   : > { %p11167_p0 = pneg %p11166_p13 }
 0x2fd   : > { %p11172_p4 = pnand %p11171_p3, %p11167_p0 }
 0x2ff   : > { %11175 = shalt.err (!%p11172_p4)
}
 0x300   : > { %s14778_s17 = sld [smem:[#allocation157_spill]]  ;;  %s11704_s5 = smov [#allocation61]  }
 0x301   : > { %9116 = dma.hbm_to_vmem [thread:$0]  (%p9257_p10), %s12626_s12, 16, %s2138_s0, [#allocation57]  }
 0x302   : > { %s2163_s10 = sshll.u32 %s11704_s5, 4  ;;  %s11190_s11 = sshra.s32 %s12637_s3, 4  ;;  %s2164_s10 = int_to_ptr.vmem [resolvable:$true] %s2163_s10  ;;  %s11191_s11 = int_to_ptr.hbm [resolvable:$true] %s11190_s11 }
 0x303   : > { %s11192_s8 = scalar_lea.hbm %s11191_s11, 2  ;;  %s11196_s9 = scalar_lea.hbm %s14777_s16, 2 }
 0x304   : > { %p11193_p7 = scmp.ne.s32.totalorder %s11191_s11, %s11192_s8  ;;  %p11197_p12 = scmp.lt.s32.totalorder %s11191_s11, %s14777_s16 }
 0x305   : > { %p11198_p13 = scmp.lt.s32.totalorder %s11196_s9, %s11192_s8 }
 0x306   : > { %s2187_s1 = sshll.u32 %s14778_s17, 4  ;;  %p11194_p8 = pnand %p11193_p7, %p9257_p10  ;;  %s12648_s1 = int_to_ptr.hbm [resolvable:$true] %s2187_s1 }
 0x307   : > { %p11199_p0 = por %p11198_p13, %p11197_p12 }
 0x308   : > { %p11195_p11 = pneg %p11194_p8 }
 0x30a   : > { %p11200_p1 = pnand %p11199_p0, %p11195_p11 }
 0x30c   : > { %11203 = shalt.err (!%p11200_p1)
}
 0x30d   : > { %s14779_s12 = sld [smem:[#allocation159_spill]]  ;;  %s11705_s0 = smov [#allocation64]  }
 0x30e   : > { %9120 = dma.hbm_to_vmem [thread:$0]  (%p9257_p10), %s12637_s3, 32, %s2164_s10, [#allocation60]  }
 0x30f   : > { %s2189_s5 = sshll.u32 %s11705_s0, 4  ;;  %s11218_s11 = sshra.s32 %s12648_s1, 4  ;;  %s2190_s5 = int_to_ptr.vmem [resolvable:$true] %s2189_s5  ;;  %s11219_s11 = int_to_ptr.hbm [resolvable:$true] %s11218_s11 }
 0x310   : > { %s11220_s8 = scalar_lea.hbm %s11219_s11, 4  ;;  %s11224_s9 = scalar_lea.hbm %s14778_s17, 4 }
 0x311   : > { %p11221_p2 = scmp.ne.s32.totalorder %s11219_s11, %s11220_s8  ;;  %p11225_p7 = scmp.lt.s32.totalorder %s11219_s11, %s14778_s17 }
 0x312   : > { %p11226_p8 = scmp.lt.s32.totalorder %s11224_s9, %s11220_s8 }
 0x313   : > { %s2215_s6 = sshll.u32 %s14779_s12, 4  ;;  %p11222_p3 = pnand %p11221_p2, %p9257_p10  ;;  %s12659_s6 = int_to_ptr.hbm [resolvable:$true] %s2215_s6 }
 0x314   : > { %p11227_p11 = por %p11226_p8, %p11225_p7 }
 0x315   : > { %p11223_p4 = pneg %p11222_p3 }
 0x317   : > { %p11228_p12 = pnand %p11227_p11, %p11223_p4 }
 0x319   : > { %11231 = shalt.err (!%p11228_p12)
}
 0x31a   : > { %s14780_s3 = sld [smem:[#allocation163_spill]]  ;;  %s11706_s0 = smov [#allocation67]  }
 0x31b   : > { %9124 = dma.hbm_to_vmem [thread:$0]  (%p9257_p10), %s12648_s1, 64, %s2190_s5, [#allocation63], %s14737_s22, %s14737_s22, %s14736_s2  }
 0x31c   : > { %s2217_s15 = sshll.u32 %s11706_s0, 4  ;;  %s11246_s11 = sshra.s32 %s12659_s6, 4  ;;  %s2218_s15 = int_to_ptr.vmem [resolvable:$true] %s2217_s15  ;;  %s11247_s11 = int_to_ptr.hbm [resolvable:$true] %s11246_s11 }
 0x31d   : > { %s11248_s8 = scalar_lea.hbm %s11247_s11, 4  ;;  %s11252_s9 = scalar_lea.hbm %s14779_s12, 4 }
 0x31e   : > { %p11249_p13 = scmp.ne.s32.totalorder %s11247_s11, %s11248_s8  ;;  %p11253_p2 = scmp.lt.s32.totalorder %s11247_s11, %s14779_s12 }
 0x31f   : > { %p11254_p3 = scmp.lt.s32.totalorder %s11252_s9, %s11248_s8 }
 0x320   : > { %s2248_s10 = sshll.u32 %s14780_s3, 4  ;;  %p11250_p0 = pnand %p11249_p13, %p9257_p10  ;;  %s12673_s10 = int_to_ptr.hbm [resolvable:$true] %s2248_s10 }
 0x321   : > { %p11255_p4 = por %p11254_p3, %p11253_p2 }
 0x322   : > { %p11251_p1 = pneg %p11250_p0 }
 0x324   : > { %p11256_p7 = pnand %p11255_p4, %p11251_p1 }
 0x326   : > { %11259 = shalt.err (!%p11256_p7)
}
 0x327   : > { %s14781_s1 = sld [smem:[#allocation166_spill]]  ;;  %s11707_s0 = smov [#allocation70]  }
 0x328   : > { %9128 = dma.hbm_to_vmem [thread:$0]  (%p9257_p10), %s12659_s6, 64, %s2218_s15, [#allocation66], %s14737_s22, %s14737_s22, %s14736_s2  }
 0x329   : > { %s2250_s16 = sshll.u32 %s11707_s0, 4  ;;  %s11274_s11 = sshra.s32 %s12673_s10, 4  ;;  %s2251_s16 = int_to_ptr.vmem [resolvable:$true] %s2250_s16  ;;  %s11275_s11 = int_to_ptr.hbm [resolvable:$true] %s11274_s11 }
 0x32a   : > { %s11276_s8 = scalar_lea.hbm %s11275_s11, 1  ;;  %s11280_s9 = scalar_lea.hbm %s14780_s3, 1 }
 0x32b   : > { %p11277_p8 = scmp.ne.s32.totalorder %s11275_s11, %s11276_s8  ;;  %p11281_p13 = scmp.lt.s32.totalorder %s11275_s11, %s14780_s3 }
 0x32c   : > { %p11282_p0 = scmp.lt.s32.totalorder %s11280_s9, %s11276_s8 }
 0x32d   : > { %s14782_s5 = smov %s14781_s1  ;;  %s2275_s17 = sshll.u32 %s14781_s1, 4  ;;  %s12687_s17 = int_to_ptr.hbm [resolvable:$true] %s2275_s17 }
 0x32e   : > { %p11278_p11 = pnand %p11277_p8, %p9257_p10  ;;  %p11283_p1 = por %p11282_p0, %p11281_p13 }
 0x330   : > { %p11279_p12 = pneg %p11278_p11 }
 0x332   : > { %p11284_p2 = pnand %p11283_p1, %p11279_p12 }
 0x334   : > { %11287 = shalt.err (!%p11284_p2)
}
 0x335   : > { %s14783_s2 = sld [smem:[#allocation168_spill]]  ;;  %s11708_s6 = smov [#allocation73]  }
 0x336   : > { %9132 = dma.hbm_to_vmem [thread:$0]  (%p9257_p10), %s12673_s10, 16, %s2251_s16, [#allocation69]  }
 0x337   : > { %s2277_s1 = sshll.u32 %s11708_s6, 4  ;;  %s11302_s0 = sshra.s32 %s12687_s17, 4  ;;  %s2278_s1 = int_to_ptr.vmem [resolvable:$true] %s2277_s1  ;;  %s11303_s0 = int_to_ptr.hbm [resolvable:$true] %s11302_s0 }
 0x338   : > { %s11304_s11 = scalar_lea.hbm %s11303_s0, 1  ;;  %s11308_s8 = scalar_lea.hbm %s14782_s5, 1 }
 0x339   : > { %p11305_p3 = scmp.ne.s32.totalorder %s11303_s0, %s11304_s11  ;;  %p11309_p8 = scmp.lt.s32.totalorder %s11303_s0, %s14782_s5 }
 0x33a   : > { %p11310_p11 = scmp.lt.s32.totalorder %s11308_s8, %s11304_s11 }
 0x33b   : > { %s14784_s22 = smov %s14783_s2  ;;  %s2299_s15 = sshll.u32 %s14783_s2, 4  ;;  %s12698_s15 = int_to_ptr.hbm [resolvable:$true] %s2299_s15 }
 0x33c   : > { %p11306_p4 = pnand %p11305_p3, %p9257_p10  ;;  %p11311_p12 = por %p11310_p11, %p11309_p8 }
 0x33e   : > { %p11307_p7 = pneg %p11306_p4 }
 0x340   : > { %p11312_p13 = pnand %p11311_p12, %p11307_p7 }
 0x342   : > { %11315 = shalt.err (!%p11312_p13)
}
 0x343   : > { %9136 = dma.hbm_to_vmem [thread:$0]  (%p9257_p10), %s12687_s17, 16, %s2278_s1, [#allocation72]  }
 0x344   : > { %s11709_s16 = smov [#allocation76]   ;;  %s2322_s9 = sshll.u32 %s12068_s21, 4  ;;  %s12709_s9 = int_to_ptr.hbm [resolvable:$true] %s2322_s9 }
 0x345   : > { %s2301_s10 = sshll.u32 %s11709_s16, 4  ;;  %s11330_s2 = sshra.s32 %s12698_s15, 4  ;;  %s2302_s10 = int_to_ptr.vmem [resolvable:$true] %s2301_s10  ;;  %s11331_s2 = int_to_ptr.hbm [resolvable:$true] %s11330_s2 }
 0x346   : > { %s11332_s6 = scalar_lea.hbm %s11331_s2, 1  ;;  %s11336_s0 = scalar_lea.hbm %s14784_s22, 1 }
 0x347   : > { %p11333_p0 = scmp.ne.s32.totalorder %s11331_s2, %s11332_s6  ;;  %p11337_p3 = scmp.lt.s32.totalorder %s11331_s2, %s14784_s22 }
 0x348   : > { %p11338_p4 = scmp.lt.s32.totalorder %s11336_s0, %s11332_s6 }
 0x349   : > { %p11334_p1 = pnand %p11333_p0, %p9257_p10 }
 0x34a   : > { %p11339_p7 = por %p11338_p4, %p11337_p3 }
 0x34b   : > { %p11335_p2 = pneg %p11334_p1 }
 0x34d   : > { %p11340_p8 = pnand %p11339_p7, %p11335_p2 }
 0x34f   : > { %11343 = shalt.err (!%p11340_p8)
}
 0x350   : > { %9140 = dma.hbm_to_vmem [thread:$0]  (%p9257_p10), %s12698_s15, 16, %s2302_s10, [#allocation75]  }
 0x351   : > { %s2337_s17 = sshll.u32 %s12073_s29, 4  ;;  %s11710_s1 = smov [#allocation79]   ;;  %s12720_s17 = int_to_ptr.hbm [resolvable:$true] %s2337_s17 }
 0x352   : > { %s2324_s11 = sshll.u32 %s11710_s1, 4  ;;  %s11358_s8 = sshra.s32 %s12709_s9, 4  ;;  %s2325_s11 = int_to_ptr.vmem [resolvable:$true] %s2324_s11  ;;  %s11359_s8 = int_to_ptr.hbm [resolvable:$true] %s11358_s8 }
 0x353   : > { %s11360_s16 = scalar_lea.hbm %s11359_s8, 128  ;;  %s11364_s2 = scalar_lea.hbm %s12068_s21, 128 }
 0x354   : > { %p11361_p11 = scmp.ne.s32.totalorder %s11359_s8, %s11360_s16  ;;  %p11365_p0 = scmp.lt.s32.totalorder %s11359_s8, %s12068_s21 }
 0x355   : > { %p11366_p1 = scmp.lt.s32.totalorder %s11364_s2, %s11360_s16 }
 0x356   : > { %p11362_p12 = pnand %p11361_p11, %p9257_p10 }
 0x357   : > { %p11367_p2 = por %p11366_p1, %p11365_p0 }
 0x358   : > { %p11363_p13 = pneg %p11362_p12 }
 0x35a   : > { %p11368_p3 = pnand %p11367_p2, %p11363_p13 }
 0x35c   : > { %11371 = shalt.err (!%p11368_p3)
}
 0x35d   : > { %9144 = dma.hbm_to_vmem [thread:$0]  (%p9257_p10), %s12709_s9, 2048, %s2325_s11, [#allocation78], %s14734_s18, %s14734_s18, %s14748_s4  }
 0x35e   : > { %s11711_s15 = smov [#allocation80]   ;;  %s11386_s6 = sshra.s32 %s12720_s17, 4  ;;  %s11387_s6 = int_to_ptr.hbm [resolvable:$true] %s11386_s6 }
 0x35f   : > { %s2339_s10 = sshll.u32 %s11711_s15, 4  ;;  %s11388_s0 = scalar_lea.hbm %s11387_s6, 3  ;;  %s2340_s10 = int_to_ptr.vmem [resolvable:$true] %s2339_s10 }
 0x360   : > { %p11389_p4 = scmp.ne.s32.totalorder %s11387_s6, %s11388_s0  ;;  %s11392_s1 = scalar_lea.hbm %s12073_s29, 3 }
 0x361   : > { %p11393_p11 = scmp.lt.s32.totalorder %s11387_s6, %s12073_s29  ;;  %p11394_p12 = scmp.lt.s32.totalorder %s11392_s1, %s11388_s0 }
 0x362   : > { %p11390_p7 = pnand %p11389_p4, %p9257_p10 }
 0x363   : > { %p11395_p13 = por %p11394_p12, %p11393_p11 }
 0x364   : > { %p11391_p8 = pneg %p11390_p7 }
 0x366   : > { %p11396_p0 = pnand %p11395_p13, %p11391_p8 }
 0x368   : > { %11399 = shalt.err (!%p11396_p0)
}
 0x369   : > { %9146 = dma.hbm_to_vmem [thread:$0]  (%p9257_p10), %s12720_s17, 48, %s2340_s10, [#allocation81]  }
 0x36a PF: > { %2363 = sbr.rel (%p12133_p9) target bundleno = 11036 (0x2b1c), region = 292  ;;  %p9309_p1 = scmp.eq.s32.totalorder (!%p12133_p9), %s12106_s7, 0 }
 0x36f   : > { %11459 = dma.done.wait (%p9309_p1), [#allocation3], 16  }
 0x370   : > { %11461 = vsyncadd (%p9309_p1), [#allocation3], 4294967280 }
 0x371   : > { %11463 = dma.done.wait (%p9309_p1), [#allocation6], 272  }
 0x372   : > { %11465 = vsyncadd (%p9309_p1), [#allocation6], 4294967024 }
 0x373   : > { %11467 = dma.done.wait (%p9309_p1), [#allocation9], 272  }
 0x374   : > { %11469 = vsyncadd (%p9309_p1), [#allocation9], 4294967024 }
 0x375   : > { %11471 = dma.done.wait (%p9309_p1), [#allocation12], 32  }
 0x376   : > { %11473 = vsyncadd (%p9309_p1), [#allocation12], 4294967264 }
 0x377   : > { %11475 = dma.done.wait (%p9309_p1), [#allocation15], 32  }
 0x378   : > { %11477 = vsyncadd (%p9309_p1), [#allocation15], 4294967264 }
 0x379   : > { %11479 = dma.done.wait (%p9309_p1), [#allocation18], 32  }
 0x37a   : > { %11481 = vsyncadd (%p9309_p1), [#allocation18], 4294967264 }
 0x37b   : > { %11483 = dma.done.wait (%p9309_p1), [#allocation21], 272  }
 0x37c   : > { %11485 = vsyncadd (%p9309_p1), [#allocation21], 4294967024 }
 0x37d   : > { %11487 = dma.done.wait (%p9309_p1), [#allocation24], 272  }
 0x37e   : > { %11489 = vsyncadd (%p9309_p1), [#allocation24], 4294967024 }
 0x37f   : > { %11491 = dma.done.wait (%p9309_p1), [#allocation27], 128  }
 0x380   : > { %11493 = vsyncadd (%p9309_p1), [#allocation27], 4294967168 }
 0x381   : > { %11495 = dma.done.wait (%p9309_p1), [#allocation30], 32  }
 0x382   : > { %11497 = vsyncadd (%p9309_p1), [#allocation30], 4294967264 }
 0x383   : > { %11499 = dma.done.wait (%p9309_p1), [#allocation33], 32  }
 0x384   : > { %11501 = vsyncadd (%p9309_p1), [#allocation33], 4294967264 }
 0x385   : > { %11503 = dma.done.wait (%p9309_p1), [#allocation36], 32  }
 0x386   : > { %11505 = vsyncadd (%p9309_p1), [#allocation36], 4294967264 }
 0x387   : > { %11507 = dma.done.wait (%p9309_p1), [#allocation39], 32  }
 0x388   : > { %11509 = vsyncadd (%p9309_p1), [#allocation39], 4294967264 }
 0x389   : > { %11511 = dma.done.wait (%p9309_p1), [#allocation42], 528  }
 0x38a   : > { %11513 = vsyncadd (%p9309_p1), [#allocation42], 4294966768 }
 0x38b   : > { %11515 = dma.done.wait (%p9309_p1), [#allocation45], 128  }
 0x38c   : > { %11517 = vsyncadd (%p9309_p1), [#allocation45], 4294967168 }
 0x38d   : > { %11519 = dma.done.wait (%p9309_p1), [#allocation48], 288  }
 0x38e   : > { %11521 = vsyncadd (%p9309_p1), [#allocation48], 4294967008 }
 0x38f   : > { %11523 = dma.done.wait (%p9309_p1), [#allocation51], 32  }
 0x390   : > { %11525 = vsyncadd (%p9309_p1), [#allocation51], 4294967264 }
 0x391   : > { %11527 = dma.done.wait (%p9309_p1), [#allocation54], 32  }
 0x392   : > { %11529 = vsyncadd (%p9309_p1), [#allocation54], 4294967264 }
 0x393   : > { %11531 = dma.done.wait (%p9309_p1), [#allocation57], 32  }
 0x394   : > { %11533 = vsyncadd (%p9309_p1), [#allocation57], 4294967264 }
 0x395   : > { %11535 = dma.done.wait (%p9309_p1), [#allocation60], 1056  }
 0x396   : > { %11537 = vsyncadd (%p9309_p1), [#allocation60], 4294966240 }
 0x397   : > { %11539 = dma.done.wait (%p9309_p1), [#allocation63], 80  }
 0x398   : > { %11541 = vsyncadd (%p9309_p1), [#allocation63], 4294967216 }
 0x399   : > { %11543 = dma.done.wait (%p9309_p1), [#allocation66], 128  }
 0x39a   : > { %11545 = vsyncadd (%p9309_p1), [#allocation66], 4294967168 }
 0x39b   : > { %11547 = dma.done.wait (%p9309_p1), [#allocation69], 80  }
 0x39c   : > { %11549 = vsyncadd (%p9309_p1), [#allocation69], 4294967216 }
 0x39d   : > { %11551 = dma.done.wait (%p9309_p1), [#allocation72], 32  }
 0x39e   : > { %11553 = vsyncadd (%p9309_p1), [#allocation72], 4294967264 }
 0x39f   : > { %11555 = dma.done.wait (%p9309_p1), [#allocation75], 32  }
 0x3a0   : > { %11557 = vsyncadd (%p9309_p1), [#allocation75], 4294967264 }
 0x3a1   : > { %11559 = dma.done.wait (%p9309_p1), [#allocation78], 2064  }
 0x3a2   : > { %11561 = vsyncadd (%p9309_p1), [#allocation78], 4294965232 }
 0x3a3   : > { %11563 = dma.done.wait (%p9309_p1), [#allocation81], 48  }
 0x3a4   : > { %11565 = vsyncadd (%p9309_p1), [#allocation81], 4294967248  ;;  %s14785_s26 = sld [smem:[#allocation111_spill]]  ;;  %p2772_p9 = scmp.lt.s32.totalorder %s12106_s7, 1  ;;  %v2781_v0 = vld [vmem:[#allocation7 + $0x8] sm:$0xff]  ;;  %v2780_v1 = vld [vmem:[#allocation7] sm:$0xff] }
 0x3a5   : > { %3239 = vmatpush.msra.mxu0 %v2781_v0  ;;  %vm3200_vm0 = vcmask 130048   ;;  %v9643_v10 = vld [vmem:[#allocation5] ss:$0 sm:$0xff]  ;;  %v11712_v32 = vmov 16.0   ;;  %s14642_s17 = smov 112   ;;  %s11714_s11 = smov 108  }
 0x3a6   : > { %s2773_s18 = scalar_select %p2772_p9, %s12106_s7, 1  ;;  %9684 = vrcp.f32 %v11712_v32 }
 0x3a7   : > { %3240 = vmatpush.msra.mxu0 %v2780_v1  ;;  %s11715_s8 = smov 124   ;;  %s14645_s16 = smov 96  }
 0x3a8   : > { %s9041_s4 = sshll.u32 %s2773_s18, 6  ;;  %s11717_s2 = smov 100  }
 0x3a9   : > { %s11718_s15 = smov 104   ;;  %s11719_s10 = smov 120  }
 0x3aa   : > { %s2776_s9 = scalar_lea.vmem %s14785_s26, %s9041_s4  ;;  %s11720_s6 = smov 116  }
 0x3ab   : > { %v3189_v2 = vld [vmem:[%s2776_s9] sm:$0xff]  ;;  %v3190_v3 = vld [vmem:[%s2776_s9 + $0x8] sm:$0xff]  ;;  %v3191_v4 = vld [vmem:[%s2776_s9 + $0x10] sm:$0xff]  ;;  %s11721_s0 = smov 92   ;;  %s11722_s1 = smov 88  }
 0x3ac   : > { %8775 = vmatmul.msk.f32.vlgmr.msra.gmra.mxu0 %vm3200_vm0, %v3189_v2  ;;  %v3192_v5 = vld [vmem:[%s2776_s9 + $0x18] sm:$0xff]  ;;  %v3193_v6 = vld [vmem:[%s2776_s9 + $0x20] sm:$0xff]  ;;  %v3194_v7 = vld [vmem:[%s2776_s9 + $0x28] sm:$0xff]  ;;  %v9685_v33 = vpop.eup %9684  ;;  %s11723_s26 = smov 84   ;;  %s14786_s18 = sld [smem:[#allocation118_spill]] }
 0x3ad   : > { %v3195_v8 = vld [vmem:[%s2776_s9 + $0x30] sm:$0xff]  ;;  %v3196_v9 = vld [vmem:[%s2776_s9 + $0x38] sm:$0xff]  ;;  %v3291_v34 = vmul.f32 16.0, %v9685_v33  ;;  %vm3295_vm1 = vweird.f32 %v9685_v33  ;;  %s14787_s4 = sld [smem:[#allocation127_spill]] }
 0x3ae   : > { %s14788_s9 = sld [smem:[#allocation128_spill]] }
 0x3af   : > { %v3292_v35 = vsub.f32 1.0, %v3291_v34 }
 0x3b1   : > { %v3293_v36 = vmul.f32 %v9685_v33, %v3292_v35 }
 0x3b3   : > { %v3294_v37 = vadd.f32 %v9685_v33, %v3293_v36 }
 0x3b4   : > { %8776 = vmatmul.msk.f32.gmra.mxu0 %vm3200_vm0, %v3190_v3 }
 0x3b5   : > { %v12891_v38 = vsel %vm3295_vm1, %v9685_v33, %v3294_v37 }
 0x3bc   : > { %8777 = vmatmul.msk.f32.gmra.mxu0 %vm3200_vm0, %v3191_v4 }
 0x3c4   : > { %8778 = vmatmul.msk.f32.gmra.mxu0 %vm3200_vm0, %v3192_v5 }
 0x3cc   : > { %8779 = vmatmul.msk.f32.gmra.mxu0 %vm3200_vm0, %v3193_v6 }
 0x3d4   : > { %8780 = vmatmul.msk.f32.gmra.mxu0 %vm3200_vm0, %v3194_v7 }
 0x3dc   : > { %8781 = vmatmul.msk.f32.gmra.mxu0 %vm3200_vm0, %v3195_v8 }
 0x3e4   : > { %8782 = vmatmul.msk.f32.gmra.mxu0 %vm3200_vm0, %v3196_v9 }
 0x429   : > { %v3242_v11 = vpop.f32.mrf.mxu0 }
 0x42a   : > { %v12863_v12 = vadd.f32 %v9643_v10, %v3242_v11 }
 0x42c   : > { %v3266_v13 = vsel %vm3200_vm0, %v12863_v12, 0.0 }
 0x42d   : > { %3267 = vadd.xlane.f32.xlu0 %v3266_v13 }
 0x431   : > { %v3245_v14 = vpop.f32.mrf.mxu0 }
 0x432   : > { %v12867_v15 = vadd.f32 %v9643_v10, %v3245_v14  ;;  %v2805_v14 = vld [vmem:[#allocation23 + $0x8] sm:$0xff] }
 0x433   : > { %3512 = vmatpush.msra.mxu1 %v2805_v14 }
 0x434   : > { %v3269_v16 = vsel %vm3200_vm0, %v12867_v15, 0.0 }
 0x435   : > { %3270 = vadd.xlane.f32.xlu0 %v3269_v16  ;;  %v2804_v16 = vld [vmem:[#allocation23] sm:$0xff] }
 0x436   : > { %3513 = vmatpush.msra.mxu1 %v2804_v16 }
 0x439   : > { %v3248_v17 = vpop.f32.mrf.mxu0 }
 0x43a   : > { %v12871_v18 = vadd.f32 %v9643_v10, %v3248_v17 }
 0x43c   : > { %v3272_v19 = vsel %vm3200_vm0, %v12871_v18, 0.0 }
 0x43d   : > { %3273 = vadd.xlane.f32.xlu1 %v3272_v19 }
 0x441   : > { %v3251_v20 = vpop.f32.mrf.mxu0 }
 0x442   : > { %v12875_v21 = vadd.f32 %v9643_v10, %v3251_v20 }
 0x444   : > { %v3275_v22 = vsel %vm3200_vm0, %v12875_v21, 0.0 }
 0x445   : > { %3276 = vadd.xlane.f32.xlu1 %v3275_v22 }
 0x449   : > { %v3254_v23 = vpop.f32.mrf.mxu0 }
 0x44a   : > { %v12879_v24 = vadd.f32 %v9643_v10, %v3254_v23 }
 0x44c   : > { %v3278_v25 = vsel %vm3200_vm0, %v12879_v24, 0.0 }
 0x44d   : > { %3279 = vadd.xlane.f32.xlu2 %v3278_v25 }
 0x451   : > { %v3257_v26 = vpop.f32.mrf.mxu0 }
 0x452   : > { %v12883_v27 = vadd.f32 %v9643_v10, %v3257_v26 }
 0x454   : > { %v3281_v28 = vsel %vm3200_vm0, %v12883_v27, 0.0 }
 0x455   : > { %3282 = vadd.xlane.f32.xlu2 %v3281_v28 }
 0x459   : > { %v3260_v29 = vpop.f32.mrf.mxu0 }
 0x45a   : > { %v12887_v30 = vadd.f32 %v9643_v10, %v3260_v29 }
 0x45c   : > { %v3284_v31 = vsel %vm3200_vm0, %v12887_v30, 0.0 }
 0x45d   : > { %3285 = vadd.xlane.f32.xlu1 %v3284_v31 }
 0x461   : > { %v3263_v43 = vpop.f32.mrf.mxu0 }
 0x462   : > { %v12901_v47 = vadd.f32 %v9643_v10, %v3263_v43 }
 0x464   : > { %v3287_v49 = vsel %vm3200_vm0, %v12901_v47, 0.0 }
 0x4a0   : > { %v3268_v39 = vpop.xlane.xlu0 %3267 }
 0x4a1   : > { %v3297_v40 = vmul.f32 %v12891_v38, %v3268_v39 }
 0x4a3   : > { %v12895_v41 = vsub.f32 %v12863_v12, %v3297_v40 }
 0x4a5   : > { %v3313_v42 = vmul.f32 %v12895_v41, %v12895_v41 }
 0x4a7   : > { %v3321_v44 = vsel %vm3200_vm0, %v3313_v42, 0.0 }
 0x4a8   : > { %3322 = vadd.xlane.f32.xlu0 %v3321_v44  ;;  %v3271_v45 = vpop.xlane.xlu0 %3270 }
 0x4a9   : > { %v3298_v46 = vmul.f32 %v12891_v38, %v3271_v45 }
 0x4ab   : > { %v12904_v48 = vsub.f32 %v12867_v15, %v3298_v46  ;;  %v12956_v46 = vld [vmem:[#allocation14] ss:$0 sm:$0xff] }
 0x4ad   : > { %v3314_v50 = vmul.f32 %v12904_v48, %v12904_v48 }
 0x4af   : > { %v3324_v51 = vsel %vm3200_vm0, %v3314_v50, 0.0 }
 0x4b0   : > { %v3274_v52 = vpop.xlane.xlu1 %3273  ;;  %3288 = vadd.xlane.f32.xlu0 %v3287_v49  ;;  %3325 = vadd.xlane.f32.xlu2 %v3324_v51 }
 0x4b1   : > { %v3299_v53 = vmul.f32 %v12891_v38, %v3274_v52  ;;  %v12959_v52 = vld [vmem:[#allocation13] ss:$0 sm:$0xff] }
 0x4b3   : > { %v12913_v54 = vsub.f32 %v12871_v18, %v3299_v53 }
 0x4b5   : > { %v3315_v55 = vmul.f32 %v12913_v54, %v12913_v54 }
 0x4b7   : > { %v3327_v56 = vsel %vm3200_vm0, %v3315_v55, 0.0 }
 0x4b8   : > { %3328 = vadd.xlane.f32.xlu1 %v3327_v56  ;;  %v3277_v57 = vpop.xlane.xlu1 %3276 }
 0x4b9   : > { %v3300_v58 = vmul.f32 %v12891_v38, %v3277_v57 }
 0x4bb   : > { %v12920_v59 = vsub.f32 %v12875_v21, %v3300_v58 }
 0x4bd   : > { %v3316_v60 = vmul.f32 %v12920_v59, %v12920_v59 }
 0x4bf   : > { %v3330_v61 = vsel %vm3200_vm0, %v3316_v60, 0.0 }
 0x4c0   : > { %v3280_v62 = vpop.xlane.xlu2 %3279  ;;  %3331 = vadd.xlane.f32.xlu2 %v3330_v61 }
 0x4c1   : > { %v3301_v63 = vmul.f32 %v12891_v38, %v3280_v62 }
 0x4c3   : > { %v12927_v0 = vsub.f32 %v12879_v24, %v3301_v63 }
 0x4c5   : > { %v3317_v1 = vmul.f32 %v12927_v0, %v12927_v0 }
 0x4c7   : > { %v3333_v2 = vsel %vm3200_vm0, %v3317_v1, 0.0 }
 0x4c8   : > { %v3283_v3 = vpop.xlane.xlu2 %3282  ;;  %3334 = vadd.xlane.f32.xlu0 %v3333_v2 }
 0x4c9   : > { %v3302_v4 = vmul.f32 %v12891_v38, %v3283_v3 }
 0x4cb   : > { %v12934_v5 = vsub.f32 %v12883_v27, %v3302_v4 }
 0x4cd   : > { %v3318_v6 = vmul.f32 %v12934_v5, %v12934_v5 }
 0x4cf   : > { %v3336_v7 = vsel %vm3200_vm0, %v3318_v6, 0.0 }
 0x4d0   : > { %3337 = vadd.xlane.f32.xlu1 %v3336_v7  ;;  %v3286_v8 = vpop.xlane.xlu1 %3285 }
 0x4d1   : > { %v3303_v9 = vmul.f32 %v12891_v38, %v3286_v8 }
 0x4d3   : > { %v12941_v10 = vsub.f32 %v12887_v30, %v3303_v9 }
 0x4d5   : > { %v3319_v11 = vmul.f32 %v12941_v10, %v12941_v10 }
 0x4d7   : > { %v3339_v13 = vsel %vm3200_vm0, %v3319_v11, 0.0 }
 0x4d8   : > { %3340 = vadd.xlane.f32.xlu2 %v3339_v13 }
 0x51b   : > { %v3323_v17 = vpop.xlane.xlu0 %3322 }
 0x51c   : > { %v3345_v19 = vmul.f32 %v3323_v17, %v12891_v38 }
 0x51e   : > { %v3353_v20 = vadd.f32 1e-05, %v3345_v19 }
 0x520   : > { %9686 = vrsqrt.f32 %v3353_v20  ;;  %vm3367_vm3 = vweird.f32 %v3353_v20 }
 0x523   : > { %v3326_v22 = vpop.xlane.xlu2 %3325  ;;  %v3289_v23 = vpop.xlane.xlu0 %3288 }
 0x524   : > { %v3346_v25 = vmul.f32 %v3326_v22, %v12891_v38  ;;  %v3304_v26 = vmul.f32 %v12891_v38, %v3289_v23 }
 0x526   : > { %v9687_v28 = vpop.eup %9686  ;;  %v3354_v29 = vadd.f32 1e-05, %v3346_v25  ;;  %v12950_v31 = vsub.f32 %v12901_v47, %v3304_v26 }
 0x527   : > { %v3362_v32 = vmul.f32 %v9687_v28, %v3353_v20  ;;  %vm3368_vm2 = vweird.f32 %v9687_v28 }
 0x528   : > { %9688 = vrsqrt.f32 %v3354_v29  ;;  %v3320_v33 = vmul.f32 %v12950_v31, %v12950_v31  ;;  %vm3369_vm4 = vmor %vm3367_vm3, %vm3368_vm2  ;;  %vm3377_vm6 = vweird.f32 %v3354_v29 }
 0x529   : > { %v3363_v34 = vmul.f32 %v9687_v28, %v3362_v32 }
 0x52a   : > { %v3342_v35 = vsel %vm3200_vm0, %v3320_v33, 0.0 }
 0x52b   : > { %v3364_v36 = vmul.f32 0.5, %v3363_v34  ;;  %v3329_v37 = vpop.xlane.xlu1 %3328  ;;  %3343 = vadd.xlane.f32.xlu0 %v3342_v35 }
 0x52c   : > { %v3347_v39 = vmul.f32 %v3329_v37, %v12891_v38 }
 0x52d   : > { %v3365_v40 = vsub.f32 1.5, %v3364_v36 }
 0x52e   : > { %v9689_v42 = vpop.eup %9688  ;;  %v3355_v43 = vadd.f32 1e-05, %v3347_v39 }
 0x52f   : > { %v3366_v44 = vmul.f32 %v9687_v28, %v3365_v40  ;;  %v3372_v45 = vmul.f32 %v9689_v42, %v3354_v29  ;;  %vm3378_vm5 = vweird.f32 %v9689_v42 }
 0x530   : > { %9690 = vrsqrt.f32 %v3355_v43  ;;  %vm3379_vm7 = vmor %vm3377_vm6, %vm3378_vm5  ;;  %vm3387_vm9 = vweird.f32 %v3355_v43 }
 0x531   : > { %v3373_v49 = vmul.f32 %v9689_v42, %v3372_v45  ;;  %v3370_v50 = vsel %vm3369_vm4, %v9687_v28, %v3366_v44 }
 0x532   : > { %v3441_v51 = vmul.f32 %v3370_v50, %v12895_v41 }
 0x533   : > { %v3374_v53 = vmul.f32 0.5, %v3373_v49  ;;  %v3332_v55 = vpop.xlane.xlu2 %3331 }
 0x534   : > { %v3348_v56 = vmul.f32 %v3332_v55, %v12891_v38  ;;  %v3452_v57 = vmul.f32 %v12956_v46, %v3441_v51 }
 0x535   : > { %v3375_v58 = vsub.f32 1.5, %v3374_v53 }
 0x536   : > { %v9691_v60 = vpop.eup %9690  ;;  %v3356_v61 = vadd.f32 1e-05, %v3348_v56  ;;  %v3463_v62 = vadd.f32 %v12959_v52, %v3452_v57 }
 0x537   : > { %v3376_v63 = vmul.f32 %v9689_v42, %v3375_v58  ;;  %v3382_v1 = vmul.f32 %v9691_v60, %v3355_v43  ;;  %vm3388_vm8 = vweird.f32 %v9691_v60 }
 0x538   : > { %9692 = vrsqrt.f32 %v3356_v61  ;;  %8783 = vmatmul.msk.f32.vlgmr.msra.gmra.mxu1 %vm3200_vm0, %v3463_v62  ;;  %vm3389_vm10 = vmor %vm3387_vm9, %vm3388_vm8  ;;  %vm3397_vm12 = vweird.f32 %v3356_v61 }
 0x539   : > { %v3383_v41 = vmul.f32 %v9691_v60, %v3382_v1  ;;  %v3380_v2 = vsel %vm3379_vm7, %v9689_v42, %v3376_v63 }
 0x53a   : > { %v3442_v3 = vmul.f32 %v3380_v2, %v12904_v48 }
 0x53b   : > { %v3384_v4 = vmul.f32 0.5, %v3383_v41  ;;  %v3335_v6 = vpop.xlane.xlu0 %3334 }
 0x53c   : > { %v3349_v7 = vmul.f32 %v3335_v6, %v12891_v38  ;;  %v3453_v8 = vmul.f32 %v12956_v46, %v3442_v3 }
 0x53d   : > { %v3385_v9 = vsub.f32 1.5, %v3384_v4 }
 0x53e   : > { %v9693_v11 = vpop.eup %9692  ;;  %v3357_v13 = vadd.f32 1e-05, %v3349_v7  ;;  %v3464_v14 = vadd.f32 %v12959_v52, %v3453_v8 }
 0x53f   : > { %v3386_v16 = vmul.f32 %v9691_v60, %v3385_v9  ;;  %v3392_v17 = vmul.f32 %v9693_v11, %v3356_v61  ;;  %vm3398_vm11 = vweird.f32 %v9693_v11 }
 0x540   : > { %9694 = vrsqrt.f32 %v3357_v13  ;;  %8784 = vmatmul.msk.f32.gmra.mxu1 %vm3200_vm0, %v3464_v14  ;;  %vm3399_vm13 = vmor %vm3397_vm12, %vm3398_vm11  ;;  %vm3407_vm15 = vweird.f32 %v3357_v13  ;;  %vm3563_vm11 = vcmask 31744   ;;  %vm3645_vm12 = vcmask 523264  }
 0x541   : > { %v3393_v48 = vmul.f32 %v9693_v11, %v3392_v17  ;;  %v3390_v19 = vsel %vm3389_vm10, %v9691_v60, %v3386_v16 }
 0x542   : > { %v3443_v20 = vmul.f32 %v3390_v19, %v12913_v54 }
 0x543   : > { %v3394_v22 = vmul.f32 0.5, %v3393_v48  ;;  %v3338_v23 = vpop.xlane.xlu1 %3337 }
 0x544   : > { %v3350_v25 = vmul.f32 %v3338_v23, %v12891_v38  ;;  %v3454_v26 = vmul.f32 %v12956_v46, %v3443_v20 }
 0x545   : > { %v3395_v28 = vsub.f32 1.5, %v3394_v22 }
 0x546   : > { %v9695_v29 = vpop.eup %9694  ;;  %v3358_v32 = vadd.f32 1e-05, %v3350_v25  ;;  %v3465_v33 = vadd.f32 %v12959_v52, %v3454_v26 }
 0x547   : > { %v3396_v34 = vmul.f32 %v9693_v11, %v3395_v28  ;;  %v3402_v35 = vmul.f32 %v9695_v29, %v3357_v13  ;;  %vm3408_vm14 = vweird.f32 %v9695_v29 }
 0x548   : > { %9696 = vrsqrt.f32 %v3358_v32  ;;  %8785 = vmatmul.msk.f32.gmra.mxu1 %vm3200_vm0, %v3465_v33  ;;  %vm3409_vm1 = vmor %vm3407_vm15, %vm3408_vm14  ;;  %vm3417_vm3 = vweird.f32 %v3358_v32 }
 0x549   : > { %v3403_v54 = vmul.f32 %v9695_v29, %v3402_v35  ;;  %v3400_v36 = vsel %vm3399_vm13, %v9693_v11, %v3396_v34  ;;  %vm4137_vm13 = vcmask 1043456  }
 0x54a   : > { %v3444_v37 = vmul.f32 %v3400_v36, %v12920_v59  ;;  %v9646_v36 = vld [vmem:[#allocation22] ss:$0 sm:$0xff] }
 0x54b   : > { %v3404_v39 = vmul.f32 0.5, %v3403_v54  ;;  %v3341_v40 = vpop.xlane.xlu2 %3340 }
 0x54c   : > { %v3351_v42 = vmul.f32 %v3341_v40, %v12891_v38  ;;  %v3455_v43 = vmul.f32 %v12956_v46, %v3444_v37 }
 0x54d   : > { %v3405_v44 = vsub.f32 1.5, %v3404_v39 }
 0x54e   : > { %v9697_v45 = vpop.eup %9696  ;;  %v3359_v49 = vadd.f32 1e-05, %v3351_v42  ;;  %v3466_v50 = vadd.f32 %v12959_v52, %v3455_v43 }
 0x54f   : > { %v3406_v51 = vmul.f32 %v9695_v29, %v3405_v44  ;;  %v3412_v53 = vmul.f32 %v9697_v45, %v3358_v32  ;;  %vm3418_vm2 = vweird.f32 %v9697_v45 }
 0x550   : > { %9698 = vrsqrt.f32 %v3359_v49  ;;  %8786 = vmatmul.msk.f32.gmra.mxu1 %vm3200_vm0, %v3466_v50  ;;  %vm3419_vm4 = vmor %vm3417_vm3, %vm3418_vm2  ;;  %vm3427_vm6 = vweird.f32 %v3359_v49 }
 0x551   : > { %v3413_v59 = vmul.f32 %v9697_v45, %v3412_v53  ;;  %v3410_v55 = vsel %vm3409_vm1, %v9695_v29, %v3406_v51 }
 0x552   : > { %v3445_v56 = vmul.f32 %v3410_v55, %v12927_v0 }
 0x553   : > { %v3414_v57 = vmul.f32 0.5, %v3413_v59 }
 0x554   : > { %v3456_v58 = vmul.f32 %v12956_v46, %v3445_v56 }
 0x555   : > { %v3415_v60 = vsub.f32 1.5, %v3414_v57 }
 0x556   : > { %v9699_v61 = vpop.eup %9698  ;;  %v3467_v62 = vadd.f32 %v12959_v52, %v3456_v58 }
 0x557   : > { %v3416_v63 = vmul.f32 %v9697_v45, %v3415_v60  ;;  %v3422_v1 = vmul.f32 %v9699_v61, %v3359_v49  ;;  %vm3428_vm5 = vweird.f32 %v9699_v61 }
 0x558   : > { %8787 = vmatmul.msk.f32.gmra.mxu1 %vm3200_vm0, %v3467_v62  ;;  %vm3429_vm7 = vmor %vm3427_vm6, %vm3428_vm5 }
 0x559   : > { %v3423_v41 = vmul.f32 %v9699_v61, %v3422_v1  ;;  %v3420_v2 = vsel %vm3419_vm4, %v9697_v45, %v3416_v63 }
 0x55a   : > { %v3446_v3 = vmul.f32 %v3420_v2, %v12934_v5 }
 0x55b   : > { %v3424_v4 = vmul.f32 0.5, %v3423_v41 }
 0x55c   : > { %v3457_v0 = vmul.f32 %v12956_v46, %v3446_v3 }
 0x55d   : > { %v3425_v6 = vsub.f32 1.5, %v3424_v4 }
 0x55e   : > { %v3468_v7 = vadd.f32 %v12959_v52, %v3457_v0 }
 0x55f   : > { %v3426_v8 = vmul.f32 %v9699_v61, %v3425_v6 }
 0x560   : > { %8788 = vmatmul.msk.f32.gmra.mxu1 %vm3200_vm0, %v3468_v7 }
 0x561   : > { %v3430_v9 = vsel %vm3429_vm7, %v9699_v61, %v3426_v8 }
 0x562   : > { %v3447_v11 = vmul.f32 %v3430_v9, %v12941_v10 }
 0x564   : > { %v3458_v13 = vmul.f32 %v12956_v46, %v3447_v11 }
 0x566   : > { %v3469_v14 = vadd.f32 %v12959_v52, %v3458_v13 }
 0x568   : > { %8789 = vmatmul.msk.f32.gmra.mxu1 %vm3200_vm0, %v3469_v14 }
 0x59e   : > { %v3344_v5 = vpop.xlane.xlu0 %3343 }
 0x59f   : > { %v3352_v16 = vmul.f32 %v3344_v5, %v12891_v38 }
 0x5a1   : > { %v3360_v17 = vadd.f32 1e-05, %v3352_v16 }
 0x5a3   : > { %9700 = vrsqrt.f32 %v3360_v17  ;;  %vm3437_vm9 = vweird.f32 %v3360_v17 }
 0x5a9   : > { %v9701_v48 = vpop.eup %9700 }
 0x5aa   : > { %v3432_v19 = vmul.f32 %v9701_v48, %v3360_v17  ;;  %vm3438_vm8 = vweird.f32 %v9701_v48 }
 0x5ab   : > { %vm3439_vm10 = vmor %vm3437_vm9, %vm3438_vm8 }
 0x5ac   : > { %v3433_v20 = vmul.f32 %v9701_v48, %v3432_v19 }
 0x5ae   : > { %v3434_v22 = vmul.f32 0.5, %v3433_v20 }
 0x5b0   : > { %v3435_v23 = vsub.f32 1.5, %v3434_v22 }
 0x5b2   : > { %v3436_v25 = vmul.f32 %v9701_v48, %v3435_v23 }
 0x5b4   : > { %v3440_v10 = vsel %vm3439_vm10, %v9701_v48, %v3436_v25 }
 0x5b5   : > { %v3515_v26 = vpop.f32.mrf.mxu1  ;;  %v3448_v28 = vmul.f32 %v3440_v10, %v12950_v31 }
 0x5b6   : > { %v13023_v44 = vadd.f32 %v9646_v36, %v3515_v26 }
 0x5b7   : > { %v3459_v29 = vmul.f32 %v12956_v46, %v3448_v28 }
 0x5b9   : > { %v3470_v32 = vadd.f32 %v12959_v52, %v3459_v29 }
 0x5bb   : > { %8790 = vmatmul.msk.f32.gmra.mxu1 %vm3200_vm0, %v3470_v32 }
 0x5bd   : > { %v3518_v33 = vpop.f32.mrf.mxu1 }
 0x5be   : > { %v13015_v42 = vadd.f32 %v9646_v36, %v3518_v33 }
 0x5c0   : > { %v13065_v59 = vpack.i.bf16 %v13023_v44, %v13015_v42 }
 0x5c5   : > { %v3521_v34 = vpop.f32.mrf.mxu1 }
 0x5c6   : > { %v13001_v31 = vadd.f32 %v9646_v36, %v3521_v34 }
 0x5cd   : > { %v3524_v35 = vpop.f32.mrf.mxu1 }
 0x5ce   : > { %v13021_v43 = vadd.f32 %v9646_v36, %v3524_v35 }
 0x5d0   : > { %v13027_v45 = vpack.i.bf16 %v13001_v31, %v13021_v43 }
 0x5d5   : > { %v3527_v54 = vpop.f32.mrf.mxu1 }
 0x5d6   : > { %v13009_v52 = vadd.f32 %v9646_v36, %v3527_v54 }
 0x5dd   : > { %v3530_v37 = vpop.f32.mrf.mxu1 }
 0x5de   : > { %v12997_v39 = vadd.f32 %v9646_v36, %v3530_v37 }
 0x5e0   : > { %3557 = vrot.lane.b32.xlu0 %v12997_v39, %s14642_s17  ;;  %v13059_v53 = vpack.i.bf16 %v13009_v52, %v12997_v39 }
 0x5e5   : > { %v3533_v40 = vpop.f32.mrf.mxu1 }
 0x5e6   : > { %v13003_v46 = vadd.f32 %v9646_v36, %v3533_v40 }
 0x5e8   : > { %3559 = vrot.lane.b32.xlu2 %v13003_v46, %s14642_s17  ;;  %3551 = vrot.lane.b32.xlu0 %v13001_v31, %s14642_s17 }
 0x5f0   : > { %3847 = vrot.lane.b32.xlu0 %v13009_v52, %s11714_s11  ;;  %3555 = vrot.lane.b32.xlu2 %v13009_v52, %s14642_s17 }
 0x5f8   : > { %3843 = vrot.lane.b32.xlu0 %v13001_v31, %s11714_s11  ;;  %3549 = vrot.lane.b32.xlu2 %v13015_v42, %s14642_s17 }
 0x600   : > { %3823 = vrot.lane.b32.xlu0 %v13023_v44, %s11715_s8  ;;  %9549 = vrot.lane.b32.xlu2 %v13027_v45, %s14645_s16 }
 0x608   : > { %3829 = vrot.lane.b32.xlu0 %v13021_v43, %s11715_s8  ;;  %3849 = vrot.lane.b32.xlu2 %v12997_v39, %s11714_s11 }
 0x610   : > { %3841 = vrot.lane.b32.xlu2 %v13015_v42, %s11714_s11 }
 0x618   : > { %3825 = vrot.lane.b32.xlu2 %v13015_v42, %s11715_s8 }
 0x638   : > { %v3536_v49 = vpop.f32.mrf.mxu1 }
 0x639   : > { %v13041_v50 = vadd.f32 %v9646_v36, %v3536_v49 }
 0x63b   : > { %3561 = vrot.lane.b32.xlu1 %v13041_v50, %s14642_s17  ;;  %v13047_v51 = vpack.i.bf16 %v13003_v46, %v13041_v50 }
 0x63d   : > { %9559 = vrot.lane.b32.xlu0 %v13047_v51, %s14645_s16 }
 0x642   : > { %v3560_v62 = vpop.permute.xlu2 %3559 }
 0x643   : > { %3553 = vrot.lane.b32.xlu1 %v13021_v43, %s14642_s17 }
 0x645   : > { %3853 = vrot.lane.b32.xlu0 %v13041_v50, %s11714_s11 }
 0x64a   : > { %v3556_v3 = vpop.permute.xlu2 %3555 }
 0x64b   : > { %3547 = vrot.lane.b32.xlu1 %v13023_v44, %s14642_s17 }
 0x652   : > { %v3558_v55 = vpop.permute.xlu0 %3557  ;;  %v3550_v6 = vpop.permute.xlu2 %3549 }
 0x653   : > { %9544 = vrot.lane.b32.xlu1 %v13059_v53, %s14645_s16 }
 0x65a   : > { %v3552_v56 = vpop.permute.xlu0 %3551  ;;  %v9550_v11 = vpop.permute.xlu2 %9549 }
 0x65b   : > { %9554 = vrot.lane.b32.xlu1 %v13065_v59, %s14645_s16  ;;  %v9551_v14 = vunpack.i.l.bf16 %v9550_v11  ;;  %v9552_v5 = vunpack.i.h.bf16 %v9550_v11 }
 0x662   : > { %v3848_v57 = vpop.permute.xlu0 %3847  ;;  %v3850_v20 = vpop.permute.xlu2 %3849 }
 0x663   : > { %3851 = vrot.lane.b32.xlu1 %v13003_v46, %s11714_s11 }
 0x66a   : > { %v3844_v58 = vpop.permute.xlu0 %3843  ;;  %v3842_v23 = vpop.permute.xlu2 %3841 }
 0x66b   : > { %3845 = vrot.lane.b32.xlu1 %v13021_v43, %s11714_s11 }
 0x672   : > { %v3824_v60 = vpop.permute.xlu0 %3823  ;;  %v3826_v10 = vpop.permute.xlu2 %3825 }
 0x673   : > { %3839 = vrot.lane.b32.xlu1 %v13023_v44, %s11714_s11  ;;  %s14646_s11 = smov 64  }
 0x67a   : > { %v13077_v61 = vpop.permute.xlu0 %3829 }
 0x67b   : > { %3827 = vrot.lane.b32.xlu1 %v13001_v31, %s11715_s8 }
 0x6ad   : > { %v3562_v63 = vpop.permute.xlu1 %3561 }
 0x6ae   : > { %8791 = vmatpush.xpose.msk.msra.mxu2 %vm3563_vm11, %v3562_v63 }
 0x6af   : > { %v9560_v1 = vpop.permute.xlu0 %9559 }
 0x6b0   : > { %v9561_v41 = vunpack.i.l.bf16 %v9560_v1  ;;  %v9562_v2 = vunpack.i.h.bf16 %v9560_v1 }
 0x6b2   : > { %8792 = vmatpush.xpose.msk.msra.mxu2 %vm3563_vm11, %v3560_v62  ;;  %3790 = vmatpush.msra.mxu3 %v9561_v41 }
 0x6b4   : > { %3791 = vmatpush.msra.mxu3 %v9562_v2 }
 0x6b5   : > { %v3554_v4 = vpop.permute.xlu1 %3553 }
 0x6b6   : > { %8793 = vmatpush.xpose.msk.msra.mxu2 %vm3563_vm11, %v3558_v55 }
 0x6b7   : > { %v3854_v0 = vpop.permute.xlu0 %3853 }
 0x6b8   : > { %8815 = vmatpush.xpose.msk.msrb.mxu0 %vm3563_vm11, %v3854_v0 }
 0x6ba   : > { %8794 = vmatpush.xpose.msk.msra.mxu2 %vm3563_vm11, %v3556_v3 }
 0x6bd   : > { %v3548_v7 = vpop.permute.xlu1 %3547 }
 0x6be   : > { %8795 = vmatpush.xpose.msk.msra.mxu2 %vm3563_vm11, %v3554_v4 }
 0x6c2   : > { %8796 = vmatpush.xpose.msk.msra.mxu2 %vm3563_vm11, %v3552_v56 }
 0x6c5   : > { %v9545_v8 = vpop.permute.xlu1 %9544 }
 0x6c6   : > { %8797 = vmatpush.xpose.msk.msra.mxu2 %vm3563_vm11, %v3550_v6  ;;  %v9546_v9 = vunpack.i.l.bf16 %v9545_v8  ;;  %v9547_v13 = vunpack.i.h.bf16 %v9545_v8 }
 0x6c8   : > { %3792 = vmatpush.msra.mxu3 %v9546_v9 }
 0x6ca   : > { %8798 = vmatpush.xpose.msk.msra.mxu2 %vm3563_vm11, %v3548_v7  ;;  %3793 = vmatpush.msra.mxu3 %v9547_v13 }
 0x6cc   : > { %3794 = vmatpush.msra.mxu3 %v9551_v14 }
 0x6cd   : > { %v9555_v16 = vpop.permute.xlu1 %9554  ;;  %8799 = vmatmul.msk.f32.vlgmr.msra.gmra.mxu2 %vm3563_vm11, %v13023_v44 }
 0x6ce   : > { %3795 = vmatpush.msra.mxu3 %v9552_v5  ;;  %v9556_v17 = vunpack.i.l.bf16 %v9555_v16  ;;  %v9557_v48 = vunpack.i.h.bf16 %v9555_v16 }
 0x6d0   : > { %3796 = vmatpush.msra.mxu3 %v9556_v17 }
 0x6d2   : > { %3797 = vmatpush.msra.mxu3 %v9557_v48 }
 0x6d5   : > { %v3852_v19 = vpop.permute.xlu1 %3851  ;;  %8800 = vmatmul.msk.f32.gmra.mxu2 %vm3563_vm11, %v13015_v42 }
 0x6d6   : > { %8816 = vmatpush.xpose.msk.msrb.mxu0 %vm3563_vm11, %v3852_v19 }
 0x6da   : > { %8817 = vmatpush.xpose.msk.msrb.mxu0 %vm3563_vm11, %v3850_v20 }
 0x6dd   : > { %8801 = vmatmul.msk.f32.gmra.mxu2 %vm3563_vm11, %v13001_v31  ;;  %v3846_v22 = vpop.permute.xlu1 %3845 }
 0x6de   : > { %8818 = vmatpush.xpose.msk.msrb.mxu0 %vm3563_vm11, %v3848_v57 }
 0x6e2   : > { %8819 = vmatpush.xpose.msk.msrb.mxu0 %vm3563_vm11, %v3846_v22 }
 0x6e5   : > { %8802 = vmatmul.msk.f32.gmra.mxu2 %vm3563_vm11, %v13021_v43  ;;  %v3840_v25 = vpop.permute.xlu1 %3839 }
 0x6e6   : > { %8820 = vmatpush.xpose.msk.msrb.mxu0 %vm3563_vm11, %v3844_v58 }
 0x6ea   : > { %8821 = vmatpush.xpose.msk.msrb.mxu0 %vm3563_vm11, %v3842_v23 }
 0x6ed   : > { %8803 = vmatmul.msk.f32.gmra.mxu2 %vm3563_vm11, %v13009_v52  ;;  %v3828_v26 = vpop.permute.xlu1 %3827 }
 0x6ee   : > { %8822 = vmatpush.xpose.msk.msrb.mxu0 %vm3563_vm11, %v3840_v25 }
 0x6f1   : > { %8823 = vmatmul.msk.f32.vlgmr.msrb.gmra.mxu0 %vm3563_vm11, %v3824_v60 }
 0x6f5   : > { %8804 = vmatmul.msk.f32.gmra.mxu2 %vm3563_vm11, %v12997_v39 }
 0x6f9   : > { %8824 = vmatmul.msk.f32.gmra.mxu0 %vm3563_vm11, %v3826_v10 }
 0x6fd   : > { %8805 = vmatmul.msk.f32.gmra.mxu2 %vm3563_vm11, %v13003_v46 }
 0x701   : > { %8825 = vmatmul.msk.f32.gmra.mxu0 %vm3563_vm11, %v3828_v26 }
 0x705   : > { %8806 = vmatmul.msk.f32.gmra.mxu2 %vm3563_vm11, %v13041_v50 }
 0x709   : > { %8826 = vmatmul.msk.f32.gmra.mxu0 %vm3563_vm11, %v13077_v61 }
 0x750   : > { %v3613_v28 = vpop.f32.mrf.mxu2 }
 0x751   : > { %v3637_v29 = vmul.f32 0.5, %v3613_v28 }
 0x753   : > { %v3646_v32 = vsel %vm3645_vm12, %v3637_v29, -inf }
 0x754   : > { %3647 = vmax.xlane.f32.xlu0 %v3646_v32 }
 0x758   : > { %v3616_v33 = vpop.f32.mrf.mxu2 }
 0x759   : > { %v3638_v34 = vmul.f32 0.5, %v3616_v33 }
 0x75b   : > { %v3649_v35 = vsel %vm3645_vm12, %v3638_v34, -inf }
 0x75c   : > { %3650 = vmax.xlane.f32.xlu2 %v3649_v35 }
 0x760   : > { %v3619_v54 = vpop.f32.mrf.mxu2 }
 0x761   : > { %v3639_v36 = vmul.f32 0.5, %v3619_v54  ;;  %v2799_v54 = vld [vmem:[#allocation20] sm:$0xf] }
 0x762   : > { %8848 = vmatpush.msk.msrb.mxu2 %vm4137_vm13, %v2799_v54 }
 0x763   : > { %v3652_v37 = vsel %vm3645_vm12, %v3639_v36, -inf }
 0x764   : > { %3653 = vmax.xlane.f32.xlu1 %v3652_v37 }
 0x768   : > { %v3622_v40 = vpop.f32.mrf.mxu2 }
 0x769   : > { %v3640_v49 = vmul.f32 0.5, %v3622_v40 }
 0x76b   : > { %v3655_v55 = vsel %vm3645_vm12, %v3640_v49, -inf }
 0x76c   : > { %3656 = vmax.xlane.f32.xlu0 %v3655_v55 }
 0x770   : > { %v3625_v56 = vpop.f32.mrf.mxu2 }
 0x771   : > { %v3641_v57 = vmul.f32 0.5, %v3625_v56 }
 0x773   : > { %v3658_v58 = vsel %vm3645_vm12, %v3641_v57, -inf }
 0x774   : > { %3659 = vmax.xlane.f32.xlu2 %v3658_v58 }
 0x778   : > { %v3628_v60 = vpop.f32.mrf.mxu2 }
 0x779   : > { %v3642_v61 = vmul.f32 0.5, %v3628_v60 }
 0x77b   : > { %v3661_v62 = vsel %vm3645_vm12, %v3642_v61, -inf }
 0x77c   : > { %3662 = vmax.xlane.f32.xlu1 %v3661_v62 }
 0x780   : > { %v3631_v63 = vpop.f32.mrf.mxu2 }
 0x781   : > { %v3643_v1 = vmul.f32 0.5, %v3631_v63 }
 0x783   : > { %v3664_v41 = vsel %vm3645_vm12, %v3643_v1, -inf }
 0x784   : > { %3665 = vmax.xlane.f32.xlu2 %v3664_v41 }
 0x788   : > { %v3634_v2 = vpop.f32.mrf.mxu2 }
 0x789   : > { %v3644_v3 = vmul.f32 0.5, %v3634_v2 }
 0x78b   : > { %v3667_v4 = vsel %vm3645_vm12, %v3644_v3, -inf }
 0x78c   : > { %3668 = vmax.xlane.f32.xlu0 %v3667_v4 }
 0x7a0   : > { %4646 = vrot.lane.b32.xlu0 %v13041_v50, %s11717_s2 }
 0x7c7   : > { %v3648_v0 = vpop.xlane.xlu0 %3647 }
 0x7c8   : > { %v3670_v6 = vsub.f32 %v3637_v29, %v3648_v0 }
 0x7ca   : > { %v3678_v7 = vmul.f32 1.442695, %v3670_v6 }
 0x7cc   : > { %9702 = vpow2.f32 %v3678_v7 }
 0x7cf   : > { %v3651_v8 = vpop.xlane.xlu2 %3650 }
 0x7d0   : > { %v3671_v9 = vsub.f32 %v3638_v34, %v3651_v8 }
 0x7d2   : > { %v13126_v11 = vpop.eup %9702  ;;  %v3680_v13 = vmul.f32 1.442695, %v3671_v9 }
 0x7d3   : > { %v3694_v14 = vsel %vm3645_vm12, %v13126_v11, 0.0 }
 0x7d4   : > { %9704 = vpow2.f32 %v3680_v13  ;;  %3695 = vadd.xlane.f32.xlu2 %v3694_v14 }
 0x7d7   : > { %v3654_v5 = vpop.xlane.xlu1 %3653 }
 0x7d8   : > { %v3672_v16 = vsub.f32 %v3639_v36, %v3654_v5 }
 0x7da   : > { %v13130_v17 = vpop.eup %9704  ;;  %v3682_v48 = vmul.f32 1.442695, %v3672_v16 }
 0x7db   : > { %v3697_v19 = vsel %vm3645_vm12, %v13130_v17, 0.0 }
 0x7dc   : > { %9706 = vpow2.f32 %v3682_v48  ;;  %3698 = vadd.xlane.f32.xlu1 %v3697_v19 }
 0x7df   : > { %v3657_v20 = vpop.xlane.xlu0 %3656 }
 0x7e0   : > { %v3673_v22 = vsub.f32 %v3640_v49, %v3657_v20 }
 0x7e2   : > { %v13134_v23 = vpop.eup %9706  ;;  %v3684_v25 = vmul.f32 1.442695, %v3673_v22 }
 0x7e3   : > { %v3700_v10 = vsel %vm3645_vm12, %v13134_v23, 0.0 }
 0x7e4   : > { %9708 = vpow2.f32 %v3684_v25  ;;  %3701 = vadd.xlane.f32.xlu2 %v3700_v10 }
 0x7e7   : > { %v3660_v26 = vpop.xlane.xlu2 %3659 }
 0x7e8   : > { %v3674_v28 = vsub.f32 %v3641_v57, %v3660_v26 }
 0x7ea   : > { %v13138_v29 = vpop.eup %9708  ;;  %v3686_v32 = vmul.f32 1.442695, %v3674_v28 }
 0x7eb   : > { %v3703_v33 = vsel %vm3645_vm12, %v13138_v29, 0.0 }
 0x7ec   : > { %9710 = vpow2.f32 %v3686_v32  ;;  %3704 = vadd.xlane.f32.xlu0 %v3703_v33 }
 0x7ef   : > { %v3663_v34 = vpop.xlane.xlu1 %3662 }
 0x7f0   : > { %v3675_v35 = vsub.f32 %v3642_v61, %v3663_v34 }
 0x7f2   : > { %v13143_v36 = vpop.eup %9710  ;;  %v3688_v37 = vmul.f32 1.442695, %v3675_v35 }
 0x7f3   : > { %v3706_v40 = vsel %vm3645_vm12, %v13143_v36, 0.0 }
 0x7f4   : > { %9712 = vpow2.f32 %v3688_v37  ;;  %3707 = vadd.xlane.f32.xlu0 %v3706_v40 }
 0x7f5   : > { %4280 = vrot.lane.b32.xlu1 %v13041_v50, %s11718_s15 }
 0x7f7   : > { %v3666_v56 = vpop.xlane.xlu2 %3665 }
 0x7f8   : > { %v3676_v58 = vsub.f32 %v3643_v1, %v3666_v56 }
 0x7fa   : > { %v13149_v49 = vpop.eup %9712  ;;  %v3690_v60 = vmul.f32 1.442695, %v3676_v58 }
 0x7fb   : > { %v3709_v55 = vsel %vm3645_vm12, %v13149_v49, 0.0 }
 0x7fc   : > { %3831 = vrot.lane.b32.xlu2 %v13009_v52, %s11715_s8  ;;  %3710 = vadd.xlane.f32.xlu0 %v3709_v55  ;;  %9714 = vpow2.f32 %v3690_v60 }
 0x7ff   : > { %v3669_v57 = vpop.xlane.xlu0 %3668 }
 0x800   : > { %v3677_v62 = vsub.f32 %v3644_v3, %v3669_v57 }
 0x802   : > { %v3692_v63 = vmul.f32 1.442695, %v3677_v62  ;;  %v13160_v41 = vpop.eup %9714 }
 0x803   : > { %v3712_v2 = vsel %vm3645_vm12, %v13160_v41, 0.0 }
 0x804   : > { %9716 = vpow2.f32 %v3692_v63 }
 0x80a   : > { %v13166_v1 = vpop.eup %9716 }
 0x80b   : > { %v3715_v3 = vsel %vm3645_vm12, %v13166_v1, 0.0 }
 0x810   : > { %3833 = vrot.lane.b32.xlu0 %v12997_v39, %s11715_s8 }
 0x812   : > { %v4647_v61 = vpop.permute.xlu0 %4646 }
 0x813   : > { %8890 = vmatpush.xpose.msk.msra.mxu2 %vm3563_vm11, %v4647_v61 }
 0x818   : > { %4274 = vrot.lane.b32.xlu0 %v13009_v52, %s11718_s15 }
 0x81f   : > { %3713 = vadd.xlane.f32.xlu1 %v3712_v2 }
 0x820   : > { %4272 = vrot.lane.b32.xlu0 %v13021_v43, %s11718_s15 }
 0x825   : > { %3716 = vadd.xlane.f32.xlu2 %v3715_v3 }
 0x828   : > { %4636 = vrot.lane.b32.xlu0 %v13001_v31, %s11717_s2 }
 0x830   : > { %4634 = vrot.lane.b32.xlu0 %v13015_v42, %s11717_s2 }
 0x838   : > { %4644 = vrot.lane.b32.xlu1 %v13003_v46, %s11717_s2  ;;  %4250 = vrot.lane.b32.xlu0 %v13023_v44, %s11719_s10 }
 0x83d   : > { %4278 = vrot.lane.b32.xlu2 %v13003_v46, %s11718_s15 }
 0x840   : > { %4642 = vrot.lane.b32.xlu1 %v12997_v39, %s11717_s2  ;;  %4618 = vrot.lane.b32.xlu0 %v13015_v42, %s11720_s6 }
 0x845   : > { %4276 = vrot.lane.b32.xlu2 %v12997_v39, %s11718_s15 }
 0x847   : > { %v3696_v4 = vpop.xlane.xlu2 %3695 }
 0x848   : > { %9718 = vrcp.f32 %v3696_v4  ;;  %3835 = vrot.lane.b32.xlu1 %v13003_v46, %s11715_s8  ;;  %4256 = vrot.lane.b32.xlu0 %v13021_v43, %s11719_s10 }
 0x84d   : > { %4640 = vrot.lane.b32.xlu2 %v13009_v52, %s11717_s2 }
 0x84e   : > { %v9719_v0 = vpop.eup %9718 }
 0x84f   : > { %v3699_v6 = vpop.xlane.xlu1 %3698  ;;  %v3726_v7 = vmul.f32 %v9719_v0, %v13126_v11 }
 0x850   : > { %9720 = vrcp.f32 %v3699_v6  ;;  %4270 = vrot.lane.b32.xlu1 %v13001_v31, %s11718_s15  ;;  %4624 = vrot.lane.b32.xlu0 %v13009_v52, %s11720_s6 }
 0x851   : > { %8807 = vmatmul.msk.f32.vlgmr.msra.gmra.mxu3 %vm3645_vm12, %v3726_v7 }
 0x855   : > { %4638 = vrot.lane.b32.xlu2 %v13021_v43, %s11717_s2 }
 0x856   : > { %v9721_v8 = vpop.eup %9720 }
 0x857   : > { %v3702_v9 = vpop.xlane.xlu2 %3701  ;;  %v3727_v13 = vmul.f32 %v9721_v8, %v13130_v17 }
 0x858   : > { %9722 = vrcp.f32 %v3702_v9  ;;  %4268 = vrot.lane.b32.xlu1 %v13015_v42, %s11718_s15  ;;  %4262 = vrot.lane.b32.xlu0 %v13003_v46, %s11719_s10 }
 0x859   : > { %8808 = vmatmul.msk.f32.gmra.mxu3 %vm3645_vm12, %v3727_v13 }
 0x85d   : > { %3837 = vrot.lane.b32.xlu2 %v13041_v50, %s11715_s8  ;;  %s11726_s8 = smov 72  }
 0x85e   : > { %v9723_v11 = vpop.eup %9722 }
 0x85f   : > { %v3832_v14 = vpop.permute.xlu2 %3831  ;;  %v3705_v5 = vpop.xlane.xlu0 %3704  ;;  %v3728_v16 = vmul.f32 %v9723_v11, %v13134_v23 }
 0x860   : > { %9724 = vrcp.f32 %v3705_v5  ;;  %4632 = vrot.lane.b32.xlu1 %v13023_v44, %s11717_s2  ;;  %8827 = vmatmul.msk.f32.gmra.mxu0 %vm3563_vm11, %v3832_v14  ;;  %v3904_v23 = vpop.f32.mrf.mxu0  ;;  %s14789_s2 = sld [smem:[#allocation136_spill]] }
 0x861   : > { %4630 = vrot.lane.b32.xlu0 %v13041_v50, %s11720_s6  ;;  %8809 = vmatmul.msk.f32.gmra.mxu3 %vm3645_vm12, %v3728_v16  ;;  %v13259_v55 = vmul.f32 0.5, %v3904_v23 }
 0x863   : > { %v3936_v58 = vsel %vm3645_vm12, %v13259_v55, -inf }
 0x865   : > { %4266 = vrot.lane.b32.xlu2 %v13023_v44, %s11718_s15 }
 0x866   : > { %v9725_v17 = vpop.eup %9724 }
 0x867   : > { %v4281_v48 = vpop.permute.xlu1 %4280  ;;  %v3708_v19 = vpop.xlane.xlu0 %3707  ;;  %v3729_v20 = vmul.f32 %v9725_v17, %v13138_v29 }
 0x868   : > { %9726 = vrcp.f32 %v3708_v19  ;;  %4252 = vrot.lane.b32.xlu1 %v13015_v42, %s11719_s10  ;;  %8857 = vmatpush.xpose.msk.msra.mxu0 %vm3563_vm11, %v4281_v48 }
 0x869   : > { %8810 = vmatmul.msk.f32.gmra.mxu3 %vm3645_vm12, %v3729_v20 }
 0x86d   : > { %4616 = vrot.lane.b32.xlu2 %v13023_v44, %s11720_s6  ;;  %v3907_v44 = vpop.f32.mrf.mxu0 }
 0x86e   : > { %v9727_v22 = vpop.eup %9726  ;;  %v13256_v37 = vmul.f32 0.5, %v3907_v44 }
 0x86f   : > { %v3711_v25 = vpop.xlane.xlu0 %3710  ;;  %v3730_v10 = vmul.f32 %v9727_v22, %v13143_v36 }
 0x870   : > { %9728 = vrcp.f32 %v3711_v25  ;;  %4620 = vrot.lane.b32.xlu1 %v13001_v31, %s11720_s6  ;;  %v3939_v56 = vsel %vm3645_vm12, %v13256_v37, -inf }
 0x871   : > { %8811 = vmatmul.msk.f32.gmra.mxu3 %vm3645_vm12, %v3730_v10 }
 0x875   : > { %4254 = vrot.lane.b32.xlu2 %v13001_v31, %s11719_s10  ;;  %v3910_v29 = vpop.f32.mrf.mxu0 }
 0x876   : > { %v9729_v42 = vpop.eup %9728  ;;  %v13241_v31 = vmul.f32 0.5, %v3910_v29 }
 0x877   : > { %v3731_v26 = vmul.f32 %v9729_v42, %v13149_v49 }
 0x878   : > { %4258 = vrot.lane.b32.xlu1 %v13009_v52, %s11719_s10  ;;  %v3942_v52 = vsel %vm3645_vm12, %v13241_v31, -inf }
 0x879   : > { %8812 = vmatmul.msk.f32.gmra.mxu3 %vm3645_vm12, %v3731_v26 }
 0x87d   : > { %4622 = vrot.lane.b32.xlu2 %v13021_v43, %s11720_s6  ;;  %v3913_v60 = vpop.f32.mrf.mxu0 }
 0x87e   : > { %v13268_v63 = vmul.f32 0.5, %v3913_v60 }
 0x880   : > { %4626 = vrot.lane.b32.xlu1 %v12997_v39, %s11720_s6  ;;  %v3945_v2 = vsel %vm3645_vm12, %v13268_v63, -inf }
 0x882   : > { %v3834_v28 = vpop.permute.xlu0 %3833 }
 0x883   : > { %8828 = vmatmul.msk.f32.gmra.mxu0 %vm3563_vm11, %v3834_v28 }
 0x885   : > { %4260 = vrot.lane.b32.xlu2 %v12997_v39, %s11719_s10 }
 0x888   : > { %4264 = vrot.lane.b32.xlu1 %v13041_v50, %s11719_s10 }
 0x88a   : > { %v4275_v54 = vpop.permute.xlu0 %4274 }
 0x88b   : > { %3943 = vmax.xlane.f32.xlu0 %v3942_v52 }
 0x88d   : > { %4628 = vrot.lane.b32.xlu2 %v13003_v46, %s11720_s6  ;;  %s11727_s6 = smov 80  }
 0x892   : > { %v3714_v43 = vpop.xlane.xlu1 %3713  ;;  %v4273_v40 = vpop.permute.xlu0 %4272 }
 0x893   : > { %9730 = vrcp.f32 %v3714_v43 }
 0x898   : > { %v3717_v32 = vpop.xlane.xlu2 %3716 }
 0x899   : > { %v9731_v33 = vpop.eup %9730  ;;  %9732 = vrcp.f32 %v3717_v32 }
 0x89a   : > { %v3732_v34 = vmul.f32 %v9731_v33, %v13160_v41  ;;  %v4637_v61 = vpop.permute.xlu0 %4636 }
 0x89c   : > { %8813 = vmatmul.msk.f32.gmra.mxu3 %vm3645_vm12, %v3732_v34 }
 0x89f   : > { %v9733_v39 = vpop.eup %9732 }
 0x8a0   : > { %v4279_v35 = vpop.permute.xlu2 %4278  ;;  %v3733_v50 = vmul.f32 %v9733_v39, %v13166_v1 }
 0x8a1   : > { %8858 = vmatpush.xpose.msk.msra.mxu0 %vm3563_vm11, %v4279_v35 }
 0x8a2   : > { %v4635_v1 = vpop.permute.xlu0 %4634 }
 0x8a4   : > { %8814 = vmatmul.msk.f32.gmra.mxu3 %vm3645_vm12, %v3733_v50 }
 0x8a8   : > { %v4277_v36 = vpop.permute.xlu2 %4276 }
 0x8a9   : > { %8859 = vmatpush.xpose.msk.msra.mxu0 %vm3563_vm11, %v4277_v36 }
 0x8aa   : > { %v4645_v46 = vpop.permute.xlu1 %4644  ;;  %v4251_v7 = vpop.permute.xlu0 %4250 }
 0x8ab   : > { %8891 = vmatpush.xpose.msk.msra.mxu2 %vm3563_vm11, %v4645_v46 }
 0x8ad   : > { %8860 = vmatpush.xpose.msk.msra.mxu0 %vm3563_vm11, %v4275_v54 }
 0x8b0   : > { %v4641_v49 = vpop.permute.xlu2 %4640 }
 0x8b1   : > { %8861 = vmatpush.xpose.msk.msra.mxu0 %vm3563_vm11, %v4273_v40 }
 0x8b2   : > { %v4643_v57 = vpop.permute.xlu1 %4642  ;;  %3940 = vmax.xlane.f32.xlu1 %v3939_v56  ;;  %v4619_v17 = vpop.permute.xlu0 %4618 }
 0x8b3   : > { %8892 = vmatpush.xpose.msk.msra.mxu2 %vm3563_vm11, %v4643_v57 }
 0x8b6   : > { %3937 = vmax.xlane.f32.xlu2 %v3936_v58 }
 0x8b7   : > { %8893 = vmatpush.xpose.msk.msra.mxu2 %vm3563_vm11, %v4641_v49 }
 0x8b8   : > { %v4639_v62 = vpop.permute.xlu2 %4638 }
 0x8ba   : > { %v3836_v41 = vpop.permute.xlu1 %3835  ;;  %v4257_v23 = vpop.permute.xlu0 %4256 }
 0x8bb   : > { %8829 = vmatmul.msk.f32.gmra.mxu0 %vm3563_vm11, %v3836_v41  ;;  %8894 = vmatpush.xpose.msk.msra.mxu2 %vm3563_vm11, %v4639_v62 }
 0x8be   : > { %3946 = vmax.xlane.f32.xlu2 %v3945_v2 }
 0x8bf   : > { %8895 = vmatpush.xpose.msk.msra.mxu2 %vm3563_vm11, %v4637_v61 }
 0x8c0   : > { %v3838_v3 = vpop.permute.xlu2 %3837 }
 0x8c2   : > { %v4271_v4 = vpop.permute.xlu1 %4270  ;;  %v4625_v44 = vpop.permute.xlu0 %4624 }
 0x8c3   : > { %8830 = vmatmul.msk.f32.gmra.mxu0 %vm3563_vm11, %v3838_v3  ;;  %8896 = vmatpush.xpose.msk.msra.mxu2 %vm3563_vm11, %v4635_v1 }
 0x8c4   : > { %8862 = vmatpush.xpose.msk.msra.mxu0 %vm3563_vm11, %v4271_v4 }
 0x8c8   : > { %v4267_v6 = vpop.permute.xlu2 %4266 }
 0x8ca   : > { %v4269_v0 = vpop.permute.xlu1 %4268  ;;  %v4263_v33 = vpop.permute.xlu0 %4262 }
 0x8cb   : > { %8863 = vmatpush.xpose.msk.msra.mxu0 %vm3563_vm11, %v4269_v0 }
 0x8cf   : > { %8864 = vmatpush.xpose.msk.msra.mxu0 %vm3563_vm11, %v4267_v6 }
 0x8d0   : > { %v4617_v13 = vpop.permute.xlu2 %4616 }
 0x8d2   : > { %v4633_v8 = vpop.permute.xlu1 %4632  ;;  %8865 = vmatmul.msk.f32.vlgmr.msra.gmra.mxu0 %vm3563_vm11, %v4251_v7 }
 0x8d3   : > { %8897 = vmatpush.xpose.msk.msra.mxu2 %vm3563_vm11, %v4633_v8  ;;  %v13311_v46 = vpop.permute.xlu0 %4630 }
 0x8d4   : > { %v3799_v9 = vpop.f32.mrf.mxu3 }
 0x8d5   : > { %8849 = vmatmul.msk.f32.vlgmr.msrb.gmra.mxu2 %vm3563_vm11, %v3799_v9 }
 0x8d6   : > { %9564 = vrot.lane.b32.xlu2 %v13047_v51, %s11721_s0 }
 0x8d8   : > { %v4255_v19 = vpop.permute.xlu2 %4254 }
 0x8da   : > { %v4253_v11 = vpop.permute.xlu1 %4252 }
 0x8db   : > { %8866 = vmatmul.msk.f32.gmra.mxu0 %vm3563_vm11, %v4253_v11 }
 0x8dc   : > { %v3802_v14 = vpop.f32.mrf.mxu3 }
 0x8dd   : > { %v3916_v5 = vpop.f32.mrf.mxu0  ;;  %8850 = vmatmul.msk.f32.gmra.mxu2 %vm3563_vm11, %v3802_v14 }
 0x8de   : > { %v13287_v16 = vmul.f32 0.5, %v3916_v5 }
 0x8e0   : > { %v3948_v48 = vsel %vm3645_vm12, %v13287_v16, -inf  ;;  %v4623_v10 = vpop.permute.xlu2 %4622 }
 0x8e1   : > { %3949 = vmax.xlane.f32.xlu1 %v3948_v48 }
 0x8e2   : > { %v4621_v22 = vpop.permute.xlu1 %4620 }
 0x8e3   : > { %8867 = vmatmul.msk.f32.gmra.mxu0 %vm3563_vm11, %v4255_v19 }
 0x8e4   : > { %v3805_v20 = vpop.f32.mrf.mxu3 }
 0x8e5   : > { %8851 = vmatmul.msk.f32.gmra.mxu2 %vm3563_vm11, %v3805_v20 }
 0x8e8   : > { %v4261_v28 = vpop.permute.xlu2 %4260 }
 0x8ea   : > { %v4259_v42 = vpop.permute.xlu1 %4258 }
 0x8eb   : > { %8868 = vmatmul.msk.f32.gmra.mxu0 %vm3563_vm11, %v4257_v23 }
 0x8ec   : > { %v3808_v25 = vpop.f32.mrf.mxu3 }
 0x8ed   : > { %8852 = vmatmul.msk.f32.gmra.mxu2 %vm3563_vm11, %v3808_v25 }
 0x8f0   : > { %v4629_v50 = vpop.permute.xlu2 %4628 }
 0x8f2   : > { %v4627_v52 = vpop.permute.xlu1 %4626 }
 0x8f3   : > { %8869 = vmatmul.msk.f32.gmra.mxu0 %vm3563_vm11, %v4259_v42 }
 0x8f4   : > { %v3811_v26 = vpop.f32.mrf.mxu3 }
 0x8f5   : > { %8853 = vmatmul.msk.f32.gmra.mxu2 %vm3563_vm11, %v3811_v26 }
 0x8fa   : > { %v4265_v39 = vpop.permute.xlu1 %4264 }
 0x8fb   : > { %8870 = vmatmul.msk.f32.gmra.mxu0 %vm3563_vm11, %v4261_v28 }
 0x8fc   : > { %v3814_v29 = vpop.f32.mrf.mxu3 }
 0x8fd   : > { %8854 = vmatmul.msk.f32.gmra.mxu2 %vm3563_vm11, %v3814_v29 }
 0x8fe   : > { %v3944_v58 = vpop.xlane.xlu0 %3943 }
 0x8ff   : > { %v3962_v2 = vsub.f32 %v13241_v31, %v3944_v58 }
 0x900   : > { %v3919_v43 = vpop.f32.mrf.mxu0 }
 0x901   : > { %v13299_v32 = vmul.f32 0.5, %v3919_v43  ;;  %v3972_v0 = vmul.f32 1.442695, %v3962_v2 }
 0x903   : > { %8871 = vmatmul.msk.f32.gmra.mxu0 %vm3563_vm11, %v4263_v33  ;;  %v3951_v34 = vsel %vm3645_vm12, %v13299_v32, -inf }
 0x904   : > { %3952 = vmax.xlane.f32.xlu0 %v3951_v34 }
 0x90b   : > { %8872 = vmatmul.msk.f32.gmra.mxu0 %vm3563_vm11, %v4265_v39 }
 0x918   : > { %9569 = vrot.lane.b32.xlu0 %v13059_v53, %s11721_s0 }
 0x91f   : > { %v3817_v35 = vpop.f32.mrf.mxu3 }
 0x920   : > { %9579 = vrot.lane.b32.xlu0 %v13065_v59, %s11721_s0  ;;  %8855 = vmatmul.msk.f32.gmra.mxu2 %vm3563_vm11, %v3817_v35 }
 0x925   : > { %v3941_v56 = vpop.xlane.xlu1 %3940 }
 0x926   : > { %v3961_v60 = vsub.f32 %v13256_v37, %v3941_v56 }
 0x927   : > { %v3820_v54 = vpop.f32.mrf.mxu3 }
 0x928   : > { %8856 = vmatmul.msk.f32.gmra.mxu2 %vm3563_vm11, %v3820_v54  ;;  %v3970_v4 = vmul.f32 1.442695, %v3961_v60 }
 0x929   : > { %v3938_v36 = vpop.xlane.xlu2 %3937 }
 0x92a   : > { %v3960_v49 = vsub.f32 %v13259_v55, %v3938_v36 }
 0x92c   : > { %v3968_v57 = vmul.f32 1.442695, %v3960_v49 }
 0x92e   : > { %9734 = vpow2.f32 %v3968_v57 }
 0x92f   : > { %9736 = vpow2.f32 %v3970_v4 }
 0x930   : > { %8898 = vmatmul.msk.f32.vlgmr.msra.gmra.mxu2 %vm3563_vm11, %v4617_v13  ;;  %9738 = vpow2.f32 %v3972_v0 }
 0x931   : > { %v3947_v40 = vpop.xlane.xlu2 %3946 }
 0x934   : > { %v13322_v37 = vpop.eup %9734 }
 0x935   : > { %v3984_v31 = vsel %vm3645_vm12, %v13322_v37, 0.0  ;;  %v13331_v9 = vpop.eup %9736 }
 0x936   : > { %v13333_v13 = vpop.eup %9738  ;;  %v3987_v11 = vsel %vm3645_vm12, %v13331_v9, 0.0 }
 0x937   : > { %v3990_v14 = vsel %vm3645_vm12, %v13333_v13, 0.0 }
 0x938   : > { %v3922_v61 = vpop.f32.mrf.mxu0  ;;  %8899 = vmatmul.msk.f32.gmra.mxu2 %vm3563_vm11, %v4619_v17  ;;  %v3963_v17 = vsub.f32 %v13268_v63, %v3947_v40 }
 0x939   : > { %v13317_v62 = vmul.f32 0.5, %v3922_v61  ;;  %v9565_v41 = vpop.permute.xlu2 %9564 }
 0x93a   : > { %v9566_v1 = vunpack.i.l.bf16 %v9565_v41  ;;  %v9567_v55 = vunpack.i.h.bf16 %v9565_v41  ;;  %v3974_v48 = vmul.f32 1.442695, %v3963_v17 }
 0x93b   : > { %v3954_v3 = vsel %vm3645_vm12, %v13317_v62, -inf }
 0x93c   : > { %4080 = vmatpush.msrb.mxu1 %v9566_v1  ;;  %3955 = vmax.xlane.f32.xlu1 %v3954_v3  ;;  %9740 = vpow2.f32 %v3974_v48 }
 0x93e   : > { %4081 = vmatpush.msrb.mxu1 %v9567_v55 }
 0x940   : > { %v3925_v6 = vpop.f32.mrf.mxu0  ;;  %8900 = vmatmul.msk.f32.gmra.mxu2 %vm3563_vm11, %v4621_v22 }
 0x941   : > { %v13325_v7 = vmul.f32 0.5, %v3925_v6 }
 0x942   : > { %v13350_v42 = vpop.eup %9740 }
 0x943   : > { %v3957_v8 = vsel %vm3645_vm12, %v13325_v7, -inf }
 0x944   : > { %3985 = vadd.xlane.f32.xlu1 %v3984_v31  ;;  %3958 = vmax.xlane.f32.xlu2 %v3957_v8 }
 0x948   : > { %8901 = vmatmul.msk.f32.gmra.mxu2 %vm3563_vm11, %v4623_v10 }
 0x94a   : > { %3988 = vadd.xlane.f32.xlu0 %v3987_v11 }
 0x94c   : > { %3991 = vadd.xlane.f32.xlu2 %v3990_v14 }
 0x94f   : > { %v4331_v5 = vpop.f32.mrf.mxu0 }
 0x950   : > { %8902 = vmatmul.msk.f32.gmra.mxu2 %vm3563_vm11, %v4625_v44  ;;  %v13386_v61 = vmul.f32 0.5, %v4331_v5 }
 0x954   : > { %v3950_v19 = vpop.xlane.xlu1 %3949 }
 0x955   : > { %v3964_v23 = vsub.f32 %v13287_v16, %v3950_v19  ;;  %v3993_v16 = vsel %vm3645_vm12, %v13350_v42, 0.0 }
 0x957   : > { %v3976_v10 = vmul.f32 1.442695, %v3964_v23 }
 0x958   : > { %v4334_v20 = vpop.f32.mrf.mxu0  ;;  %8903 = vmatmul.msk.f32.gmra.mxu2 %vm3563_vm11, %v4627_v52  ;;  %v13363_v52 = vpop.f32.mrf.mxu2 }
 0x959   : > { %v13343_v22 = vmul.f32 0.5, %v4334_v20  ;;  %9742 = vpow2.f32 %v3976_v10 }
 0x95b   : > { %v4366_v25 = vsel %vm3645_vm12, %v13343_v22, -inf }
 0x95c   : > { %4367 = vmax.xlane.f32.xlu2 %v4366_v25 }
 0x95d   : > { %9574 = vrot.lane.b32.xlu1 %v13027_v45, %s11721_s0  ;;  %s11729_s0 = smov 56  }
 0x95f   : > { %v13359_v28 = vpop.eup %9742 }
 0x960   : > { %v4337_v63 = vpop.f32.mrf.mxu0  ;;  %8904 = vmatmul.msk.f32.gmra.mxu2 %vm3563_vm11, %v4629_v50  ;;  %v3996_v34 = vsel %vm3645_vm12, %v13359_v28, 0.0  ;;  %v13373_v50 = vpop.f32.mrf.mxu2 }
 0x961   : > { %v13353_v26 = vmul.f32 0.5, %v4337_v63 }
 0x963   : > { %v4369_v44 = vsel %vm3645_vm12, %v13353_v26, -inf }
 0x964   : > { %4370 = vmax.xlane.f32.xlu0 %v4369_v44  ;;  %3994 = vadd.xlane.f32.xlu2 %v3993_v16 }
 0x968   : > { %v4340_v29 = vpop.f32.mrf.mxu0  ;;  %8905 = vmatmul.msk.f32.gmra.mxu2 %vm3563_vm11, %v13311_v46  ;;  %v13382_v58 = vpop.f32.mrf.mxu2 }
 0x969   : > { %v13365_v43 = vmul.f32 0.5, %v4340_v29 }
 0x96b   : > { %v4372_v33 = vsel %vm3645_vm12, %v13365_v43, -inf }
 0x96c   : > { %4373 = vmax.xlane.f32.xlu0 %v4372_v33  ;;  %3997 = vadd.xlane.f32.xlu2 %v3996_v34 }
 0x970   : > { %v4343_v39 = vpop.f32.mrf.mxu0  ;;  %v13392_v2 = vpop.f32.mrf.mxu2 }
 0x971   : > { %v13371_v35 = vmul.f32 0.5, %v4343_v39 }
 0x973   : > { %v4375_v54 = vsel %vm3645_vm12, %v13371_v35, -inf }
 0x974   : > { %4376 = vmax.xlane.f32.xlu0 %v4375_v54 }
 0x977   : > { %v3953_v36 = vpop.xlane.xlu0 %3952 }
 0x978   : > { %v3965_v46 = vsub.f32 %v13299_v32, %v3953_v36  ;;  %v4346_v40 = vpop.f32.mrf.mxu0  ;;  %v4363_v32 = vsel %vm3645_vm12, %v13386_v61, -inf  ;;  %v13400_v31 = vpop.f32.mrf.mxu2 }
 0x979   : > { %v13378_v49 = vmul.f32 0.5, %v4346_v40 }
 0x97a   : > { %v3978_v56 = vmul.f32 1.442695, %v3965_v46 }
 0x97b   : > { %v4378_v57 = vsel %vm3645_vm12, %v13378_v49, -inf }
 0x97c   : > { %9744 = vpow2.f32 %v3978_v56  ;;  %4379 = vmax.xlane.f32.xlu0 %v4378_v57 }
 0x980   : > { %v4349_v1 = vpop.f32.mrf.mxu0  ;;  %v13404_v8 = vpop.f32.mrf.mxu2 }
 0x981   : > { %v13394_v3 = vmul.f32 0.5, %v4349_v1 }
 0x982   : > { %v13384_v60 = vpop.eup %9744 }
 0x983   : > { %v3999_v41 = vsel %vm3645_vm12, %v13384_v60, 0.0  ;;  %v4381_v6 = vsel %vm3645_vm12, %v13394_v3, -inf }
 0x984   : > { %4000 = vadd.xlane.f32.xlu2 %v3999_v41 }
 0x987   : > { %4364 = vmax.xlane.f32.xlu1 %v4363_v32 }
 0x988   : > { %v4352_v10 = vpop.f32.mrf.mxu0 }
 0x989   : > { %v13418_v29 = vmul.f32 0.5, %v4352_v10 }
 0x98a   : > { %v9570_v4 = vpop.permute.xlu0 %9569 }
 0x98b   : > { %v9571_v55 = vunpack.i.l.bf16 %v9570_v4  ;;  %v9572_v0 = vunpack.i.h.bf16 %v9570_v4 }
 0x98d   : > { %4082 = vmatpush.msrb.mxu1 %v9571_v55 }
 0x98f   : > { %4382 = vmax.xlane.f32.xlu1 %v4381_v6  ;;  %4083 = vmatpush.msrb.mxu1 %v9572_v0 }
 0x990   : > { %9584 = vrot.lane.b32.xlu0 %v13047_v51, %s11722_s1 }
 0x992   : > { %v9580_v46 = vpop.permute.xlu0 %9579 }
 0x998   : > { %9594 = vrot.lane.b32.xlu0 %v13027_v45, %s11722_s1 }
 0x9a3   : > { %v13406_v11 = vpop.f32.mrf.mxu2 }
 0x9a8   : > { %9589 = vrot.lane.b32.xlu1 %v13059_v53, %s11722_s1 }
 0x9ab   : > { %v13410_v14 = vpop.f32.mrf.mxu2 }
 0x9af   : > { %v3956_v5 = vpop.xlane.xlu1 %3955 }
 0x9b0   : > { %v3966_v17 = vsub.f32 %v13317_v62, %v3956_v5  ;;  %v4384_v62 = vsel %vm3645_vm12, %v13418_v29, -inf  ;;  %v9581_v5 = vunpack.i.l.bf16 %v9580_v46 }
 0x9b2   : > { %v3980_v48 = vmul.f32 1.442695, %v3966_v17 }
 0x9b3   : > { %v4697_v19 = vpop.f32.mrf.mxu2 }
 0x9b4   : > { %9746 = vpow2.f32 %v3980_v48  ;;  %v13426_v39 = vmul.f32 0.5, %v4697_v19  ;;  %v9582_v48 = vunpack.i.h.bf16 %v9580_v46 }
 0x9b6   : > { %v4729_v36 = vsel %vm3645_vm12, %v13426_v39, -inf }
 0x9b7   : > { %v3959_v20 = vpop.xlane.xlu2 %3958  ;;  %v3986_v54 = vpop.xlane.xlu1 %3985 }
 0x9b8   : > { %v3967_v23 = vsub.f32 %v13325_v7, %v3959_v20 }
 0x9ba   : > { %v13414_v25 = vpop.eup %9746  ;;  %v3982_v63 = vmul.f32 1.442695, %v3967_v23 }
 0x9bb   : > { %v4700_v44 = vpop.f32.mrf.mxu2  ;;  %v4002_v16 = vsel %vm3645_vm12, %v13414_v25, 0.0 }
 0x9bc   : > { %9748 = vpow2.f32 %v3982_v63  ;;  %4003 = vadd.xlane.f32.xlu2 %v4002_v16  ;;  %v13430_v56 = vmul.f32 0.5, %v4700_v44 }
 0x9bd   : > { %9750 = vrcp.f32 %v3986_v54  ;;  %v3989_v55 = vpop.xlane.xlu0 %3988 }
 0x9be   : > { %v4732_v1 = vsel %vm3645_vm12, %v13430_v56, -inf  ;;  %9752 = vrcp.f32 %v3989_v55 }
 0x9bf   : > { %v3992_v57 = vpop.xlane.xlu2 %3991 }
 0x9c0   : > { %9754 = vrcp.f32 %v3992_v57 }
 0x9c2   : > { %v13422_v33 = vpop.eup %9748  ;;  %4385 = vmax.xlane.f32.xlu0 %v4384_v62 }
 0x9c3   : > { %v4703_v34 = vpop.f32.mrf.mxu2  ;;  %v4005_v7 = vsel %vm3645_vm12, %v13422_v33, 0.0  ;;  %v9751_v0 = vpop.eup %9750 }
 0x9c4   : > { %4006 = vadd.xlane.f32.xlu2 %v4005_v7  ;;  %v13434_v17 = vmul.f32 0.5, %v4703_v34  ;;  %v4016_v20 = vmul.f32 %v9751_v0, %v13322_v37  ;;  %v9753_v10 = vpop.eup %9752 }
 0x9c5   : > { %v4017_v37 = vmul.f32 %v9753_v10, %v13331_v9 }
 0x9c6   : > { %v4735_v23 = vsel %vm3645_vm12, %v13434_v17, -inf  ;;  %v9755_v7 = vpop.eup %9754 }
 0x9ca   : > { %4730 = vmax.xlane.f32.xlu0 %v4729_v36  ;;  %v4018_v36 = vmul.f32 %v9755_v7, %v13333_v13 }
 0x9cb   : > { %v4706_v40 = vpop.f32.mrf.mxu2 }
 0x9cc   : > { %v13446_v44 = vmul.f32 0.5, %v4706_v40 }
 0x9ce   : > { %v4738_v34 = vsel %vm3645_vm12, %v13446_v44, -inf }
 0x9cf   : > { %v9575_v41 = vpop.permute.xlu1 %9574  ;;  %v13436_v19 = vpop.xlane.xlu2 %4367 }
 0x9d0   : > { %v9576_v32 = vunpack.i.l.bf16 %v9575_v41  ;;  %v9577_v4 = vunpack.i.h.bf16 %v9575_v41 }
 0x9d2   : > { %4084 = vmatpush.msrb.mxu1 %v9576_v32  ;;  %4733 = vmax.xlane.f32.xlu1 %v4732_v1 }
 0x9d3   : > { %v4709_v6 = vpop.f32.mrf.mxu2 }
 0x9d4   : > { %4085 = vmatpush.msrb.mxu1 %v9577_v4 }
 0x9d6   : > { %4086 = vmatpush.msrb.mxu1 %v9581_v5 }
 0x9d7   : > { %v13442_v63 = vpop.xlane.xlu0 %4370  ;;  %v3995_v62 = vpop.xlane.xlu2 %3994 }
 0x9d8   : > { %4087 = vmatpush.msrb.mxu1 %v9582_v48  ;;  %9756 = vrcp.f32 %v3995_v62 }
 0x9d9   : > { %8831 = vmatmul.msk.f32.vlgmr.msrb.gmra.mxu1 %vm3645_vm12, %v4016_v20 }
 0x9da   : > { %4736 = vmax.xlane.f32.xlu1 %v4735_v23 }
 0x9db   : > { %v4712_v16 = vpop.f32.mrf.mxu2 }
 0x9dc   : > { %9599 = vrot.lane.b32.xlu2 %v13047_v51, %s11723_s26  ;;  %v13456_v51 = vmul.f32 0.5, %v4709_v6 }
 0x9de   : > { %9614 = vrot.lane.b32.xlu0 %v13027_v45, %s11723_s26  ;;  %v4741_v9 = vsel %vm3645_vm12, %v13456_v51, -inf  ;;  %v9757_v40 = vpop.eup %9756 }
 0x9df   : > { %v4374_v54 = vpop.xlane.xlu0 %4373  ;;  %v3998_v46 = vpop.xlane.xlu2 %3997  ;;  %v4019_v41 = vmul.f32 %v9757_v40, %v13350_v42 }
 0x9e0   : > { %9758 = vrcp.f32 %v3998_v46  ;;  %v4390_v46 = vsub.f32 %v13365_v43, %v4374_v54 }
 0x9e1   : > { %8832 = vmatmul.msk.f32.gmra.mxu1 %vm3645_vm12, %v4017_v37 }
 0x9e2   : > { %4739 = vmax.xlane.f32.xlu1 %v4738_v34 }
 0x9e3   : > { %v4715_v45 = vpop.f32.mrf.mxu2 }
 0x9e4   : > { %9604 = vrot.lane.b32.xlu2 %v13065_v59, %s11722_s1  ;;  %v13464_v57 = vmul.f32 0.5, %v4715_v45  ;;  %v13493_v45 = vmul.f32 0.5, %v4712_v16 }
 0x9e6   : > { %v4747_v13 = vsel %vm3645_vm12, %v13464_v57, -inf  ;;  %v9759_v4 = vpop.eup %9758 }
 0x9e7   : > { %v13467_v32 = vpop.xlane.xlu0 %4376 }
 0x9e9   : > { %8833 = vmatmul.msk.f32.gmra.mxu1 %vm3645_vm12, %v4018_v36  ;;  %v4388_v36 = vsub.f32 %v13343_v22, %v13436_v19 }
 0x9ea   : > { %4742 = vmax.xlane.f32.xlu1 %v4741_v9 }
 0x9eb   : > { %v4718_v1 = vpop.f32.mrf.mxu2 }
 0x9ec   : > { %9609 = vrot.lane.b32.xlu2 %v13059_v53, %s11723_s26  ;;  %v13472_v55 = vmul.f32 0.5, %v4718_v1  ;;  %v4020_v53 = vmul.f32 %v9759_v4, %v13359_v28 }
 0x9ee   : > { %v4750_v42 = vsel %vm3645_vm12, %v13472_v55, -inf }
 0x9ef   : > { %v13478_v6 = vpop.xlane.xlu0 %4379 }
 0x9f1   : > { %8834 = vmatmul.msk.f32.gmra.mxu1 %vm3645_vm12, %v4019_v41 }
 0x9f2   : > { %4748 = vmax.xlane.f32.xlu1 %v4747_v13  ;;  %v4744_v13 = vsel %vm3645_vm12, %v13493_v45, -inf }
 0x9f7   : > { %v4001_v0 = vpop.xlane.xlu2 %4000 }
 0x9f8   : > { %9760 = vrcp.f32 %v4001_v0 }
 0x9f9   : > { %8835 = vmatmul.msk.f32.gmra.mxu1 %vm3645_vm12, %v4020_v53 }
 0x9fa   : > { %4751 = vmax.xlane.f32.xlu1 %v4750_v42  ;;  %v4365_v20 = vpop.xlane.xlu1 %4364 }
 0x9fb   : > { %v4387_v10 = vsub.f32 %v13386_v61, %v4365_v20  ;;  %v4397_v61 = vmul.f32 1.442695, %v4388_v36  ;;  %v4389_v36 = vsub.f32 %v13353_v26, %v13442_v63  ;;  %v4391_v26 = vsub.f32 %v13371_v35, %v13467_v32 }
 0x9fd   : > { %v4395_v62 = vmul.f32 1.442695, %v4387_v10 }
 0x9fe   : > { %v9761_v5 = vpop.eup %9760 }
 0x9ff   : > { %v4021_v48 = vmul.f32 %v9761_v5, %v13384_v60  ;;  %9762 = vpow2.f32 %v4395_v62  ;;  %v2800_v5 = vld [vmem:[#allocation20 + $0x4] sm:$0xf] }
 0xa00   : > { %9764 = vpow2.f32 %v4397_v61  ;;  %8839 = vmatpush.msk.msrb.mxu3 %vm4137_vm13, %v2800_v5 }
 0xa01   : > { %8836 = vmatmul.msk.f32.gmra.mxu1 %vm3645_vm12, %v4021_v48 }
 0xa02   : > { %v9585_v23 = vpop.permute.xlu0 %9584  ;;  %v13485_v7 = vpop.xlane.xlu1 %4382 }
 0xa03   : > { %v9586_v37 = vunpack.i.l.bf16 %v9585_v23  ;;  %v9587_v28 = vunpack.i.h.bf16 %v9585_v23 }
 0xa05   : > { %4507 = vmatpush.msra.mxu1 %v9586_v37  ;;  %v13483_v34 = vpop.eup %9762 }
 0xa06   : > { %v4411_v60 = vsel %vm3645_vm12, %v13483_v34, 0.0  ;;  %v13498_v1 = vpop.eup %9764 }
 0xa07   : > { %4508 = vmatpush.msra.mxu1 %v9587_v28  ;;  %v4414_v43 = vsel %vm3645_vm12, %v13498_v1, 0.0 }
 0xa0a   : > { %v9595_v41 = vpop.permute.xlu0 %9594 }
 0xa0b   : > { %v9596_v19 = vunpack.i.l.bf16 %v9595_v41  ;;  %v9597_v4 = vunpack.i.h.bf16 %v9595_v41 }
 0xa13   : > { %9619 = vrot.lane.b32.xlu1 %v13065_v59, %s11723_s26  ;;  %v4401_v59 = vmul.f32 1.442695, %v4390_v46  ;;  %s14791_s26 = sld [smem:[#allocation129_spill]] }
 0xa15   : > { %4412 = vadd.xlane.f32.xlu2 %v4411_v60  ;;  %9766 = vpow2.f32 %v4401_v59  ;;  %v4403_v59 = vmul.f32 1.442695, %v4391_v26 }
 0xa1a   : > { %v9590_v9 = vpop.permute.xlu1 %9589 }
 0xa1b   : > { %v9591_v40 = vunpack.i.l.bf16 %v9590_v9  ;;  %v9592_v22 = vunpack.i.h.bf16 %v9590_v9  ;;  %v13502_v16 = vpop.eup %9766  ;;  %v4399_v9 = vmul.f32 1.442695, %v4389_v36 }
 0xa1c   : > { %v4420_v54 = vsel %vm3645_vm12, %v13502_v16, 0.0 }
 0xa1d   : > { %4509 = vmatpush.msra.mxu1 %v9591_v40  ;;  %4745 = vmax.xlane.f32.xlu2 %v4744_v13 }
 0xa1f   : > { %4510 = vmatpush.msra.mxu1 %v9592_v22 }
 0xa21   : > { %4511 = vmatpush.msra.mxu1 %v9596_v19 }
 0xa23   : > { %4512 = vmatpush.msra.mxu1 %v9597_v4 }
 0xa25   : > { %4415 = vadd.xlane.f32.xlu2 %v4414_v43 }
 0xa2d   : > { %4421 = vadd.xlane.f32.xlu2 %v4420_v54 }
 0xa2f   : > { %v4004_v0 = vpop.xlane.xlu2 %4003 }
 0xa30   : > { %9768 = vrcp.f32 %v4004_v0 }
 0xa35   : > { %v13506_v53 = vpop.xlane.xlu0 %4385 }
 0xa36   : > { %v9769_v42 = vpop.eup %9768 }
 0xa37   : > { %v4007_v48 = vpop.xlane.xlu2 %4006  ;;  %v4022_v20 = vmul.f32 %v9769_v42, %v13414_v25 }
 0xa38   : > { %9770 = vrcp.f32 %v4007_v48 }
 0xa39   : > { %8837 = vmatmul.msk.f32.gmra.mxu1 %vm3645_vm12, %v4022_v20 }
 0xa3d   : > { %v4731_v23 = vpop.xlane.xlu0 %4730 }
 0xa3e   : > { %v9771_v10 = vpop.eup %9770  ;;  %v4753_v37 = vsub.f32 %v13426_v39, %v4731_v23 }
 0xa3f   : > { %v9600_v28 = vpop.permute.xlu2 %9599  ;;  %v4023_v62 = vmul.f32 %v9771_v10, %v13422_v33 }
 0xa40   : > { %v4761_v60 = vmul.f32 1.442695, %v4753_v37  ;;  %v9601_v61 = vunpack.i.l.bf16 %v9600_v28  ;;  %v9602_v25 = vunpack.i.h.bf16 %v9600_v28 }
 0xa41   : > { %8838 = vmatmul.msk.f32.gmra.mxu1 %vm3645_vm12, %v4023_v62 }
 0xa42   : > { %9772 = vpow2.f32 %v4761_v60  ;;  %4873 = vmatpush.msrb.mxu0 %v9601_v61  ;;  %v4392_v60 = vsub.f32 %v13378_v49, %v13478_v6  ;;  %v4393_v49 = vsub.f32 %v13394_v3, %v13485_v7  ;;  %v4394_v3 = vsub.f32 %v13418_v29, %v13506_v53 }
 0xa43   : > { %9774 = vpow2.f32 %v4399_v9 }
 0xa44   : > { %4874 = vmatpush.msrb.mxu0 %v9602_v25  ;;  %v4405_v25 = vmul.f32 1.442695, %v4392_v60 }
 0xa45   : > { %v4734_v46 = vpop.xlane.xlu1 %4733 }
 0xa46   : > { %v4754_v40 = vsub.f32 %v13430_v56, %v4734_v46 }
 0xa47   : > { %v9605_v41 = vpop.permute.xlu2 %9604 }
 0xa48   : > { %v13517_v39 = vpop.eup %9772  ;;  %v4763_v33 = vmul.f32 1.442695, %v4754_v40  ;;  %v9606_v13 = vunpack.i.l.bf16 %v9605_v41  ;;  %v9607_v22 = vunpack.i.h.bf16 %v9605_v41 }
 0xa49   : > { %v4777_v63 = vsel %vm3645_vm12, %v13517_v39, 0.0  ;;  %v13523_v56 = vpop.eup %9774 }
 0xa4a   : > { %9776 = vpow2.f32 %v4763_v33  ;;  %4513 = vmatpush.msra.mxu1 %v9606_v13  ;;  %4778 = vadd.xlane.f32.xlu0 %v4777_v63  ;;  %v4417_v32 = vsel %vm3645_vm12, %v13523_v56, 0.0  ;;  %v4407_v13 = vmul.f32 1.442695, %v4393_v49 }
 0xa4b   : > { %9778 = vpow2.f32 %v4403_v59 }
 0xa4c   : > { %4514 = vmatpush.msra.mxu1 %v9607_v22 }
 0xa4d   : > { %v4737_v19 = vpop.xlane.xlu1 %4736 }
 0xa4e   : > { %v4755_v4 = vsub.f32 %v13434_v17, %v4737_v19 }
 0xa4f   : > { %v9610_v43 = vpop.permute.xlu2 %9609 }
 0xa50   : > { %v13526_v54 = vpop.eup %9776  ;;  %v4765_v0 = vmul.f32 1.442695, %v4755_v4  ;;  %v9611_v42 = vunpack.i.l.bf16 %v9610_v43  ;;  %v9615_v35 = vpop.permute.xlu0 %9614  ;;  %v9612_v48 = vunpack.i.h.bf16 %v9610_v43  ;;  %v4409_v4 = vmul.f32 1.442695, %v4394_v3 }
 0xa51   : > { %v4780_v5 = vsel %vm3645_vm12, %v13526_v54, 0.0  ;;  %v9616_v20 = vunpack.i.l.bf16 %v9615_v35  ;;  %v9617_v23 = vunpack.i.h.bf16 %v9615_v35  ;;  %v13533_v28 = vpop.eup %9778 }
 0xa52   : > { %9780 = vpow2.f32 %v4765_v0  ;;  %4875 = vmatpush.msrb.mxu0 %v9611_v42  ;;  %4418 = vadd.xlane.f32.xlu0 %v4417_v32 }
 0xa53   : > { %4781 = vadd.xlane.f32.xlu2 %v4780_v5 }
 0xa54   : > { %4876 = vmatpush.msrb.mxu0 %v9612_v48 }
 0xa55   : > { %v4740_v17 = vpop.xlane.xlu1 %4739 }
 0xa56   : > { %v4756_v10 = vsub.f32 %v13446_v44, %v4740_v17  ;;  %v4089_v37 = vpop.f32.mrf.mxu1  ;;  %4877 = vmatpush.msrb.mxu0 %v9616_v20  ;;  %v4423_v44 = vsel %vm3645_vm12, %v13533_v28, 0.0 }
 0xa57   : > { %8840 = vmatmul.msk.f32.vlgmr.msrb.gmra.mxu3 %vm3563_vm11, %v4089_v37 }
 0xa58   : > { %v13536_v62 = vpop.eup %9780  ;;  %v4767_v36 = vmul.f32 1.442695, %v4756_v10  ;;  %4878 = vmatpush.msrb.mxu0 %v9617_v23 }
 0xa59   : > { %v4783_v61 = vsel %vm3645_vm12, %v13536_v62, 0.0 }
 0xa5a   : > { %9782 = vpow2.f32 %v4767_v36  ;;  %4784 = vadd.xlane.f32.xlu1 %v4783_v61 }
 0xa5b   : > { %4424 = vadd.xlane.f32.xlu2 %v4423_v44  ;;  %9784 = vpow2.f32 %v4405_v25 }
 0xa5d   : > { %v4743_v9 = vpop.xlane.xlu1 %4742 }
 0xa5e   : > { %v4757_v46 = vsub.f32 %v13456_v51, %v4743_v9  ;;  %v4092_v40 = vpop.f32.mrf.mxu1 }
 0xa5f   : > { %8841 = vmatmul.msk.f32.gmra.mxu3 %vm3563_vm11, %v4092_v40 }
 0xa60   : > { %v13546_v41 = vpop.eup %9782  ;;  %v4769_v33 = vmul.f32 1.442695, %v4757_v46 }
 0xa61   : > { %v4786_v6 = vsel %vm3645_vm12, %v13546_v41, 0.0  ;;  %v13553_v22 = vpop.eup %9784 }
 0xa62   : > { %9786 = vpow2.f32 %v4769_v33 }
 0xa63   : > { %4787 = vadd.xlane.f32.xlu2 %v4786_v6  ;;  %9788 = vpow2.f32 %v4407_v13 }
 0xa65   : > { %v4749_v26 = vpop.xlane.xlu1 %4748 }
 0xa66   : > { %v4759_v63 = vsub.f32 %v13464_v57, %v4749_v26  ;;  %v4095_v51 = vpop.f32.mrf.mxu1  ;;  %v4426_v57 = vsel %vm3645_vm12, %v13553_v22, 0.0 }
 0xa67   : > { %8842 = vmatmul.msk.f32.gmra.mxu3 %vm3563_vm11, %v4095_v51 }
 0xa68   : > { %v13556_v59 = vpop.eup %9786  ;;  %v4773_v19 = vmul.f32 1.442695, %v4759_v63 }
 0xa69   : > { %v4789_v7 = vsel %vm3645_vm12, %v13556_v59, 0.0  ;;  %v13564_v0 = vpop.eup %9788 }
 0xa6a   : > { %9790 = vpow2.f32 %v4773_v19  ;;  %4790 = vadd.xlane.f32.xlu0 %v4789_v7  ;;  %v4429_v53 = vsel %vm3645_vm12, %v13564_v0, 0.0 }
 0xa6b   : > { %4427 = vadd.xlane.f32.xlu2 %v4426_v57  ;;  %9792 = vpow2.f32 %v4409_v4 }
 0xa6d   : > { %v4752_v48 = vpop.xlane.xlu1 %4751 }
 0xa6e   : > { %v4098_v43 = vpop.f32.mrf.mxu1  ;;  %v4760_v25 = vsub.f32 %v13472_v55, %v4752_v48 }
 0xa6f   : > { %8843 = vmatmul.msk.f32.gmra.mxu3 %vm3563_vm11, %v4098_v43 }
 0xa70   : > { %v13567_v42 = vpop.eup %9790  ;;  %v4775_v46 = vmul.f32 1.442695, %v4760_v25 }
 0xa71   : > { %v4795_v29 = vsel %vm3645_vm12, %v13567_v42, 0.0  ;;  %v13573_v32 = vpop.eup %9792 }
 0xa72   : > { %4796 = vadd.xlane.f32.xlu1 %v4795_v29  ;;  %v4432_v5 = vsel %vm3645_vm12, %v13573_v32, 0.0 }
 0xa73   : > { %4430 = vadd.xlane.f32.xlu2 %v4429_v53 }
 0xa76   : > { %v4101_v35 = vpop.f32.mrf.mxu1 }
 0xa77   : > { %8844 = vmatmul.msk.f32.gmra.mxu3 %vm3563_vm11, %v4101_v35 }
 0xa7b   : > { %4433 = vadd.xlane.f32.xlu2 %v4432_v5 }
 0xa7e   : > { %v4104_v20 = vpop.f32.mrf.mxu1 }
 0xa7f   : > { %8845 = vmatmul.msk.f32.gmra.mxu3 %vm3563_vm11, %v4104_v20 }
 0xa85   : > { %v9620_v17 = vpop.permute.xlu1 %9619 }
 0xa86   : > { %v9621_v23 = vunpack.i.l.bf16 %v9620_v17  ;;  %v9622_v10 = vunpack.i.h.bf16 %v9620_v17 }
 0xa88   : > { %v4413_v37 = vpop.xlane.xlu2 %4412  ;;  %4879 = vmatpush.msrb.mxu0 %v9621_v23 }
 0xa89   : > { %9794 = vrcp.f32 %v4413_v37 }
 0xa8a   : > { %4880 = vmatpush.msrb.mxu0 %v9622_v10 }
 0xa8f   : > { %v9795_v36 = vpop.eup %9794 }
 0xa90   : > { %v4443_v60 = vmul.f32 %v9795_v36, %v13483_v34  ;;  %v4746_v61 = vpop.xlane.xlu2 %4745 }
 0xa91   : > { %v4758_v44 = vsub.f32 %v13493_v45, %v4746_v61 }
 0xa92   : > { %8873 = vmatmul.msk.f32.vlgmr.msra.gmra.mxu1 %vm3645_vm12, %v4443_v60 }
 0xa93   : > { %v4771_v9 = vmul.f32 1.442695, %v4758_v44 }
 0xa95   : > { %9796 = vpow2.f32 %v4771_v9  ;;  %v2801_v9 = vld [vmem:[#allocation20 + $0x8] sm:$0xf] }
 0xa96   : > { %9042 = vmatpush.msk.msra.mxu3 %vm4137_vm13, %v2801_v9  ;;  %8881 = vmatpush.msk.msrb.mxu1 %vm4137_vm13, %v2801_v9 }
 0xa98   : > { %v4416_v40 = vpop.xlane.xlu2 %4415 }
 0xa99   : > { %9798 = vrcp.f32 %v4416_v40 }
 0xa9a   : > { %9800 = vpow2.f32 %v4775_v46 }
 0xa9b   : > { %v13583_v33 = vpop.eup %9796 }
 0xa9c   : > { %v4792_v49 = vsel %vm3645_vm12, %v13583_v33, 0.0 }
 0xa9d   : > { %4793 = vadd.xlane.f32.xlu0 %v4792_v49 }
 0xa9f   : > { %v9799_v34 = vpop.eup %9798 }
 0xaa0   : > { %v4444_v6 = vmul.f32 %v9799_v34, %v13498_v1  ;;  %v13588_v45 = vpop.eup %9800  ;;  %v4422_v63 = vpop.xlane.xlu2 %4421 }
 0xaa1   : > { %v4798_v55 = vsel %vm3645_vm12, %v13588_v45, 0.0 }
 0xaa2   : > { %8874 = vmatmul.msk.f32.gmra.mxu1 %vm3645_vm12, %v4444_v6 }
 0xaa5   : > { %4799 = vadd.xlane.f32.xlu0 %v4798_v55 }
 0xab6   : > { %v4107_v13 = vpop.f32.mrf.mxu1 }
 0xab7   : > { %8846 = vmatmul.msk.f32.gmra.mxu3 %vm3563_vm11, %v4107_v13 }
 0xabd   : > { %v4779_v26 = vpop.xlane.xlu0 %4778 }
 0xabe   : > { %9802 = vrcp.f32 %v4779_v26  ;;  %v4110_v51 = vpop.f32.mrf.mxu1  ;;  %v2802_v26 = vld [vmem:[#allocation20 + $0xc] sm:$0xf] }
 0xabf   : > { %8847 = vmatmul.msk.f32.gmra.mxu3 %vm3563_vm11, %v4110_v51  ;;  %8914 = vmatpush.msk.msra.mxu1 %vm4137_vm13, %v2802_v26 }
 0xac4   : > { %v9803_v19 = vpop.eup %9802 }
 0xac5   : > { %v4809_v1 = vmul.f32 %v9803_v19, %v13517_v39  ;;  %v4419_v3 = vpop.xlane.xlu0 %4418 }
 0xac6   : > { %9804 = vrcp.f32 %v4419_v3  ;;  %v4782_v7 = vpop.xlane.xlu2 %4781 }
 0xac7   : > { %9806 = vrcp.f32 %v4782_v7  ;;  %8906 = vmatmul.msk.f32.vlgmr.msrb.gmra.mxu0 %vm3645_vm12, %v4809_v1 }
 0xac8   : > { %9808 = vrcp.f32 %v4422_v63 }
 0xacc   : > { %v9805_v57 = vpop.eup %9804 }
 0xacd   : > { %v9807_v4 = vpop.eup %9806  ;;  %v4785_v43 = vpop.xlane.xlu1 %4784  ;;  %v4445_v29 = vmul.f32 %v9805_v57, %v13523_v56 }
 0xace   : > { %v4425_v53 = vpop.xlane.xlu2 %4424  ;;  %9810 = vrcp.f32 %v4785_v43  ;;  %v4810_v35 = vmul.f32 %v9807_v4, %v13526_v54  ;;  %v9809_v39 = vpop.eup %9808 }
 0xacf   : > { %8875 = vmatmul.msk.f32.gmra.mxu1 %vm3645_vm12, %v4445_v29  ;;  %9812 = vrcp.f32 %v4425_v53  ;;  %v4446_v48 = vmul.f32 %v9809_v39, %v13502_v16 }
 0xad0   : > { %8907 = vmatmul.msk.f32.gmra.mxu0 %vm3645_vm12, %v4810_v35 }
 0xad4   : > { %v9811_v5 = vpop.eup %9810 }
 0xad5   : > { %v4811_v20 = vmul.f32 %v9811_v5, %v13536_v62  ;;  %v9813_v56 = vpop.eup %9812 }
 0xad6   : > { %v4788_v17 = vpop.xlane.xlu2 %4787  ;;  %v4447_v10 = vmul.f32 %v9813_v56, %v13533_v28 }
 0xad7   : > { %9814 = vrcp.f32 %v4788_v17  ;;  %8876 = vmatmul.msk.f32.gmra.mxu1 %vm3645_vm12, %v4446_v48 }
 0xad8   : > { %8908 = vmatmul.msk.f32.gmra.mxu0 %vm3645_vm12, %v4811_v20 }
 0xada   : > { %v4158_v53 = vpop.f32.mrf.mxu3 }
 0xadd   : > { %v9815_v23 = vpop.eup %9814  ;;  %v4791_v54 = vpop.xlane.xlu0 %4790 }
 0xade   : > { %9816 = vrcp.f32 %v4791_v54  ;;  %v4428_v37 = vpop.xlane.xlu2 %4427  ;;  %v4812_v36 = vmul.f32 %v9815_v23, %v13546_v41 }
 0xadf   : > { %9818 = vrcp.f32 %v4428_v37  ;;  %8877 = vmatmul.msk.f32.gmra.mxu1 %vm3645_vm12, %v4447_v10  ;;  %v4227_v37 = vadd.f32 %v13363_v52, %v4158_v53 }
 0xae0   : > { %8909 = vmatmul.msk.f32.gmra.mxu0 %vm3645_vm12, %v4812_v36 }
 0xae2   : > { %v4161_v35 = vpop.f32.mrf.mxu3 }
 0xae4   : > { %v9817_v16 = vpop.eup %9816 }
 0xae5   : > { %v9819_v62 = vpop.eup %9818  ;;  %v4813_v60 = vmul.f32 %v9817_v16, %v13556_v59  ;;  %v4797_v49 = vpop.xlane.xlu1 %4796 }
 0xae6   : > { %v4431_v61 = vpop.xlane.xlu2 %4430  ;;  %v4448_v44 = vmul.f32 %v9819_v62, %v13553_v22 }
 0xae7   : > { %9820 = vrcp.f32 %v4431_v61  ;;  %v13645_v61 = vld [vmem:[#allocation19] ss:$0 sm:$0xff] }
 0xae8   : > { %8878 = vmatmul.msk.f32.gmra.mxu1 %vm3645_vm12, %v4448_v44  ;;  %8910 = vmatmul.msk.f32.gmra.mxu0 %vm3645_vm12, %v4813_v60 }
 0xaea   : > { %v4164_v39 = vpop.f32.mrf.mxu3 }
 0xaed   : > { %v9821_v28 = vpop.eup %9820 }
 0xaee   : > { %v4434_v25 = vpop.xlane.xlu2 %4433  ;;  %v4449_v41 = vmul.f32 %v9821_v28, %v13564_v0 }
 0xaef   : > { %9822 = vrcp.f32 %v4434_v25 }
 0xaf0   : > { %8879 = vmatmul.msk.f32.gmra.mxu1 %vm3645_vm12, %v4449_v41  ;;  %v4230_v41 = vadd.f32 %v13373_v50, %v4161_v35 }
 0xaf2   : > { %v4167_v48 = vpop.f32.mrf.mxu3 }
 0xaf5   : > { %v9823_v59 = vpop.eup %9822 }
 0xaf6   : > { %v4450_v22 = vmul.f32 %v9823_v59, %v13573_v32 }
 0xaf8   : > { %8880 = vmatmul.msk.f32.gmra.mxu1 %vm3645_vm12, %v4450_v22 }
 0xafa   : > { %v4170_v17 = vpop.f32.mrf.mxu3 }
 0xb02   : > { %v4173_v23 = vpop.f32.mrf.mxu3 }
 0xb0f   : > { %v4516_v46 = vpop.f32.mrf.mxu1 }
 0xb10   : > { %v4794_v40 = vpop.xlane.xlu0 %4793  ;;  %8882 = vmatmul.msk.f32.vlgmr.msrb.gmra.mxu1 %vm3563_vm11, %v4516_v46 }
 0xb11   : > { %9824 = vrcp.f32 %v4794_v40  ;;  %v4233_v40 = vadd.f32 %v13382_v58, %v4164_v39 }
 0xb12   : > { %9826 = vrcp.f32 %v4797_v49 }
 0xb17   : > { %v9825_v0 = vpop.eup %9824 }
 0xb18   : > { %v4814_v34 = vmul.f32 %v9825_v0, %v13583_v33  ;;  %v4800_v6 = vpop.xlane.xlu0 %4799  ;;  %v9827_v55 = vpop.eup %9826 }
 0xb19   : > { %9828 = vrcp.f32 %v4800_v6  ;;  %v4815_v32 = vmul.f32 %v9827_v55, %v13567_v42 }
 0xb1a   : > { %8911 = vmatmul.msk.f32.gmra.mxu0 %vm3645_vm12, %v4814_v34 }
 0xb1f   : > { %v4519_v13 = vpop.f32.mrf.mxu1  ;;  %v9829_v63 = vpop.eup %9828 }
 0xb20   : > { %8883 = vmatmul.msk.f32.vlgmr.msra.gmra.mxu3 %vm3563_vm11, %v4519_v13  ;;  %v4816_v51 = vmul.f32 %v9829_v63, %v13588_v45  ;;  %v4236_v13 = vadd.f32 %v13392_v2, %v4167_v48 }
 0xb22   : > { %8912 = vmatmul.msk.f32.gmra.mxu0 %vm3645_vm12, %v4815_v32 }
 0xb2a   : > { %8913 = vmatmul.msk.f32.gmra.mxu0 %vm3645_vm12, %v4816_v51 }
 0xb3a   : > { %v4176_v54 = vpop.f32.mrf.mxu3 }
 0xb42   : > { %v13643_v36 = vpop.f32.mrf.mxu3 }
 0xb44   : > { %v4882_v33 = vpop.f32.mrf.mxu0 }
 0xb45   : > { %8915 = vmatmul.msk.f32.vlgmr.msra.gmra.mxu1 %vm3563_vm11, %v4882_v33 }
 0xb4c   : > { %v4522_v19 = vpop.f32.mrf.mxu1 }
 0xb4d   : > { %v4885_v1 = vpop.f32.mrf.mxu0  ;;  %8884 = vmatmul.msk.f32.gmra.mxu3 %vm3563_vm11, %v4522_v19  ;;  %v4239_v19 = vadd.f32 %v13400_v31, %v4170_v17 }
 0xb4e   : > { %8916 = vmatmul.msk.f32.gmra.mxu1 %vm3563_vm11, %v4885_v1 }
 0xb54   : > { %v4525_v42 = vpop.f32.mrf.mxu1 }
 0xb55   : > { %v4888_v3 = vpop.f32.mrf.mxu0  ;;  %8885 = vmatmul.msk.f32.gmra.mxu3 %vm3563_vm11, %v4525_v42 }
 0xb56   : > { %8917 = vmatmul.msk.f32.gmra.mxu1 %vm3563_vm11, %v4888_v3 }
 0xb5c   : > { %v4528_v7 = vpop.f32.mrf.mxu1 }
 0xb5d   : > { %v4891_v57 = vpop.f32.mrf.mxu0  ;;  %8886 = vmatmul.msk.f32.gmra.mxu3 %vm3563_vm11, %v4528_v7 }
 0xb5e   : > { %8918 = vmatmul.msk.f32.gmra.mxu1 %vm3563_vm11, %v4891_v57 }
 0xb65   : > { %v4531_v45 = vpop.f32.mrf.mxu1  ;;  %v4894_v4 = vpop.f32.mrf.mxu0 }
 0xb66   : > { %8887 = vmatmul.msk.f32.gmra.mxu3 %vm3563_vm11, %v4531_v45  ;;  %8919 = vmatmul.msk.f32.gmra.mxu1 %vm3563_vm11, %v4894_v4  ;;  %v4242_v4 = vadd.f32 %v13404_v8, %v4173_v23 }
 0xb6d   : > { %v4534_v43 = vpop.f32.mrf.mxu1 }
 0xb6e   : > { %8888 = vmatmul.msk.f32.gmra.mxu3 %vm3563_vm11, %v4534_v43 }
 0xb75   : > { %v4537_v29 = vpop.f32.mrf.mxu1 }
 0xb76   : > { %8889 = vmatmul.msk.f32.gmra.mxu3 %vm3563_vm11, %v4537_v29 }
 0xb8d   : > { %v4584_v10 = vpop.f32.mrf.mxu1 }
 0xb8e   : > { %v4608_v16 = vadd.f32 %v4584_v10, %v4227_v37 }
 0xb97   : > { %v4897_v5 = vpop.f32.mrf.mxu0 }
 0xb98   : > { %8920 = vmatmul.msk.f32.gmra.mxu1 %vm3563_vm11, %v4897_v5  ;;  %v4245_v5 = vadd.f32 %v13406_v11, %v4176_v54  ;;  %v4248_v54 = vadd.f32 %v13410_v14, %v13643_v36 }
 0xb9f   : > { %v4900_v20 = vpop.f32.mrf.mxu0 }
 0xba0   : > { %8921 = vmatmul.msk.f32.gmra.mxu1 %vm3563_vm11, %v4900_v20 }
 0xba3   : > { %v4587_v28 = vpop.f32.mrf.mxu3 }
 0xba4   : > { %v4609_v59 = vadd.f32 %v4587_v28, %v4230_v41 }
 0xba7   : > { %v4903_v56 = vpop.f32.mrf.mxu0 }
 0xba8   : > { %8922 = vmatmul.msk.f32.gmra.mxu1 %vm3563_vm11, %v4903_v56 }
 0xbc2   : > { %v4950_v62 = vpop.f32.mrf.mxu1 }
 0xbc3   : > { %v4974_v60 = vadd.f32 %v4950_v62, %v4608_v16 }
 0xbc5   : > { %v4982_v44 = vadd.f32 %v4974_v60, %v12863_v12 }
 0xbc7   : > { %v13649_v25 = vadd.f32 %v13645_v61, %v4982_v44 }
 0xbc9   : > { %v5001_v9 = vsel %vm3200_vm0, %v13649_v25, 0.0 }
 0xbca   : > { %5002 = vadd.xlane.f32.xlu2 %v5001_v9 }
 0xbcb   : > { %v4953_v52 = vpop.f32.mrf.mxu1 }
 0xbcc   : > { %v4975_v22 = vadd.f32 %v4953_v52, %v4609_v59 }
 0xbce   : > { %v4983_v46 = vadd.f32 %v4975_v22, %v12867_v15 }
 0xbd0   : > { %v4590_v49 = vpop.f32.mrf.mxu3  ;;  %v13657_v12 = vadd.f32 %v13645_v61, %v4983_v46 }
 0xbd1   : > { %v4610_v0 = vadd.f32 %v4590_v49, %v4233_v40 }
 0xbd2   : > { %v5004_v34 = vsel %vm3200_vm0, %v13657_v12, 0.0 }
 0xbd3   : > { %v4956_v50 = vpop.f32.mrf.mxu1  ;;  %5005 = vadd.xlane.f32.xlu1 %v5004_v34 }
 0xbd4   : > { %v4976_v6 = vadd.f32 %v4956_v50, %v4610_v0 }
 0xbd6   : > { %v4984_v55 = vadd.f32 %v4976_v6, %v12871_v18 }
 0xbd8   : > { %v13664_v32 = vadd.f32 %v13645_v61, %v4984_v55  ;;  %v4593_v15 = vpop.f32.mrf.mxu3 }
 0xbd9   : > { %v4611_v58 = vadd.f32 %v4593_v15, %v4236_v13 }
 0xbda   : > { %v5007_v26 = vsel %vm3200_vm0, %v13664_v32, 0.0 }
 0xbdb   : > { %v4959_v63 = vpop.f32.mrf.mxu1  ;;  %5008 = vadd.xlane.f32.xlu0 %v5007_v26 }
 0xbdc   : > { %v4977_v51 = vadd.f32 %v4959_v63, %v4611_v58 }
 0xbde   : > { %v4985_v33 = vadd.f32 %v4977_v51, %v12875_v21 }
 0xbe0   : > { %v13671_v1 = vadd.f32 %v13645_v61, %v4985_v33  ;;  %v4596_v18 = vpop.f32.mrf.mxu3 }
 0xbe1   : > { %v4612_v2 = vadd.f32 %v4596_v18, %v4239_v19 }
 0xbe2   : > { %v5010_v42 = vsel %vm3200_vm0, %v13671_v1, 0.0 }
 0xbe3   : > { %v4962_v3 = vpop.f32.mrf.mxu1  ;;  %5011 = vadd.xlane.f32.xlu2 %v5010_v42 }
 0xbe4   : > { %v4978_v7 = vadd.f32 %v4962_v3, %v4612_v2 }
 0xbe6   : > { %v4986_v57 = vadd.f32 %v4978_v7, %v12879_v24 }
 0xbe8   : > { %v13677_v45 = vadd.f32 %v13645_v61, %v4986_v57 }
 0xbe9   : > { %v4599_v31 = vpop.f32.mrf.mxu3 }
 0xbea   : > { %v5013_v21 = vsel %vm3200_vm0, %v13677_v45, 0.0  ;;  %v4613_v43 = vadd.f32 %v4599_v31, %v4242_v4  ;;  %v2784_v4 = vld [vmem:[#allocation10 + $0x8] sm:$0xff] }
 0xbeb   : > { %5014 = vadd.xlane.f32.xlu1 %v5013_v21  ;;  %5240 = vmatpush.msrb.mxu3 %v2784_v4 }
 0xbf1   : > { %v4602_v39 = vpop.f32.mrf.mxu3 }
 0xbf2   : > { %v4614_v48 = vadd.f32 %v4602_v39, %v4245_v5 }
 0xbf9   : > { %v4605_v11 = vpop.f32.mrf.mxu3 }
 0xbfa   : > { %v4615_v16 = vadd.f32 %v4605_v11, %v4248_v54 }
 0xc15   : > { %v4965_v29 = vpop.f32.mrf.mxu1 }
 0xc16   : > { %v4979_v53 = vadd.f32 %v4965_v29, %v4613_v43  ;;  %v2783_v43 = vld [vmem:[#allocation10] sm:$0xff] }
 0xc17   : > { %5241 = vmatpush.msrb.mxu3 %v2783_v43 }
 0xc18   : > { %v4987_v35 = vadd.f32 %v4979_v53, %v12883_v27 }
 0xc1a   : > { %v13685_v24 = vadd.f32 %v13645_v61, %v4987_v35 }
 0xc1c   : > { %v5016_v20 = vsel %vm3200_vm0, %v13685_v24, 0.0 }
 0xc1d   : > { %v4968_v17 = vpop.f32.mrf.mxu1  ;;  %5017 = vadd.xlane.f32.xlu0 %v5016_v20 }
 0xc1e   : > { %v4980_v56 = vadd.f32 %v4968_v17, %v4614_v48 }
 0xc20   : > { %v4988_v8 = vadd.f32 %v4980_v56, %v12887_v30 }
 0xc22   : > { %v13691_v23 = vadd.f32 %v13645_v61, %v4988_v8 }
 0xc24   : > { %v5019_v27 = vsel %vm3200_vm0, %v13691_v23, 0.0 }
 0xc25   : > { %5020 = vadd.xlane.f32.xlu1 %v5019_v27  ;;  %v4971_v10 = vpop.f32.mrf.mxu1 }
 0xc26   : > { %v4981_v60 = vadd.f32 %v4971_v10, %v4615_v16 }
 0xc28   : > { %v4989_v28 = vadd.f32 %v4981_v60, %v12901_v47 }
 0xc2a   : > { %v13707_v36 = vadd.f32 %v13645_v61, %v4989_v28 }
 0xc2c   : > { %v5022_v22 = vsel %vm3200_vm0, %v13707_v36, 0.0 }
 0xc3d   : > { %v5003_v37 = vpop.xlane.xlu2 %5002 }
 0xc3e   : > { %v5025_v62 = vmul.f32 %v5003_v37, %v12891_v38 }
 0xc40   : > { %v13699_v44 = vsub.f32 %v13649_v25, %v5025_v62 }
 0xc42   : > { %v5041_v30 = vmul.f32 %v13699_v44, %v13699_v44 }
 0xc44   : > { %v5049_v41 = vsel %vm3200_vm0, %v5041_v30, 0.0 }
 0xc45   : > { %5050 = vadd.xlane.f32.xlu2 %v5049_v41 }
 0xc46   : > { %v5006_v9 = vpop.xlane.xlu1 %5005 }
 0xc47   : > { %v5026_v14 = vmul.f32 %v5006_v9, %v12891_v38  ;;  %v13762_v9 = vld [vmem:[#allocation17] ss:$0 sm:$0xff] }
 0xc49   : > { %v13710_v59 = vsub.f32 %v13657_v12, %v5026_v14 }
 0xc4b   : > { %v5042_v52 = vmul.f32 %v13710_v59, %v13710_v59 }
 0xc4d   : > { %v5052_v47 = vsel %vm3200_vm0, %v5042_v52, 0.0  ;;  %5023 = vadd.xlane.f32.xlu2 %v5022_v22 }
 0xc4e   : > { %v5009_v46 = vpop.xlane.xlu0 %5008  ;;  %5053 = vadd.xlane.f32.xlu0 %v5052_v47 }
 0xc4f   : > { %v5027_v40 = vmul.f32 %v5009_v46, %v12891_v38  ;;  %v13765_v46 = vld [vmem:[#allocation16] ss:$0 sm:$0xff] }
 0xc51   : > { %v13719_v49 = vsub.f32 %v13664_v32, %v5027_v40 }
 0xc53   : > { %v5043_v61 = vmul.f32 %v13719_v49, %v13719_v49 }
 0xc55   : > { %v5055_v0 = vsel %vm3200_vm0, %v5043_v61, 0.0 }
 0xc56   : > { %v5012_v34 = vpop.xlane.xlu2 %5011  ;;  %5056 = vadd.xlane.f32.xlu1 %v5055_v0 }
 0xc57   : > { %v5028_v50 = vmul.f32 %v5012_v34, %v12891_v38 }
 0xc59   : > { %v13726_v6 = vsub.f32 %v13671_v1, %v5028_v50 }
 0xc5b   : > { %v5044_v55 = vmul.f32 %v13726_v6, %v13726_v6 }
 0xc5d   : > { %v5058_v13 = vsel %vm3200_vm0, %v5044_v55, 0.0 }
 0xc5e   : > { %v5015_v15 = vpop.xlane.xlu1 %5014  ;;  %5059 = vadd.xlane.f32.xlu0 %v5058_v13 }
 0xc5f   : > { %v5029_v58 = vmul.f32 %v5015_v15, %v12891_v38 }
 0xc61   : > { %v13733_v26 = vsub.f32 %v13677_v45, %v5029_v58 }
 0xc63   : > { %v5045_v63 = vmul.f32 %v13733_v26, %v13733_v26 }
 0xc65   : > { %v5061_v51 = vsel %vm3200_vm0, %v5045_v63, 0.0 }
 0xc66   : > { %5062 = vadd.xlane.f32.xlu2 %v5061_v51 }
 0xc90   : > { %v5018_v33 = vpop.xlane.xlu0 %5017 }
 0xc91   : > { %v5030_v19 = vmul.f32 %v5018_v33, %v12891_v38 }
 0xc93   : > { %v13740_v18 = vsub.f32 %v13685_v24, %v5030_v19 }
 0xc95   : > { %v5046_v2 = vmul.f32 %v13740_v18, %v13740_v18 }
 0xc97   : > { %v5064_v42 = vsel %vm3200_vm0, %v5046_v2, 0.0 }
 0xc98   : > { %5065 = vadd.xlane.f32.xlu1 %v5064_v42  ;;  %v5021_v3 = vpop.xlane.xlu1 %5020 }
 0xc99   : > { %v5031_v7 = vmul.f32 %v5021_v3, %v12891_v38 }
 0xc9b   : > { %v13747_v57 = vsub.f32 %v13691_v23, %v5031_v7 }
 0xc9d   : > { %v5047_v21 = vmul.f32 %v13747_v57, %v13747_v57 }
 0xc9f   : > { %v5067_v31 = vsel %vm3200_vm0, %v5047_v21, 0.0 }
 0xca0   : > { %5068 = vadd.xlane.f32.xlu0 %v5067_v31 }
 0xcb8   : > { %v5051_v29 = vpop.xlane.xlu2 %5050 }
 0xcb9   : > { %v5073_v53 = vmul.f32 %v5051_v29, %v12891_v38 }
 0xcbb   : > { %v5081_v35 = vadd.f32 1e-05, %v5073_v53 }
 0xcbd   : > { %9830 = vrsqrt.f32 %v5081_v35  ;;  %vm5095_vm15 = vweird.f32 %v5081_v35 }
 0xcc0   : > { %v5024_v39 = vpop.xlane.xlu2 %5023 }
 0xcc1   : > { %v5054_v5 = vpop.xlane.xlu0 %5053  ;;  %v5032_v48 = vmul.f32 %v5024_v39, %v12891_v38 }
 0xcc2   : > { %v5074_v20 = vmul.f32 %v5054_v5, %v12891_v38 }
 0xcc3   : > { %v9831_v17 = vpop.eup %9830  ;;  %v13756_v56 = vsub.f32 %v13707_v36, %v5032_v48 }
 0xcc4   : > { %v5090_v8 = vmul.f32 %v9831_v17, %v5081_v35  ;;  %v5082_v27 = vadd.f32 1e-05, %v5074_v20  ;;  %vm5096_vm14 = vweird.f32 %v9831_v17 }
 0xcc5   : > { %v5048_v11 = vmul.f32 %v13756_v56, %v13756_v56  ;;  %vm5097_vm1 = vmor %vm5095_vm15, %vm5096_vm14 }
 0xcc6   : > { %v5091_v54 = vmul.f32 %v9831_v17, %v5090_v8  ;;  %9832 = vrsqrt.f32 %v5082_v27  ;;  %vm5105_vm3 = vweird.f32 %v5082_v27 }
 0xcc7   : > { %v5070_v10 = vsel %vm3200_vm0, %v5048_v11, 0.0 }
 0xcc8   : > { %v5092_v37 = vmul.f32 0.5, %v5091_v54  ;;  %5071 = vadd.xlane.f32.xlu2 %v5070_v10 }
 0xcc9   : > { %v5057_v16 = vpop.xlane.xlu1 %5056 }
 0xcca   : > { %v5093_v62 = vsub.f32 1.5, %v5092_v37  ;;  %v5075_v60 = vmul.f32 %v5057_v16, %v12891_v38 }
 0xccc   : > { %v9833_v30 = vpop.eup %9832  ;;  %v5094_v28 = vmul.f32 %v9831_v17, %v5093_v62  ;;  %v5083_v41 = vadd.f32 1e-05, %v5075_v60 }
 0xccd   : > { %v5100_v14 = vmul.f32 %v9833_v30, %v5082_v27  ;;  %vm5106_vm2 = vweird.f32 %v9833_v30 }
 0xcce   : > { %v5098_v52 = vsel %vm5097_vm1, %v9831_v17, %v5094_v28  ;;  %9834 = vrsqrt.f32 %v5083_v41  ;;  %vm5107_vm4 = vmor %vm5105_vm3, %vm5106_vm2  ;;  %vm5115_vm6 = vweird.f32 %v5083_v41 }
 0xccf   : > { %v5169_v22 = vmul.f32 %v5098_v52, %v13699_v44  ;;  %v5101_v47 = vmul.f32 %v9833_v30, %v5100_v14 }
 0xcd1   : > { %v5180_v40 = vmul.f32 %v13762_v9, %v5169_v22  ;;  %v5102_v61 = vmul.f32 0.5, %v5101_v47  ;;  %v5060_v0 = vpop.xlane.xlu0 %5059 }
 0xcd2   : > { %v5076_v34 = vmul.f32 %v5060_v0, %v12891_v38 }
 0xcd3   : > { %v5103_v50 = vsub.f32 1.5, %v5102_v61  ;;  %v5191_v55 = vadd.f32 %v13765_v46, %v5180_v40 }
 0xcd4   : > { %v9835_v13 = vpop.eup %9834  ;;  %v5084_v15 = vadd.f32 1e-05, %v5076_v34 }
 0xcd5   : > { %v5104_v58 = vmul.f32 %v9833_v30, %v5103_v50  ;;  %v5110_v63 = vmul.f32 %v9835_v13, %v5083_v41  ;;  %8923 = vmatmul.msk.f32.vlgmr.msrb.gmra.mxu3 %vm3200_vm0, %v5191_v55  ;;  %vm5116_vm5 = vweird.f32 %v9835_v13 }
 0xcd6   : > { %9836 = vrsqrt.f32 %v5084_v15  ;;  %vm5117_vm7 = vmor %vm5115_vm6, %vm5116_vm5  ;;  %vm5125_vm9 = vweird.f32 %v5084_v15 }
 0xcd7   : > { %v5108_v44 = vsel %vm5107_vm4, %v9833_v30, %v5104_v58  ;;  %v5111_v51 = vmul.f32 %v9835_v13, %v5110_v63 }
 0xcd8   : > { %v5170_v33 = vmul.f32 %v5108_v44, %v13710_v59 }
 0xcd9   : > { %v5112_v19 = vmul.f32 0.5, %v5111_v51  ;;  %v5063_v2 = vpop.xlane.xlu2 %5062 }
 0xcda   : > { %v5077_v42 = vmul.f32 %v5063_v2, %v12891_v38  ;;  %v5181_v3 = vmul.f32 %v13762_v9, %v5170_v33 }
 0xcdb   : > { %v5113_v7 = vsub.f32 1.5, %v5112_v19 }
 0xcdc   : > { %v9837_v21 = vpop.eup %9836  ;;  %v5085_v31 = vadd.f32 1e-05, %v5077_v42  ;;  %v5192_v4 = vadd.f32 %v13765_v46, %v5181_v3 }
 0xcdd   : > { %v5114_v43 = vmul.f32 %v9835_v13, %v5113_v7  ;;  %v5120_v29 = vmul.f32 %v9837_v21, %v5084_v15  ;;  %vm5126_vm8 = vweird.f32 %v9837_v21 }
 0xcde   : > { %9838 = vrsqrt.f32 %v5085_v31  ;;  %8924 = vmatmul.msk.f32.gmra.mxu3 %vm3200_vm0, %v5192_v4  ;;  %vm5127_vm10 = vmor %vm5125_vm9, %vm5126_vm8  ;;  %vm5135_vm15 = vweird.f32 %v5085_v31 }
 0xcdf   : > { %v5118_v59 = vsel %vm5117_vm7, %v9835_v13, %v5114_v43  ;;  %v5121_v53 = vmul.f32 %v9837_v21, %v5120_v29 }
 0xce0   : > { %v5171_v35 = vmul.f32 %v5118_v59, %v13719_v49  ;;  %v2793_v59 = vld [vmem:[%s14786_s18 + $0x38] sm:$0xff] }
 0xce1   : > { %v5122_v39 = vmul.f32 0.5, %v5121_v53  ;;  %5374 = vmatpush.msrb.mxu2 %v2793_v59  ;;  %v2792_v53 = vld [vmem:[%s14786_s18 + $0x30] sm:$0xff] }
 0xce2   : > { %v5182_v5 = vmul.f32 %v13762_v9, %v5171_v35 }
 0xce3   : > { %v5123_v48 = vsub.f32 1.5, %v5122_v39  ;;  %5375 = vmatpush.msrb.mxu2 %v2792_v53  ;;  %v2791_v39 = vld [vmem:[%s14786_s18 + $0x28] sm:$0xff] }
 0xce4   : > { %v9839_v20 = vpop.eup %9838  ;;  %v5193_v17 = vadd.f32 %v13765_v46, %v5182_v5 }
 0xce5   : > { %v5124_v8 = vmul.f32 %v9837_v21, %v5123_v48  ;;  %v5130_v27 = vmul.f32 %v9839_v20, %v5085_v31  ;;  %vm5136_vm14 = vweird.f32 %v9839_v20  ;;  %5376 = vmatpush.msrb.mxu2 %v2791_v39  ;;  %v2790_v48 = vld [vmem:[%s14786_s18 + $0x20] sm:$0xff] }
 0xce6   : > { %8925 = vmatmul.msk.f32.gmra.mxu3 %vm3200_vm0, %v5193_v17  ;;  %vm5137_vm1 = vmor %vm5135_vm15, %vm5136_vm14  ;;  %v2789_v17 = vld [vmem:[%s14786_s18 + $0x18] sm:$0xff] }
 0xce7   : > { %v5128_v11 = vsel %vm5127_vm10, %v9837_v21, %v5124_v8  ;;  %v5131_v54 = vmul.f32 %v9839_v20, %v5130_v27  ;;  %5377 = vmatpush.msrb.mxu2 %v2790_v48  ;;  %v2788_v27 = vld [vmem:[%s14786_s18 + $0x10] sm:$0xff] }
 0xce8   : > { %v5172_v10 = vmul.f32 %v5128_v11, %v13726_v6 }
 0xce9   : > { %v5132_v37 = vmul.f32 0.5, %v5131_v54  ;;  %5378 = vmatpush.msrb.mxu2 %v2789_v17  ;;  %v2787_v54 = vld [vmem:[%s14786_s18 + $0x8] sm:$0xff] }
 0xcea   : > { %v5183_v49 = vmul.f32 %v13762_v9, %v5172_v10 }
 0xceb   : > { %v5133_v16 = vsub.f32 1.5, %v5132_v37  ;;  %5379 = vmatpush.msrb.mxu2 %v2788_v27  ;;  %v2786_v37 = vld [vmem:[%s14786_s18] sm:$0xff] }
 0xcec   : > { %v5194_v62 = vadd.f32 %v13765_v46, %v5183_v49 }
 0xced   : > { %v5134_v60 = vmul.f32 %v9839_v20, %v5133_v16  ;;  %5380 = vmatpush.msrb.mxu2 %v2787_v54 }
 0xcee   : > { %8926 = vmatmul.msk.f32.gmra.mxu3 %vm3200_vm0, %v5194_v62  ;;  %v13809_v62 = vld [vmem:[#allocation8] ss:$0 sm:$0xff] }
 0xcef   : > { %v5138_v30 = vsel %vm5137_vm1, %v9839_v20, %v5134_v60  ;;  %5381 = vmatpush.msrb.mxu2 %v2786_v37 }
 0xcf0   : > { %v5173_v28 = vmul.f32 %v5138_v30, %v13733_v26 }
 0xcf2   : > { %v5184_v41 = vmul.f32 %v13762_v9, %v5173_v28 }
 0xcf4   : > { %v5195_v14 = vadd.f32 %v13765_v46, %v5184_v41 }
 0xcf6   : > { %8927 = vmatmul.msk.f32.gmra.mxu3 %vm3200_vm0, %v5195_v14 }
 0xd0b   : > { %v5066_v6 = vpop.xlane.xlu1 %5065 }
 0xd0c   : > { %v5078_v52 = vmul.f32 %v5066_v6, %v12891_v38 }
 0xd0e   : > { %v5086_v22 = vadd.f32 1e-05, %v5078_v52 }
 0xd10   : > { %9840 = vrsqrt.f32 %v5086_v22  ;;  %vm5145_vm3 = vweird.f32 %v5086_v22 }
 0xd13   : > { %v5069_v47 = vpop.xlane.xlu0 %5068 }
 0xd14   : > { %v5079_v40 = vmul.f32 %v5069_v47, %v12891_v38 }
 0xd16   : > { %v9841_v61 = vpop.eup %9840  ;;  %v5087_v0 = vadd.f32 1e-05, %v5079_v40 }
 0xd17   : > { %v5140_v34 = vmul.f32 %v9841_v61, %v5086_v22  ;;  %vm5146_vm2 = vweird.f32 %v9841_v61 }
 0xd18   : > { %9842 = vrsqrt.f32 %v5087_v0  ;;  %vm5147_vm4 = vmor %vm5145_vm3, %vm5146_vm2  ;;  %vm5155_vm6 = vweird.f32 %v5087_v0 }
 0xd19   : > { %v5141_v50 = vmul.f32 %v9841_v61, %v5140_v34 }
 0xd1b   : > { %v5142_v26 = vmul.f32 0.5, %v5141_v50 }
 0xd1d   : > { %v5143_v55 = vsub.f32 1.5, %v5142_v26 }
 0xd1e   : > { %v9843_v13 = vpop.eup %9842 }
 0xd1f   : > { %v5144_v15 = vmul.f32 %v9841_v61, %v5143_v55  ;;  %v5150_v58 = vmul.f32 %v9843_v13, %v5087_v0  ;;  %vm5156_vm5 = vweird.f32 %v9843_v13 }
 0xd20   : > { %vm5157_vm7 = vmor %vm5155_vm6, %vm5156_vm5  ;;  %vm5780_vm5 = vcmask 261120  }
 0xd21   : > { %v5148_v63 = vsel %vm5147_vm4, %v9841_v61, %v5144_v15  ;;  %v5151_v44 = vmul.f32 %v9843_v13, %v5150_v58 }
 0xd22   : > { %v5174_v51 = vmul.f32 %v5148_v63, %v13740_v18 }
 0xd23   : > { %v5152_v33 = vmul.f32 0.5, %v5151_v44 }
 0xd24   : > { %v5185_v19 = vmul.f32 %v13762_v9, %v5174_v51 }
 0xd25   : > { %v5153_v2 = vsub.f32 1.5, %v5152_v33 }
 0xd26   : > { %v5196_v42 = vadd.f32 %v13765_v46, %v5185_v19 }
 0xd27   : > { %v5154_v3 = vmul.f32 %v9843_v13, %v5153_v2 }
 0xd28   : > { %8928 = vmatmul.msk.f32.gmra.mxu3 %vm3200_vm0, %v5196_v42 }
 0xd29   : > { %v5158_v7 = vsel %vm5157_vm7, %v9843_v13, %v5154_v3 }
 0xd2a   : > { %v5175_v21 = vmul.f32 %v5158_v7, %v13747_v57 }
 0xd2c   : > { %v5186_v18 = vmul.f32 %v13762_v9, %v5175_v21 }
 0xd2e   : > { %v5197_v31 = vadd.f32 %v13765_v46, %v5186_v18 }
 0xd30   : > { %8929 = vmatmul.msk.f32.gmra.mxu3 %vm3200_vm0, %v5197_v31 }
 0xd3b   : > { %v5072_v4 = vpop.xlane.xlu2 %5071 }
 0xd3c   : > { %v5080_v43 = vmul.f32 %v5072_v4, %v12891_v38 }
 0xd3e   : > { %v5088_v29 = vadd.f32 1e-05, %v5080_v43 }
 0xd40   : > { %9844 = vrsqrt.f32 %v5088_v29  ;;  %vm5165_vm9 = vweird.f32 %v5088_v29 }
 0xd46   : > { %v9845_v35 = vpop.eup %9844 }
 0xd47   : > { %v5160_v57 = vmul.f32 %v9845_v35, %v5088_v29  ;;  %vm5166_vm8 = vweird.f32 %v9845_v35 }
 0xd48   : > { %vm5167_vm10 = vmor %vm5165_vm9, %vm5166_vm8 }
 0xd49   : > { %v5161_v5 = vmul.f32 %v9845_v35, %v5160_v57 }
 0xd4b   : > { %v5162_v20 = vmul.f32 0.5, %v5161_v5 }
 0xd4d   : > { %v5163_v8 = vsub.f32 1.5, %v5162_v20 }
 0xd4f   : > { %v5164_v11 = vmul.f32 %v9845_v35, %v5163_v8 }
 0xd51   : > { %v5168_v10 = vsel %vm5167_vm10, %v9845_v35, %v5164_v11 }
 0xd52   : > { %v5176_v49 = vmul.f32 %v5168_v10, %v13756_v56 }
 0xd54   : > { %v5187_v16 = vmul.f32 %v13762_v9, %v5176_v49 }
 0xd56   : > { %v5198_v60 = vadd.f32 %v13765_v46, %v5187_v16 }
 0xd58   : > { %v5243_v30 = vpop.f32.mrf.mxu3  ;;  %8930 = vmatmul.msk.f32.gmra.mxu3 %vm3200_vm0, %v5198_v60 }
 0xd59   : > { %v5244_v28 = vadd.f32 %v13809_v62, %v5243_v30 }
 0xd5b   : > { %v5267_v41 = vmul.f32 %v5244_v28, %v5244_v28 }
 0xd5d   : > { %v5275_v14 = vmul.f32 %v5267_v41, %v5244_v28 }
 0xd5f   : > { %v5283_v6 = vmul.f32 0.044715, %v5275_v14 }
 0xd61   : > { %v5291_v52 = vadd.f32 %v5283_v6, %v5244_v28  ;;  %v5246_v22 = vpop.f32.mrf.mxu3 }
 0xd62   : > { %v5247_v47 = vadd.f32 %v13809_v62, %v5246_v22 }
 0xd63   : > { %v5299_v56 = vmul.f32 0.7978846, %v5291_v52 }
 0xd64   : > { %v5268_v40 = vmul.f32 %v5247_v47, %v5247_v47 }
 0xd65   : > { %9846 = vtanh.f32 %v5299_v56 }
 0xd66   : > { %v5276_v9 = vmul.f32 %v5268_v40, %v5247_v47 }
 0xd68   : > { %v5284_v61 = vmul.f32 0.044715, %v5276_v9 }
 0xd69   : > { %v5249_v0 = vpop.f32.mrf.mxu3 }
 0xd6a   : > { %v5292_v34 = vadd.f32 %v5284_v61, %v5247_v47  ;;  %v5250_v46 = vadd.f32 %v13809_v62, %v5249_v0 }
 0xd6b   : > { %v9847_v50 = vpop.eup %9846 }
 0xd6c   : > { %v5315_v26 = vadd.f32 1.0, %v9847_v50  ;;  %v5300_v55 = vmul.f32 0.7978846, %v5292_v34  ;;  %v5269_v13 = vmul.f32 %v5250_v46, %v5250_v46 }
 0xd6e   : > { %v5323_v15 = vmul.f32 0.5, %v5315_v26  ;;  %9848 = vtanh.f32 %v5300_v55  ;;  %v5277_v58 = vmul.f32 %v5269_v13, %v5250_v46 }
 0xd70   : > { %v5331_v63 = vmul.f32 %v5323_v15, %v5244_v28  ;;  %v5285_v44 = vmul.f32 0.044715, %v5277_v58 }
 0xd71   : > { %v5252_v51 = vpop.f32.mrf.mxu3 }
 0xd72   : > { %v5293_v33 = vadd.f32 %v5285_v44, %v5250_v46  ;;  %v5253_v19 = vadd.f32 %v13809_v62, %v5252_v51  ;;  %8931 = vmatmul.msk.f32.vlgmr.msrb.gmra.mxu2 %vm3645_vm12, %v5331_v63 }
 0xd74   : > { %v9849_v2 = vpop.eup %9848  ;;  %v5301_v42 = vmul.f32 0.7978846, %v5293_v33  ;;  %v5270_v3 = vmul.f32 %v5253_v19, %v5253_v19 }
 0xd75   : > { %v5316_v7 = vadd.f32 1.0, %v9849_v2 }
 0xd76   : > { %9850 = vtanh.f32 %v5301_v42  ;;  %v5278_v21 = vmul.f32 %v5270_v3, %v5253_v19 }
 0xd77   : > { %v5324_v18 = vmul.f32 0.5, %v5316_v7 }
 0xd78   : > { %v5286_v31 = vmul.f32 0.044715, %v5278_v21 }
 0xd79   : > { %v5255_v4 = vpop.f32.mrf.mxu3  ;;  %v5332_v43 = vmul.f32 %v5324_v18, %v5247_v47 }
 0xd7a   : > { %v5294_v29 = vadd.f32 %v5286_v31, %v5253_v19  ;;  %v5256_v59 = vadd.f32 %v13809_v62, %v5255_v4 }
 0xd7b   : > { %8932 = vmatmul.msk.f32.gmra.mxu2 %vm3645_vm12, %v5332_v43 }
 0xd7c   : > { %v9851_v53 = vpop.eup %9850  ;;  %v5302_v35 = vmul.f32 0.7978846, %v5294_v29  ;;  %v5271_v57 = vmul.f32 %v5256_v59, %v5256_v59 }
 0xd7d   : > { %v5317_v39 = vadd.f32 1.0, %v9851_v53 }
 0xd7e   : > { %9852 = vtanh.f32 %v5302_v35  ;;  %v5279_v5 = vmul.f32 %v5271_v57, %v5256_v59 }
 0xd7f   : > { %v5325_v48 = vmul.f32 0.5, %v5317_v39 }
 0xd80   : > { %v5287_v20 = vmul.f32 0.044715, %v5279_v5 }
 0xd81   : > { %v5333_v17 = vmul.f32 %v5325_v48, %v5250_v46 }
 0xd82   : > { %v5295_v8 = vadd.f32 %v5287_v20, %v5256_v59 }
 0xd83   : > { %8933 = vmatmul.msk.f32.gmra.mxu2 %vm3645_vm12, %v5333_v17 }
 0xd84   : > { %v9853_v27 = vpop.eup %9852  ;;  %v5303_v11 = vmul.f32 0.7978846, %v5295_v8 }
 0xd85   : > { %v5318_v54 = vadd.f32 1.0, %v9853_v27 }
 0xd86   : > { %9854 = vtanh.f32 %v5303_v11 }
 0xd87   : > { %v5326_v10 = vmul.f32 0.5, %v5318_v54 }
 0xd89   : > { %v5334_v37 = vmul.f32 %v5326_v10, %v5253_v19 }
 0xd8b   : > { %8934 = vmatmul.msk.f32.gmra.mxu2 %vm3645_vm12, %v5334_v37 }
 0xd8c   : > { %v9855_v49 = vpop.eup %9854 }
 0xd8d   : > { %v5319_v16 = vadd.f32 1.0, %v9855_v49 }
 0xd8f   : > { %v5327_v60 = vmul.f32 0.5, %v5319_v16 }
 0xd91   : > { %v5335_v30 = vmul.f32 %v5327_v60, %v5256_v59 }
 0xd93   : > { %8935 = vmatmul.msk.f32.gmra.mxu2 %vm3645_vm12, %v5335_v30  ;;  %v2819_v30 = vld [vmem:[%s14787_s4 + $0x20] sm:$0xff] }
 0xdab   : > { %v5258_v28 = vpop.f32.mrf.mxu3 }
 0xdac   : > { %v5259_v41 = vadd.f32 %v13809_v62, %v5258_v28  ;;  %v2818_v28 = vld [vmem:[%s14787_s4 + $0x18] sm:$0xff] }
 0xdae   : > { %v5272_v14 = vmul.f32 %v5259_v41, %v5259_v41 }
 0xdb0   : > { %v5280_v6 = vmul.f32 %v5272_v14, %v5259_v41  ;;  %v2822_v14 = vld [vmem:[%s14787_s4 + $0x38] sm:$0xff] }
 0xdb2   : > { %v5288_v52 = vmul.f32 0.044715, %v5280_v6 }
 0xdb3   : > { %v5261_v22 = vpop.f32.mrf.mxu3 }
 0xdb4   : > { %v5296_v47 = vadd.f32 %v5288_v52, %v5259_v41  ;;  %v5262_v56 = vadd.f32 %v13809_v62, %v5261_v22 }
 0xdb6   : > { %v5304_v40 = vmul.f32 0.7978846, %v5296_v47  ;;  %v5273_v9 = vmul.f32 %v5262_v56, %v5262_v56 }
 0xdb8   : > { %9856 = vtanh.f32 %v5304_v40  ;;  %v5281_v61 = vmul.f32 %v5273_v9, %v5262_v56 }
 0xdba   : > { %v5289_v0 = vmul.f32 0.044715, %v5281_v61 }
 0xdbc   : > { %v5297_v34 = vadd.f32 %v5289_v0, %v5262_v56 }
 0xdbe   : > { %v9857_v46 = vpop.eup %9856  ;;  %v5305_v50 = vmul.f32 0.7978846, %v5297_v34 }
 0xdbf   : > { %v5320_v26 = vadd.f32 1.0, %v9857_v46 }
 0xdc0   : > { %9858 = vtanh.f32 %v5305_v50 }
 0xdc1   : > { %v5328_v55 = vmul.f32 0.5, %v5320_v26 }
 0xdc3   : > { %v5336_v13 = vmul.f32 %v5328_v55, %v5259_v41  ;;  %v2821_v41 = vld [vmem:[%s14787_s4 + $0x30] sm:$0xff] }
 0xdc5   : > { %8936 = vmatmul.msk.f32.gmra.mxu2 %vm3645_vm12, %v5336_v13 }
 0xdc6   : > { %v9859_v15 = vpop.eup %9858 }
 0xdc7   : > { %v5321_v58 = vadd.f32 1.0, %v9859_v15 }
 0xdc9   : > { %v5329_v63 = vmul.f32 0.5, %v5321_v58 }
 0xdcb   : > { %v5337_v44 = vmul.f32 %v5329_v63, %v5262_v56 }
 0xdcd   : > { %8937 = vmatmul.msk.f32.gmra.mxu2 %vm3645_vm12, %v5337_v44 }
 0xddb   : > { %v5264_v51 = vpop.f32.mrf.mxu3 }
 0xddc   : > { %v5265_v33 = vadd.f32 %v13809_v62, %v5264_v51  ;;  %v9651_v62 = vld [vmem:[#allocation11] ss:$0 sm:$0xff] }
 0xdde   : > { %v5274_v19 = vmul.f32 %v5265_v33, %v5265_v33 }
 0xde0   : > { %v5282_v2 = vmul.f32 %v5274_v19, %v5265_v33 }
 0xde2   : > { %v5290_v42 = vmul.f32 0.044715, %v5282_v2 }
 0xde4   : > { %v5298_v3 = vadd.f32 %v5290_v42, %v5265_v33 }
 0xde6   : > { %v5306_v7 = vmul.f32 0.7978846, %v5298_v3 }
 0xde8   : > { %9860 = vtanh.f32 %v5306_v7 }
 0xdee   : > { %v9861_v21 = vpop.eup %9860 }
 0xdef   : > { %v5322_v18 = vadd.f32 1.0, %v9861_v21 }
 0xdf1   : > { %v5330_v31 = vmul.f32 0.5, %v5322_v18 }
 0xdf3   : > { %v5338_v4 = vmul.f32 %v5330_v31, %v5265_v33 }
 0xdf5   : > { %8938 = vmatmul.msk.f32.gmra.mxu2 %vm3645_vm12, %v5338_v4  ;;  %v5383_v43 = vpop.f32.mrf.mxu2 }
 0xdfe   : > { %v5386_v29 = vpop.f32.mrf.mxu2 }
 0xdff   : > { %v5387_v16 = vadd.f32 %v9651_v62, %v5386_v29 }
 0xe06   : > { %v5389_v59 = vpop.f32.mrf.mxu2 }
 0xe07   : > { %v5390_v37 = vadd.f32 %v9651_v62, %v5389_v59 }
 0xe0e   : > { %v5392_v53 = vpop.f32.mrf.mxu2 }
 0xe0f   : > { %v5393_v54 = vadd.f32 %v9651_v62, %v5392_v53 }
 0xe16   : > { %v5395_v35 = vpop.f32.mrf.mxu2 }
 0xe17   : > { %v5396_v27 = vadd.f32 %v9651_v62, %v5395_v35  ;;  %v2826_v35 = vld [vmem:[%s14788_s9 + $0x18] sm:$0xff] }
 0xe18   : > { %5679 = vmatpush.msra.mxu2 %v2826_v35 }
 0xe19   : > { %v5411_v49 = vadd.f32 %v5396_v27, %v13677_v45  ;;  %v5408_v45 = vadd.f32 %v5387_v16, %v13657_v12  ;;  %v2820_v12 = vld [vmem:[%s14787_s4 + $0x28] sm:$0xff]  ;;  %v2827_v27 = vld [vmem:[%s14788_s9 + $0x20] sm:$0xff] }
 0xe48   : > { %v5398_v57 = vpop.f32.mrf.mxu2 }
 0xe49   : > { %v5399_v17 = vadd.f32 %v9651_v62, %v5398_v57  ;;  %v2824_v57 = vld [vmem:[%s14788_s9 + $0x8] sm:$0xff] }
 0xe4b   : > { %v5412_v10 = vadd.f32 %v5399_v17, %v13685_v24  ;;  %v5409_v24 = vadd.f32 %v5390_v37, %v13664_v32  ;;  %v2817_v32 = vld [vmem:[%s14787_s4 + $0x10] sm:$0xff]  ;;  %v2823_v17 = vld [vmem:[%s14788_s9] sm:$0xff] }
 0xe50   : > { %v5401_v39 = vpop.f32.mrf.mxu2 }
 0xe51   : > { %v5402_v48 = vadd.f32 %v9651_v62, %v5401_v39  ;;  %v2828_v39 = vld [vmem:[%s14788_s9 + $0x28] sm:$0xff] }
 0xe53   : > { %v5413_v11 = vadd.f32 %v5402_v48, %v13691_v23  ;;  %v5384_v23 = vadd.f32 %v9651_v62, %v5383_v43 }
 0xe55   : > { %v5407_v60 = vadd.f32 %v5384_v23, %v13649_v25  ;;  %v2816_v25 = vld [vmem:[%s14787_s4 + $0x8] sm:$0xff] }
 0xe78   : > { %v5404_v5 = vpop.f32.mrf.mxu2 }
 0xe79   : > { %v5405_v20 = vadd.f32 %v9651_v62, %v5404_v5  ;;  %v2830_v5 = vld [vmem:[%s14788_s9 + $0x38] sm:$0xff] }
 0xe7b   : > { %v5414_v8 = vadd.f32 %v5405_v20, %v13707_v36  ;;  %v5410_v36 = vadd.f32 %v5393_v54, %v13671_v1  ;;  %v2815_v1 = vld [vmem:[%s14787_s4] sm:$0xff] }
 0xe7d   : > { %5429 = vmatpush.msra.mxu0 %v5414_v8  ;;  %5458 = vmatpush.msrb.mxu1 %v5414_v8 }
 0xe7e   : > { %5487 = vmatpush.msra.mxu3 %v5414_v8 }
 0xe7f   : > { %5430 = vmatpush.msra.mxu0 %v5413_v11  ;;  %5459 = vmatpush.msrb.mxu1 %v5413_v11 }
 0xe80   : > { %5488 = vmatpush.msra.mxu3 %v5413_v11 }
 0xe81   : > { %5431 = vmatpush.msra.mxu0 %v5412_v10  ;;  %5460 = vmatpush.msrb.mxu1 %v5412_v10 }
 0xe82   : > { %5489 = vmatpush.msra.mxu3 %v5412_v10 }
 0xe83   : > { %5432 = vmatpush.msra.mxu0 %v5411_v49  ;;  %5461 = vmatpush.msrb.mxu1 %v5411_v49 }
 0xe84   : > { %5490 = vmatpush.msra.mxu3 %v5411_v49 }
 0xe85   : > { %5433 = vmatpush.msra.mxu0 %v5410_v36  ;;  %5462 = vmatpush.msrb.mxu1 %v5410_v36 }
 0xe86   : > { %5491 = vmatpush.msra.mxu3 %v5410_v36 }
 0xe87   : > { %5434 = vmatpush.msra.mxu0 %v5409_v24  ;;  %5463 = vmatpush.msrb.mxu1 %v5409_v24 }
 0xe88   : > { %5492 = vmatpush.msra.mxu3 %v5409_v24 }
 0xe89   : > { %5435 = vmatpush.msra.mxu0 %v5408_v45  ;;  %5464 = vmatpush.msrb.mxu1 %v5408_v45 }
 0xe8a   : > { %5493 = vmatpush.msra.mxu3 %v5408_v45 }
 0xe8b   : > { %5436 = vmatpush.msra.mxu0 %v5407_v60  ;;  %5465 = vmatpush.msrb.mxu1 %v5407_v60 }
 0xe8c   : > { %5494 = vmatpush.msra.mxu3 %v5407_v60  ;;  %8939 = vmatmul.msk.f32.vlgmr.msra.gmra.mxu0 %vm3645_vm12, %v2815_v1 }
 0xe8d   : > { %5516 = vmatpush.msrb.mxu0 %v5414_v8  ;;  %8943 = vmatmul.msk.f32.vlgmr.msra.gmra.mxu3 %vm3645_vm12, %v2819_v30  ;;  %v2825_v8 = vld [vmem:[%s14788_s9 + $0x10] sm:$0xff] }
 0xe8e   : > { %8941 = vmatmul.msk.f32.vlgmr.msrb.gmra.mxu1 %vm3645_vm12, %v2817_v32  ;;  %5724 = vmatpush.msrb.mxu3 %v2828_v39 }
 0xe8f   : > { %5517 = vmatpush.msrb.mxu0 %v5413_v11  ;;  %5631 = vmatpush.msra.mxu1 %v2824_v57  ;;  %v2829_v11 = vld [vmem:[%s14788_s9 + $0x30] sm:$0xff] }
 0xe90   : > { %5680 = vmatpush.msra.mxu2 %v2825_v8  ;;  %5725 = vmatpush.msrb.mxu3 %v2827_v27 }
 0xe91   : > { %5518 = vmatpush.msrb.mxu0 %v5412_v10  ;;  %5632 = vmatpush.msra.mxu1 %v2823_v17 }
 0xe93   : > { %5519 = vmatpush.msrb.mxu0 %v5411_v49 }
 0xe94   : > { %8940 = vmatmul.msk.f32.gmra.mxu0 %vm3645_vm12, %v2816_v25 }
 0xe95   : > { %5520 = vmatpush.msrb.mxu0 %v5410_v36  ;;  %8944 = vmatmul.msk.f32.gmra.mxu3 %vm3645_vm12, %v2820_v12 }
 0xe96   : > { %8942 = vmatmul.msk.f32.gmra.mxu1 %vm3645_vm12, %v2818_v28 }
 0xe97   : > { %5521 = vmatpush.msrb.mxu0 %v5409_v24 }
 0xe99   : > { %5522 = vmatpush.msrb.mxu0 %v5408_v45 }
 0xe9b   : > { %5523 = vmatpush.msrb.mxu0 %v5407_v60 }
 0xe9c   : > { %8945 = vmatmul.msk.f32.vlgmr.msrb.gmra.mxu0 %vm3645_vm12, %v2821_v41 }
 0xe9d   : > { %5769 = vmatpush.msra.mxu0 %v2830_v5 }
 0xe9f   : > { %5770 = vmatpush.msra.mxu0 %v2829_v11 }
 0xea4   : > { %8946 = vmatmul.msk.f32.gmra.mxu0 %vm3645_vm12, %v2822_v14 }
 0xf09   : > { %v13853_v6 = vpop.f32.mrf.mxu0 }
 0xf0a   : > { %v5547_v56 = vmul.f32 %v13853_v6, %v13853_v6 }
 0xf0b   : > { %v13855_v52 = vpop.f32.mrf.mxu1 }
 0xf0c   : > { %v5549_v40 = vmul.f32 %v13855_v52, %v13855_v52  ;;  %v5531_v9 = vadd.f32 %v13855_v52, %v13853_v6 }
 0xf0e   : > { %v5551_v0 = vadd.f32 %v5549_v40, %v5547_v56 }
 0xf10   : > { %v13859_v47 = vpop.f32.mrf.mxu3 }
 0xf11   : > { %v13857_v22 = vpop.f32.mrf.mxu0  ;;  %v5553_v61 = vmul.f32 %v13859_v47, %v13859_v47  ;;  %v5533_v34 = vadd.f32 %v5531_v9, %v13859_v47 }
 0xf12   : > { %v5548_v58 = vmul.f32 %v13857_v22, %v13857_v22 }
 0xf13   : > { %v13872_v50 = vpop.f32.mrf.mxu1  ;;  %v5555_v26 = vadd.f32 %v5553_v61, %v5551_v0  ;;  %v9652_v61 = vld [vmem:[#allocation28] ss:$0 sm:$0xff] }
 0xf14   : > { %v5550_v63 = vmul.f32 %v13872_v50, %v13872_v50  ;;  %v5532_v33 = vadd.f32 %v13872_v50, %v13857_v22 }
 0xf16   : > { %v5552_v42 = vadd.f32 %v5550_v63, %v5548_v58  ;;  %v9655_v58 = vld [vmem:[#allocation28 + $0x3] ss:$0 sm:$0xff] }
 0xf18   : > { %v13877_v15 = vpop.f32.mrf.mxu3 }
 0xf19   : > { %v13870_v46 = vpop.f32.mrf.mxu0  ;;  %v5554_v19 = vmul.f32 %v13877_v15, %v13877_v15  ;;  %v5534_v3 = vadd.f32 %v5532_v33, %v13877_v15 }
 0xf1a   : > { %v5535_v55 = vadd.f32 %v5533_v34, %v13870_v46  ;;  %v5557_v13 = vmul.f32 %v13870_v46, %v13870_v46 }
 0xf1b   : > { %v5556_v21 = vadd.f32 %v5554_v19, %v5552_v42  ;;  %v9657_v42 = vld [vmem:[#allocation26 + $0x1] ss:$0 sm:$0xff] }
 0xf1c   : > { %v5537_v44 = vsel %vm3200_vm0, %v5535_v55, 0.0  ;;  %v5559_v51 = vadd.f32 %v5557_v13, %v5555_v26  ;;  %v9654_v13 = vld [vmem:[#allocation28 + $0x2] ss:$0 sm:$0xff] }
 0xf1d   : > { %5538 = vadd.xlane.f32.xlu1 %v5537_v44 }
 0xf1e   : > { %v5561_v2 = vsel %vm3200_vm0, %v5559_v51, 0.0  ;;  %v9656_v51 = vld [vmem:[#allocation26] ss:$0 sm:$0xff] }
 0xf1f   : > { %5562 = vadd.xlane.f32.xlu0 %v5561_v2 }
 0xf21   : > { %v13890_v7 = vpop.f32.mrf.mxu0 }
 0xf22   : > { %v5536_v18 = vadd.f32 %v5534_v3, %v13890_v7  ;;  %v5558_v31 = vmul.f32 %v13890_v7, %v13890_v7  ;;  %v9658_v3 = vld [vmem:[#allocation26 + $0x2] ss:$0 sm:$0xff] }
 0xf24   : > { %v5540_v4 = vsel %vm3200_vm0, %v5536_v18, 0.0  ;;  %v5560_v43 = vadd.f32 %v5558_v31, %v5556_v21  ;;  %v9659_v21 = vld [vmem:[#allocation26 + $0x3] ss:$0 sm:$0xff] }
 0xf25   : > { %5541 = vadd.xlane.f32.xlu2 %v5540_v4 }
 0xf26   : > { %v5564_v29 = vsel %vm3200_vm0, %v5560_v43, 0.0 }
 0xf27   : > { %5565 = vadd.xlane.f32.xlu1 %v5564_v29 }
 0xf90   : > { %v5539_v59 = vpop.xlane.xlu1 %5538 }
 0xf91   : > { %v5543_v53 = vmul.f32 %v5539_v59, %v12891_v38 }
 0xf92   : > { %v5563_v62 = vpop.xlane.xlu0 %5562 }
 0xf93   : > { %v5545_v48 = vmul.f32 0.25, %v5543_v53  ;;  %v5567_v20 = vmul.f32 %v5563_v62, %v12891_v38 }
 0xf95   : > { %v5569_v54 = vmul.f32 0.25, %v5567_v20  ;;  %v5571_v10 = vmul.f32 %v5545_v48, %v5545_v48  ;;  %v5597_v9 = vsub.f32 %v13853_v6, %v5545_v48  ;;  %v5645_v34 = vsub.f32 %v13855_v52, %v5545_v48 }
 0xf96   : > { %v5690_v26 = vsub.f32 %v13859_v47, %v5545_v48  ;;  %v5735_v55 = vsub.f32 %v13870_v46, %v5545_v48 }
 0xf97   : > { %v5573_v37 = vsub.f32 %v5569_v54, %v5571_v10 }
 0xf98   : > { %v5542_v49 = vpop.xlane.xlu2 %5541 }
 0xf99   : > { %v5544_v16 = vmul.f32 %v5542_v49, %v12891_v38  ;;  %v5575_v36 = vadd.f32 1e-05, %v5573_v37 }
 0xf9a   : > { %v5566_v23 = vpop.xlane.xlu1 %5565 }
 0xf9b   : > { %v13908_v24 = vmul.f32 0.25, %v5544_v16  ;;  %v5568_v45 = vmul.f32 %v5566_v23, %v12891_v38  ;;  %9862 = vrsqrt.f32 %v5575_v36  ;;  %v9653_v38 = vld [vmem:[#allocation28 + $0x1] ss:$0 sm:$0xff]  ;;  %vm5583_vm15 = vweird.f32 %v5575_v36  ;;  %v9660_v16 = vld [vmem:[#allocation25] ss:$0 sm:$0xff] }
 0xf9d   : > { %v5570_v60 = vmul.f32 0.25, %v5568_v45  ;;  %v5572_v1 = vmul.f32 %v13908_v24, %v13908_v24  ;;  %v5598_v57 = vsub.f32 %v13857_v22, %v13908_v24  ;;  %v5646_v39 = vsub.f32 %v13872_v50, %v13908_v24 }
 0xf9e   : > { %v5691_v62 = vsub.f32 %v13877_v15, %v13908_v24  ;;  %v5736_v5 = vsub.f32 %v13890_v7, %v13908_v24 }
 0xf9f   : > { %v5574_v30 = vsub.f32 %v5570_v60, %v5572_v1 }
 0xfa1   : > { %v5576_v32 = vadd.f32 1e-05, %v5574_v30  ;;  %v9863_v25 = vpop.eup %9862 }
 0xfa2   : > { %v5578_v12 = vmul.f32 %v9863_v25, %v5575_v36  ;;  %vm5584_vm14 = vweird.f32 %v9863_v25 }
 0xfa3   : > { %9864 = vrsqrt.f32 %v5576_v32  ;;  %vm5585_vm1 = vmor %vm5583_vm15, %vm5584_vm14  ;;  %vm5593_vm3 = vweird.f32 %v5576_v32 }
 0xfa4   : > { %v5579_v28 = vmul.f32 %v9863_v25, %v5578_v12 }
 0xfa6   : > { %v5580_v41 = vmul.f32 0.5, %v5579_v28 }
 0xfa8   : > { %v5581_v56 = vsub.f32 1.5, %v5580_v41 }
 0xfa9   : > { %v9865_v14 = vpop.eup %9864 }
 0xfaa   : > { %v5588_v40 = vmul.f32 %v9865_v14, %v5576_v32  ;;  %v5582_v0 = vmul.f32 %v9863_v25, %v5581_v56  ;;  %vm5594_vm2 = vweird.f32 %v9865_v14 }
 0xfab   : > { %vm5595_vm4 = vmor %vm5593_vm3, %vm5594_vm2 }
 0xfac   : > { %v5589_v63 = vmul.f32 %v9865_v14, %v5588_v40  ;;  %v5586_v44 = vsel %vm5585_vm1, %v9863_v25, %v5582_v0  ;;  %vm5880_vm1 = vcmask 64512  }
 0xfad   : > { %v5599_v33 = vmul.f32 %v5597_v9, %v5586_v44  ;;  %v5647_v19 = vmul.f32 %v5645_v34, %v5586_v44  ;;  %v5692_v2 = vmul.f32 %v5690_v26, %v5586_v44  ;;  %v5737_v6 = vmul.f32 %v5735_v55, %v5586_v44 }
 0xfae   : > { %v5590_v18 = vmul.f32 0.5, %v5589_v63 }
 0xfaf   : > { %v5604_v31 = vmul.f32 %v9652_v61, %v5599_v33  ;;  %v5652_v52 = vmul.f32 %v9653_v38, %v5647_v19  ;;  %v5697_v4 = vmul.f32 %v9654_v13, %v5692_v2  ;;  %v5742_v47 = vmul.f32 %v9655_v58, %v5737_v6 }
 0xfb0   : > { %v5591_v43 = vsub.f32 1.5, %v5590_v18  ;;  %v2866_v18 = vld [vmem:[#allocation41 + $0x18] sm:$0xff] }
 0xfb1   : > { %v5609_v46 = vadd.f32 %v9656_v51, %v5604_v31  ;;  %v5657_v29 = vadd.f32 %v9657_v42, %v5652_v52  ;;  %v5702_v59 = vadd.f32 %v9658_v3, %v5697_v4  ;;  %v5747_v53 = vadd.f32 %v9659_v21, %v5742_v47  ;;  %5863 = vmatpush.msrb.mxu1 %v2866_v18  ;;  %v2865_v31 = vld [vmem:[#allocation41 + $0x10] sm:$0xff]  ;;  %v2864_v52 = vld [vmem:[#allocation41 + $0x8] sm:$0xff]  ;;  %v2863_v4 = vld [vmem:[#allocation41] sm:$0xff] }
 0xfb2   : > { %v5592_v35 = vmul.f32 %v9865_v14, %v5591_v43 }
 0xfb3   : > { %8947 = vmatmul.msk.f32.vlgmr.msra.gmra.mxu1 %vm3200_vm0, %v5609_v46  ;;  %8949 = vmatmul.msk.f32.vlgmr.msra.gmra.mxu2 %vm3200_vm0, %v5657_v29 }
 0xfb4   : > { %v5596_v48 = vsel %vm5595_vm4, %v9865_v14, %v5592_v35  ;;  %8951 = vmatmul.msk.f32.vlgmr.msrb.gmra.mxu3 %vm3200_vm0, %v5702_v59  ;;  %8953 = vmatmul.msk.f32.vlgmr.msra.gmra.mxu0 %vm3200_vm0, %v5747_v53 }
 0xfb5   : > { %v5600_v22 = vmul.f32 %v5598_v57, %v5596_v48  ;;  %v5648_v20 = vmul.f32 %v5646_v39, %v5596_v48  ;;  %v5693_v17 = vmul.f32 %v5691_v62, %v5596_v48  ;;  %v5738_v8 = vmul.f32 %v5736_v5, %v5596_v48  ;;  %5864 = vmatpush.msrb.mxu1 %v2865_v31 }
 0xfb7   : > { %v5605_v27 = vmul.f32 %v9652_v61, %v5600_v22  ;;  %v5653_v11 = vmul.f32 %v9653_v38, %v5648_v20  ;;  %v5698_v54 = vmul.f32 %v9654_v13, %v5693_v17  ;;  %v5743_v10 = vmul.f32 %v9655_v58, %v5738_v8  ;;  %5865 = vmatpush.msrb.mxu1 %v2864_v52  ;;  %v9661_v17 = vld [vmem:[#allocation34] ss:$0 sm:$0xff] }
 0xfb8   : > { %v11724_v38 = vmov 32.0  }
 0xfb9   : > { %v5610_v50 = vadd.f32 %v9656_v51, %v5605_v27  ;;  %v5658_v37 = vadd.f32 %v9657_v42, %v5653_v11  ;;  %v5703_v49 = vadd.f32 %v9658_v3, %v5698_v54  ;;  %v5748_v15 = vadd.f32 %v9659_v21, %v5743_v10  ;;  %5866 = vmatpush.msrb.mxu1 %v2863_v4  ;;  %v9662_v11 = vld [vmem:[#allocation32] ss:$0 sm:$0xff] }
 0xfba   : > { %9866 = vrcp.f32 %v11724_v38 }
 0xfbb   : > { %8948 = vmatmul.msk.f32.gmra.mxu1 %vm3200_vm0, %v5610_v50  ;;  %8950 = vmatmul.msk.f32.gmra.mxu2 %vm3200_vm0, %v5658_v37 }
 0xfbc   : > { %8952 = vmatmul.msk.f32.gmra.mxu3 %vm3200_vm0, %v5703_v49  ;;  %8954 = vmatmul.msk.f32.gmra.mxu0 %vm3200_vm0, %v5748_v15 }
 0xfc0   : > { %v9867_v0 = vpop.eup %9866 }
 0xfc1   : > { %v5788_v34 = vmul.f32 32.0, %v9867_v0  ;;  %vm5792_vm6 = vweird.f32 %v9867_v0 }
 0xfc3   : > { %v5789_v26 = vsub.f32 1.0, %v5788_v34 }
 0xfc5   : > { %v5790_v55 = vmul.f32 %v9867_v0, %v5789_v26 }
 0xfc7   : > { %v5791_v13 = vadd.f32 %v9867_v0, %v5790_v55 }
 0xfc9   : > { %v13941_v58 = vsel %vm5792_vm6, %v9867_v0, %v5791_v13 }
0x1030   : > { %v5634_v7 = vpop.f32.mrf.mxu1 }
0x1031   : > { %v5643_v36 = vadd.f32 %v9660_v16, %v5634_v7  ;;  %v5772_v60 = vpop.f32.mrf.mxu0 }
0x1036   : > { %v5682_v23 = vpop.f32.mrf.mxu2 }
0x1037   : > { %v5688_v24 = vadd.f32 %v5682_v23, %v5643_v36  ;;  %v5727_v45 = vpop.f32.mrf.mxu3 }
0x1038   : > { %v5637_v30 = vpop.f32.mrf.mxu1 }
0x1039   : > { %v5733_v1 = vadd.f32 %v5727_v45, %v5688_v24  ;;  %v5644_v25 = vadd.f32 %v9660_v16, %v5637_v30  ;;  %v5775_v40 = vpop.f32.mrf.mxu0  ;;  %v9663_v24 = vld [vmem:[#allocation40] ss:$0 sm:$0xff] }
0x103b   : > { %v13933_v32 = vadd.f32 %v5772_v60, %v5733_v1 }
0x103d   : > { %v5781_v12 = vsel %vm5780_vm5, %v13933_v32, 0.0 }
0x103e   : > { %5782 = vadd.xlane.f32.xlu0 %v5781_v12  ;;  %v5685_v28 = vpop.f32.mrf.mxu2 }
0x103f   : > { %v5689_v41 = vadd.f32 %v5685_v28, %v5644_v25  ;;  %v5730_v14 = vpop.f32.mrf.mxu3 }
0x1041   : > { %v5734_v56 = vadd.f32 %v5730_v14, %v5689_v41 }
0x1043   : > { %v13937_v9 = vadd.f32 %v5775_v40, %v5734_v56 }
0x1045   : > { %v5784_v61 = vsel %vm5780_vm5, %v13937_v9, 0.0 }
0x1046   : > { %5785 = vadd.xlane.f32.xlu2 %v5784_v61 }
0x10b1   : > { %v5783_v63 = vpop.xlane.xlu0 %5782 }
0x10b2   : > { %v5794_v44 = vmul.f32 %v13941_v58, %v5783_v63 }
0x10b4   : > { %v5796_v51 = vsub.f32 %v13933_v32, %v5794_v44 }
0x10b6   : > { %v5798_v33 = vmul.f32 %v5796_v51, %v5796_v51 }
0x10b8   : > { %v5800_v19 = vsel %vm5780_vm5, %v5798_v33, 0.0 }
0x10b9   : > { %5801 = vadd.xlane.f32.xlu1 %v5800_v19  ;;  %v5786_v2 = vpop.xlane.xlu2 %5785 }
0x10ba   : > { %v5795_v6 = vmul.f32 %v13941_v58, %v5786_v2 }
0x10bc   : > { %v5797_v42 = vsub.f32 %v13937_v9, %v5795_v6 }
0x10be   : > { %v5799_v3 = vmul.f32 %v5797_v42, %v5797_v42 }
0x10c0   : > { %v5803_v21 = vsel %vm5780_vm5, %v5799_v3, 0.0 }
0x10c1   : > { %5804 = vadd.xlane.f32.xlu0 %v5803_v21  ;;  %v2858_v21 = vld [vmem:[%s14789_s2] sm:$0xff] }
0x112c   : > { %v5802_v47 = vpop.xlane.xlu1 %5801 }
0x112d   : > { %v5806_v43 = vmul.f32 %v5802_v47, %v13941_v58 }
0x112f   : > { %v5808_v46 = vadd.f32 1e-05, %v5806_v43 }
0x1131   : > { %9868 = vrsqrt.f32 %v5808_v46  ;;  %vm5816_vm8 = vweird.f32 %v5808_v46 }
0x1134   : > { %v5805_v29 = vpop.xlane.xlu0 %5804 }
0x1135   : > { %v5807_v59 = vmul.f32 %v5805_v29, %v13941_v58 }
0x1137   : > { %v9869_v53 = vpop.eup %9868  ;;  %v5809_v35 = vadd.f32 1e-05, %v5807_v59 }
0x1138   : > { %v5811_v57 = vmul.f32 %v9869_v53, %v5808_v46  ;;  %vm5817_vm7 = vweird.f32 %v9869_v53 }
0x1139   : > { %9870 = vrsqrt.f32 %v5809_v35  ;;  %vm5818_vm9 = vmor %vm5816_vm8, %vm5817_vm7  ;;  %vm5826_vm14 = vweird.f32 %v5809_v35 }
0x113a   : > { %v5812_v39 = vmul.f32 %v9869_v53, %v5811_v57 }
0x113c   : > { %v5813_v62 = vmul.f32 0.5, %v5812_v39 }
0x113e   : > { %v5814_v5 = vsub.f32 1.5, %v5813_v62 }
0x113f   : > { %v9871_v48 = vpop.eup %9870 }
0x1140   : > { %v5815_v22 = vmul.f32 %v9869_v53, %v5814_v5  ;;  %v5821_v20 = vmul.f32 %v9871_v48, %v5809_v35  ;;  %vm5827_vm10 = vweird.f32 %v9871_v48 }
0x1141   : > { %vm5828_vm15 = vmor %vm5826_vm14, %vm5827_vm10 }
0x1142   : > { %v5819_v8 = vsel %vm5818_vm9, %v9869_v53, %v5815_v22  ;;  %v5822_v27 = vmul.f32 %v9871_v48, %v5821_v20  ;;  %vm6619_vm9 = vcmask 257024  }
0x1143   : > { %v5830_v54 = vmul.f32 %v5819_v8, %v5796_v51 }
0x1144   : > { %v5823_v10 = vmul.f32 0.5, %v5822_v27 }
0x1145   : > { %v5835_v50 = vmul.f32 %v9661_v17, %v5830_v54 }
0x1146   : > { %v5824_v37 = vsub.f32 1.5, %v5823_v10 }
0x1147   : > { %v5840_v49 = vadd.f32 %v9662_v11, %v5835_v50 }
0x1148   : > { %v5825_v15 = vmul.f32 %v9871_v48, %v5824_v37 }
0x1149   : > { %8955 = vmatmul.msk.f32.vlgmr.msrb.gmra.mxu1 %vm5780_vm5, %v5840_v49 }
0x114a   : > { %v5829_v7 = vsel %vm5828_vm15, %v9871_v48, %v5825_v15 }
0x114b   : > { %v5831_v16 = vmul.f32 %v5829_v7, %v5797_v42 }
0x114d   : > { %v5836_v36 = vmul.f32 %v9661_v17, %v5831_v16 }
0x114f   : > { %v5841_v23 = vadd.f32 %v9662_v11, %v5836_v36 }
0x1151   : > { %8956 = vmatmul.msk.f32.gmra.mxu1 %vm5780_vm5, %v5841_v23 }
0x11c6   : > { %v5868_v45 = vpop.f32.mrf.mxu1 }
0x11c7   : > { %v5869_v60 = vadd.f32 %v9663_v24, %v5868_v45 }
0x11c9   : > { %5876 = vrot.lane.b32.xlu1 %v5869_v60, %s14645_s16 }
0x11ce   : > { %v5871_v1 = vpop.f32.mrf.mxu1 }
0x11cf   : > { %v5872_v30 = vadd.f32 %v9663_v24, %v5871_v1 }
0x11d1   : > { %5878 = vrot.lane.b32.xlu2 %v5872_v30, %s14645_s16  ;;  %v13955_v25 = vpack.i.bf16 %v5869_v60, %v5872_v30 }
0x11d9   : > { %9624 = vrot.lane.b32.xlu2 %v13955_v25, %s14646_s11 }
0x11e1   : > { %5975 = vrot.lane.b32.xlu2 %v5869_v60, %s11722_s1 }
0x11e9   : > { %5971 = vrot.lane.b32.xlu2 %v5869_v60, %s11719_s10 }
0x11f1   : > { %5973 = vrot.lane.b32.xlu2 %v5872_v30, %s11719_s10  ;;  %s14790_s10 = smov %s14789_s2  ;;  %s14793_s2 = sld [smem:[#allocation143_spill]] }
0x11f9   : > { %6262 = vrot.lane.b32.xlu2 %v5872_v30, %s11726_s8 }
0x1201   : > { %6260 = vrot.lane.b32.xlu2 %v5869_v60, %s11726_s8  ;;  %s14792_s8 = sld [smem:[#allocation131_spill]] }
0x1209   : > { %6129 = vrot.lane.b32.xlu2 %v5872_v30, %s14642_s17 }
0x122b   : > { %v5879_v12 = vpop.permute.xlu2 %5878 }
0x122c   : > { %8957 = vmatpush.xpose.msk.msrb.mxu2 %vm5880_vm1, %v5879_v12 }
0x1233   : > { %v9625_v28 = vpop.permute.xlu2 %9624 }
0x1234   : > { %v9626_v41 = vunpack.i.l.bf16 %v9625_v28  ;;  %v9627_v14 = vunpack.i.h.bf16 %v9625_v28 }
0x1236   : > { %5962 = vmatpush.msra.mxu3 %v9626_v41 }
0x1238   : > { %5963 = vmatpush.msra.mxu3 %v9627_v14 }
0x123a   : > { %6119 = vmatpush.msrb.mxu3 %v2858_v21 }
0x123b   : > { %v5877_v56 = vpop.permute.xlu1 %5876  ;;  %v5976_v3 = vpop.permute.xlu2 %5975 }
0x123c   : > { %8958 = vmatpush.xpose.msk.msrb.mxu2 %vm5880_vm1, %v5877_v56 }
0x123f   : > { %8959 = vmatmul.msk.f32.vlgmr.msrb.gmra.mxu2 %vm5880_vm1, %v5869_v60 }
0x1243   : > { %v5972_v18 = vpop.permute.xlu2 %5971 }
0x1247   : > { %8960 = vmatmul.msk.f32.gmra.mxu2 %vm5880_vm1, %v5872_v30 }
0x124b   : > { %v5974_v31 = vpop.permute.xlu2 %5973 }
0x1253   : > { %v6263_v4 = vpop.permute.xlu2 %6262 }
0x125b   : > { %v6261_v29 = vpop.permute.xlu2 %6260 }
0x1263   : > { %v6130_v5 = vpop.permute.xlu2 %6129 }
0x12c2   : > { %v5906_v40 = vpop.f32.mrf.mxu2 }
0x12c3   : > { %v5912_v61 = vmul.f32 0.35355338, %v5906_v40 }
0x12c5   : > { %v5914_v38 = vsel %vm3200_vm0, %v5912_v61, -inf }
0x12c6   : > { %5915 = vmax.xlane.f32.xlu0 %v5914_v38 }
0x12ca   : > { %v5909_v0 = vpop.f32.mrf.mxu2 }
0x12cb   : > { %v5913_v34 = vmul.f32 0.35355338, %v5909_v0 }
0x12cd   : > { %v5917_v26 = vsel %vm3200_vm0, %v5913_v34, -inf }
0x12ce   : > { %5918 = vmax.xlane.f32.xlu0 %v5917_v26 }
0x1339   : > { %v5916_v55 = vpop.xlane.xlu0 %5915 }
0x133a   : > { %v5920_v13 = vsub.f32 %v5912_v61, %v5916_v55 }
0x133c   : > { %v5922_v63 = vmul.f32 1.442695, %v5920_v13 }
0x133e   : > { %9872 = vpow2.f32 %v5922_v63 }
0x1341   : > { %v5919_v44 = vpop.xlane.xlu0 %5918 }
0x1342   : > { %v5921_v51 = vsub.f32 %v5913_v34, %v5919_v44 }
0x1344   : > { %v9873_v33 = vpop.eup %9872  ;;  %v5924_v19 = vmul.f32 1.442695, %v5921_v51 }
0x1345   : > { %v5926_v2 = vsel %vm3200_vm0, %v9873_v33, 0.0 }
0x1346   : > { %9874 = vpow2.f32 %v5924_v19  ;;  %5927 = vadd.xlane.f32.xlu0 %v5926_v2 }
0x134c   : > { %v9875_v6 = vpop.eup %9874 }
0x134d   : > { %v5929_v42 = vsel %vm3200_vm0, %v9875_v6, 0.0 }
0x134e   : > { %5930 = vadd.xlane.f32.xlu1 %v5929_v42 }
0x135a   : > { %5977 = vrot.lane.b32.xlu0 %v5872_v30, %s11722_s1  ;;  %s11730_s1 = smov 40  }
0x1362   : > { %6133 = vrot.lane.b32.xlu0 %v5872_v30, %s11727_s6 }
0x1367   : > { %6256 = vrot.lane.b32.xlu1 %v5869_v60, %s11718_s15 }
0x136a   : > { %6131 = vrot.lane.b32.xlu0 %v5869_v60, %s11727_s6 }
0x1372   : > { %6127 = vrot.lane.b32.xlu0 %v5869_v60, %s14642_s17  ;;  %s14794_s17 = smov %s14793_s2 }
0x137a   : > { %6258 = vrot.lane.b32.xlu0 %v5872_v30, %s11718_s15  ;;  %s14644_s15 = smov 48  }
0x13b9   : > { %v5928_v52 = vpop.xlane.xlu0 %5927 }
0x13ba   : > { %9876 = vrcp.f32 %v5928_v52 }
0x13c0   : > { %v9877_v47 = vpop.eup %9876 }
0x13c1   : > { %v5934_v43 = vmul.f32 %v9877_v47, %v9873_v33  ;;  %v5931_v46 = vpop.xlane.xlu1 %5930 }
0x13c2   : > { %9878 = vrcp.f32 %v5931_v46 }
0x13c3   : > { %8961 = vmatmul.msk.f32.vlgmr.msra.gmra.mxu3 %vm3200_vm0, %v5934_v43 }
0x13c4   : > { %8981 = vmatpush.xpose.msk.msra.mxu3 %vm5880_vm1, %v6263_v4 }
0x13c8   : > { %v9879_v59 = vpop.eup %9878  ;;  %8982 = vmatpush.xpose.msk.msra.mxu3 %vm5880_vm1, %v6261_v29 }
0x13c9   : > { %v5935_v53 = vmul.f32 %v9879_v59, %v9875_v6 }
0x13cb   : > { %8962 = vmatmul.msk.f32.gmra.mxu3 %vm3200_vm0, %v5935_v53 }
0x13cc   : > { %v5978_v35 = vpop.permute.xlu0 %5977 }
0x13cd   : > { %8963 = vmatpush.xpose.msk.msrb.mxu0 %vm5880_vm1, %v5978_v35 }
0x13d1   : > { %8964 = vmatpush.xpose.msk.msrb.mxu0 %vm5880_vm1, %v5976_v3 }
0x13d4   : > { %v6134_v57 = vpop.permute.xlu0 %6133  ;;  %8965 = vmatmul.msk.f32.vlgmr.msrb.gmra.mxu0 %vm5880_vm1, %v5972_v18 }
0x13d5   : > { %8973 = vmatpush.xpose.msk.msra.mxu0 %vm5880_vm1, %v6134_v57 }
0x13d9   : > { %v6257_v27 = vpop.permute.xlu1 %6256 }
0x13dc   : > { %v6132_v39 = vpop.permute.xlu0 %6131  ;;  %8966 = vmatmul.msk.f32.gmra.mxu0 %vm5880_vm1, %v5974_v31 }
0x13dd   : > { %8974 = vmatpush.xpose.msk.msra.mxu0 %vm5880_vm1, %v6132_v39 }
0x13e4   : > { %v6128_v62 = vpop.permute.xlu0 %6127 }
0x13e5   : > { %8975 = vmatmul.msk.f32.vlgmr.msra.gmra.mxu0 %vm5880_vm1, %v6128_v62 }
0x13ec   : > { %v6259_v50 = vpop.permute.xlu0 %6258 }
0x13ed   : > { %8976 = vmatmul.msk.f32.gmra.mxu0 %vm5880_vm1, %v6130_v5 }
0x1446   : > { %v5965_v48 = vpop.f32.mrf.mxu3 }
0x1447   : > { %8971 = vmatmul.msk.f32.vlgmr.msrb.gmra.mxu3 %vm5880_vm1, %v5965_v48 }
0x144e   : > { %v5968_v22 = vpop.f32.mrf.mxu3 }
0x144f   : > { %8972 = vmatmul.msk.f32.gmra.mxu3 %vm5880_vm1, %v5968_v22 }
0x1451   : > { %v6004_v20 = vpop.f32.mrf.mxu0 }
0x1452   : > { %v6010_v17 = vmul.f32 0.35355338, %v6004_v20 }
0x1454   : > { %v6012_v8 = vsel %vm3200_vm0, %v6010_v17, -inf }
0x1455   : > { %6013 = vmax.xlane.f32.xlu2 %v6012_v8 }
0x1457   : > { %8983 = vmatmul.msk.f32.vlgmr.msra.gmra.mxu3 %vm5880_vm1, %v6257_v27 }
0x1459   : > { %v6007_v11 = vpop.f32.mrf.mxu0 }
0x145a   : > { %v6011_v54 = vmul.f32 0.35355338, %v6007_v11 }
0x145c   : > { %v6015_v10 = vsel %vm3200_vm0, %v6011_v54, -inf }
0x145d   : > { %6016 = vmax.xlane.f32.xlu0 %v6015_v10 }
0x145f   : > { %8984 = vmatmul.msk.f32.gmra.mxu3 %vm5880_vm1, %v6259_v50 }
0x1462   : > { %v6160_v37 = vpop.f32.mrf.mxu0 }
0x1463   : > { %v6166_v49 = vmul.f32 0.35355338, %v6160_v37 }
0x1465   : > { %v6168_v15 = vsel %vm3200_vm0, %v6166_v49, -inf }
0x1466   : > { %6169 = vmax.xlane.f32.xlu1 %v6168_v15 }
0x146a   : > { %v6163_v7 = vpop.f32.mrf.mxu0 }
0x146b   : > { %v6167_v16 = vmul.f32 0.35355338, %v6163_v7 }
0x146d   : > { %v6171_v36 = vsel %vm3200_vm0, %v6167_v16, -inf }
0x146e   : > { %6172 = vmax.xlane.f32.xlu2 %v6171_v36 }
0x14c8   : > { %v6014_v45 = vpop.xlane.xlu2 %6013 }
0x14c9   : > { %v6018_v12 = vsub.f32 %v6010_v17, %v6014_v45 }
0x14ca   : > { %v13998_v23 = vpop.f32.mrf.mxu3 }
0x14cb   : > { %v6020_v28 = vmul.f32 1.442695, %v6018_v12 }
0x14d0   : > { %v6017_v24 = vpop.xlane.xlu0 %6016 }
0x14d1   : > { %v6019_v60 = vsub.f32 %v6011_v54, %v6017_v24  ;;  %v2860_v24 = vld [vmem:[%s14790_s10 + $0x10] sm:$0xff] }
0x14d2   : > { %v14000_v1 = vpop.f32.mrf.mxu3 }
0x14d3   : > { %v6022_v30 = vmul.f32 1.442695, %v6019_v60 }
0x14d5   : > { %9880 = vpow2.f32 %v6022_v30 }
0x14d6   : > { %9882 = vpow2.f32 %v6020_v28 }
0x14d9   : > { %v6170_v41 = vpop.xlane.xlu1 %6169 }
0x14da   : > { %v6289_v14 = vpop.f32.mrf.mxu3  ;;  %v6174_v61 = vsub.f32 %v6166_v49, %v6170_v41 }
0x14db   : > { %v14002_v56 = vpop.eup %9880  ;;  %v6295_v40 = vmul.f32 0.35355338, %v6289_v14 }
0x14dc   : > { %v6027_v38 = vsel %vm3200_vm0, %v14002_v56, 0.0  ;;  %v6176_v34 = vmul.f32 1.442695, %v6174_v61  ;;  %v9883_v55 = vpop.eup %9882  ;;  %v2861_v61 = vld [vmem:[%s14790_s10 + $0x18] sm:$0xff] }
0x14dd   : > { %6028 = vadd.xlane.f32.xlu1 %v6027_v38  ;;  %v6297_v0 = vsel %vm3200_vm0, %v6295_v40, -inf  ;;  %v6024_v51 = vsel %vm3200_vm0, %v9883_v55, 0.0 }
0x14de   : > { %6298 = vmax.xlane.f32.xlu0 %v6297_v0  ;;  %9884 = vpow2.f32 %v6176_v34 }
0x14e1   : > { %v6173_v26 = vpop.xlane.xlu2 %6172 }
0x14e2   : > { %v6292_v13 = vpop.f32.mrf.mxu3  ;;  %v6175_v44 = vsub.f32 %v6167_v16, %v6173_v26  ;;  %v2859_v16 = vld [vmem:[%s14790_s10 + $0x8] sm:$0xff] }
0x14e3   : > { %v6296_v63 = vmul.f32 0.35355338, %v6292_v13  ;;  %6090 = vmatpush.msra.mxu2 %v2859_v16 }
0x14e4   : > { %v6178_v19 = vmul.f32 1.442695, %v6175_v44  ;;  %v9885_v2 = vpop.eup %9884 }
0x14e5   : > { %v6300_v33 = vsel %vm3200_vm0, %v6296_v63, -inf  ;;  %v6180_v6 = vsel %vm3200_vm0, %v9885_v2, 0.0  ;;  %6246 = vmatpush.msrb.mxu2 %v2860_v24  ;;  %v9665_v24 = vld [vmem:[#allocation37] ss:$0 sm:$0xff] }
0x14e6   : > { %6025 = vadd.xlane.f32.xlu0 %v6024_v51  ;;  %6301 = vmax.xlane.f32.xlu2 %v6300_v33  ;;  %9886 = vpow2.f32 %v6178_v19  ;;  %v9664_v33 = vld [vmem:[#allocation38] ss:$0 sm:$0xff] }
0x14ec   : > { %v9887_v42 = vpop.eup %9886 }
0x14ed   : > { %v6183_v3 = vsel %vm3200_vm0, %v9887_v42, 0.0 }
0x14ee   : > { %6181 = vadd.xlane.f32.xlu0 %v6180_v6 }
0x14f6   : > { %9634 = vrot.lane.b32.xlu1 %v13955_v25, %s14644_s15  ;;  %6184 = vadd.xlane.f32.xlu0 %v6183_v3 }
0x14fe   : > { %9629 = vrot.lane.b32.xlu2 %v13955_v25, %s11729_s0  ;;  %s14795_s0 = sld [smem:[#allocation155_spill]] }
0x1504   : > { %s14796_s15 = smov %s14795_s0 }
0x1506   : > { %9639 = vrot.lane.b32.xlu2 %v13955_v25, %s11730_s1  ;;  %s11732_s1 = smov 32  }
0x1550   : > { %v6029_v59 = vpop.xlane.xlu1 %6028 }
0x1551   : > { %v6299_v21 = vpop.xlane.xlu0 %6298 }
0x1552   : > { %v6303_v18 = vsub.f32 %v6295_v40, %v6299_v21 }
0x1554   : > { %v6305_v31 = vmul.f32 1.442695, %v6303_v18 }
0x1556   : > { %9888 = vpow2.f32 %v6305_v31 }
0x1559   : > { %v6026_v52 = vpop.xlane.xlu0 %6025  ;;  %v6302_v4 = vpop.xlane.xlu2 %6301 }
0x155a   : > { %v6304_v47 = vsub.f32 %v6296_v63, %v6302_v4  ;;  %9890 = vrcp.f32 %v6026_v52 }
0x155c   : > { %v9889_v43 = vpop.eup %9888  ;;  %v6307_v46 = vmul.f32 1.442695, %v6304_v47 }
0x155d   : > { %v6309_v29 = vsel %vm3200_vm0, %v9889_v43, 0.0 }
0x155e   : > { %9892 = vpow2.f32 %v6307_v46  ;;  %6310 = vadd.xlane.f32.xlu0 %v6309_v29 }
0x155f   : > { %9894 = vrcp.f32 %v6029_v59 }
0x1560   : > { %v9891_v35 = vpop.eup %9890 }
0x1561   : > { %v9630_v53 = vpop.permute.xlu2 %9629  ;;  %v6032_v62 = vmul.f32 %v9891_v35, %v9883_v55  ;;  %v6182_v48 = vpop.xlane.xlu0 %6181 }
0x1562   : > { %v9631_v57 = vunpack.i.l.bf16 %v9630_v53  ;;  %v9632_v25 = vunpack.i.h.bf16 %v9630_v53  ;;  %9896 = vrcp.f32 %v6182_v48 }
0x1564   : > { %v9893_v39 = vpop.eup %9892  ;;  %6060 = vmatpush.msra.mxu1 %v9631_v57  ;;  %v2835_v57 = vld [vmem:[%s14791_s26 + $0x18] sm:$0xff] }
0x1565   : > { %v6312_v5 = vsel %vm3200_vm0, %v9893_v39, 0.0  ;;  %v9895_v8 = vpop.eup %9894 }
0x1566   : > { %6313 = vadd.xlane.f32.xlu0 %v6312_v5  ;;  %6061 = vmatpush.msra.mxu1 %v9632_v25  ;;  %v6033_v10 = vmul.f32 %v9895_v8, %v14002_v56  ;;  %v2833_v25 = vld [vmem:[%s14791_s26 + $0x8] sm:$0xff] }
0x1567   : > { %8967 = vmatmul.msk.f32.vlgmr.msra.gmra.mxu1 %vm3200_vm0, %v6032_v62  ;;  %v2832_v62 = vld [vmem:[%s14791_s26] sm:$0xff]  ;;  %v2850_v8 = vld [vmem:[%s14792_s8 + $0x68] sm:$0xff] }
0x1568   : > { %v9635_v22 = vpop.permute.xlu1 %9634  ;;  %v9897_v37 = vpop.eup %9896 }
0x1569   : > { %v9636_v20 = vunpack.i.l.bf16 %v9635_v22  ;;  %v9640_v17 = vpop.permute.xlu2 %9639  ;;  %v9637_v11 = vunpack.i.h.bf16 %v9635_v22  ;;  %v6185_v50 = vpop.xlane.xlu0 %6184  ;;  %v6188_v49 = vmul.f32 %v9897_v37, %v9885_v2 }
0x156a   : > { %v9641_v27 = vunpack.i.l.bf16 %v9640_v17  ;;  %v9642_v54 = vunpack.i.h.bf16 %v9640_v17  ;;  %9898 = vrcp.f32 %v6185_v50  ;;  %v2851_v17 = vld [vmem:[%s14792_s8 + $0x70] sm:$0xff] }
0x156b   : > { %6216 = vmatpush.msrb.mxu1 %v9636_v20  ;;  %v2852_v20 = vld [vmem:[%s14792_s8 + $0x78] sm:$0xff] }
0x156c   : > { %6345 = vmatpush.msrb.mxu0 %v9641_v27  ;;  %6499 = vmatpush.msrb.mxu3 %v2852_v20 }
0x156d   : > { %6217 = vmatpush.msrb.mxu1 %v9637_v11 }
0x156e   : > { %6346 = vmatpush.msrb.mxu0 %v9642_v54  ;;  %6500 = vmatpush.msrb.mxu3 %v2851_v17 }
0x156f   : > { %8968 = vmatmul.msk.f32.gmra.mxu1 %vm3200_vm0, %v6033_v10 }
0x1570   : > { %v9899_v15 = vpop.eup %9898  ;;  %6375 = vmatpush.msra.mxu1 %v2861_v61  ;;  %6501 = vmatpush.msrb.mxu3 %v2850_v8 }
0x1571   : > { %v6189_v7 = vmul.f32 %v9899_v15, %v9887_v42 }
0x1577   : > { %8977 = vmatmul.msk.f32.vlgmr.msrb.gmra.mxu1 %vm3200_vm0, %v6188_v49 }
0x157f   : > { %8978 = vmatmul.msk.f32.gmra.mxu1 %vm3200_vm0, %v6189_v7 }
0x15d1   : > { %v6311_v36 = vpop.xlane.xlu0 %6310 }
0x15d2   : > { %9900 = vrcp.f32 %v6311_v36 }
0x15d8   : > { %v9901_v45 = vpop.eup %9900 }
0x15d9   : > { %v6317_v60 = vmul.f32 %v9901_v45, %v9889_v43  ;;  %v6314_v30 = vpop.xlane.xlu0 %6313 }
0x15da   : > { %9902 = vrcp.f32 %v6314_v30  ;;  %v9666_v30 = vld [vmem:[#allocation35] ss:$0 sm:$0xff] }
0x15db   : > { %8985 = vmatmul.msk.f32.vlgmr.msrb.gmra.mxu0 %vm3200_vm0, %v6317_v60 }
0x15e0   : > { %v9903_v12 = vpop.eup %9902 }
0x15e1   : > { %v6318_v28 = vmul.f32 %v9903_v12, %v9893_v39  ;;  %v2834_v39 = vld [vmem:[%s14791_s26 + $0x10] sm:$0xff] }
0x15e3   : > { %8986 = vmatmul.msk.f32.gmra.mxu0 %vm3200_vm0, %v6318_v28 }
0x15e4   : > { %v6063_v41 = vpop.f32.mrf.mxu1 }
0x15e5   : > { %8969 = vmatmul.msk.f32.vlgmr.msra.gmra.mxu2 %vm5880_vm1, %v6063_v41 }
0x15e6   : > { %6467 = vmatpush.msra.mxu2 %v2835_v57 }
0x15e8   : > { %6468 = vmatpush.msra.mxu2 %v2834_v39 }
0x15ea   : > { %6469 = vmatpush.msra.mxu2 %v2833_v25 }
0x15ec   : > { %v6066_v14 = vpop.f32.mrf.mxu1  ;;  %6470 = vmatpush.msra.mxu2 %v2832_v62 }
0x15ed   : > { %8970 = vmatmul.msk.f32.gmra.mxu2 %vm5880_vm1, %v6066_v14 }
0x15f4   : > { %v6219_v56 = vpop.f32.mrf.mxu1 }
0x15f5   : > { %8979 = vmatmul.msk.f32.vlgmr.msrb.gmra.mxu2 %vm5880_vm1, %v6219_v56 }
0x15fc   : > { %v6222_v40 = vpop.f32.mrf.mxu1 }
0x15fd   : > { %8980 = vmatmul.msk.f32.gmra.mxu2 %vm5880_vm1, %v6222_v40 }
0x1658   : > { %v6348_v38 = vpop.f32.mrf.mxu0 }
0x1659   : > { %8987 = vmatmul.msk.f32.vlgmr.msra.gmra.mxu1 %vm5880_vm1, %v6348_v38 }
0x1660   : > { %v6351_v0 = vpop.f32.mrf.mxu0 }
0x1661   : > { %8988 = vmatmul.msk.f32.gmra.mxu1 %vm5880_vm1, %v6351_v0  ;;  %vm6789_vm1 = vcmask 519168  }
0x1668   : > { %v6092_v34 = vpop.f32.mrf.mxu2 }
0x1669   : > { %v6122_v13 = vadd.f32 %v13998_v23, %v6092_v34 }
0x1670   : > { %v6095_v26 = vpop.f32.mrf.mxu2 }
0x1671   : > { %v6125_v6 = vadd.f32 %v14000_v1, %v6095_v26  ;;  %v2849_v26 = vld [vmem:[%s14792_s8 + $0x60] sm:$0xff] }
0x1672   : > { %6502 = vmatpush.msrb.mxu3 %v2849_v26 }
0x1678   : > { %v6248_v55 = vpop.f32.mrf.mxu2 }
0x1679   : > { %v6254_v63 = vadd.f32 %v6248_v55, %v6122_v13  ;;  %v2848_v55 = vld [vmem:[%s14792_s8 + $0x58] sm:$0xff]  ;;  %v2847_v13 = vld [vmem:[%s14792_s8 + $0x50] sm:$0xff] }
0x167a   : > { %6503 = vmatpush.msrb.mxu3 %v2848_v55  ;;  %v2883_v55 = vld [vmem:[%s14793_s2 + $0x18] sm:$0xff]  ;;  %s14797_s2 = smov 48  }
0x167b   : > { %6675 = vmatpush.msrb.mxu2 %v2883_v55 }
0x167c   : > { %6504 = vmatpush.msrb.mxu3 %v2847_v13  ;;  %v2887_v13 = vld [vmem:[%s14794_s17 + $0x38] sm:$0xff] }
0x1680   : > { %v6251_v2 = vpop.f32.mrf.mxu2 }
0x1681   : > { %v6255_v3 = vadd.f32 %v6251_v2, %v6125_v6  ;;  %v2841_v2 = vld [vmem:[%s14792_s8 + $0x20] sm:$0xff]  ;;  %v2840_v6 = vld [vmem:[%s14792_s8 + $0x18] sm:$0xff] }
0x16d6   : > { %v6377_v44 = vpop.f32.mrf.mxu1 }
0x16d7   : > { %v6383_v51 = vadd.f32 %v6377_v44, %v6254_v63  ;;  %v2846_v63 = vld [vmem:[%s14792_s8 + $0x48] sm:$0xff]  ;;  %v2845_v44 = vld [vmem:[%s14792_s8 + $0x40] sm:$0xff] }
0x16d8   : > { %6505 = vmatpush.msrb.mxu3 %v2846_v63  ;;  %v2891_v63 = vld [vmem:[%s14794_s17 + $0x58] sm:$0xff] }
0x16d9   : > { %v6385_v19 = vadd.f32 %v6383_v51, %v13933_v32  ;;  %v2844_v51 = vld [vmem:[%s14792_s8 + $0x38] sm:$0xff] }
0x16da   : > { %6506 = vmatpush.msrb.mxu3 %v2845_v44 }
0x16db   : > { %v14036_v42 = vadd.f32 %v9664_v33, %v6385_v19  ;;  %v2842_v19 = vld [vmem:[%s14792_s8 + $0x28] sm:$0xff] }
0x16dc   : > { %6507 = vmatpush.msrb.mxu3 %v2844_v51  ;;  %v2882_v51 = vld [vmem:[%s14794_s17 + $0x10] sm:$0xff] }
0x16dd   : > { %v6392_v21 = vsel %vm5780_vm5, %v14036_v42, 0.0  ;;  %6676 = vmatpush.msrb.mxu2 %v2882_v51 }
0x16de   : > { %v6380_v18 = vpop.f32.mrf.mxu1  ;;  %6393 = vadd.xlane.f32.xlu2 %v6392_v21  ;;  %v2838_v21 = vld [vmem:[%s14792_s8 + $0x8] sm:$0xff] }
0x16df   : > { %v6384_v31 = vadd.f32 %v6380_v18, %v6255_v3  ;;  %v2839_v3 = vld [vmem:[%s14792_s8 + $0x10] sm:$0xff]  ;;  %v2837_v18 = vld [vmem:[%s14792_s8] sm:$0xff] }
0x16e1   : > { %v6386_v23 = vadd.f32 %v6384_v31, %v13937_v9  ;;  %v9667_v31 = vld [vmem:[#allocation29] ss:$0 sm:$0xff] }
0x16e3   : > { %v14041_v52 = vadd.f32 %v9664_v33, %v6386_v23  ;;  %v2843_v33 = vld [vmem:[%s14792_s8 + $0x30] sm:$0xff] }
0x16e4   : > { %6508 = vmatpush.msrb.mxu3 %v2843_v33  ;;  %v2886_v33 = vld [vmem:[%s14794_s17 + $0x30] sm:$0xff] }
0x16e5   : > { %v6395_v32 = vsel %vm5780_vm5, %v14041_v52, 0.0 }
0x16e6   : > { %6396 = vadd.xlane.f32.xlu1 %v6395_v32  ;;  %6509 = vmatpush.msrb.mxu3 %v2842_v19  ;;  %v2890_v19 = vld [vmem:[%s14794_s17 + $0x50] sm:$0xff] }
0x16e8   : > { %6510 = vmatpush.msrb.mxu3 %v2841_v2  ;;  %v2881_v2 = vld [vmem:[%s14794_s17 + $0x8] sm:$0xff] }
0x16e9   : > { %6677 = vmatpush.msrb.mxu2 %v2881_v2 }
0x16ea   : > { %6511 = vmatpush.msrb.mxu3 %v2840_v6  ;;  %v2885_v6 = vld [vmem:[%s14794_s17 + $0x28] sm:$0xff] }
0x16ec   : > { %6512 = vmatpush.msrb.mxu3 %v2839_v3  ;;  %v2889_v3 = vld [vmem:[%s14794_s17 + $0x48] sm:$0xff] }
0x16ee   : > { %6513 = vmatpush.msrb.mxu3 %v2838_v21  ;;  %v2880_v21 = vld [vmem:[%s14794_s17] sm:$0xff] }
0x16ef   : > { %6678 = vmatpush.msrb.mxu2 %v2880_v21 }
0x16f0   : > { %6514 = vmatpush.msrb.mxu3 %v2837_v18 }
0x1751   : > { %v6394_v1 = vpop.xlane.xlu2 %6393 }
0x1752   : > { %v6398_v4 = vmul.f32 %v6394_v1, %v13941_v58 }
0x1754   : > { %v6400_v47 = vsub.f32 %v14036_v42, %v6398_v4 }
0x1756   : > { %v6402_v43 = vmul.f32 %v6400_v47, %v6400_v47 }
0x1758   : > { %v6404_v46 = vsel %vm5780_vm5, %v6402_v43, 0.0 }
0x1759   : > { %6405 = vadd.xlane.f32.xlu0 %v6404_v46  ;;  %v6397_v9 = vpop.xlane.xlu1 %6396 }
0x175a   : > { %v6399_v29 = vmul.f32 %v6397_v9, %v13941_v58 }
0x175c   : > { %v6401_v59 = vsub.f32 %v14041_v52, %v6399_v29 }
0x175e   : > { %v6403_v53 = vmul.f32 %v6401_v59, %v6401_v59 }
0x1760   : > { %v6407_v35 = vsel %vm5780_vm5, %v6403_v53, 0.0 }
0x1761   : > { %6408 = vadd.xlane.f32.xlu0 %v6407_v35 }
0x17cc   : > { %v6406_v5 = vpop.xlane.xlu0 %6405 }
0x17cd   : > { %v6410_v48 = vmul.f32 %v6406_v5, %v13941_v58 }
0x17cf   : > { %v6412_v22 = vadd.f32 1e-05, %v6410_v48 }
0x17d1   : > { %9904 = vrsqrt.f32 %v6412_v22  ;;  %vm6420_vm3 = vweird.f32 %v6412_v22 }
0x17d4   : > { %v6409_v27 = vpop.xlane.xlu0 %6408 }
0x17d5   : > { %v6411_v11 = vmul.f32 %v6409_v27, %v13941_v58 }
0x17d7   : > { %v9905_v54 = vpop.eup %9904  ;;  %v6413_v10 = vadd.f32 1e-05, %v6411_v11  ;;  %v9668_v11 = vld [vmem:[#allocation31] ss:$0 sm:$0xff] }
0x17d8   : > { %v6415_v50 = vmul.f32 %v9905_v54, %v6412_v22  ;;  %vm6421_vm2 = vweird.f32 %v9905_v54 }
0x17d9   : > { %9906 = vrsqrt.f32 %v6413_v10  ;;  %vm6422_vm4 = vmor %vm6420_vm3, %vm6421_vm2  ;;  %vm6430_vm7 = vweird.f32 %v6413_v10 }
0x17da   : > { %v6416_v37 = vmul.f32 %v9905_v54, %v6415_v50 }
0x17dc   : > { %v6417_v49 = vmul.f32 0.5, %v6416_v37 }
0x17de   : > { %v6418_v15 = vsub.f32 1.5, %v6417_v49 }
0x17df   : > { %v9907_v7 = vpop.eup %9906 }
0x17e0   : > { %v6419_v16 = vmul.f32 %v9905_v54, %v6418_v15  ;;  %v6425_v36 = vmul.f32 %v9907_v7, %v6413_v10  ;;  %vm6431_vm6 = vweird.f32 %v9907_v7  ;;  %v2876_v15 = vld [vmem:[#allocation47] sm:$0xf] }
0x17e1   : > { %vm6432_vm8 = vmor %vm6430_vm7, %vm6431_vm6  ;;  %vm6903_vm7 = vcmask 27648  }
0x17e2   : > { %v6423_v45 = vsel %vm6422_vm4, %v9905_v54, %v6419_v16  ;;  %v6426_v60 = vmul.f32 %v9907_v7, %v6425_v36  ;;  %v2878_v16 = vld [vmem:[#allocation47 + $0x8] sm:$0xf]  ;;  %v2879_v36 = vld [vmem:[#allocation47 + $0xc] sm:$0xf] }
0x17e3   : > { %v6434_v12 = vmul.f32 %v6423_v45, %v6400_v47 }
0x17e4   : > { %v6427_v28 = vmul.f32 0.5, %v6426_v60 }
0x17e5   : > { %v6439_v41 = vmul.f32 %v9665_v24, %v6434_v12 }
0x17e6   : > { %v6428_v14 = vsub.f32 1.5, %v6427_v28 }
0x17e7   : > { %v6444_v56 = vadd.f32 %v9666_v30, %v6439_v41 }
0x17e8   : > { %v6429_v40 = vmul.f32 %v9907_v7, %v6428_v14 }
0x17e9   : > { %8989 = vmatmul.msk.f32.vlgmr.msra.gmra.mxu2 %vm5780_vm5, %v6444_v56 }
0x17ea   : > { %v6433_v61 = vsel %vm6432_vm8, %v9907_v7, %v6429_v40  ;;  %v2877_v7 = vld [vmem:[#allocation47 + $0x4] sm:$0xf] }
0x17eb   : > { %v6435_v38 = vmul.f32 %v6433_v61, %v6401_v59 }
0x17ed   : > { %v6440_v0 = vmul.f32 %v9665_v24, %v6435_v38 }
0x17ef   : > { %v6445_v34 = vadd.f32 %v9666_v30, %v6440_v0 }
0x17f1   : > { %8990 = vmatmul.msk.f32.gmra.mxu2 %vm5780_vm5, %v6445_v34 }
0x186c   : > { %v6472_v23 = vpop.f32.mrf.mxu2 }
0x186d   : > { %v6473_v32 = vadd.f32 %v9667_v31, %v6472_v23  ;;  %v2888_v23 = vld [vmem:[%s14794_s17 + $0x40] sm:$0xff] }
0x186f   : > { %v6478_v1 = vmul.f32 %v6473_v32, %v6473_v32 }
0x1871   : > { %v6480_v4 = vmul.f32 %v6478_v1, %v6473_v32 }
0x1873   : > { %v6482_v47 = vmul.f32 0.044715, %v6480_v4  ;;  %v2895_v4 = vld [vmem:[%s14794_s17 + $0x78] sm:$0xff] }
0x1874   : > { %v6475_v43 = vpop.f32.mrf.mxu2  ;;  %6780 = vmatpush.msra.mxu2 %v2895_v4  ;;  %v2973_v4 = vld [vmem:[%s14796_s15 + $0x68] sm:$0xff] }
0x1875   : > { %v6484_v46 = vadd.f32 %v6482_v47, %v6473_v32  ;;  %v6476_v9 = vadd.f32 %v9667_v31, %v6475_v43  ;;  %v2884_v31 = vld [vmem:[%s14794_s17 + $0x20] sm:$0xff]  ;;  %v2894_v47 = vld [vmem:[%s14794_s17 + $0x70] sm:$0xff] }
0x1876   : > { %6781 = vmatpush.msra.mxu2 %v2894_v47  ;;  %v2970_v47 = vld [vmem:[%s14796_s15 + $0x50] sm:$0xff] }
0x1877   : > { %v6486_v29 = vmul.f32 0.7978846, %v6484_v46  ;;  %v6479_v59 = vmul.f32 %v6476_v9, %v6476_v9 }
0x1879   : > { %9908 = vtanh.f32 %v6486_v29  ;;  %v6481_v53 = vmul.f32 %v6479_v59, %v6476_v9  ;;  %v2892_v59 = vld [vmem:[%s14794_s17 + $0x60] sm:$0xff] }
0x187b   : > { %v6483_v35 = vmul.f32 0.044715, %v6481_v53 }
0x187d   : > { %v6485_v57 = vadd.f32 %v6483_v35, %v6476_v9 }
0x187f   : > { %v9909_v39 = vpop.eup %9908  ;;  %v6487_v25 = vmul.f32 0.7978846, %v6485_v57 }
0x1880   : > { %v6490_v62 = vadd.f32 1.0, %v9909_v39 }
0x1881   : > { %9910 = vtanh.f32 %v6487_v25 }
0x1882   : > { %v6492_v5 = vmul.f32 0.5, %v6490_v62  ;;  %v9669_v62 = vld [vmem:[#allocation46] ss:$0 sm:$0xff] }
0x1884   : > { %v6494_v48 = vmul.f32 %v6492_v5, %v6473_v32 }
0x1886   : > { %6515 = vmatmul.f32.vlgmr.msrb.gmra.mxu3 %v6494_v48 }
0x1887   : > { %v9911_v22 = vpop.eup %9910 }
0x1888   : > { %v6491_v20 = vadd.f32 1.0, %v9911_v22 }
0x188a   : > { %v6493_v17 = vmul.f32 0.5, %v6491_v20 }
0x188c   : > { %v6495_v8 = vmul.f32 %v6493_v17, %v6476_v9  ;;  %v2893_v9 = vld [vmem:[%s14794_s17 + $0x68] sm:$0xff]  ;;  %v9670_v17 = vld [vmem:[#allocation46 + $0x1] ss:$0 sm:$0xff] }
0x188d   : > { %6782 = vmatpush.msra.mxu2 %v2893_v9  ;;  %v2969_v9 = vld [vmem:[%s14796_s15 + $0x48] sm:$0xff] }
0x188e   : > { %6518 = vmatmul.f32.gmra.mxu3 %v6495_v8  ;;  %v9671_v8 = vld [vmem:[#allocation46 + $0x2] ss:$0 sm:$0xff] }
0x188f   : > { %6783 = vmatpush.msra.mxu2 %v2892_v59  ;;  %v2967_v59 = vld [vmem:[%s14796_s15 + $0x38] sm:$0xff] }
0x1909   : > { %v6516_v27 = vpop.f32.mrf.mxu3 }
0x190a   : > { %v6517_v10 = vadd.f32 %v9668_v11, %v6516_v27 }
0x190c   : > { %v6522_v49 = vadd.f32 %v6517_v10, %v14036_v42 }
0x1911   : > { %v6519_v54 = vpop.f32.mrf.mxu3 }
0x1912   : > { %v6520_v50 = vadd.f32 %v9668_v11, %v6519_v54 }
0x1914   : > { %v6523_v37 = vadd.f32 %v6520_v50, %v14041_v52  ;;  %v9673_v50 = vld [vmem:[#allocation44] ss:$0 sm:$0xff] }
0x1916   : > { %6541 = vmatpush.msra.mxu0 %v6523_v37  ;;  %6564 = vmatpush.msrb.mxu1 %v6523_v37 }
0x1918   : > { %6542 = vmatpush.msra.mxu0 %v6522_v49  ;;  %6565 = vmatpush.msrb.mxu1 %v6522_v49 }
0x1919   : > { %8991 = vmatmul.msk.f32.vlgmr.msra.gmra.mxu0 %vm3200_vm0, %v2876_v15  ;;  %8992 = vmatmul.msk.f32.vlgmr.msrb.gmra.mxu1 %vm3200_vm0, %v2877_v7 }
0x191a   : > { %6610 = vmatpush.msra.mxu1 %v6523_v37  ;;  %6587 = vmatpush.msrb.mxu0 %v6523_v37  ;;  %v9674_v37 = vld [vmem:[#allocation44 + $0x1] ss:$0 sm:$0xff] }
0x191c   : > { %6611 = vmatpush.msra.mxu1 %v6522_v49  ;;  %6588 = vmatpush.msrb.mxu0 %v6522_v49  ;;  %v9675_v49 = vld [vmem:[#allocation44 + $0x2] ss:$0 sm:$0xff] }
0x191e   : > { %6712 = vmatpush.msra.mxu0 %v2887_v13  ;;  %6746 = vmatpush.msrb.mxu1 %v2891_v63  ;;  %v11731_v13 = vmov 64.0  }
0x1920   : > { %6713 = vmatpush.msra.mxu0 %v2886_v33  ;;  %6747 = vmatpush.msrb.mxu1 %v2890_v19 }
0x1921   : > { %8993 = vmatmul.msk.f32.vlgmr.msrb.gmra.mxu0 %vm3200_vm0, %v2878_v16  ;;  %8994 = vmatmul.msk.f32.vlgmr.msra.gmra.mxu1 %vm3200_vm0, %v2879_v36 }
0x1922   : > { %6714 = vmatpush.msra.mxu0 %v2885_v6  ;;  %6748 = vmatpush.msrb.mxu1 %v2889_v3 }
0x1924   : > { %6715 = vmatpush.msra.mxu0 %v2884_v31  ;;  %6749 = vmatpush.msrb.mxu1 %v2888_v23  ;;  %v2974_v23 = vld [vmem:[%s14795_s0 + $0x70] sm:$0xff]  ;;  %s11733_s0 = smov 16  }
0x1925   : > { %6843 = vmatpush.msra.mxu3 %v2974_v23 }
0x1996   : > { %v14081_v42 = vpop.f32.mrf.mxu0  ;;  %v14083_v52 = vpop.f32.mrf.mxu1 }
0x1997   : > { %v6625_v24 = vmul.f32 %v14081_v42, %v14081_v42  ;;  %v6616_v45 = vadd.f32 %v14083_v52, %v14081_v42  ;;  %v6626_v60 = vmul.f32 %v14083_v52, %v14083_v52 }
0x1999   : > { %v6627_v14 = vadd.f32 %v6626_v60, %v6625_v24 }
0x199e   : > { %v14091_v30 = vpop.f32.mrf.mxu0  ;;  %v14096_v41 = vpop.f32.mrf.mxu1 }
0x199f   : > { %v6617_v12 = vadd.f32 %v6616_v45, %v14091_v30  ;;  %v6628_v28 = vmul.f32 %v14091_v30, %v14091_v30  ;;  %v6630_v61 = vmul.f32 %v14096_v41, %v14096_v41 }
0x19a1   : > { %v6618_v56 = vadd.f32 %v6617_v12, %v14096_v41  ;;  %v6629_v40 = vadd.f32 %v6628_v28, %v6627_v14  ;;  %v9676_v12 = vld [vmem:[#allocation44 + $0x3] ss:$0 sm:$0xff] }
0x19a3   : > { %v6620_v38 = vsel %vm6619_vm9, %v6618_v56, 0.0  ;;  %v6631_v0 = vadd.f32 %v6630_v61, %v6629_v40 }
0x19a4   : > { %6621 = vadd.xlane.f32.xlu0 %v6620_v38 }
0x19a5   : > { %v6632_v34 = vsel %vm6619_vm9, %v6631_v0, 0.0 }
0x19ac   : > { %6633 = vadd.xlane.f32.xlu0 %v6632_v34 }
0x1a17   : > { %v6622_v26 = vpop.xlane.xlu0 %6621 }
0x1a18   : > { %v6623_v44 = vmul.f32 %v6622_v26, %v13941_v58 }
0x1a1a   : > { %v6624_v18 = vmul.f32 0.25, %v6623_v44 }
0x1a1c   : > { %v6637_v43 = vmul.f32 %v6624_v18, %v6624_v18  ;;  %v6650_v48 = vsub.f32 %v14081_v42, %v6624_v18  ;;  %v6687_v22 = vsub.f32 %v14083_v52, %v6624_v18  ;;  %v6721_v20 = vsub.f32 %v14091_v30, %v6624_v18  ;;  %v9672_v42 = vld [vmem:[#allocation46 + $0x3] ss:$0 sm:$0xff] }
0x1a1d   : > { %v6755_v15 = vsub.f32 %v14096_v41, %v6624_v18  ;;  %v9677_v41 = vld [vmem:[#allocation43] ss:$0 sm:$0xff] }
0x1a1f   : > { %v6634_v32 = vpop.xlane.xlu0 %6633 }
0x1a20   : > { %v6635_v1 = vmul.f32 %v6634_v32, %v13941_v58  ;;  %v2975_v32 = vld [vmem:[%s14796_s15 + $0x78] sm:$0xff] }
0x1a21   : > { %6863 = vmatpush.msrb.mxu0 %v2975_v32 }
0x1a22   : > { %v6636_v46 = vmul.f32 0.25, %v6635_v1  ;;  %v2972_v1 = vld [vmem:[%s14796_s15 + $0x60] sm:$0xff] }
0x1a23   : > { %6844 = vmatpush.msra.mxu3 %v2972_v1  ;;  %6864 = vmatpush.msrb.mxu0 %v2973_v4 }
0x1a24   : > { %v6638_v29 = vsub.f32 %v6636_v46, %v6637_v43  ;;  %v2971_v43 = vld [vmem:[%s14796_s15 + $0x58] sm:$0xff]  ;;  %v2968_v46 = vld [vmem:[%s14796_s15 + $0x40] sm:$0xff] }
0x1a25   : > { %6845 = vmatpush.msra.mxu3 %v2970_v47  ;;  %6865 = vmatpush.msrb.mxu0 %v2971_v43 }
0x1a26   : > { %v6639_v53 = vadd.f32 1e-05, %v6638_v29  ;;  %v2966_v29 = vld [vmem:[%s14796_s15 + $0x30] sm:$0xff] }
0x1a27   : > { %6846 = vmatpush.msra.mxu3 %v2968_v46  ;;  %6866 = vmatpush.msrb.mxu0 %v2969_v9 }
0x1a28   : > { %9912 = vrsqrt.f32 %v6639_v53  ;;  %vm6646_vm14 = vweird.f32 %v6639_v53 }
0x1a29   : > { %9914 = vrcp.f32 %v11731_v13  ;;  %6847 = vmatpush.msra.mxu3 %v2966_v29  ;;  %6867 = vmatpush.msrb.mxu0 %v2967_v59 }
0x1a2e   : > { %v9913_v35 = vpop.eup %9912 }
0x1a2f   : > { %v6641_v57 = vmul.f32 %v9913_v35, %v6639_v53  ;;  %vm6647_vm10 = vweird.f32 %v9913_v35  ;;  %v9915_v63 = vpop.eup %9914  ;;  %v2964_v53 = vld [vmem:[%s14796_s15 + $0x20] sm:$0xff] }
0x1a30   : > { %vm6648_vm15 = vmor %vm6646_vm14, %vm6647_vm10  ;;  %v6794_v44 = vmul.f32 64.0, %v9915_v63  ;;  %vm6798_vm2 = vweird.f32 %v9915_v63  ;;  %6848 = vmatpush.msra.mxu3 %v2964_v53 }
0x1a31   : > { %v6642_v39 = vmul.f32 %v9913_v35, %v6641_v57  ;;  %v2962_v57 = vld [vmem:[%s14796_s15 + $0x10] sm:$0xff] }
0x1a32   : > { %v6795_v51 = vsub.f32 1.0, %v6794_v44  ;;  %6849 = vmatpush.msra.mxu3 %v2962_v57 }
0x1a33   : > { %v6643_v58 = vmul.f32 0.5, %v6642_v39  ;;  %v2963_v39 = vld [vmem:[%s14796_s15 + $0x18] sm:$0xff] }
0x1a34   : > { %v6796_v33 = vmul.f32 %v9915_v63, %v6795_v51 }
0x1a35   : > { %v6644_v25 = vsub.f32 1.5, %v6643_v58  ;;  %v2960_v58 = vld [vmem:[%s14796_s15] sm:$0xff] }
0x1a36   : > { %v6797_v19 = vadd.f32 %v9915_v63, %v6796_v33  ;;  %6850 = vmatpush.msra.mxu3 %v2960_v58 }
0x1a37   : > { %v6645_v5 = vmul.f32 %v9913_v35, %v6644_v25  ;;  %v2961_v25 = vld [vmem:[%s14796_s15 + $0x8] sm:$0xff] }
0x1a38   : > { %v14131_v2 = vsel %vm6798_vm2, %v9915_v63, %v6797_v19 }
0x1a39   : > { %v6649_v27 = vsel %vm6648_vm15, %v9913_v35, %v6645_v5  ;;  %v2965_v35 = vld [vmem:[%s14796_s15 + $0x28] sm:$0xff]  ;;  %vm7622_vm15 = vcmask 1040384  }
0x1a3a   : > { %v6651_v11 = vmul.f32 %v6650_v48, %v6649_v27  ;;  %v6688_v54 = vmul.f32 %v6687_v22, %v6649_v27  ;;  %v6722_v10 = vmul.f32 %v6721_v20, %v6649_v27  ;;  %v6756_v24 = vmul.f32 %v6755_v15, %v6649_v27  ;;  %6868 = vmatpush.msrb.mxu0 %v2965_v35 }
0x1a3c   : > { %v6655_v7 = vmul.f32 %v9669_v62, %v6651_v11  ;;  %v6692_v16 = vmul.f32 %v9670_v17, %v6688_v54  ;;  %v6726_v36 = vmul.f32 %v9671_v8, %v6722_v10  ;;  %v6760_v30 = vmul.f32 %v9672_v42, %v6756_v24  ;;  %6869 = vmatpush.msrb.mxu0 %v2963_v39  ;;  %v9678_v54 = vld [vmem:[#allocation53] ss:$0 sm:$0xff] }
0x1a3e   : > { %v6659_v52 = vadd.f32 %v9673_v50, %v6655_v7  ;;  %v6696_v45 = vadd.f32 %v9674_v37, %v6692_v16  ;;  %v6730_v60 = vadd.f32 %v9675_v49, %v6726_v36  ;;  %v6764_v28 = vadd.f32 %v9676_v12, %v6760_v30  ;;  %6870 = vmatpush.msrb.mxu0 %v2961_v25  ;;  %v9679_v50 = vld [vmem:[#allocation52] ss:$0 sm:$0xff]  ;;  %v2959_v7 = vld [vmem:[#allocation61] sm:$0x3] }
0x1a3f   : > { %v6829_v16 = vperm.slane %v2959_v7, 1  ;;  %v6828_v24 = vperm.slane %v2959_v7, 0  ;;  %v2953_v7 = vld [vmem:[#allocation59 + $0x10] sm:$0xff] }
0x1a40   : > { %8995 = vmatmul.msk.f32.vlgmr.msrb.gmra.mxu2 %vm5780_vm5, %v6659_v52  ;;  %8996 = vmatmul.msk.f32.vlgmr.msra.gmra.mxu0 %vm5780_vm5, %v6696_v45 }
0x1a41   : > { %8997 = vmatmul.msk.f32.vlgmr.msrb.gmra.mxu1 %vm5780_vm5, %v6730_v60 }
0x1a48   : > { %8998 = vmatmul.msk.f32.vlgmr.msra.gmra.mxu2 %vm5780_vm5, %v6764_v28 }
0x1abd   : > { %v6717_v40 = vpop.f32.mrf.mxu0 }
0x1abe   : > { %v6751_v38 = vpop.f32.mrf.mxu1 }
0x1ac3   : > { %v6680_v14 = vpop.f32.mrf.mxu2 }
0x1ac4   : > { %v6686_v56 = vadd.f32 %v9677_v41, %v6680_v14  ;;  %v2952_v41 = vld [vmem:[#allocation59 + $0x8] sm:$0xff]  ;;  %v2951_v14 = vld [vmem:[#allocation59] sm:$0xff] }
0x1ac5   : > { %7048 = vmatpush.msra.mxu0 %v2952_v41 }
0x1ac6   : > { %v6720_v61 = vadd.f32 %v6717_v40, %v6686_v56 }
0x1ac7   : > { %7049 = vmatpush.msra.mxu0 %v2951_v14 }
0x1ac8   : > { %v6754_v0 = vadd.f32 %v6751_v38, %v6720_v61 }
0x1acb   : > { %v6785_v34 = vpop.f32.mrf.mxu2 }
0x1acc   : > { %v14127_v26 = vadd.f32 %v6785_v34, %v6754_v0 }
0x1ace   : > { %v6790_v55 = vsel %vm6789_vm1, %v14127_v26, 0.0 }
0x1acf   : > { %6791 = vadd.xlane.f32.xlu0 %v6790_v55 }
0x1b42   : > { %v6792_v6 = vpop.xlane.xlu0 %6791 }
0x1b43   : > { %v6800_v3 = vmul.f32 %v14131_v2, %v6792_v6 }
0x1b45   : > { %v6801_v21 = vsub.f32 %v14127_v26, %v6800_v3 }
0x1b47   : > { %v6802_v18 = vmul.f32 %v6801_v21, %v6801_v21 }
0x1b49   : > { %v6803_v31 = vsel %vm6789_vm1, %v6802_v18, 0.0 }
0x1b4a   : > { %6804 = vadd.xlane.f32.xlu2 %v6803_v31 }
0x1bbd   : > { %v6805_v62 = vpop.xlane.xlu2 %6804 }
0x1bbe   : > { %v6806_v5 = vmul.f32 %v6805_v62, %v14131_v2 }
0x1bc0   : > { %v6807_v48 = vadd.f32 1e-05, %v6806_v5 }
0x1bc2   : > { %9916 = vrsqrt.f32 %v6807_v48  ;;  %vm6814_vm4 = vweird.f32 %v6807_v48 }
0x1bc8   : > { %v9917_v22 = vpop.eup %9916 }
0x1bc9   : > { %v6809_v20 = vmul.f32 %v9917_v22, %v6807_v48  ;;  %vm6815_vm3 = vweird.f32 %v9917_v22 }
0x1bca   : > { %vm6816_vm6 = vmor %vm6814_vm4, %vm6815_vm3 }
0x1bcb   : > { %v6810_v17 = vmul.f32 %v9917_v22, %v6809_v20 }
0x1bcd   : > { %v6811_v8 = vmul.f32 0.5, %v6810_v17 }
0x1bcf   : > { %v6812_v27 = vsub.f32 1.5, %v6811_v8 }
0x1bd1   : > { %v6813_v11 = vmul.f32 %v9917_v22, %v6812_v27 }
0x1bd3   : > { %v6817_v10 = vsel %vm6816_vm6, %v9917_v22, %v6813_v11 }
0x1bd4   : > { %v6818_v37 = vmul.f32 %v6817_v10, %v6801_v21 }
0x1bd6   : > { %v6822_v49 = vmul.f32 %v9678_v54, %v6818_v37 }
0x1bd8   : > { %v6826_v15 = vadd.f32 %v9679_v50, %v6822_v49 }
0x1bda   : > { %8999 = vmatmul.msk.f32.vlgmr.msra.gmra.mxu3 %vm3645_vm12, %v6826_v15  ;;  %9000 = vmatmul.msk.f32.vlgmr.msrb.gmra.mxu0 %vm3645_vm12, %v6826_v15  ;;  %v2954_v15 = vld [vmem:[#allocation59 + $0x18] sm:$0xff] }
0x1bdb   : > { %7025 = vmatpush.msrb.mxu3 %v2954_v15 }
0x1bdd   : > { %7026 = vmatpush.msrb.mxu3 %v2953_v7 }
0x1c57   : > { %v6872_v36 = vpop.f32.mrf.mxu0 }
0x1c58   : > { %v14155_v42 = vadd.f32 %v6872_v36, %v6829_v16  ;;  %v2956_v16 = vld [vmem:[#allocation59 + $0x28] sm:$0xff] }
0x1c59   : > { %7138 = vmatpush.msra.mxu3 %v2956_v16 }
0x1c5a   : > { %9003 = vmatpush.msk.msrb.mxu2 %vm4137_vm13, %v14155_v42 }
0x1c5d   : > { %v6852_v52 = vpop.f32.mrf.mxu3 }
0x1c5e   : > { %v6853_v45 = vadd.f32 %v6852_v52, %v6828_v24  ;;  %v2955_v24 = vld [vmem:[#allocation59 + $0x20] sm:$0xff]  ;;  %v2958_v52 = vld [vmem:[#allocation59 + $0x38] sm:$0xff] }
0x1c5f   : > { %7139 = vmatpush.msra.mxu3 %v2955_v24 }
0x1c60   : > { %6876 = vrot.lane.b32.xlu0 %v6853_v45, %s14646_s11 }
0x1c68   : > { %7056 = vrot.lane.b32.xlu0 %v6853_v45, %s11732_s1 }
0x1c70   : > { %7054 = vrot.lane.b32.xlu0 %v6853_v45, %s14645_s16 }
0x1c78   : > { %7145 = vrot.lane.b32.xlu0 %v6853_v45, %s11727_s6 }
0x1cd2   : > { %v6877_v60 = vpop.permute.xlu0 %6876 }
0x1cd3   : > { %9001 = vmatpush.xpose.msk.msra.mxu1 %vm3200_vm0, %v6877_v60 }
0x1cd6   : > { %9002 = vmatmul.msk.f32.vlgmr.msra.gmra.mxu1 %vm3200_vm0, %v6853_v45 }
0x1cda   : > { %v7057_v55 = vpop.permute.xlu0 %7056 }
0x1ce2   : > { %v7055_v19 = vpop.permute.xlu0 %7054 }
0x1cea   : > { %v7146_v1 = vpop.permute.xlu0 %7145 }
0x1d53   : > { %v6899_v30 = vpop.f32.mrf.mxu1 }
0x1d54   : > { %v6902_v12 = vmul.f32 0.25, %v6899_v30 }
0x1d56   : > { %v6904_v28 = vsel %vm6903_vm7, %v6902_v12, -inf }
0x1d57   : > { %6905 = vmax.xlane.f32.xlu1 %v6904_v28  ;;  %v2957_v28 = vld [vmem:[#allocation59 + $0x30] sm:$0xff] }
0x1d70   : > { %6943 = vrot.lane.b32.xlu1 %v6853_v45, %s14797_s2  ;;  %s14798_s2 = smov 112  }
0x1d78   : > { %7147 = vrot.lane.b32.xlu1 %v6853_v45, %s11733_s0  ;;  %s14800_s0 = sld [smem:[#allocation147_spill]] }
0x1dca   : > { %v6906_v56 = vpop.xlane.xlu1 %6905 }
0x1dcb   : > { %v6907_v40 = vsub.f32 %v6902_v12, %v6906_v56 }
0x1dcd   : > { %v6908_v61 = vmul.f32 1.442695, %v6907_v40 }
0x1dcf   : > { %9918 = vpow2.f32 %v6908_v61 }
0x1dd5   : > { %v9919_v38 = vpop.eup %9918 }
0x1dd6   : > { %v6910_v0 = vsel %vm6903_vm7, %v9919_v38, 0.0 }
0x1dd7   : > { %6911 = vadd.xlane.f32.xlu2 %v6910_v0 }
0x1de2   : > { %v6944_v34 = vpop.permute.xlu1 %6943 }
0x1de3   : > { %9005 = vmatpush.xpose.msk.msrb.mxu1 %vm3200_vm0, %v6944_v34  ;;  %v9680_v34 = vld [vmem:[#allocation58] ss:$0 sm:$0xff] }
0x1de7   : > { %9011 = vmatpush.xpose.msk.msra.mxu1 %vm3200_vm0, %v7057_v55 }
0x1dea   : > { %v7148_v13 = vpop.permute.xlu1 %7147 }
0x1deb   : > { %9016 = vmatpush.xpose.msk.msrb.mxu0 %vm3200_vm0, %v7148_v13 }
0x1def   : > { %6941 = vrot.lane.b32.xlu2 %v6853_v45, %s14798_s2 }
0x1e4a   : > { %v6912_v63 = vpop.xlane.xlu2 %6911 }
0x1e4b   : > { %9920 = vrcp.f32 %v6912_v63 }
0x1e51   : > { %v9921_v44 = vpop.eup %9920 }
0x1e52   : > { %v6914_v51 = vmul.f32 %v9921_v44, %v9919_v38  ;;  %v6942_v33 = vpop.permute.xlu2 %6941 }
0x1e53   : > { %9006 = vmatmul.msk.f32.vlgmr.msrb.gmra.mxu1 %vm3200_vm0, %v6942_v33 }
0x1e54   : > { %9004 = vmatmul.msk.f32.vlgmr.msrb.gmra.mxu2 %vm3563_vm11, %v6914_v51 }
0x1e5b   : > { %9012 = vmatmul.msk.f32.vlgmr.msra.gmra.mxu1 %vm3200_vm0, %v7055_v19 }
0x1ed0   : > { %v6966_v6 = vpop.f32.mrf.mxu1 }
0x1ed1   : > { %v6969_v3 = vmul.f32 0.25, %v6966_v6 }
0x1ed3   : > { %v6970_v21 = vsel %vm6903_vm7, %v6969_v3, -inf }
0x1ed4   : > { %6971 = vmax.xlane.f32.xlu2 %v6970_v21 }
0x1ed7   : > { %v6938_v18 = vpop.f32.mrf.mxu2 }
0x1ed8   : > { %9010 = vmatmul.msk.f32.vlgmr.msra.gmra.mxu0 %vm3200_vm0, %v6938_v18  ;;  %v7079_v31 = vpop.f32.mrf.mxu1 }
0x1ed9   : > { %v7082_v23 = vmul.f32 0.25, %v7079_v31 }
0x1edb   : > { %v7083_v32 = vsel %vm6903_vm7, %v7082_v23, -inf }
0x1edc   : > { %7084 = vmax.xlane.f32.xlu1 %v7083_v32 }
0x1ee0   : > { %9017 = vmatmul.msk.f32.vlgmr.msrb.gmra.mxu0 %vm3200_vm0, %v7146_v1 }
0x1f47   : > { %v6972_v4 = vpop.xlane.xlu2 %6971 }
0x1f48   : > { %v6973_v47 = vsub.f32 %v6969_v3, %v6972_v4 }
0x1f4a   : > { %v6974_v43 = vmul.f32 1.442695, %v6973_v47 }
0x1f4c   : > { %9922 = vpow2.f32 %v6974_v43 }
0x1f4f   : > { %v7085_v46 = vpop.xlane.xlu1 %7084 }
0x1f50   : > { %v7086_v9 = vsub.f32 %v7082_v23, %v7085_v46 }
0x1f52   : > { %v9923_v29 = vpop.eup %9922  ;;  %v7087_v59 = vmul.f32 1.442695, %v7086_v9 }
0x1f53   : > { %v6976_v53 = vsel %vm6903_vm7, %v9923_v29, 0.0 }
0x1f54   : > { %9924 = vpow2.f32 %v7087_v59  ;;  %6977 = vadd.xlane.f32.xlu2 %v6976_v53 }
0x1f55   : > { %v7051_v35 = vpop.f32.mrf.mxu0 }
0x1f5a   : > { %v9925_v57 = vpop.eup %9924 }
0x1f5b   : > { %v7089_v39 = vsel %vm6903_vm7, %v9925_v57, 0.0 }
0x1f5c   : > { %7090 = vadd.xlane.f32.xlu1 %v7089_v39 }
0x1f5d   : > { %v7170_v58 = vpop.f32.mrf.mxu0 }
0x1f5e   : > { %v7173_v25 = vmul.f32 0.25, %v7170_v58 }
0x1f60   : > { %v7174_v62 = vsel %vm6903_vm7, %v7173_v25, -inf }
0x1f61   : > { %7175 = vmax.xlane.f32.xlu0 %v7174_v62 }
0x1f75   : > { %7094 = vrot.lane.b32.xlu1 %v14155_v42, %s14645_s16  ;;  %6981 = vrot.lane.b32.xlu0 %v14155_v42, %s14798_s2  ;;  %s14801_s16 = smov %s14800_s0  ;;  %s14802_s2 = sld [smem:[#allocation160_spill]] }
0x1f76   : > { %v2943_v39 = vld [vmem:[%s14801_s16 + $0xe8] sm:$0xff]  ;;  %v2942_v15 = vld [vmem:[%s14801_s16 + $0xe0] sm:$0xff]  ;;  %v2928_v7 = vld [vmem:[%s14801_s16 + $0x70] sm:$0xff] }
0x1f77   : > { %v2941_v16 = vld [vmem:[%s14801_s16 + $0xd8] sm:$0xff]  ;;  %v2940_v24 = vld [vmem:[%s14801_s16 + $0xd0] sm:$0xff] }
0x1f7b   : > { %s14803_s11 = smov %s14802_s2 }
0x1fc7   : > { %v6978_v20 = vpop.xlane.xlu2 %6977 }
0x1fcf   : > { %v7091_v8 = vpop.xlane.xlu1 %7090 }
0x1fd4   : > { %v7176_v5 = vpop.xlane.xlu0 %7175 }
0x1fd5   : > { %v7177_v48 = vsub.f32 %v7173_v25, %v7176_v5 }
0x1fd7   : > { %v7178_v22 = vmul.f32 1.442695, %v7177_v48 }
0x1fd9   : > { %9926 = vpow2.f32 %v7178_v22 }
0x1fda   : > { %9928 = vrcp.f32 %v6978_v20 }
0x1fdb   : > { %9930 = vrcp.f32 %v7091_v8 }
0x1fdf   : > { %v9927_v17 = vpop.eup %9926 }
0x1fe0   : > { %v7180_v27 = vsel %vm6903_vm7, %v9927_v17, 0.0  ;;  %v9929_v11 = vpop.eup %9928 }
0x1fe1   : > { %7181 = vadd.xlane.f32.xlu2 %v7180_v27  ;;  %v6980_v54 = vmul.f32 %v9929_v11, %v9923_v29  ;;  %v9931_v37 = vpop.eup %9930  ;;  %v9681_v27 = vld [vmem:[#allocation56] ss:$0 sm:$0xff] }
0x1fe2   : > { %v7093_v49 = vmul.f32 %v9931_v37, %v9925_v57  ;;  %v2944_v57 = vld [vmem:[%s14801_s16 + $0xf0] sm:$0xff] }
0x1fe7   : > { %v7095_v10 = vpop.permute.xlu1 %7094  ;;  %v6982_v50 = vpop.permute.xlu0 %6981 }
0x1fe8   : > { %9007 = vmatpush.msk.msra.mxu2 %vm4137_vm13, %v6982_v50 }
0x1fe9   : > { %9008 = vmatmul.msk.f32.vlgmr.msra.gmra.mxu2 %vm3563_vm11, %v6980_v54  ;;  %v9682_v54 = vld [vmem:[#allocation55] ss:$0 sm:$0xff] }
0x1fea   : > { %9013 = vmatpush.msk.msrb.mxu2 %vm4137_vm13, %v7095_v10 }
0x1fec   : > { %7229 = vmatpush.msra.mxu2 %v2958_v52  ;;  %v2926_v52 = vld [vmem:[%s14801_s16 + $0x60] sm:$0xff] }
0x1fee   : > { %7230 = vmatpush.msra.mxu2 %v2957_v28  ;;  %v2923_v28 = vld [vmem:[%s14801_s16 + $0x48] sm:$0xff] }
0x1ff1   : > { %9014 = vmatmul.msk.f32.vlgmr.msrb.gmra.mxu2 %vm3563_vm11, %v7093_v49  ;;  %v2929_v49 = vld [vmem:[%s14801_s16 + $0x78] sm:$0xff] }
0x1ff9   : > { %7185 = vrot.lane.b32.xlu2 %v14155_v42, %s11727_s6  ;;  %s14799_s6 = sld [smem:[#allocation145_spill]] }
0x1fff   : > { %v2912_v3 = vld [vmem:[%s14799_s6 + $0x78] sm:$0xff]  ;;  %v2909_v21 = vld [vmem:[%s14799_s6 + $0x60] sm:$0xff]  ;;  %v2910_v18 = vld [vmem:[%s14799_s6 + $0x68] sm:$0xff] }
0x2000   : > { %7307 = vmatpush.msra.mxu0 %v2912_v3  ;;  %v2907_v31 = vld [vmem:[%s14799_s6 + $0x50] sm:$0xff]  ;;  %v2908_v23 = vld [vmem:[%s14799_s6 + $0x58] sm:$0xff]  ;;  %v2905_v32 = vld [vmem:[%s14799_s6 + $0x40] sm:$0xff] }
0x2001   : > { %v2906_v1 = vld [vmem:[%s14799_s6 + $0x48] sm:$0xff]  ;;  %v2903_v4 = vld [vmem:[%s14799_s6 + $0x30] sm:$0xff]  ;;  %v2904_v47 = vld [vmem:[%s14799_s6 + $0x38] sm:$0xff] }
0x2002   : > { %7308 = vmatpush.msra.mxu0 %v2910_v18  ;;  %v2901_v43 = vld [vmem:[%s14799_s6 + $0x20] sm:$0xff]  ;;  %v2902_v46 = vld [vmem:[%s14799_s6 + $0x28] sm:$0xff]  ;;  %v2899_v9 = vld [vmem:[%s14799_s6 + $0x10] sm:$0xff] }
0x2003   : > { %v2900_v29 = vld [vmem:[%s14799_s6 + $0x18] sm:$0xff]  ;;  %v2897_v59 = vld [vmem:[%s14799_s6] sm:$0xff]  ;;  %v2898_v53 = vld [vmem:[%s14799_s6 + $0x8] sm:$0xff] }
0x2004   : > { %7309 = vmatpush.msra.mxu0 %v2908_v23  ;;  %v2915_v3 = vld [vmem:[%s14801_s16 + $0x8] sm:$0xff] }
0x2006   : > { %7310 = vmatpush.msra.mxu0 %v2906_v1 }
0x2008   : > { %7311 = vmatpush.msra.mxu0 %v2904_v47 }
0x200a   : > { %7312 = vmatpush.msra.mxu0 %v2902_v46 }
0x200c   : > { %7313 = vmatpush.msra.mxu0 %v2900_v29 }
0x200e   : > { %7314 = vmatpush.msra.mxu0 %v2898_v53 }
0x2054   : > { %v7182_v36 = vpop.xlane.xlu2 %7181 }
0x2055   : > { %9932 = vrcp.f32 %v7182_v36  ;;  %v2927_v36 = vld [vmem:[%s14801_s16 + $0x68] sm:$0xff] }
0x205b   : > { %v9933_v45 = vpop.eup %9932 }
0x205c   : > { %v7184_v60 = vmul.f32 %v9933_v45, %v9927_v17  ;;  %v7186_v30 = vpop.permute.xlu2 %7185  ;;  %v2939_v45 = vld [vmem:[%s14801_s16 + $0xc8] sm:$0xff] }
0x205d   : > { %9018 = vmatpush.msk.msrb.mxu1 %vm4137_vm13, %v7186_v30  ;;  %v2938_v30 = vld [vmem:[%s14801_s16 + $0xc0] sm:$0xff] }
0x205e   : > { %9019 = vmatmul.msk.f32.vlgmr.msrb.gmra.mxu1 %vm3563_vm11, %v7184_v60  ;;  %v2925_v60 = vld [vmem:[%s14801_s16 + $0x58] sm:$0xff] }
0x205f   : > { %7340 = vmatpush.msra.mxu1 %v2929_v49  ;;  %v2987_v49 = vld [vmem:[#allocation67 + $0x2] sm:$0x1] }
0x2061   : > { %7341 = vmatpush.msra.mxu1 %v2928_v7 }
0x2063   : > { %7342 = vmatpush.msra.mxu1 %v2927_v36 }
0x2065   : > { %7343 = vmatpush.msra.mxu1 %v2926_v52 }
0x2067   : > { %7344 = vmatpush.msra.mxu1 %v2925_v60 }
0x206c   : > { %v7005_v42 = vpop.f32.mrf.mxu2 }
0x206d   : > { %9009 = vmatmul.msk.f32.vlgmr.msrb.gmra.mxu3 %vm3200_vm0, %v7005_v42  ;;  %v2924_v42 = vld [vmem:[%s14801_s16 + $0x50] sm:$0xff] }
0x206e   : > { %7345 = vmatpush.msra.mxu1 %v2924_v42 }
0x2070   : > { %7346 = vmatpush.msra.mxu1 %v2923_v28 }
0x2074   : > { %v7118_v12 = vpop.f32.mrf.mxu2 }
0x2075   : > { %9015 = vmatmul.msk.f32.vlgmr.msra.gmra.mxu3 %vm3200_vm0, %v7118_v12  ;;  %v2937_v12 = vld [vmem:[%s14801_s16 + $0xb8] sm:$0xff] }
0x20db   : > { %v7209_v41 = vpop.f32.mrf.mxu1 }
0x20dc   : > { %9020 = vmatmul.msk.f32.vlgmr.msra.gmra.mxu2 %vm3200_vm0, %v7209_v41  ;;  %v2936_v41 = vld [vmem:[%s14801_s16 + $0xb0] sm:$0xff] }
0x20f0   : > { %v7028_v14 = vpop.f32.mrf.mxu3 }
0x20f1   : > { %v7052_v40 = vadd.f32 %v7051_v35, %v7028_v14  ;;  %v2945_v35 = vld [vmem:[%s14800_s0 + $0xf8] sm:$0xff]  ;;  %v2922_v14 = vld [vmem:[%s14801_s16 + $0x40] sm:$0xff]  ;;  %s14804_s0 = smov 64  }
0x20f2   : > { %7360 = vmatpush.msrb.mxu2 %v2945_v35  ;;  %7347 = vmatpush.msra.mxu1 %v2922_v14 }
0x20f4   : > { %7361 = vmatpush.msrb.mxu2 %v2944_v57 }
0x20f6   : > { %7362 = vmatpush.msrb.mxu2 %v2943_v39 }
0x20f8   : > { %v7141_v56 = vpop.f32.mrf.mxu3  ;;  %7363 = vmatpush.msrb.mxu2 %v2942_v15  ;;  %v2988_v15 = vld [vmem:[#allocation67 + $0x3] sm:$0x1] }
0x20f9   : > { %v7144_v61 = vadd.f32 %v7141_v56, %v7052_v40  ;;  %v2935_v56 = vld [vmem:[%s14801_s16 + $0xa8] sm:$0xff]  ;;  %v2921_v40 = vld [vmem:[%s14801_s16 + $0x38] sm:$0xff] }
0x20fa   : > { %7364 = vmatpush.msrb.mxu2 %v2941_v16  ;;  %7348 = vmatpush.msra.mxu1 %v2921_v40 }
0x20fc   : > { %7365 = vmatpush.msrb.mxu2 %v2940_v24 }
0x20fe   : > { %7366 = vmatpush.msrb.mxu2 %v2939_v45 }
0x2100   : > { %7367 = vmatpush.msrb.mxu2 %v2938_v30 }
0x2102   : > { %7368 = vmatpush.msrb.mxu2 %v2937_v12 }
0x2104   : > { %7369 = vmatpush.msrb.mxu2 %v2936_v41 }
0x2106   : > { %7370 = vmatpush.msrb.mxu2 %v2935_v56 }
0x215f   : > { %v7232_v38 = vpop.f32.mrf.mxu2 }
0x2160   : > { %v7235_v0 = vadd.f32 %v7232_v38, %v7144_v61  ;;  %v2934_v61 = vld [vmem:[%s14801_s16 + $0xa0] sm:$0xff]  ;;  %v2920_v38 = vld [vmem:[%s14801_s16 + $0x30] sm:$0xff] }
0x2161   : > { %7371 = vmatpush.msrb.mxu2 %v2934_v61  ;;  %7349 = vmatpush.msra.mxu1 %v2920_v38  ;;  %v2996_v61 = vld [vmem:[%s14802_s2 + $0x38] sm:$0xff]  ;;  %s14805_s2 = smov 96  }
0x2162   : > { %v7236_v55 = vadd.f32 %v7235_v0, %v14127_v26  ;;  %v2911_v26 = vld [vmem:[%s14799_s6 + $0x70] sm:$0xff]  ;;  %v2933_v0 = vld [vmem:[%s14801_s16 + $0x98] sm:$0xff] }
0x2163   : > { %7287 = vmatpush.msrb.mxu3 %v2911_v26  ;;  %7372 = vmatpush.msrb.mxu2 %v2933_v0  ;;  %v3004_v38 = vld [vmem:[%s14803_s11 + $0x78] sm:$0xff] }
0x2164   : > { %v14199_v13 = vadd.f32 %v9680_v34, %v7236_v55  ;;  %v2919_v34 = vld [vmem:[%s14801_s16 + $0x28] sm:$0xff]  ;;  %v2932_v55 = vld [vmem:[%s14801_s16 + $0x90] sm:$0xff]  ;;  %v3012_v0 = vld [vmem:[%s14803_s11 + $0xb8] sm:$0xff] }
0x2165   : > { %7288 = vmatpush.msrb.mxu3 %v2909_v21  ;;  %7350 = vmatpush.msra.mxu1 %v2919_v34  ;;  %v2914_v21 = vld [vmem:[%s14801_s16] sm:$0xff]  ;;  %v3020_v34 = vld [vmem:[%s14803_s11 + $0xf8] sm:$0xff] }
0x2166   : > { %v7241_v63 = vsel %vm6789_vm1, %v14199_v13, 0.0  ;;  %7373 = vmatpush.msrb.mxu2 %v2932_v55  ;;  %v2995_v55 = vld [vmem:[%s14803_s11 + $0x30] sm:$0xff] }
0x2167   : > { %7242 = vadd.xlane.f32.xlu0 %v7241_v63  ;;  %7289 = vmatpush.msrb.mxu3 %v2907_v31  ;;  %v2918_v63 = vld [vmem:[%s14801_s16 + $0x20] sm:$0xff] }
0x2168   : > { %7351 = vmatpush.msra.mxu1 %v2918_v63  ;;  %v3003_v63 = vld [vmem:[%s14803_s11 + $0x70] sm:$0xff] }
0x2169   : > { %7290 = vmatpush.msrb.mxu3 %v2905_v32 }
0x216b   : > { %7291 = vmatpush.msrb.mxu3 %v2903_v4 }
0x216d   : > { %7292 = vmatpush.msrb.mxu3 %v2901_v43 }
0x216f   : > { %7293 = vmatpush.msrb.mxu3 %v2899_v9 }
0x2171   : > { %7294 = vmatpush.msrb.mxu3 %v2897_v59 }
0x21da   : > { %v7243_v44 = vpop.xlane.xlu0 %7242 }
0x21db   : > { %v7244_v51 = vmul.f32 %v7243_v44, %v14131_v2  ;;  %v2931_v44 = vld [vmem:[%s14801_s16 + $0x88] sm:$0xff] }
0x21dc   : > { %7374 = vmatpush.msrb.mxu2 %v2931_v44  ;;  %v3011_v44 = vld [vmem:[%s14803_s11 + $0xb0] sm:$0xff] }
0x21dd   : > { %v7245_v33 = vsub.f32 %v14199_v13, %v7244_v51  ;;  %v2917_v51 = vld [vmem:[%s14801_s16 + $0x18] sm:$0xff] }
0x21de   : > { %7352 = vmatpush.msra.mxu1 %v2917_v51  ;;  %v3019_v51 = vld [vmem:[%s14803_s11 + $0xf0] sm:$0xff] }
0x21df   : > { %v7246_v19 = vmul.f32 %v7245_v33, %v7245_v33 }
0x21e1   : > { %v7247_v6 = vsel %vm6789_vm1, %v7246_v19, 0.0  ;;  %v2896_v19 = vld [vmem:[#allocation49] sm:$0x3] }
0x21e2   : > { %7248 = vadd.xlane.f32.xlu1 %v7247_v6  ;;  %v2916_v6 = vld [vmem:[%s14801_s16 + $0x10] sm:$0xff]  ;;  %v7273_v26 = vperm.slane %v2896_v19, 1  ;;  %v7272_v32 = vperm.slane %v2896_v19, 0  ;;  %v3002_v19 = vld [vmem:[%s14803_s11 + $0x68] sm:$0xff] }
0x21e3   : > { %7353 = vmatpush.msra.mxu1 %v2916_v6  ;;  %v3010_v6 = vld [vmem:[%s14803_s11 + $0xa8] sm:$0xff] }
0x21e5   : > { %7354 = vmatpush.msra.mxu1 %v2915_v3  ;;  %v2993_v3 = vld [vmem:[%s14803_s11 + $0x20] sm:$0xff] }
0x21e7   : > { %7355 = vmatpush.msra.mxu1 %v2914_v21  ;;  %v3001_v21 = vld [vmem:[%s14803_s11 + $0x60] sm:$0xff] }
0x21e9   : > { %7581 = vmatpush.msrb.mxu1 %v3012_v0  ;;  %v2979_v0 = vld [vmem:[#allocation64 + $0x2] sm:$0x1] }
0x21eb   : > { %7582 = vmatpush.msrb.mxu1 %v3011_v44 }
0x21ed   : > { %7583 = vmatpush.msrb.mxu1 %v3010_v6 }
0x2255   : > { %v7249_v58 = vpop.xlane.xlu1 %7248 }
0x2256   : > { %v7250_v25 = vmul.f32 %v7249_v58, %v14131_v2 }
0x2258   : > { %v7251_v62 = vadd.f32 1e-05, %v7250_v25 }
0x225a   : > { %9934 = vrsqrt.f32 %v7251_v62  ;;  %vm7258_vm8 = vweird.f32 %v7251_v62 }
0x2260   : > { %v9935_v5 = vpop.eup %9934 }
0x2261   : > { %v7253_v48 = vmul.f32 %v9935_v5, %v7251_v62  ;;  %vm7259_vm0 = vweird.f32 %v9935_v5 }
0x2262   : > { %vm7260_vm9 = vmor %vm7258_vm8, %vm7259_vm0 }
0x2263   : > { %v7254_v22 = vmul.f32 %v9935_v5, %v7253_v48 }
0x2265   : > { %v7255_v20 = vmul.f32 0.5, %v7254_v22 }
0x2267   : > { %v7256_v17 = vsub.f32 1.5, %v7255_v20 }
0x2269   : > { %v7257_v8 = vmul.f32 %v9935_v5, %v7256_v17  ;;  %v9683_v17 = vld [vmem:[#allocation50] ss:$0 sm:$0xff] }
0x226b   : > { %v7261_v11 = vsel %vm7260_vm9, %v9935_v5, %v7257_v8 }
0x226c   : > { %v7262_v10 = vmul.f32 %v7261_v11, %v7245_v33  ;;  %v2930_v33 = vld [vmem:[%s14801_s16 + $0x80] sm:$0xff] }
0x226d   : > { %7375 = vmatpush.msrb.mxu2 %v2930_v33  ;;  %v2994_v33 = vld [vmem:[%s14803_s11 + $0x28] sm:$0xff] }
0x226e   : > { %v7266_v50 = vmul.f32 %v9681_v27, %v7262_v10 }
0x226f   : > { %7609 = vmatpush.msra.mxu2 %v3020_v34 }
0x2270   : > { %v7270_v37 = vadd.f32 %v9682_v54, %v7266_v50  ;;  %v2985_v50 = vld [vmem:[#allocation67] sm:$0x1] }
0x2271   : > { %7610 = vmatpush.msra.mxu2 %v3019_v51 }
0x2272   : > { %9021 = vmatmul.msk.f32.vlgmr.msrb.gmra.mxu3 %vm3645_vm12, %v7270_v37  ;;  %9022 = vmatmul.msk.f32.vlgmr.msra.gmra.mxu0 %vm3645_vm12, %v7270_v37  ;;  %v2986_v37 = vld [vmem:[#allocation67 + $0x1] sm:$0x1] }
0x22ef   : > { %v7316_v18 = vpop.f32.mrf.mxu0 }
0x22f0   : > { %v7317_v31 = vadd.f32 %v7316_v18, %v7273_v26  ;;  %v3018_v26 = vld [vmem:[%s14803_s11 + $0xe8] sm:$0xff]  ;;  %v3009_v18 = vld [vmem:[%s14803_s11 + $0xa0] sm:$0xff] }
0x22f1   : > { %7611 = vmatpush.msra.mxu2 %v3018_v26  ;;  %7584 = vmatpush.msrb.mxu1 %v3009_v18 }
0x22f2   : > { %v7320_v23 = vmul.f32 %v7317_v31, %v7317_v31 }
0x22f4   : > { %v7322_v1 = vmul.f32 %v7320_v23, %v7317_v31  ;;  %v2992_v23 = vld [vmem:[%s14803_s11 + $0x18] sm:$0xff] }
0x22f5   : > { %v7296_v4 = vpop.f32.mrf.mxu3 }
0x22f6   : > { %v7324_v47 = vmul.f32 0.044715, %v7322_v1  ;;  %v7297_v43 = vadd.f32 %v7296_v4, %v7272_v32  ;;  %v3000_v32 = vld [vmem:[%s14803_s11 + $0x58] sm:$0xff] }
0x22f7   : > { %v3008_v1 = vld [vmem:[%s14803_s11 + $0x98] sm:$0xff] }
0x22f8   : > { %v7326_v46 = vadd.f32 %v7324_v47, %v7317_v31  ;;  %v7319_v9 = vmul.f32 %v7297_v43, %v7297_v43  ;;  %v3016_v4 = vld [vmem:[%s14803_s11 + $0xd8] sm:$0xff]  ;;  %7585 = vmatpush.msrb.mxu1 %v3008_v1  ;;  %v2991_v47 = vld [vmem:[%s14803_s11 + $0x10] sm:$0xff]  ;;  %v11734_v1 = vmov 128.0  }
0x22fa   : > { %v7328_v29 = vmul.f32 0.7978846, %v7326_v46  ;;  %v7321_v59 = vmul.f32 %v7319_v9, %v7297_v43  ;;  %v3007_v46 = vld [vmem:[%s14803_s11 + $0x90] sm:$0xff] }
0x22fb   : > { %v3015_v9 = vld [vmem:[%s14803_s11 + $0xd0] sm:$0xff]  ;;  %7586 = vmatpush.msrb.mxu1 %v3007_v46 }
0x22fc   : > { %9936 = vtanh.f32 %v7328_v29  ;;  %v7323_v53 = vmul.f32 0.044715, %v7321_v59  ;;  %v2990_v59 = vld [vmem:[%s14803_s11 + $0x8] sm:$0xff] }
0x22fe   : > { %v7325_v35 = vadd.f32 %v7323_v53, %v7297_v43  ;;  %v2998_v53 = vld [vmem:[%s14803_s11 + $0x48] sm:$0xff] }
0x2300   : > { %v7327_v57 = vmul.f32 0.7978846, %v7325_v35  ;;  %v3006_v35 = vld [vmem:[%s14803_s11 + $0x88] sm:$0xff] }
0x2301   : > { %7587 = vmatpush.msrb.mxu1 %v3006_v35 }
0x2302   : > { %v9937_v39 = vpop.eup %9936  ;;  %9938 = vtanh.f32 %v7327_v57 }
0x2303   : > { %v7332_v58 = vadd.f32 1.0, %v9937_v39  ;;  %v3014_v39 = vld [vmem:[%s14803_s11 + $0xc8] sm:$0xff] }
0x2305   : > { %v7334_v25 = vmul.f32 0.5, %v7332_v58  ;;  %v2989_v58 = vld [vmem:[%s14803_s11] sm:$0xff] }
0x2307   : > { %v7336_v62 = vmul.f32 %v7334_v25, %v7317_v31  ;;  %v3017_v31 = vld [vmem:[%s14803_s11 + $0xe0] sm:$0xff] }
0x2308   : > { %v9939_v5 = vpop.eup %9938  ;;  %7612 = vmatpush.msra.mxu2 %v3017_v31  ;;  %v2997_v25 = vld [vmem:[%s14803_s11 + $0x40] sm:$0xff] }
0x2309   : > { %v7331_v48 = vadd.f32 1.0, %v9939_v5  ;;  %7376 = vmatmul.f32.vlgmr.msrb.gmra.mxu2 %v7336_v62  ;;  %v3005_v5 = vld [vmem:[%s14803_s11 + $0x80] sm:$0xff] }
0x230a   : > { %7613 = vmatpush.msra.mxu2 %v3016_v4  ;;  %7588 = vmatpush.msrb.mxu1 %v3005_v5  ;;  %v3188_v4 = vld [vmem:[%s12078_s13 + $0x178] sm:$0xff]  ;;  %v3185_v5 = vld [vmem:[%s12078_s13 + $0x130] sm:$0xff] }
0x230b   : > { %v7333_v22 = vmul.f32 0.5, %v7331_v48  ;;  %v3013_v48 = vld [vmem:[%s14803_s11 + $0xc0] sm:$0xff] }
0x230c   : > { %7614 = vmatpush.msra.mxu2 %v3015_v9 }
0x230d   : > { %v7335_v20 = vmul.f32 %v7333_v22, %v7297_v43  ;;  %v2999_v43 = vld [vmem:[%s14803_s11 + $0x50] sm:$0xff] }
0x230e   : > { %7615 = vmatpush.msra.mxu2 %v3014_v39 }
0x230f   : > { %7356 = vmatmul.f32.vlgmr.msra.gmra.mxu1 %v7335_v20 }
0x2310   : > { %7616 = vmatpush.msra.mxu2 %v3013_v48  ;;  %v3184_v48 = vld [vmem:[%s12078_s13 + $0x118] sm:$0xff] }
0x238c   : > { %v7357_v8 = vpop.f32.mrf.mxu1  ;;  %v7377_v11 = vpop.f32.mrf.mxu2 }
0x238d   : > { %v7358_v27 = vadd.f32 %v9683_v17, %v7357_v8 }
0x238f   : > { %v7378_v54 = vadd.f32 %v7377_v11, %v7358_v27 }
0x2391   : > { %v7380_v10 = vadd.f32 %v7378_v54, %v14199_v13 }
0x2393   : > { %9023 = vmatpush.msk.msra.mxu3 %vm4137_vm13, %v7380_v10  ;;  %9025 = vmatpush.msk.msrb.mxu0 %vm4137_vm13, %v7380_v10 }
0x2394   : > { %9024 = vmatmul.msk.f32.vlgmr.msra.gmra.mxu3 %vm3563_vm11, %v2985_v50  ;;  %9026 = vmatmul.msk.f32.vlgmr.msrb.gmra.mxu0 %vm3563_vm11, %v2986_v37 }
0x2395   : > { %9029 = vmatpush.msk.msra.mxu0 %vm4137_vm13, %v7380_v10  ;;  %9027 = vmatpush.msk.msrb.mxu3 %vm4137_vm13, %v7380_v10 }
0x2397   : > { %7525 = vmatpush.msra.mxu3 %v2996_v61  ;;  %7553 = vmatpush.msrb.mxu0 %v3004_v38  ;;  %v2977_v61 = vld [vmem:[#allocation64] sm:$0x1]  ;;  %v2978_v38 = vld [vmem:[#allocation64 + $0x1] sm:$0x1] }
0x2399   : > { %7526 = vmatpush.msra.mxu3 %v2995_v55  ;;  %7554 = vmatpush.msrb.mxu0 %v3003_v63 }
0x239b   : > { %7527 = vmatpush.msra.mxu3 %v2994_v33  ;;  %7555 = vmatpush.msrb.mxu0 %v3002_v19  ;;  %v2976_v33 = vld [vmem:[#allocation62] sm:$0x1] }
0x239c   : > { %9028 = vmatmul.msk.f32.vlgmr.msrb.gmra.mxu3 %vm3563_vm11, %v2987_v49  ;;  %9030 = vmatmul.msk.f32.vlgmr.msra.gmra.mxu0 %vm3563_vm11, %v2988_v15  ;;  %vm7479_vm11 = vcmask 516096  }
0x239d   : > { %7528 = vmatpush.msra.mxu3 %v2993_v3  ;;  %7556 = vmatpush.msrb.mxu0 %v3001_v21 }
0x239f   : > { %7529 = vmatpush.msra.mxu3 %v2992_v23  ;;  %7557 = vmatpush.msrb.mxu0 %v3000_v32 }
0x23a1   : > { %7530 = vmatpush.msra.mxu3 %v2991_v47  ;;  %7558 = vmatpush.msrb.mxu0 %v2999_v43  ;;  %v3187_v47 = vld [vmem:[%s12078_s13 + $0x160] sm:$0xff] }
0x23a3   : > { %7531 = vmatpush.msra.mxu3 %v2990_v59  ;;  %7559 = vmatpush.msrb.mxu0 %v2998_v53 }
0x23a5   : > { %7532 = vmatpush.msra.mxu3 %v2989_v58  ;;  %7560 = vmatpush.msrb.mxu0 %v2997_v25 }
0x23a7   : > { %7657 = vmatpush.msrb.mxu3 %v3188_v4 }
0x23a9   : > { %7658 = vmatpush.msrb.mxu3 %v3187_v47 }
0x2411   : > { %v14266_v13 = vpop.f32.mrf.mxu0 }
0x2412   : > { %v7486_v36 = vmul.f32 %v14266_v13, %v14266_v13 }
0x2417   : > { %v14268_v7 = vpop.f32.mrf.mxu3 }
0x2418   : > { %v7485_v16 = vmul.f32 %v14268_v7, %v14268_v7  ;;  %v7476_v52 = vadd.f32 %v14266_v13, %v14268_v7 }
0x2419   : > { %v14274_v24 = vpop.f32.mrf.mxu0 }
0x241a   : > { %v7487_v60 = vadd.f32 %v7486_v36, %v7485_v16  ;;  %v7490_v12 = vmul.f32 %v14274_v24, %v14274_v24 }
0x241f   : > { %v14278_v45 = vpop.f32.mrf.mxu3 }
0x2420   : > { %v7477_v30 = vadd.f32 %v7476_v52, %v14278_v45  ;;  %v7488_v42 = vmul.f32 %v14278_v45, %v14278_v45 }
0x2422   : > { %v7489_v28 = vadd.f32 %v7488_v42, %v7487_v60  ;;  %v7478_v41 = vadd.f32 %v7477_v30, %v14274_v24  ;;  %v2981_v60 = vld [vmem:[#allocation65] sm:$0x1]  ;;  %v2982_v30 = vld [vmem:[#allocation65 + $0x1] sm:$0x1]  ;;  %v2983_v42 = vld [vmem:[#allocation65 + $0x2] sm:$0x1] }
0x2424   : > { %v7480_v14 = vsel %vm7479_vm11, %v7478_v41, 0.0  ;;  %v7491_v56 = vadd.f32 %v7490_v12, %v7489_v28  ;;  %v2984_v12 = vld [vmem:[#allocation65 + $0x3] sm:$0x1] }
0x2425   : > { %7481 = vadd.xlane.f32.xlu2 %v7480_v14 }
0x2426   : > { %v7492_v40 = vsel %vm7479_vm11, %v7491_v56, 0.0 }
0x2427   : > { %7493 = vadd.xlane.f32.xlu0 %v7492_v40 }
0x2498   : > { %v7482_v29 = vpop.xlane.xlu2 %7481 }
0x2499   : > { %v7483_v57 = vmul.f32 %v7482_v29, %v14131_v2 }
0x249a   : > { %v7494_v62 = vpop.xlane.xlu0 %7493 }
0x249b   : > { %v7484_v22 = vmul.f32 0.25, %v7483_v57  ;;  %v7495_v20 = vmul.f32 %v7494_v62, %v14131_v2  ;;  %v3186_v62 = vld [vmem:[%s12078_s13 + $0x148] sm:$0xff] }
0x249c   : > { %7659 = vmatpush.msrb.mxu3 %v3186_v62 }
0x249d   : > { %v7496_v17 = vmul.f32 0.25, %v7495_v20  ;;  %v7497_v8 = vmul.f32 %v7484_v22, %v7484_v22  ;;  %v7510_v16 = vsub.f32 %v14268_v7, %v7484_v22  ;;  %v7538_v2 = vsub.f32 %v14266_v13, %v7484_v22  ;;  %v2980_v7 = vld [vmem:[#allocation64 + $0x3] sm:$0x1]  ;;  %v3182_v20 = vld [vmem:[%s12078_s13 + $0xe8] sm:$0xff] }
0x249e   : > { %v7566_v36 = vsub.f32 %v14278_v45, %v7484_v22  ;;  %v7594_v52 = vsub.f32 %v14274_v24, %v7484_v22  ;;  %7660 = vmatpush.msrb.mxu3 %v3185_v5  ;;  %v3183_v22 = vld [vmem:[%s12078_s13 + $0x100] sm:$0xff] }
0x249f   : > { %v7498_v27 = vsub.f32 %v7496_v17, %v7497_v8  ;;  %v3181_v17 = vld [vmem:[%s12078_s13 + $0xd0] sm:$0xff]  ;;  %v3180_v8 = vld [vmem:[%s12078_s13 + $0xb8] sm:$0xff] }
0x24a0   : > { %7661 = vmatpush.msrb.mxu3 %v3184_v48 }
0x24a1   : > { %v7499_v11 = vadd.f32 1e-05, %v7498_v27  ;;  %v3179_v27 = vld [vmem:[%s12078_s13 + $0xa0] sm:$0xff] }
0x24a2   : > { %7662 = vmatpush.msrb.mxu3 %v3183_v22 }
0x24a3   : > { %9940 = vrsqrt.f32 %v7499_v11  ;;  %vm7506_vm10 = vweird.f32 %v7499_v11 }
0x24a4   : > { %9942 = vrcp.f32 %v11734_v1  ;;  %7663 = vmatpush.msrb.mxu3 %v3182_v20 }
0x24a6   : > { %7664 = vmatpush.msrb.mxu3 %v3181_v17 }
0x24a8   : > { %7665 = vmatpush.msrb.mxu3 %v3180_v8 }
0x24a9   : > { %v9941_v54 = vpop.eup %9940 }
0x24aa   : > { %v7501_v10 = vmul.f32 %v9941_v54, %v7499_v11  ;;  %vm7507_vm13 = vweird.f32 %v9941_v54  ;;  %v9943_v43 = vpop.eup %9942  ;;  %7666 = vmatpush.msrb.mxu3 %v3179_v27  ;;  %v3178_v11 = vld [vmem:[%s12078_s13 + $0x88] sm:$0xff] }
0x24ab   : > { %vm7508_vm14 = vmor %vm7506_vm10, %vm7507_vm13  ;;  %v7627_v46 = vmul.f32 128.0, %v9943_v43 }
0x24ac   : > { %v7502_v50 = vmul.f32 %v9941_v54, %v7501_v10  ;;  %7667 = vmatpush.msrb.mxu3 %v3178_v11  ;;  %v3176_v10 = vld [vmem:[%s12078_s13 + $0x58] sm:$0xff] }
0x24ad   : > { %v7628_v9 = vsub.f32 1.0, %v7627_v46 }
0x24ae   : > { %v7503_v37 = vmul.f32 0.5, %v7502_v50  ;;  %v3175_v50 = vld [vmem:[%s12078_s13 + $0x40] sm:$0xff] }
0x24af   : > { %v7629_v29 = vmul.f32 %v9943_v43, %v7628_v9 }
0x24b0   : > { %v7504_v49 = vsub.f32 1.5, %v7503_v37  ;;  %v3174_v37 = vld [vmem:[%s12078_s13 + $0x28] sm:$0xff] }
0x24b1   : > { %v7630_v59 = vadd.f32 %v9943_v43, %v7629_v29 }
0x24b2   : > { %v7505_v15 = vmul.f32 %v9941_v54, %v7504_v49  ;;  %v3173_v49 = vld [vmem:[%s12078_s13 + $0x10] sm:$0xff] }
0x24b4   : > { %v7509_v28 = vsel %vm7508_vm14, %v9941_v54, %v7505_v15  ;;  %v3177_v54 = vld [vmem:[%s12078_s13 + $0x70] sm:$0xff] }
0x24b5   : > { %v7511_v41 = vmul.f32 %v7510_v16, %v7509_v28  ;;  %v7539_v14 = vmul.f32 %v7538_v2, %v7509_v28  ;;  %v7567_v56 = vmul.f32 %v7566_v36, %v7509_v28  ;;  %v7595_v40 = vmul.f32 %v7594_v52, %v7509_v28  ;;  %7668 = vmatpush.msrb.mxu3 %v3177_v54  ;;  %v3159_v15 = vld [vmem:[#allocation79 + $0x18] sm:$0xff]  ;;  %v3158_v16 = vld [vmem:[#allocation79 + $0x10] sm:$0xff] }
0x24b6   : > { %7716 = vmatpush.msra.mxu1 %v3159_v15 }
0x24b7   : > { %v7512_v34 = vmul.f32 %v7511_v41, %v2981_v60  ;;  %v7540_v13 = vmul.f32 %v7539_v14, %v2982_v30  ;;  %v7568_v55 = vmul.f32 %v7567_v56, %v2983_v42  ;;  %v7596_v45 = vmul.f32 %v7595_v40, %v2984_v12  ;;  %7669 = vmatpush.msrb.mxu3 %v3176_v10  ;;  %v3152_v14 = vld [vmem:[#allocation73] sm:$0x1] }
0x24b8   : > { %7717 = vmatpush.msra.mxu1 %v3158_v16 }
0x24b9   : > { %v7513_v63 = vadd.f32 %v7512_v34, %v2977_v61  ;;  %v7541_v24 = vadd.f32 %v7540_v13, %v2978_v38  ;;  %v7569_v44 = vadd.f32 %v7568_v55, %v2979_v0  ;;  %v7597_v51 = vadd.f32 %v7596_v45, %v2980_v7  ;;  %7670 = vmatpush.msrb.mxu3 %v3175_v50  ;;  %v3151_v61 = vld [vmem:[#allocation71] sm:$0x1]  ;;  %v3157_v7 = vld [vmem:[#allocation79 + $0x8] sm:$0xff]  ;;  %v3156_v34 = vld [vmem:[#allocation79] sm:$0xff] }
0x24ba   : > { %7718 = vmatpush.msra.mxu1 %v3157_v7  ;;  %v3163_v13 = vld [vmem:[#allocation79 + $0x38] sm:$0xff]  ;;  %v3162_v55 = vld [vmem:[#allocation79 + $0x30] sm:$0xff]  ;;  %v3161_v45 = vld [vmem:[#allocation79 + $0x28] sm:$0xff] }
0x24bb   : > { %9031 = vmatmul.msk.f32.vlgmr.msra.gmra.mxu3 %vm3645_vm12, %v7513_v63  ;;  %9032 = vmatmul.msk.f32.vlgmr.msrb.gmra.mxu0 %vm3645_vm12, %v7541_v24  ;;  %v3160_v63 = vld [vmem:[#allocation79 + $0x20] sm:$0xff] }
0x24bc   : > { %9033 = vmatmul.msk.f32.vlgmr.msrb.gmra.mxu1 %vm3645_vm12, %v7569_v44  ;;  %9034 = vmatmul.msk.f32.vlgmr.msra.gmra.mxu2 %vm3645_vm12, %v7597_v51  ;;  %vm7631_vm12 = vweird.f32 %v9943_v43  ;;  %v3172_v24 = vld [vmem:[#allocation80] sm:$0x7] }
0x24bd   : > { %v14334_v53 = vsel %vm7631_vm12, %v9943_v43, %v7630_v59  ;;  %7671 = vmatpush.msrb.mxu3 %v3174_v37  ;;  %7719 = vmatpush.msra.mxu1 %v3156_v34  ;;  %v7655_v44 = vperm.slane %v3172_v24, 2 }
0x24be   : > { %7694 = vmatpush.msra.mxu0 %v3163_v13 }
0x24bf   : > { %7672 = vmatpush.msrb.mxu3 %v3173_v49 }
0x24c0   : > { %7695 = vmatpush.msra.mxu0 %v3162_v55 }
0x24c2   : > { %7696 = vmatpush.msra.mxu0 %v3161_v45 }
0x24c4   : > { %7697 = vmatpush.msra.mxu0 %v3160_v63 }
0x2538   : > { %v7562_v26 = vpop.f32.mrf.mxu0 }
0x2539   : > { %v7590_v21 = vpop.f32.mrf.mxu1 }
0x253e   : > { %v7534_v19 = vpop.f32.mrf.mxu3 }
0x253f   : > { %v7537_v6 = vadd.f32 %v7534_v19, %v2976_v33  ;;  %v7618_v31 = vpop.f32.mrf.mxu2  ;;  %v3167_v19 = vld [vmem:[#allocation79 + $0x58] sm:$0xff] }
0x2540   : > { %7740 = vmatpush.msrb.mxu2 %v3167_v19 }
0x2541   : > { %v7565_v3 = vadd.f32 %v7562_v26, %v7537_v6  ;;  %v3171_v6 = vld [vmem:[#allocation79 + $0x78] sm:$0xff]  ;;  %v3166_v26 = vld [vmem:[#allocation79 + $0x50] sm:$0xff] }
0x2542   : > { %7765 = vmatpush.msrb.mxu0 %v3171_v6  ;;  %7741 = vmatpush.msrb.mxu2 %v3166_v26 }
0x2543   : > { %v7593_v18 = vadd.f32 %v7590_v21, %v7565_v3  ;;  %v3170_v3 = vld [vmem:[#allocation79 + $0x70] sm:$0xff]  ;;  %v3165_v21 = vld [vmem:[#allocation79 + $0x48] sm:$0xff] }
0x2544   : > { %7766 = vmatpush.msrb.mxu0 %v3170_v3  ;;  %7742 = vmatpush.msrb.mxu2 %v3165_v21 }
0x2545   : > { %v14328_v23 = vadd.f32 %v7618_v31, %v7593_v18  ;;  %v3169_v18 = vld [vmem:[#allocation79 + $0x68] sm:$0xff]  ;;  %v3164_v31 = vld [vmem:[#allocation79 + $0x40] sm:$0xff] }
0x2546   : > { %7767 = vmatpush.msrb.mxu0 %v3169_v18  ;;  %7743 = vmatpush.msrb.mxu2 %v3164_v31 }
0x2547   : > { %v7623_v32 = vsel %vm7622_vm15, %v14328_v23, 0.0 }
0x2548   : > { %7624 = vadd.xlane.f32.xlu0 %v7623_v32  ;;  %v3168_v32 = vld [vmem:[#allocation79 + $0x60] sm:$0xff] }
0x2549   : > { %7768 = vmatpush.msrb.mxu0 %v3168_v32 }
0x25bb   : > { %v7625_v35 = vpop.xlane.xlu0 %7624 }
0x25bc   : > { %v7633_v57 = vmul.f32 %v14334_v53, %v7625_v35 }
0x25be   : > { %v7634_v39 = vsub.f32 %v14328_v23, %v7633_v57 }
0x25c0   : > { %v7635_v58 = vmul.f32 %v7634_v39, %v7634_v39 }
0x25c2   : > { %v7636_v25 = vsel %vm7622_vm15, %v7635_v58, 0.0 }
0x25c3   : > { %7637 = vadd.xlane.f32.xlu1 %v7636_v25 }
0x2636   : > { %v7638_v2 = vpop.xlane.xlu1 %7637 }
0x2637   : > { %v7639_v36 = vmul.f32 %v7638_v2, %v14334_v53 }
0x2639   : > { %v7640_v52 = vadd.f32 1e-05, %v7639_v36 }
0x263b   : > { %9944 = vrsqrt.f32 %v7640_v52  ;;  %vm7647_vm2 = vweird.f32 %v7640_v52 }
0x2641   : > { %v9945_v60 = vpop.eup %9944 }
0x2642   : > { %v7642_v30 = vmul.f32 %v9945_v60, %v7640_v52  ;;  %vm7648_vm1 = vweird.f32 %v9945_v60 }
0x2643   : > { %vm7649_vm3 = vmor %vm7647_vm2, %vm7648_vm1 }
0x2644   : > { %v7643_v42 = vmul.f32 %v9945_v60, %v7642_v30 }
0x2646   : > { %v7644_v12 = vmul.f32 0.5, %v7643_v42 }
0x2648   : > { %v7645_v28 = vsub.f32 1.5, %v7644_v12 }
0x264a   : > { %v7646_v41 = vmul.f32 %v9945_v60, %v7645_v28 }
0x264c   : > { %v7650_v56 = vsel %vm7649_vm3, %v9945_v60, %v7646_v41 }
0x264d   : > { %v7651_v40 = vmul.f32 %v7650_v56, %v7634_v39  ;;  %v3155_v39 = vld [vmem:[#allocation77] sm:$0x1] }
0x264f   : > { %v7652_v38 = vmul.f32 %v7651_v40, %v3152_v14 }
0x2651   : > { %v7653_v0 = vadd.f32 %v7652_v38, %v3151_v61 }
0x2653   : > { %7673 = vmatmul.f32.vlgmr.msrb.gmra.mxu3 %v7653_v0 }
0x26d6   : > { %v7674_v51 = vpop.f32.mrf.mxu3 }
0x26d7   : > { %v7675_v33 = vadd.f32 %v7674_v51, %v7655_v44 }
0x26d9   : > { %7749 = vrot.lane.b32.xlu1 %v7675_v33, %s11732_s1  ;;  %7724 = vrot.lane.b32.xlu0 %v7675_v33, %s14804_s0  ;;  %s14806_s1 = sld [smem:[#allocation162_spill]] }
0x26da   : > { %7678 = vrot.lane.b32.xlu2 %v7675_v33, %s14805_s2  ;;  %9036 = vmatmul.msk.f32.vlgmr.msra.gmra.mxu1 %vm5780_vm5, %v7675_v33  ;;  %s14808_s0 = sld [smem:[#allocation164_spill]] }
0x26db   : > { %s14810_s2 = sld [smem:[#allocation112_spill]] }
0x26df   : > { %s14807_s3 = smov %s14806_s1  ;;  %v3082_v5 = vld [vmem:[%s14806_s1 + $0x1e0] sm:$0xff]  ;;  %s2770_s1 = sand.u32 1, %s11576_s28  }
0x26e0   : > { %v3083_v48 = vld [vmem:[%s14807_s3 + $0x1e8] sm:$0xff]  ;;  %v3084_v22 = vld [vmem:[%s14807_s3 + $0x1f0] sm:$0xff]  ;;  %7809 = vmatpush.msrb.mxu1 %v3082_v5  ;;  %v3085_v20 = vld [vmem:[%s14807_s3 + $0x1f8] sm:$0xff]  ;;  %s14809_s4 = smov %s14808_s0  ;;  %s8033_s8 = scalar_lea.sflag [#allocation4], %s2770_s1 }
0x26e1   : > { %7829 = vmatpush.msra.mxu2 %v3083_v48  ;;  %v3078_v17 = vld [vmem:[%s14807_s3 + $0x1c0] sm:$0xff]  ;;  %v3079_v8 = vld [vmem:[%s14807_s3 + $0x1c8] sm:$0xff]  ;;  %7869 = vmatpush.msra.mxu3 %v3085_v20  ;;  %v3081_v27 = vld [vmem:[%s14807_s3 + $0x1d8] sm:$0xff] }
0x26e2   : > { %7810 = vmatpush.msrb.mxu1 %v3078_v17  ;;  %v3074_v49 = vld [vmem:[%s14807_s3 + $0x1a0] sm:$0xff]  ;;  %v3075_v15 = vld [vmem:[%s14807_s3 + $0x1a8] sm:$0xff]  ;;  %v3076_v16 = vld [vmem:[%s14807_s3 + $0x1b0] sm:$0xff] }
0x26e3   : > { %7830 = vmatpush.msra.mxu2 %v3079_v8  ;;  %7870 = vmatpush.msra.mxu3 %v3081_v27  ;;  %v3077_v2 = vld [vmem:[%s14807_s3 + $0x1b8] sm:$0xff]  ;;  %v3070_v36 = vld [vmem:[%s14807_s3 + $0x180] sm:$0xff]  ;;  %v3071_v52 = vld [vmem:[%s14807_s3 + $0x188] sm:$0xff] }
0x26e4   : > { %7811 = vmatpush.msrb.mxu1 %v3074_v49  ;;  %v3072_v60 = vld [vmem:[%s14807_s3 + $0x190] sm:$0xff]  ;;  %v3073_v30 = vld [vmem:[%s14807_s3 + $0x198] sm:$0xff]  ;;  %v3066_v42 = vld [vmem:[%s14807_s3 + $0x160] sm:$0xff] }
0x26e5   : > { %7831 = vmatpush.msra.mxu2 %v3075_v15  ;;  %7871 = vmatpush.msra.mxu3 %v3077_v2  ;;  %v3067_v12 = vld [vmem:[%s14807_s3 + $0x168] sm:$0xff]  ;;  %v3068_v28 = vld [vmem:[%s14807_s3 + $0x170] sm:$0xff]  ;;  %v3069_v41 = vld [vmem:[%s14807_s3 + $0x178] sm:$0xff] }
0x26e6   : > { %7812 = vmatpush.msrb.mxu1 %v3070_v36  ;;  %v3062_v14 = vld [vmem:[%s14807_s3 + $0x140] sm:$0xff]  ;;  %v3063_v56 = vld [vmem:[%s14807_s3 + $0x148] sm:$0xff]  ;;  %v3064_v40 = vld [vmem:[%s14807_s3 + $0x150] sm:$0xff] }
0x26e7   : > { %7832 = vmatpush.msra.mxu2 %v3071_v52  ;;  %7872 = vmatpush.msra.mxu3 %v3073_v30  ;;  %v3065_v61 = vld [vmem:[%s14807_s3 + $0x158] sm:$0xff]  ;;  %v3058_v38 = vld [vmem:[%s14807_s3 + $0x120] sm:$0xff]  ;;  %v3059_v0 = vld [vmem:[%s14807_s3 + $0x128] sm:$0xff] }
0x26e8   : > { %7813 = vmatpush.msrb.mxu1 %v3066_v42  ;;  %v3060_v7 = vld [vmem:[%s14807_s3 + $0x130] sm:$0xff]  ;;  %v3061_v34 = vld [vmem:[%s14807_s3 + $0x138] sm:$0xff]  ;;  %v3054_v13 = vld [vmem:[%s14807_s3 + $0x100] sm:$0xff] }
0x26e9   : > { %7833 = vmatpush.msra.mxu2 %v3067_v12  ;;  %7873 = vmatpush.msra.mxu3 %v3069_v41  ;;  %v3055_v55 = vld [vmem:[%s14807_s3 + $0x108] sm:$0xff]  ;;  %v3056_v45 = vld [vmem:[%s14807_s3 + $0x110] sm:$0xff]  ;;  %v3057_v63 = vld [vmem:[%s14807_s3 + $0x118] sm:$0xff] }
0x26ea   : > { %7814 = vmatpush.msrb.mxu1 %v3062_v14  ;;  %v3050_v24 = vld [vmem:[%s14807_s3 + $0xe0] sm:$0xff]  ;;  %v3051_v44 = vld [vmem:[%s14807_s3 + $0xe8] sm:$0xff]  ;;  %v3052_v51 = vld [vmem:[%s14807_s3 + $0xf0] sm:$0xff] }
0x26eb   : > { %7834 = vmatpush.msra.mxu2 %v3063_v56  ;;  %7874 = vmatpush.msra.mxu3 %v3065_v61  ;;  %v3053_v33 = vld [vmem:[%s14807_s3 + $0xf8] sm:$0xff]  ;;  %v3046_v19 = vld [vmem:[%s14807_s3 + $0xc0] sm:$0xff]  ;;  %v3047_v6 = vld [vmem:[%s14807_s3 + $0xc8] sm:$0xff] }
0x26ec   : > { %7815 = vmatpush.msrb.mxu1 %v3058_v38  ;;  %v3048_v26 = vld [vmem:[%s14807_s3 + $0xd0] sm:$0xff]  ;;  %v3049_v3 = vld [vmem:[%s14807_s3 + $0xd8] sm:$0xff]  ;;  %v3042_v21 = vld [vmem:[%s14807_s3 + $0xa0] sm:$0xff] }
0x26ed   : > { %7835 = vmatpush.msra.mxu2 %v3059_v0  ;;  %7875 = vmatpush.msra.mxu3 %v3061_v34  ;;  %v3043_v18 = vld [vmem:[%s14807_s3 + $0xa8] sm:$0xff]  ;;  %v3044_v31 = vld [vmem:[%s14807_s3 + $0xb0] sm:$0xff]  ;;  %v3045_v32 = vld [vmem:[%s14807_s3 + $0xb8] sm:$0xff] }
0x26ee   : > { %7816 = vmatpush.msrb.mxu1 %v3054_v13  ;;  %v3027_v5 = vld [vmem:[%s14807_s3 + $0x28] sm:$0xff]  ;;  %v3028_v48 = vld [vmem:[%s14807_s3 + $0x30] sm:$0xff]  ;;  %v3022_v20 = vld [vmem:[%s14807_s3] sm:$0xff] }
0x26ef   : > { %7836 = vmatpush.msra.mxu2 %v3055_v55  ;;  %7876 = vmatpush.msra.mxu3 %v3057_v63  ;;  %v3023_v17 = vld [vmem:[%s14807_s3 + $0x8] sm:$0xff]  ;;  %v3024_v8 = vld [vmem:[%s14807_s3 + $0x10] sm:$0xff]  ;;  %v3102_v27 = vld [vmem:[%s14808_s0 + $0x78] sm:$0xff]  ;;  %s8041_s0 = scalar_lea.hbm %s12083_s14, %s12106_s7  ;;  %s11434_s7 = scalar_lea.hbm %s12083_s14, 2 }
0x26f0   : > { %7817 = vmatpush.msrb.mxu1 %v3050_v24  ;;  %v3100_v49 = vld [vmem:[%s14809_s4 + $0x68] sm:$0xff]  ;;  %v3153_v56 = vld [vmem:[#allocation74] sm:$0x1]  ;;  %v3099_v38 = vld [vmem:[%s14809_s4 + $0x60] sm:$0xff]  ;;  %s8045_s6 = sshll.u32 %s8041_s0, 4  ;;  %s8046_s6 = int_to_ptr.hbm [resolvable:$true] %s8045_s6 }
0x26f1   : > { %7837 = vmatpush.msra.mxu2 %v3051_v44  ;;  %7877 = vmatpush.msra.mxu3 %v3053_v33  ;;  %v3132_v15 = vld [vmem:[%s14809_s4 + $0x168] sm:$0xff]  ;;  %v3118_v0 = vld [vmem:[%s14809_s4 + $0xf8] sm:$0xff]  ;;  %v3117_v13 = vld [vmem:[%s14809_s4 + $0xf0] sm:$0xff]  ;;  %s11428_s9 = sshra.s32 %s8046_s6, 4  ;;  %s11429_s9 = int_to_ptr.hbm [resolvable:$true] %s11428_s9 }
0x26f2   : > { %7818 = vmatpush.msrb.mxu1 %v3046_v19  ;;  %v3098_v34 = vld [vmem:[%s14809_s4 + $0x58] sm:$0xff]  ;;  %v3097_v63 = vld [vmem:[%s14809_s4 + $0x50] sm:$0xff]  ;;  %v3116_v24 = vld [vmem:[%s14809_s4 + $0xe8] sm:$0xff]  ;;  %s11430_s10 = scalar_lea.hbm %s11429_s9, 1  ;;  %p11435_p4 = scmp.lt.s32.totalorder %s11429_s9, %s12083_s14 }
0x26f3   : > { %7838 = vmatpush.msra.mxu2 %v3047_v6  ;;  %7878 = vmatpush.msra.mxu3 %v3049_v3  ;;  %v3130_v55 = vld [vmem:[%s14809_s4 + $0x158] sm:$0xff]  ;;  %v3129_v44 = vld [vmem:[%s14809_s4 + $0x150] sm:$0xff]  ;;  %v3096_v33 = vld [vmem:[%s14809_s4 + $0x48] sm:$0xff]  ;;  %p11431_p10 = scmp.ne.s32.totalorder %s11429_s9, %s11430_s10  ;;  %p11436_p7 = scmp.lt.s32.totalorder %s11434_s7, %s11430_s10 }
0x26f4   : > { %7819 = vmatpush.msrb.mxu1 %v3042_v21  ;;  %v3115_v19 = vld [vmem:[%s14809_s4 + $0xe0] sm:$0xff]  ;;  %v3128_v6 = vld [vmem:[%s14809_s4 + $0x148] sm:$0xff]  ;;  %v3114_v21 = vld [vmem:[%s14809_s4 + $0xd8] sm:$0xff] }
0x26f5   : > { %7839 = vmatpush.msra.mxu2 %v3043_v18  ;;  %7879 = vmatpush.msra.mxu3 %v3045_v32  ;;  %v3095_v3 = vld [vmem:[%s14809_s4 + $0x40] sm:$0xff]  ;;  %v3094_v32 = vld [vmem:[%s14809_s4 + $0x38] sm:$0xff]  ;;  %p11432_p2 = pnand %p11431_p10, %p12123_p5  ;;  %p11437_p8 = por %p11436_p7, %p11435_p4 }
0x26f6   : > { %v3127_v18 = vld [vmem:[%s14809_s4 + $0x140] sm:$0xff] }
0x26f7   : > { %p11433_p3 = pneg %p11432_p2 }
0x26f9   : > { %p11438_p11 = pnand %p11437_p8, %p11433_p3 }
0x2734   : > { %v7679_v1 = vpop.permute.xlu2 %7678 }
0x2735   : > { %9035 = vmatmul.msk.f32.vlgmr.msra.gmra.mxu0 %vm5780_vm5, %v7679_v1  ;;  %v3038_v1 = vld [vmem:[%s14807_s3 + $0x80] sm:$0xff] }
0x2736   : > { %7849 = vmatpush.msra.mxu0 %v3084_v22  ;;  %7820 = vmatpush.msrb.mxu1 %v3038_v1  ;;  %v3029_v22 = vld [vmem:[%s14807_s3 + $0x38] sm:$0xff]  ;;  %v3113_v1 = vld [vmem:[%s14809_s4 + $0xd0] sm:$0xff] }
0x274b   : > { %v7750_v4 = vpop.permute.xlu1 %7749  ;;  %v7725_v47 = vpop.permute.xlu0 %7724 }
0x274c   : > { %9037 = vmatmul.msk.f32.vlgmr.msrb.gmra.mxu2 %vm5780_vm5, %v7725_v47  ;;  %9038 = vmatmul.msk.f32.vlgmr.msrb.gmra.mxu0 %vm5780_vm5, %v7750_v4  ;;  %v3039_v4 = vld [vmem:[%s14807_s3 + $0x88] sm:$0xff]  ;;  %v3040_v47 = vld [vmem:[%s14807_s3 + $0x90] sm:$0xff] }
0x274d   : > { %7840 = vmatpush.msra.mxu2 %v3039_v4  ;;  %v3126_v4 = vld [vmem:[%s14809_s4 + $0x138] sm:$0xff] }
0x2757   : > { %v7721_v46 = vpop.f32.mrf.mxu1 }
0x27b2   : > { %v7699_v43 = vpop.f32.mrf.mxu0 }
0x27b3   : > { %v7722_v9 = vadd.f32 %v7721_v46, %v7699_v43  ;;  %v3041_v43 = vld [vmem:[%s14807_s3 + $0x98] sm:$0xff]  ;;  %v3034_v46 = vld [vmem:[%s14807_s3 + $0x60] sm:$0xff] }
0x27b4   : > { %7880 = vmatpush.msra.mxu3 %v3041_v43  ;;  %7821 = vmatpush.msrb.mxu1 %v3034_v46  ;;  %v3093_v43 = vld [vmem:[%s14809_s4 + $0x30] sm:$0xff]  ;;  %v3112_v46 = vld [vmem:[%s14809_s4 + $0xc8] sm:$0xff] }
0x27c9   : > { %v7770_v35 = vpop.f32.mrf.mxu0 }
0x27cf   : > { %v7745_v29 = vpop.f32.mrf.mxu2 }
0x27d0   : > { %v7748_v59 = vadd.f32 %v7745_v29, %v7722_v9  ;;  %v3035_v9 = vld [vmem:[%s14807_s3 + $0x68] sm:$0xff]  ;;  %v3036_v29 = vld [vmem:[%s14807_s3 + $0x70] sm:$0xff] }
0x27d1   : > { %7841 = vmatpush.msra.mxu2 %v3035_v9  ;;  %v3125_v9 = vld [vmem:[%s14809_s4 + $0x130] sm:$0xff] }
0x27d2   : > { %v7773_v57 = vadd.f32 %v7770_v35, %v7748_v59  ;;  %v3037_v59 = vld [vmem:[%s14807_s3 + $0x78] sm:$0xff]  ;;  %v3030_v35 = vld [vmem:[%s14807_s3 + $0x40] sm:$0xff] }
0x27d3   : > { %7881 = vmatpush.msra.mxu3 %v3037_v59  ;;  %7822 = vmatpush.msrb.mxu1 %v3030_v35  ;;  %v3092_v59 = vld [vmem:[%s14809_s4 + $0x28] sm:$0xff]  ;;  %v3111_v35 = vld [vmem:[%s14809_s4 + $0xc0] sm:$0xff] }
0x27d4   : > { %v7774_v58 = vadd.f32 %v7773_v57, %v14328_v23  ;;  %v3080_v23 = vld [vmem:[%s14807_s3 + $0x1d0] sm:$0xff]  ;;  %v3031_v57 = vld [vmem:[%s14807_s3 + $0x48] sm:$0xff] }
0x27d5   : > { %7850 = vmatpush.msra.mxu0 %v3080_v23  ;;  %7842 = vmatpush.msra.mxu2 %v3031_v57  ;;  %v3025_v23 = vld [vmem:[%s14807_s3 + $0x18] sm:$0xff]  ;;  %v3124_v57 = vld [vmem:[%s14809_s4 + $0x128] sm:$0xff] }
0x27d6   : > { %v14362_v25 = vadd.f32 %v7774_v58, %v3155_v39  ;;  %v3032_v39 = vld [vmem:[%s14807_s3 + $0x50] sm:$0xff]  ;;  %v3033_v58 = vld [vmem:[%s14807_s3 + $0x58] sm:$0xff] }
0x27d7   : > { %7851 = vmatpush.msra.mxu0 %v3076_v16  ;;  %7882 = vmatpush.msra.mxu3 %v3033_v58  ;;  %v3091_v58 = vld [vmem:[%s14809_s4 + $0x20] sm:$0xff] }
0x27d8   : > { %v7776_v62 = vsel %vm7622_vm15, %v14362_v25, 0.0  ;;  %7843 = vmatpush.msra.mxu2 %v3027_v5  ;;  %v3123_v5 = vld [vmem:[%s14809_s4 + $0x120] sm:$0xff] }
0x27d9   : > { %7777 = vadd.xlane.f32.xlu2 %v7776_v62  ;;  %7852 = vmatpush.msra.mxu0 %v3072_v60  ;;  %v3026_v62 = vld [vmem:[%s14807_s3 + $0x20] sm:$0xff] }
0x27da   : > { %7823 = vmatpush.msrb.mxu1 %v3026_v62  ;;  %7883 = vmatpush.msra.mxu3 %v3029_v22  ;;  %v3110_v62 = vld [vmem:[%s14809_s4 + $0xb8] sm:$0xff] }
0x27db   : > { %7853 = vmatpush.msra.mxu0 %v3068_v28  ;;  %7844 = vmatpush.msra.mxu2 %v3023_v17  ;;  %v3154_v28 = vld [vmem:[#allocation76] sm:$0x1]  ;;  %v3090_v22 = vld [vmem:[%s14809_s4 + $0x18] sm:$0xff] }
0x27dc   : > { %7824 = vmatpush.msrb.mxu1 %v3022_v20  ;;  %7884 = vmatpush.msra.mxu3 %v3025_v23  ;;  %v3109_v20 = vld [vmem:[%s14809_s4 + $0xb0] sm:$0xff]  ;;  %v3122_v17 = vld [vmem:[%s14809_s4 + $0x118] sm:$0xff] }
0x27dd   : > { %7854 = vmatpush.msra.mxu0 %v3064_v40  ;;  %7945 = vmatpush.msrb.mxu2 %v3118_v0  ;;  %v3089_v23 = vld [vmem:[%s14809_s4 + $0x10] sm:$0xff] }
0x27de   : > { %7925 = vmatpush.msra.mxu1 %v3102_v27  ;;  %v3108_v27 = vld [vmem:[%s14809_s4 + $0xa8] sm:$0xff] }
0x27df   : > { %7855 = vmatpush.msra.mxu0 %v3060_v7  ;;  %v3131_v7 = vld [vmem:[%s14809_s4 + $0x160] sm:$0xff]  ;;  %7946 = vmatpush.msrb.mxu2 %v3117_v13 }
0x27e1   : > { %7856 = vmatpush.msra.mxu0 %v3056_v45  ;;  %v3149_v45 = vld [vmem:[%s14809_s4 + $0x1f0] sm:$0xff]  ;;  %7947 = vmatpush.msrb.mxu2 %v3116_v24 }
0x27e3   : > { %7857 = vmatpush.msra.mxu0 %v3052_v51  ;;  %v3148_v51 = vld [vmem:[%s14809_s4 + $0x1e8] sm:$0xff]  ;;  %7948 = vmatpush.msrb.mxu2 %v3115_v19 }
0x27e5   : > { %7858 = vmatpush.msra.mxu0 %v3048_v26  ;;  %v3147_v26 = vld [vmem:[%s14809_s4 + $0x1e0] sm:$0xff]  ;;  %7949 = vmatpush.msrb.mxu2 %v3114_v21 }
0x27e7   : > { %7859 = vmatpush.msra.mxu0 %v3044_v31  ;;  %v3146_v31 = vld [vmem:[%s14809_s4 + $0x1d8] sm:$0xff]  ;;  %7950 = vmatpush.msrb.mxu2 %v3113_v1 }
0x27e9   : > { %7860 = vmatpush.msra.mxu0 %v3040_v47  ;;  %v3145_v47 = vld [vmem:[%s14809_s4 + $0x1d0] sm:$0xff]  ;;  %7951 = vmatpush.msrb.mxu2 %v3112_v46 }
0x27eb   : > { %7861 = vmatpush.msra.mxu0 %v3036_v29  ;;  %v3144_v29 = vld [vmem:[%s14809_s4 + $0x1c8] sm:$0xff]  ;;  %7952 = vmatpush.msrb.mxu2 %v3111_v35 }
0x27ed   : > { %7862 = vmatpush.msra.mxu0 %v3032_v39  ;;  %v3143_v39 = vld [vmem:[%s14809_s4 + $0x1c0] sm:$0xff]  ;;  %7953 = vmatpush.msrb.mxu2 %v3110_v62 }
0x27ef   : > { %7863 = vmatpush.msra.mxu0 %v3028_v48  ;;  %v3142_v48 = vld [vmem:[%s14809_s4 + $0x1b8] sm:$0xff]  ;;  %7954 = vmatpush.msrb.mxu2 %v3109_v20 }
0x27f1   : > { %7864 = vmatpush.msra.mxu0 %v3024_v8  ;;  %v3141_v8 = vld [vmem:[%s14809_s4 + $0x1b0] sm:$0xff]  ;;  %7955 = vmatpush.msrb.mxu2 %v3108_v27 }
0x284c   : > { %v7778_v11 = vpop.xlane.xlu2 %7777 }
0x284d   : > { %v7779_v54 = vmul.f32 %v7778_v11, %v14334_v53  ;;  %v3134_v11 = vld [vmem:[%s14809_s4 + $0x178] sm:$0xff] }
0x284e   : > { %7965 = vmatpush.msrb.mxu0 %v3134_v11  ;;  %v3121_v11 = vld [vmem:[%s14809_s4 + $0x110] sm:$0xff] }
0x284f   : > { %v14376_v10 = vsub.f32 %v14362_v25, %v7779_v54  ;;  %v3101_v54 = vld [vmem:[%s14809_s4 + $0x70] sm:$0xff] }
0x2850   : > { %7926 = vmatpush.msra.mxu1 %v3101_v54  ;;  %v3140_v54 = vld [vmem:[%s14809_s4 + $0x1a8] sm:$0xff] }
0x2851   : > { %v7781_v50 = vmul.f32 %v14376_v10, %v14376_v10 }
0x2852   : > { %7927 = vmatpush.msra.mxu1 %v3100_v49  ;;  %v3120_v49 = vld [vmem:[%s14809_s4 + $0x108] sm:$0xff] }
0x2853   : > { %v7782_v37 = vsel %vm7622_vm15, %v7781_v50, 0.0  ;;  %v3133_v50 = vld [vmem:[%s14809_s4 + $0x170] sm:$0xff] }
0x2854   : > { %7783 = vadd.xlane.f32.xlu0 %v7782_v37  ;;  %7966 = vmatpush.msrb.mxu0 %v3133_v50  ;;  %v3088_v50 = vld [vmem:[%s14809_s4 + $0x8] sm:$0xff] }
0x2855   : > { %7928 = vmatpush.msra.mxu1 %v3099_v38 }
0x2856   : > { %7967 = vmatpush.msrb.mxu0 %v3132_v15  ;;  %v3139_v15 = vld [vmem:[%s14809_s4 + $0x1a0] sm:$0xff] }
0x2857   : > { %7929 = vmatpush.msra.mxu1 %v3098_v34 }
0x2858   : > { %7968 = vmatpush.msrb.mxu0 %v3131_v7 }
0x2859   : > { %7930 = vmatpush.msra.mxu1 %v3097_v63 }
0x285a   : > { %7969 = vmatpush.msrb.mxu0 %v3130_v55 }
0x285b   : > { %7931 = vmatpush.msra.mxu1 %v3096_v33 }
0x285c   : > { %7970 = vmatpush.msrb.mxu0 %v3129_v44 }
0x285d   : > { %7932 = vmatpush.msra.mxu1 %v3095_v3 }
0x285e   : > { %7971 = vmatpush.msrb.mxu0 %v3128_v6 }
0x285f   : > { %7933 = vmatpush.msra.mxu1 %v3094_v32 }
0x2860   : > { %7972 = vmatpush.msrb.mxu0 %v3127_v18 }
0x2861   : > { %7934 = vmatpush.msra.mxu1 %v3093_v43 }
0x2862   : > { %7973 = vmatpush.msrb.mxu0 %v3126_v4 }
0x2863   : > { %7935 = vmatpush.msra.mxu1 %v3092_v59 }
0x2864   : > { %7974 = vmatpush.msrb.mxu0 %v3125_v9 }
0x2865   : > { %7936 = vmatpush.msra.mxu1 %v3091_v58 }
0x2866   : > { %7975 = vmatpush.msrb.mxu0 %v3124_v57 }
0x2867   : > { %7937 = vmatpush.msra.mxu1 %v3090_v22 }
0x2868   : > { %7976 = vmatpush.msrb.mxu0 %v3123_v5 }
0x2869   : > { %7938 = vmatpush.msra.mxu1 %v3089_v23 }
0x286a   : > { %7977 = vmatpush.msrb.mxu0 %v3122_v17 }
0x286b   : > { %7939 = vmatpush.msra.mxu1 %v3088_v50 }
0x286c   : > { %7978 = vmatpush.msrb.mxu0 %v3121_v11 }
0x286e   : > { %7979 = vmatpush.msrb.mxu0 %v3120_v49 }
0x28c7   : > { %v7784_v37 = vpop.xlane.xlu0 %7783 }
0x28c8   : > { %v7785_v16 = vmul.f32 %v7784_v37, %v14334_v53  ;;  %v3107_v37 = vld [vmem:[%s14809_s4 + $0xa0] sm:$0xff] }
0x28c9   : > { %7956 = vmatpush.msrb.mxu2 %v3107_v37  ;;  %v3086_v37 = vld [vmem:[#allocation70] sm:$0x1] }
0x28ca   : > { %v7786_v2 = vadd.f32 1e-05, %v7785_v16  ;;  %v3087_v16 = vld [vmem:[%s14809_s4] sm:$0xff] }
0x28cb   : > { %7940 = vmatpush.msra.mxu1 %v3087_v16 }
0x28cc   : > { %9946 = vrsqrt.f32 %v7786_v2  ;;  %vm7793_vm4 = vweird.f32 %v7786_v2 }
0x28d2   : > { %v9947_v36 = vpop.eup %9946 }
0x28d3   : > { %v7788_v52 = vmul.f32 %v9947_v36, %v7786_v2  ;;  %vm7794_vm5 = vweird.f32 %v9947_v36  ;;  %v3106_v2 = vld [vmem:[%s14809_s4 + $0x98] sm:$0xff] }
0x28d4   : > { %vm7795_vm6 = vmor %vm7793_vm4, %vm7794_vm5  ;;  %7957 = vmatpush.msrb.mxu2 %v3106_v2 }
0x28d5   : > { %v7789_v60 = vmul.f32 %v9947_v36, %v7788_v52  ;;  %v3021_v52 = vld [vmem:[#allocation68] sm:$0xf] }
0x28d6   : > { %v7802_v34 = vperm.slane %v3021_v52, 1  ;;  %v7804_v55 = vperm.slane %v3021_v52, 3 }
0x28d7   : > { %v7790_v30 = vmul.f32 0.5, %v7789_v60  ;;  %v3138_v60 = vld [vmem:[%s14809_s4 + $0x198] sm:$0xff] }
0x28d9   : > { %v7791_v42 = vsub.f32 1.5, %v7790_v30  ;;  %v3105_v30 = vld [vmem:[%s14809_s4 + $0x90] sm:$0xff] }
0x28da   : > { %7958 = vmatpush.msrb.mxu2 %v3105_v30 }
0x28db   : > { %v7792_v12 = vmul.f32 %v9947_v36, %v7791_v42  ;;  %v3137_v42 = vld [vmem:[%s14809_s4 + $0x190] sm:$0xff] }
0x28dd   : > { %v7796_v41 = vsel %vm7795_vm6, %v9947_v36, %v7792_v12  ;;  %v3119_v36 = vld [vmem:[%s14809_s4 + $0x100] sm:$0xff]  ;;  %v7801_v12 = vperm.slane %v3021_v52, 0 }
0x28de   : > { %v7797_v14 = vmul.f32 %v7796_v41, %v14376_v10  ;;  %v3150_v10 = vld [vmem:[%s14809_s4 + $0x1f8] sm:$0xff]  ;;  %7980 = vmatpush.msrb.mxu0 %v3119_v36  ;;  %v3136_v41 = vld [vmem:[%s14809_s4 + $0x188] sm:$0xff] }
0x28df   : > { %7985 = vmatpush.msrb.mxu3 %v3150_v10 }
0x28e0   : > { %v7798_v40 = vmul.f32 %v7797_v14, %v3154_v28  ;;  %v3104_v28 = vld [vmem:[%s14809_s4 + $0x88] sm:$0xff]  ;;  %v7803_v14 = vperm.slane %v3021_v52, 2 }
0x28e1   : > { %7986 = vmatpush.msrb.mxu3 %v3149_v45  ;;  %7959 = vmatpush.msrb.mxu2 %v3104_v28 }
0x28e2   : > { %v7799_v61 = vadd.f32 %v7798_v40, %v3153_v56  ;;  %v3103_v56 = vld [vmem:[%s14809_s4 + $0x80] sm:$0xff] }
0x28e3   : > { %7987 = vmatpush.msrb.mxu3 %v3148_v51  ;;  %v3135_v40 = vld [vmem:[%s14809_s4 + $0x180] sm:$0xff]  ;;  %7960 = vmatpush.msrb.mxu2 %v3103_v56  ;;  %s2771_s4 = scalar_lea.vmem [#allocation82], %s2770_s1 }
0x28e4   : > { %7825 = vmatmul.f32.vlgmr.msrb.gmra.mxu1 %v7799_v61  ;;  %7845 = vmatmul.f32.vlgmr.msra.gmra.mxu2 %v7799_v61  ;;  %s8043_s5 = sshll.u32 %s2771_s4, 4  ;;  %s8044_s5 = int_to_ptr.vmem [resolvable:$true] %s8043_s5 }
0x28e5   : > { %7865 = vmatmul.f32.vlgmr.msra.gmra.mxu0 %v7799_v61  ;;  %7885 = vmatmul.f32.vlgmr.msra.gmra.mxu3 %v7799_v61 }
0x28e6   : > { %7988 = vmatpush.msrb.mxu3 %v3147_v26 }
0x28e8   : > { %7989 = vmatpush.msrb.mxu3 %v3146_v31 }
0x28ea   : > { %7990 = vmatpush.msrb.mxu3 %v3145_v47 }
0x28ec   : > { %7991 = vmatpush.msrb.mxu3 %v3144_v29 }
0x28ee   : > { %7992 = vmatpush.msrb.mxu3 %v3143_v39 }
0x28f0   : > { %7993 = vmatpush.msrb.mxu3 %v3142_v48 }
0x28f2   : > { %7994 = vmatpush.msrb.mxu3 %v3141_v8 }
0x28f4   : > { %7995 = vmatpush.msrb.mxu3 %v3140_v54 }
0x28f6   : > { %7996 = vmatpush.msrb.mxu3 %v3139_v15 }
0x28f8   : > { %7997 = vmatpush.msrb.mxu3 %v3138_v60 }
0x28fa   : > { %7998 = vmatpush.msrb.mxu3 %v3137_v42 }
0x28fc   : > { %7999 = vmatpush.msrb.mxu3 %v3136_v41 }
0x28fe   : > { %8000 = vmatpush.msrb.mxu3 %v3135_v40 }
0x2961   : > { %v7826_v61 = vpop.f32.mrf.mxu1 }
0x2962   : > { %v7827_v38 = vadd.f32 %v7826_v61, %v7801_v12  ;;  %v7866_v0 = vpop.f32.mrf.mxu0 }
0x2963   : > { %v7867_v7 = vadd.f32 %v7866_v0, %v7803_v14 }
0x2964   : > { %v7889_v10 = vmul.f32 %v7827_v38, %v7827_v38 }
0x2965   : > { %v7891_v13 = vmul.f32 %v7867_v7, %v7867_v7 }
0x2966   : > { %v7893_v45 = vmul.f32 %v7889_v10, %v7827_v38 }
0x2967   : > { %v7895_v63 = vmul.f32 %v7891_v13, %v7867_v7  ;;  %v7846_v24 = vpop.f32.mrf.mxu2 }
0x2968   : > { %v7897_v44 = vmul.f32 0.044715, %v7893_v45  ;;  %v7847_v51 = vadd.f32 %v7846_v24, %v7802_v34  ;;  %v7886_v33 = vpop.f32.mrf.mxu3  ;;  %v2778_v45 = vld [vmem:[#allocation2] sm:$0x1] }
0x2969   : > { %v7899_v19 = vmul.f32 0.044715, %v7895_v63  ;;  %v7887_v6 = vadd.f32 %v7886_v33, %v7804_v55 }
0x296a   : > { %v7901_v26 = vadd.f32 %v7897_v44, %v7827_v38  ;;  %v7890_v3 = vmul.f32 %v7847_v51, %v7847_v51  ;;  %v2777_v44 = vld [vmem:[%s14810_s2] sm:$0x1] }
0x296b   : > { %v7903_v21 = vadd.f32 %v7899_v19, %v7867_v7  ;;  %v7892_v18 = vmul.f32 %v7887_v6, %v7887_v6 }
0x296c   : > { %v7905_v31 = vmul.f32 0.7978846, %v7901_v26  ;;  %v7894_v32 = vmul.f32 %v7890_v3, %v7847_v51 }
0x296d   : > { %v7907_v1 = vmul.f32 0.7978846, %v7903_v21  ;;  %v7896_v4 = vmul.f32 %v7892_v18, %v7887_v6 }
0x296e   : > { %9948 = vtanh.f32 %v7905_v31  ;;  %v7898_v47 = vmul.f32 0.044715, %v7894_v32 }
0x296f   : > { %9950 = vtanh.f32 %v7907_v1  ;;  %v7900_v43 = vmul.f32 0.044715, %v7896_v4 }
0x2970   : > { %v7902_v46 = vadd.f32 %v7898_v47, %v7847_v51 }
0x2971   : > { %v7904_v9 = vadd.f32 %v7900_v43, %v7887_v6 }
0x2972   : > { %v7906_v29 = vmul.f32 0.7978846, %v7902_v46 }
0x2973   : > { %v7908_v59 = vmul.f32 0.7978846, %v7904_v9 }
0x2974   : > { %v9949_v35 = vpop.eup %9948  ;;  %9952 = vtanh.f32 %v7906_v29 }
0x2975   : > { %v9951_v57 = vpop.eup %9950  ;;  %v7913_v39 = vadd.f32 1.0, %v9949_v35  ;;  %9954 = vtanh.f32 %v7908_v59 }
0x2976   : > { %v7915_v58 = vadd.f32 1.0, %v9951_v57 }
0x2977   : > { %v7917_v62 = vmul.f32 0.5, %v7913_v39 }
0x2978   : > { %v7919_v5 = vmul.f32 0.5, %v7915_v58 }
0x2979   : > { %v7921_v48 = vmul.f32 %v7917_v62, %v7827_v38 }
0x297a   : > { %v9953_v22 = vpop.eup %9952  ;;  %v7923_v20 = vmul.f32 %v7919_v5, %v7867_v7 }
0x297b   : > { %v9955_v17 = vpop.eup %9954  ;;  %v7914_v8 = vadd.f32 1.0, %v9953_v22  ;;  %7941 = vmatmul.f32.vlgmr.msra.gmra.mxu1 %v7921_v48 }
0x297c   : > { %v7916_v23 = vadd.f32 1.0, %v9955_v17  ;;  %7981 = vmatmul.f32.vlgmr.msrb.gmra.mxu0 %v7923_v20 }
0x297d   : > { %v7918_v27 = vmul.f32 0.5, %v7914_v8 }
0x297e   : > { %v7920_v11 = vmul.f32 0.5, %v7916_v23 }
0x297f   : > { %v7922_v54 = vmul.f32 %v7918_v27, %v7847_v51 }
0x2980   : > { %v7924_v50 = vmul.f32 %v7920_v11, %v7887_v6 }
0x2981   : > { %7961 = vmatmul.f32.vlgmr.msrb.gmra.mxu2 %v7922_v54 }
0x2982   : > { %8001 = vmatmul.f32.vlgmr.msrb.gmra.mxu3 %v7924_v50 }
0x29f8   : > { %v7942_v49 = vpop.f32.mrf.mxu1 }
0x29f9   : > { %v7943_v15 = vadd.f32 %v7942_v49, %v3086_v37  ;;  %v7982_v36 = vpop.f32.mrf.mxu0 }
0x2a04   : > { %v7962_v16 = vpop.f32.mrf.mxu2 }
0x2a05   : > { %v7963_v2 = vadd.f32 %v7962_v16, %v7943_v15  ;;  %v8002_v60 = vpop.f32.mrf.mxu3 }
0x2a07   : > { %v7983_v52 = vadd.f32 %v7982_v36, %v7963_v2 }
0x2a09   : > { %v8003_v30 = vadd.f32 %v8002_v60, %v7983_v52 }
0x2a0b   : > { %v8005_v42 = vadd.f32 %v8003_v30, %v14362_v25 }
0x2a0d   : > { %v8006_v12 = vsel %vm7622_vm15, %v8005_v42, 0.0 }
0x2a0e   : > { %8007 = vadd.xlane.f32.xlu1 %v8006_v12 }
0x2a81   : > { %v8008_v28 = vpop.xlane.xlu1 %8007 }
0x2a82   : > { %v8009_v41 = vmul.f32 %v8008_v28, %v14334_v53 }
0x2a84   : > { %v8010_v14 = vsub.f32 %v8005_v42, %v8009_v41 }
0x2a86   : > { %v8011_v56 = vmul.f32 %v8010_v14, %v8010_v14 }
0x2a88   : > { %v8012_v40 = vsel %vm7622_vm15, %v8011_v56, 0.0 }
0x2a89   : > { %8013 = vadd.xlane.f32.xlu2 %v8012_v40 }
0x2afc   : > { %v8014_v61 = vpop.xlane.xlu2 %8013 }
0x2afd   : > { %v8015_v38 = vmul.f32 %v8014_v61, %v14334_v53 }
0x2aff   : > { %v8016_v0 = vadd.f32 1e-05, %v8015_v38 }
0x2b01   : > { %9956 = vrsqrt.f32 %v8016_v0  ;;  %vm8023_vm0 = vweird.f32 %v8016_v0 }
0x2b07   : > { %v9957_v25 = vpop.eup %9956 }
0x2b08   : > { %v8018_v7 = vmul.f32 %v9957_v25, %v8016_v0  ;;  %vm8024_vm7 = vweird.f32 %v9957_v25 }
0x2b09   : > { %vm8025_vm8 = vmor %vm8023_vm0, %vm8024_vm7 }
0x2b0a   : > { %v8019_v10 = vmul.f32 %v9957_v25, %v8018_v7 }
0x2b0c   : > { %v8020_v34 = vmul.f32 0.5, %v8019_v10 }
0x2b0e   : > { %v8021_v13 = vsub.f32 1.5, %v8020_v34 }
0x2b10   : > { %v8022_v55 = vmul.f32 %v9957_v25, %v8021_v13 }
0x2b12   : > { %v8026_v63 = vsel %vm8025_vm8, %v9957_v25, %v8022_v55 }
0x2b13   : > { %v8027_v24 = vmul.f32 %v8026_v63, %v8010_v14 }
0x2b15   : > { %v8028_v53 = vmul.f32 %v8027_v24, %v2778_v45 }
0x2b17   : > { %v8029_v51 = vadd.f32 %v8028_v53, %v2777_v44 }
0x2b19   : > { %8031 = vst [vmem:[%s2771_s4] sm:$0x1] %v8029_v51 }
0x2b1a   : > { %11441 = shalt.err (!%p11438_p11)
}
0x2b1b   : > { %9251 = dma.vmem_to_hbm [thread:$0]  (%p12123_p5), %s8044_s5, 16, %s8046_s6, %s8033_s8  }
0x2b1c PF: > { %s14812_s2 = sld [smem:[#allocation172_spill]] }
0x2b1d   : > { %s14813_s4 = sld [smem:[#allocation170_spill]] }
0x2b22   : > { %p9361_p12 = scmp.ge.s32.totalorder %s14812_s2, 2 }
0x2b23   : > { %s8057_s0 = sand.u32 1, %s14813_s4  }
0x2b24   : > { %p9254_p13 = pnand %p9361_p12, %p12127_p6  ;;  %s8058_s11 = scalar_lea.sflag [#allocation4], %s8057_s0 }
0x2b26   : > { %p9255_p0 = pneg %p9254_p13 }
0x2b28   : > { %11567 = dma.done.wait (%p9255_p0), %s8058_s11, 16  }
0x2b29   : > { %11569 = vsyncadd (%p9255_p0), %s8058_s11, 4294967280  ;;  %s14815_s2 = sld [smem:[#allocation173_spill]]  ;;  %s14818_s0 = smov %s11576_s28 }
0x2b2a   : > { %s14816_s9 = sld [smem:[#allocation171_spill]] }
0x2b2b   : > { %s14817_s1 = sld [smem:[#allocation174_spill]] }
0x2b2f   : > { %p174_p1 = scmp.ge.s32.totalorder %s14815_s2, 4  }
0x2b30   : > { %s14819_s28 = smov %s14816_s9 }
0x2b31   :  { %176 = sbr.rel (!%p174_p1) target bundleno = 165 (0xa5), region = 604 }
0x2b36   :  { %8063 = vsyncpa [#allocation3], 1 }
0x2b37   :  { %8065 = vsyncpa [#allocation3 + $0x1], 1 }
0x2b38   :  { %8066 = vsyncpa [#allocation6], 1 }
0x2b39   :  { %8067 = vsyncpa [#allocation9], 1 }
0x2b3a   :  { %8068 = vsyncpa [#allocation12], 1 }
0x2b3b   :  { %8069 = vsyncpa [#allocation15], 1 }
0x2b3c   :  { %8070 = vsyncpa [#allocation18], 1 }
0x2b3d   :  { %8071 = vsyncpa [#allocation21], 1 }
0x2b3e   :  { %8072 = vsyncpa [#allocation24], 1 }
0x2b3f   :  { %8073 = vsyncpa [#allocation27], 1 }
0x2b40   :  { %8074 = vsyncpa [#allocation30], 1 }
0x2b41   :  { %8075 = vsyncpa [#allocation33], 1 }
0x2b42   :  { %8076 = vsyncpa [#allocation36], 1 }
0x2b43   :  { %8077 = vsyncpa [#allocation39], 1 }
0x2b44   :  { %8078 = vsyncpa [#allocation42], 1 }
0x2b45   :  { %8079 = vsyncpa [#allocation45], 1 }
0x2b46   :  { %8080 = vsyncpa [#allocation48], 1 }
0x2b47   :  { %8081 = vsyncpa [#allocation51], 1 }
0x2b48   :  { %8082 = vsyncpa [#allocation54], 1 }
0x2b49   :  { %8083 = vsyncpa [#allocation57], 1 }
0x2b4a   :  { %8084 = vsyncpa [#allocation60], 1 }
0x2b4b   :  { %8085 = vsyncpa [#allocation63], 1 }
0x2b4c   :  { %8086 = vsyncpa [#allocation66], 1 }
0x2b4d   :  { %8087 = vsyncpa [#allocation69], 1 }
0x2b4e   :  { %8088 = vsyncpa [#allocation72], 1 }
0x2b4f   :  { %8089 = vsyncpa [#allocation75], 1 }
0x2b50   :  { %8090 = vsyncpa [#allocation78], 1 }
0x2b51   :  { %8091 = vsyncpa [#allocation81], 1 }
0x2b52   :  { %8092 = vsyncpa [#allocation4], 1 }
0x2b53   :  { %8094 = vsyncpa [#allocation4 + $0x1], 1 }

</bundles_post_ra>
